<compile_context>
chip_gen: v6e
topology: v6e:2x2x1
jax: 0.10.0
libtpu: 0.0.40
codegen_flags: <defaults>
</compile_context>

<pallas_src>
import jax
import jax.numpy as jnp
from jax.experimental import pallas as pl
from jax.experimental.pallas import tpu as pltpu

BN_EPS = 1e-5


def _round_up(a, b):
    return ((a + b - 1) // b) * b


def _umod(x, m):
    """Floor-mod of a non-negative int32 vector by a Python-int constant.

    Uses an f32 reciprocal estimate plus a +/-1 integer correction so it never relies
    on vector integer div/rem lowering.  Exact for 0 <= x < 2**24.
    """
    q = jnp.floor(x.astype(jnp.float32) * (1.0 / float(m))).astype(jnp.int32)
    r = x - q * m
    r = jnp.where(r < 0, r + m, r)
    r = jnp.where(r >= m, r - m, r)
    return r


def _conv_tile(x_ref, halo_ref, w_ref, tm, offsets):
    """3x3 conv on one flat row-tile as a single K-packed MXU matmul.

    The nine shifted (TM, Cin) bf16 views are packed along the contraction dim into a
    (TM, 9*Cin) LHS and contracted against the (9*Cin, Cout_pad) bf16 weight slab with
    f32 accumulation (instead of nine K=Cin matmuls that underfill the MXU).
    """
    xcat = jnp.concatenate([x_ref[...], halo_ref[0]], axis=0)          # (TM+halo, Cin)
    lhs = jnp.concatenate([xcat[off:off + tm, :] for off in offsets], axis=1)
    return jnp.dot(lhs, w_ref[...], preferred_element_type=jnp.float32)


def _make_stats_kernel(tm, offsets, wp2, pgrid, img_h, img_w, m_ext):
    """Phase 1: conv tile (registers only) -> masked per-tile (sum, sum-of-squares)."""
    h_rows = img_h * wp2

    def kernel(x_ref, halo_ref, w_ref, part_ref):
        y = _conv_tile(x_ref, halo_ref, w_ref, tm, offsets)            # (TM, Cout_pad) f32

        # In-kernel validity mask: flat padded-grid row p is a real output pixel iff
        # p < m_ext and its (row, col) inside the padded image lie within HxW.
        base = pl.program_id(0) * tm
        p = base + jax.lax.broadcasted_iota(jnp.int32, (tm, 1), 0)
        rem = _umod(p, pgrid)                                          # index within one image
        col = _umod(rem, wp2)                                          # padded column index
        valid = (p < m_ext) & (rem < h_rows) & (col < img_w)

        ym = jnp.where(valid, y, 0.0)
        s_sum = jnp.sum(ym, axis=0, keepdims=True)                     # (1, Cout_pad)
        s_sq = jnp.sum(ym * ym, axis=0, keepdims=True)                 # (1, Cout_pad)
        part_ref[...] = jnp.concatenate([s_sum, s_sq], axis=0)[None]   # (1, 2, Cout_pad)

    return kernel


def _make_apply_kernel(tm, offsets):
    """Phase 2: recompute conv tile, apply fused BN scale/shift + ReLU (lane-dense store)."""

    def kernel(x_ref, halo_ref, w_ref, ss_ref, o_ref):
        y = _conv_tile(x_ref, halo_ref, w_ref, tm, offsets)
        o_ref[...] = jnp.maximum(y * ss_ref[0:1, :] + ss_ref[1:2, :], 0.0)

    return kernel


def conv_block_forward(x_nchw, conv_w, conv_b, bn_gamma, bn_beta, *, tile_m=512):
    """
    x_nchw : (N, Cin, H, W) f32   conv_w : (Cout, Cin, 3, 3)   conv_b : (Cout,)
    bn_gamma, bn_beta : (Cout,)   returns (N, Cout, H, W) f32
    Matches ConvBlock forward with BatchNorm2d in training mode (batch statistics).
    """
    del conv_b  # cancels exactly against the training-mode BN batch-mean subtraction

    n, cin, h, w = x_nchw.shape
    cout = conv_w.shape[0]

    cout_pad = _round_up(max(cout, 128), 128)
    hp2, wp2 = h + 2, w + 2
    pgrid = hp2 * wp2
    m_ext = n * pgrid                                   # padded-grid pixel rows (all images)

    # Flat-row offsets of the 9 conv taps within the zero-padded image.
    offsets = tuple(dy * wp2 + dx for dy in range(3) for dx in range(3))
    halo_pad = _round_up(offsets[-1], 16)               # halo rows each tile needs (bf16-tile aligned)

    tm = max(_round_up(tile_m, 128), _round_up(halo_pad, 128))
    num_tiles = pl.cdiv(m_ext, tm)
    rows = num_tiles * tm

    assert m_ext + tm < (1 << 24), "in-kernel mask index math assumes row indices < 2^24"

    # NCHW -> NHWC bf16, zero-pad spatially, flatten pixels, pad one extra tile
    # (halo source for the last tile + alignment; masked out of the statistics).
    x_nhwc = jnp.transpose(x_nchw, (0, 2, 3, 1)).astype(jnp.bfloat16)
    xp = jnp.pad(x_nhwc, ((0, 0), (1, 1), (1, 1), (0, 0)))
    xf = jnp.pad(xp.reshape(m_ext, cin), ((0, rows + tm - m_ext), (0, 0)))

    # Halo-only companion array: tile t needs the first halo_pad rows of tile t+1.
    xh = xf.reshape(num_tiles + 1, tm, cin)[1:, :halo_pad, :]   # (num_tiles, halo_pad, Cin)

    # Conv weights packed along K: (Cout,Cin,3,3) -> (3,3,Cin,Cout) -> (9*Cin, Cout_pad) bf16.
    w_packed = jnp.transpose(conv_w, (2, 3, 1, 0)).reshape(9 * cin, cout)
    w_packed = jnp.pad(w_packed, ((0, 0), (0, cout_pad - cout))).astype(jnp.bfloat16)

    cparams = pltpu.CompilerParams(
        dimension_semantics=("parallel",),
        vmem_limit_bytes=48 * 1024 * 1024,   # leaves headroom even on v7x (64 MiB/TC)
    )

    x_spec = pl.BlockSpec((tm, cin), lambda t: (t, 0))
    halo_spec = pl.BlockSpec((1, halo_pad, cin), lambda t: (t, 0, 0))
    w_spec = pl.BlockSpec((9 * cin, cout_pad), lambda t: (0, 0))

    # ---- Phase 1: per-tile masked BN partial sums (conv output never hits HBM) ----
    partials = pl.pallas_call(
        _make_stats_kernel(tm, offsets, wp2, pgrid, h, w, m_ext),
        out_shape=jax.ShapeDtypeStruct((num_tiles, 2, cout_pad), jnp.float32),
        grid_spec=pltpu.PrefetchScalarGridSpec(
            num_scalar_prefetch=0,
            grid=(num_tiles,),
            in_specs=[x_spec, halo_spec, w_spec],
            out_specs=pl.BlockSpec((1, 2, cout_pad), lambda t: (t, 0, 0)),
        ),
        compiler_params=cparams,
    )(xf, xh, w_packed)

    # ---- Global batch statistics (tiny, plain JAX); fold gamma/beta into scale/shift ----
    m_valid = float(n * h * w)
    sums = jnp.sum(partials[:, 0, :], axis=0)
    sumsq = jnp.sum(partials[:, 1, :], axis=0)
    mean = sums / m_valid
    var = jnp.maximum(sumsq / m_valid - mean * mean, 0.0)      # biased var (train-mode BN)
    inv_std = jax.lax.rsqrt(var + BN_EPS)
    gamma_p = jnp.pad(bn_gamma.astype(jnp.float32), (0, cout_pad - cout), constant_values=1.0)
    beta_p = jnp.pad(bn_beta.astype(jnp.float32), (0, cout_pad - cout))
    scale = gamma_p * inv_std
    shift = beta_p - mean * scale
    ss = jnp.stack([scale, shift], axis=0)                     # (2, Cout_pad)

    # ---- Phase 2: recompute conv, fused scale/shift + ReLU, lane-dense f32 stores ----
    out_flat = pl.pallas_call(
        _make_apply_kernel(tm, offsets),
        out_shape=jax.ShapeDtypeStruct((rows, cout_pad), jnp.float32),
        grid_spec=pltpu.PrefetchScalarGridSpec(
            num_scalar_prefetch=0,
            grid=(num_tiles,),
            in_specs=[x_spec, halo_spec, w_spec,
                      pl.BlockSpec((2, cout_pad), lambda t: (0, 0))],
            out_specs=pl.BlockSpec((tm, cout_pad), lambda t: (t, 0)),
        ),
        compiler_params=cparams,
    )(xf, xh, w_packed, ss)

    # Drop padded-grid garbage rows and channel padding; back to NCHW.
    # TODO(synk): if the surrounding model can run NHWC, drop these transposes/pads
    # (they are full-array HBM copies outside the kernels).
    out_ext = out_flat[:m_ext].reshape(n, hp2, wp2, cout_pad)
    out_nhwc = out_ext[:, :h, :w, :cout]
    return jnp.transpose(out_nhwc, (0, 3, 1, 2))


if __name__ == "__main__":
    key = jax.random.PRNGKey(0)
    k_x, k_w, k_b = jax.random.split(key, 3)

    N, Cin, H, W = 2, 4, 16, 16
    Cout = 8

    x = jax.random.normal(k_x, (N, Cin, H, W), dtype=jnp.float32)

    # Deterministic synthetic parameters (PyTorch-style init ranges).
    fan_in = Cin * 3 * 3
    bound = 1.0 / (fan_in ** 0.5)
    conv_w = jax.random.uniform(k_w, (Cout, Cin, 3, 3), jnp.float32, -bound, bound)
    conv_b = jax.random.uniform(k_b, (Cout,), jnp.float32, -bound, bound)
    bn_gamma = jnp.ones((Cout,), jnp.float32)   # BatchNorm2d default init
    bn_beta = jnp.zeros((Cout,), jnp.float32)

    y = jax.jit(conv_block_forward)(x, conv_w, conv_b, bn_gamma, bn_beta)
    jax.block_until_ready(y)
    assert y.shape == (N, Cout, H, W)
    assert bool(jnp.all(jnp.isfinite(y)))
    print("KERNEL_OK")
</pallas_src>

<mosaic_0001>
module attributes {stable_mosaic.version = 11 : i64} {
  func.func @kernel(%arg0: i32, %arg1: memref<512x4xbf16, #tpu.memory_space<vmem>>, %arg2: memref<1x48x4xbf16, #tpu.memory_space<vmem>>, %arg3: memref<36x128xbf16, #tpu.memory_space<vmem>>, %arg4: memref<1x2x128xf32, #tpu.memory_space<vmem>>) attributes {dimension_semantics = [#tpu.dimension_semantics<parallel>], iteration_bounds = array<i64: 2>, scalar_prefetch = 0 : i64, scratch_operands = 0 : i64, tpu.core_type = #tpu.core_type<tc>, window_params = [{transform_indices = @transform_0, window_bounds = array<i64: 512, 4>}, {transform_indices = @transform_1, window_bounds = array<i64: 1, 48, 4>}, {pipeline_mode = #tpu.pipeline_mode<synchronous>, transform_indices = @transform_2, window_bounds = array<i64: 36, 128>}, {transform_indices = @transform_3, window_bounds = array<i64: 1, 2, 128>}]} {
    %c0 = arith.constant 0 : index
    %c0_0 = arith.constant 0 : index
    %0 = vector.load %arg1[%c0, %c0_0] : memref<512x4xbf16, #tpu.memory_space<vmem>>, vector<512x4xbf16>
    %c0_1 = arith.constant 0 : index
    %c0_2 = arith.constant 0 : index
    %c0_3 = arith.constant 0 : index
    %1 = vector.load %arg2[%c0_1, %c0_2, %c0_3] : memref<1x48x4xbf16, #tpu.memory_space<vmem>>, vector<1x48x4xbf16>
    %2 = vector.shape_cast %1 : vector<1x48x4xbf16> to vector<48x4xbf16>
    %3 = tpu.concatenate %0, %2 in 0 : vector<512x4xbf16>, vector<48x4xbf16> -> vector<560x4xbf16>
    %4 = vector.extract_strided_slice %3 {offsets = [0, 0], sizes = [512, 4], strides = [1, 1]} : vector<560x4xbf16> to vector<512x4xbf16>
    %5 = vector.extract_strided_slice %3 {offsets = [1, 0], sizes = [512, 4], strides = [1, 1]} : vector<560x4xbf16> to vector<512x4xbf16>
    %6 = vector.extract_strided_slice %3 {offsets = [2, 0], sizes = [512, 4], strides = [1, 1]} : vector<560x4xbf16> to vector<512x4xbf16>
    %7 = vector.extract_strided_slice %3 {offsets = [18, 0], sizes = [512, 4], strides = [1, 1]} : vector<560x4xbf16> to vector<512x4xbf16>
    %8 = vector.extract_strided_slice %3 {offsets = [19, 0], sizes = [512, 4], strides = [1, 1]} : vector<560x4xbf16> to vector<512x4xbf16>
    %9 = vector.extract_strided_slice %3 {offsets = [20, 0], sizes = [512, 4], strides = [1, 1]} : vector<560x4xbf16> to vector<512x4xbf16>
    %10 = vector.extract_strided_slice %3 {offsets = [36, 0], sizes = [512, 4], strides = [1, 1]} : vector<560x4xbf16> to vector<512x4xbf16>
    %11 = vector.extract_strided_slice %3 {offsets = [37, 0], sizes = [512, 4], strides = [1, 1]} : vector<560x4xbf16> to vector<512x4xbf16>
    %12 = vector.extract_strided_slice %3 {offsets = [38, 0], sizes = [512, 4], strides = [1, 1]} : vector<560x4xbf16> to vector<512x4xbf16>
    %13 = tpu.concatenate %4, %5, %6, %7, %8, %9, %10, %11, %12 in 1 : vector<512x4xbf16>, vector<512x4xbf16>, vector<512x4xbf16>, vector<512x4xbf16>, vector<512x4xbf16>, vector<512x4xbf16>, vector<512x4xbf16>, vector<512x4xbf16>, vector<512x4xbf16> -> vector<512x36xbf16>
    %c0_4 = arith.constant 0 : index
    %c0_5 = arith.constant 0 : index
    %14 = vector.load %arg3[%c0_4, %c0_5] : memref<36x128xbf16, #tpu.memory_space<vmem>>, vector<36x128xbf16>
    %cst = arith.constant dense<0.000000e+00> : vector<512x128xf32>
    %15 = tpu.matmul %13, %14, %cst {dimension_numbers = #tpu.dot_dimension_numbers<[1], [0], [0], [1], [0, 0, 1, 1], [], []>} : vector<512x36xbf16>, vector<36x128xbf16>, vector<512x128xf32> -> vector<512x128xf32>
    %c512_i32 = arith.constant 512 : i32
    %16 = arith.muli %arg0, %c512_i32 : i32
    %17 = tpu.iota {dimensions = array<i32: 0>} : vector<512x1xi32>
    %18 = vector.broadcast %16 : i32 to vector<512x1xi32>
    %19 = arith.addi %18, %17 : vector<512x1xi32>
    %20 = arith.sitofp %19 : vector<512x1xi32> to vector<512x1xf32>
    %cst_6 = arith.constant 0.00308641978 : f32
    %21 = vector.broadcast %cst_6 : f32 to vector<512x1xf32>
    %22 = arith.mulf %20, %21 : vector<512x1xf32>
    %23 = math.floor %22 : vector<512x1xf32>
    %24 = arith.fptosi %23 : vector<512x1xf32> to vector<512x1xi32>
    %c324_i32 = arith.constant 324 : i32
    %25 = vector.broadcast %c324_i32 : i32 to vector<512x1xi32>
    %26 = arith.muli %24, %25 : vector<512x1xi32>
    %27 = arith.subi %19, %26 : vector<512x1xi32>
    %c0_i32 = arith.constant 0 : i32
    %28 = vector.broadcast %c0_i32 : i32 to vector<512x1xi32>
    %29 = arith.cmpi slt, %27, %28 : vector<512x1xi32>
    %c324_i32_7 = arith.constant 324 : i32
    %30 = vector.broadcast %c324_i32_7 : i32 to vector<512x1xi32>
    %31 = arith.addi %27, %30 : vector<512x1xi32>
    %32 = arith.select %29, %31, %27 : vector<512x1xi1>, vector<512x1xi32>
    %c324_i32_8 = arith.constant 324 : i32
    %33 = vector.broadcast %c324_i32_8 : i32 to vector<512x1xi32>
    %34 = arith.cmpi sge, %32, %33 : vector<512x1xi32>
    %c324_i32_9 = arith.constant 324 : i32
    %35 = vector.broadcast %c324_i32_9 : i32 to vector<512x1xi32>
    %36 = arith.subi %32, %35 : vector<512x1xi32>
    %37 = arith.select %34, %36, %32 : vector<512x1xi1>, vector<512x1xi32>
    %38 = arith.sitofp %37 : vector<512x1xi32> to vector<512x1xf32>
    %cst_10 = arith.constant 0.055555556 : f32
    %39 = vector.broadcast %cst_10 : f32 to vector<512x1xf32>
    %40 = arith.mulf %38, %39 : vector<512x1xf32>
    %41 = math.floor %40 : vector<512x1xf32>
    %42 = arith.fptosi %41 : vector<512x1xf32> to vector<512x1xi32>
    %c18_i32 = arith.constant 18 : i32
    %43 = vector.broadcast %c18_i32 : i32 to vector<512x1xi32>
    %44 = arith.muli %42, %43 : vector<512x1xi32>
    %45 = arith.subi %37, %44 : vector<512x1xi32>
    %c0_i32_11 = arith.constant 0 : i32
    %46 = vector.broadcast %c0_i32_11 : i32 to vector<512x1xi32>
    %47 = arith.cmpi slt, %45, %46 : vector<512x1xi32>
    %c18_i32_12 = arith.constant 18 : i32
    %48 = vector.broadcast %c18_i32_12 : i32 to vector<512x1xi32>
    %49 = arith.addi %45, %48 : vector<512x1xi32>
    %50 = arith.select %47, %49, %45 : vector<512x1xi1>, vector<512x1xi32>
    %c18_i32_13 = arith.constant 18 : i32
    %51 = vector.broadcast %c18_i32_13 : i32 to vector<512x1xi32>
    %52 = arith.cmpi sge, %50, %51 : vector<512x1xi32>
    %c18_i32_14 = arith.constant 18 : i32
    %53 = vector.broadcast %c18_i32_14 : i32 to vector<512x1xi32>
    %54 = arith.subi %50, %53 : vector<512x1xi32>
    %55 = arith.select %52, %54, %50 : vector<512x1xi1>, vector<512x1xi32>
    %c648_i32 = arith.constant 648 : i32
    %56 = vector.broadcast %c648_i32 : i32 to vector<512x1xi32>
    %57 = arith.cmpi slt, %19, %56 : vector<512x1xi32>
    %c288_i32 = arith.constant 288 : i32
    %58 = vector.broadcast %c288_i32 : i32 to vector<512x1xi32>
    %59 = arith.cmpi slt, %37, %58 : vector<512x1xi32>
    %60 = arith.andi %57, %59 : vector<512x1xi1>
    %c16_i32 = arith.constant 16 : i32
    %61 = vector.broadcast %c16_i32 : i32 to vector<512x1xi32>
    %62 = arith.cmpi slt, %55, %61 : vector<512x1xi32>
    %63 = arith.andi %60, %62 : vector<512x1xi1>
    %cst_15 = arith.constant 0.000000e+00 : f32
    %64 = vector.shape_cast %63 : vector<512x1xi1> to vector<512x1xi1>
    %65 = vector.broadcast %64 : vector<512x1xi1> to vector<512x128xi1>
    %66 = vector.broadcast %cst_15 : f32 to vector<512x128xf32>
    %67 = arith.select %65, %15, %66 : vector<512x128xi1>, vector<512x128xf32>
    %cst_16 = arith.constant dense<0.000000e+00> : vector<128xf32>
    %68 = vector.multi_reduction <add>, %67, %cst_16 [0] : vector<512x128xf32> to vector<128xf32>
    %69 = vector.shape_cast %68 : vector<128xf32> to vector<1x128xf32>
    %70 = arith.mulf %67, %67 : vector<512x128xf32>
    %cst_17 = arith.constant dense<0.000000e+00> : vector<128xf32>
    %71 = vector.multi_reduction <add>, %70, %cst_17 [0] : vector<512x128xf32> to vector<128xf32>
    %72 = vector.shape_cast %71 : vector<128xf32> to vector<1x128xf32>
    %73 = tpu.concatenate %69, %72 in 0 : vector<1x128xf32>, vector<1x128xf32> -> vector<2x128xf32>
    %74 = vector.shape_cast %73 : vector<2x128xf32> to vector<1x2x128xf32>
    %c0_18 = arith.constant 0 : index
    %c0_19 = arith.constant 0 : index
    %c0_20 = arith.constant 0 : index
    %75 = vector.load %arg4[%c0_18, %c0_19, %c0_20] : memref<1x2x128xf32, #tpu.memory_space<vmem>>, vector<1x2x128xf32>
    tpu.vector_store %arg4[%c0_18, %c0_19, %c0_20], %74 {strides = array<i32>} : memref<1x2x128xf32, #tpu.memory_space<vmem>>, vector<1x2x128xf32>,
    return
  }
  func.func @transform_0(%arg0: i32) -> (i32, i32) {
    %c0_i32 = arith.constant 0 : i32
    %c0_i32_0 = arith.constant 0 : i32
    return %arg0, %c0_i32 : i32, i32
  }
  func.func @transform_1(%arg0: i32) -> (i32, i32, i32) {
    %c0_i32 = arith.constant 0 : i32
    %c0_i32_0 = arith.constant 0 : i32
    %c0_i32_1 = arith.constant 0 : i32
    return %arg0, %c0_i32, %c0_i32_0 : i32, i32, i32
  }
  func.func @transform_2(%arg0: i32) -> (i32, i32) {
    %c0_i32 = arith.constant 0 : i32
    %c0_i32_0 = arith.constant 0 : i32
    %c0_i32_1 = arith.constant 0 : i32
    return %c0_i32, %c0_i32_0 : i32, i32
  }
  func.func @transform_3(%arg0: i32) -> (i32, i32, i32) {
    %c0_i32 = arith.constant 0 : i32
    %c0_i32_0 = arith.constant 0 : i32
    %c0_i32_1 = arith.constant 0 : i32
    return %arg0, %c0_i32, %c0_i32_0 : i32, i32, i32
  }
}

module attributes {stable_mosaic.version = 11 : i64} {
  func.func @kernel(%arg0: i32, %arg1: memref<512x4xbf16, #tpu.memory_space<vmem>>, %arg2: memref<1x48x4xbf16, #tpu.memory_space<vmem>>, %arg3: memref<36x128xbf16, #tpu.memory_space<vmem>>, %arg4: memref<2x128xf32, #tpu.memory_space<vmem>>, %arg5: memref<512x128xf32, #tpu.memory_space<vmem>>) attributes {dimension_semantics = [#tpu.dimension_semantics<parallel>], iteration_bounds = array<i64: 2>, scalar_prefetch = 0 : i64, scratch_operands = 0 : i64, tpu.core_type = #tpu.core_type<tc>, window_params = [{transform_indices = @transform_0, window_bounds = array<i64: 512, 4>}, {transform_indices = @transform_1, window_bounds = array<i64: 1, 48, 4>}, {pipeline_mode = #tpu.pipeline_mode<synchronous>, transform_indices = @transform_2, window_bounds = array<i64: 36, 128>}, {pipeline_mode = #tpu.pipeline_mode<synchronous>, transform_indices = @transform_3, window_bounds = array<i64: 2, 128>}, {transform_indices = @transform_4, window_bounds = array<i64: 512, 128>}]} {
    %c0 = arith.constant 0 : index
    %c0_0 = arith.constant 0 : index
    %0 = vector.load %arg1[%c0, %c0_0] : memref<512x4xbf16, #tpu.memory_space<vmem>>, vector<512x4xbf16>
    %c0_1 = arith.constant 0 : index
    %c0_2 = arith.constant 0 : index
    %c0_3 = arith.constant 0 : index
    %1 = vector.load %arg2[%c0_1, %c0_2, %c0_3] : memref<1x48x4xbf16, #tpu.memory_space<vmem>>, vector<1x48x4xbf16>
    %2 = vector.shape_cast %1 : vector<1x48x4xbf16> to vector<48x4xbf16>
    %3 = tpu.concatenate %0, %2 in 0 : vector<512x4xbf16>, vector<48x4xbf16> -> vector<560x4xbf16>
    %4 = vector.extract_strided_slice %3 {offsets = [0, 0], sizes = [512, 4], strides = [1, 1]} : vector<560x4xbf16> to vector<512x4xbf16>
    %5 = vector.extract_strided_slice %3 {offsets = [1, 0], sizes = [512, 4], strides = [1, 1]} : vector<560x4xbf16> to vector<512x4xbf16>
    %6 = vector.extract_strided_slice %3 {offsets = [2, 0], sizes = [512, 4], strides = [1, 1]} : vector<560x4xbf16> to vector<512x4xbf16>
    %7 = vector.extract_strided_slice %3 {offsets = [18, 0], sizes = [512, 4], strides = [1, 1]} : vector<560x4xbf16> to vector<512x4xbf16>
    %8 = vector.extract_strided_slice %3 {offsets = [19, 0], sizes = [512, 4], strides = [1, 1]} : vector<560x4xbf16> to vector<512x4xbf16>
    %9 = vector.extract_strided_slice %3 {offsets = [20, 0], sizes = [512, 4], strides = [1, 1]} : vector<560x4xbf16> to vector<512x4xbf16>
    %10 = vector.extract_strided_slice %3 {offsets = [36, 0], sizes = [512, 4], strides = [1, 1]} : vector<560x4xbf16> to vector<512x4xbf16>
    %11 = vector.extract_strided_slice %3 {offsets = [37, 0], sizes = [512, 4], strides = [1, 1]} : vector<560x4xbf16> to vector<512x4xbf16>
    %12 = vector.extract_strided_slice %3 {offsets = [38, 0], sizes = [512, 4], strides = [1, 1]} : vector<560x4xbf16> to vector<512x4xbf16>
    %13 = tpu.concatenate %4, %5, %6, %7, %8, %9, %10, %11, %12 in 1 : vector<512x4xbf16>, vector<512x4xbf16>, vector<512x4xbf16>, vector<512x4xbf16>, vector<512x4xbf16>, vector<512x4xbf16>, vector<512x4xbf16>, vector<512x4xbf16>, vector<512x4xbf16> -> vector<512x36xbf16>
    %c0_4 = arith.constant 0 : index
    %c0_5 = arith.constant 0 : index
    %14 = vector.load %arg3[%c0_4, %c0_5] : memref<36x128xbf16, #tpu.memory_space<vmem>>, vector<36x128xbf16>
    %cst = arith.constant dense<0.000000e+00> : vector<512x128xf32>
    %15 = tpu.matmul %13, %14, %cst {dimension_numbers = #tpu.dot_dimension_numbers<[1], [0], [0], [1], [0, 0, 1, 1], [], []>} : vector<512x36xbf16>, vector<36x128xbf16>, vector<512x128xf32> -> vector<512x128xf32>
    %c0_6 = arith.constant 0 : index
    %c0_7 = arith.constant 0 : index
    %16 = vector.load %arg4[%c0_6, %c0_7] : memref<2x128xf32, #tpu.memory_space<vmem>>, vector<1x128xf32>
    %17 = vector.broadcast %16 : vector<1x128xf32> to vector<512x128xf32>
    %18 = arith.mulf %15, %17 : vector<512x128xf32>
    %c1 = arith.constant 1 : index
    %c0_8 = arith.constant 0 : index
    %19 = vector.load %arg4[%c1, %c0_8] : memref<2x128xf32, #tpu.memory_space<vmem>>, vector<1x128xf32>
    %20 = vector.broadcast %19 : vector<1x128xf32> to vector<512x128xf32>
    %21 = arith.addf %18, %20 : vector<512x128xf32>
    %cst_9 = arith.constant 0.000000e+00 : f32
    %22 = vector.broadcast %cst_9 : f32 to vector<512x128xf32>
    %23 = arith.maximumf %21, %22 : vector<512x128xf32>
    %c0_10 = arith.constant 0 : index
    %c0_11 = arith.constant 0 : index
    %24 = vector.load %arg5[%c0_10, %c0_11] : memref<512x128xf32, #tpu.memory_space<vmem>>, vector<512x128xf32>
    tpu.vector_store %arg5[%c0_10, %c0_11], %23 {strides = array<i32>} : memref<512x128xf32, #tpu.memory_space<vmem>>, vector<512x128xf32>,
    return
  }
  func.func @transform_0(%arg0: i32) -> (i32, i32) {
    %c0_i32 = arith.constant 0 : i32
    %c0_i32_0 = arith.constant 0 : i32
    return %arg0, %c0_i32 : i32, i32
  }
  func.func @transform_1(%arg0: i32) -> (i32, i32, i32) {
    %c0_i32 = arith.constant 0 : i32
    %c0_i32_0 = arith.constant 0 : i32
    %c0_i32_1 = arith.constant 0 : i32
    return %arg0, %c0_i32, %c0_i32_0 : i32, i32, i32
  }
  func.func @transform_2(%arg0: i32) -> (i32, i32) {
    %c0_i32 = arith.constant 0 : i32
    %c0_i32_0 = arith.constant 0 : i32
    %c0_i32_1 = arith.constant 0 : i32
    return %c0_i32, %c0_i32_0 : i32, i32
  }
  func.func @transform_3(%arg0: i32) -> (i32, i32) {
    %c0_i32 = arith.constant 0 : i32
    %c0_i32_0 = arith.constant 0 : i32
    %c0_i32_1 = arith.constant 0 : i32
    return %c0_i32, %c0_i32_0 : i32, i32
  }
  func.func @transform_4(%arg0: i32) -> (i32, i32) {
    %c0_i32 = arith.constant 0 : i32
    %c0_i32_0 = arith.constant 0 : i32
    return %arg0, %c0_i32 : i32, i32
  }
}

</mosaic_0001>

<bundles_post_ra>
// kernel: conv_block_forward.3
= control target key start
LH: loop header
LB: loop body
LE: loop exit
PB: predicated region body
PF: predicated region fallthrough
CT: control target
= control target key end

     0   :  { %s3276_s15 = smov 0   ;;  %s5814_s0 = inlined_call_operand.vmem [shape: bf16[1536,4], index: 0, kind: input, shape index: {}]   ;;  %s5815_s1 = inlined_call_operand.vmem [shape: bf16[2,48,4], index: 1, kind: input, shape index: {}]   ;;  %s5816_s2 = inlined_call_operand.vmem [shape: bf16[36,128], index: 2, kind: input, shape index: {}]   ;;  %s5817_s3 = inlined_call_operand.vmem [shape: f32[2,128], index: 3, kind: input, shape index: {}]   ;;  %s5818_s4 = inlined_call_operand.vmem [shape: f32[1024,128], index: 4, kind: output, shape index: {}]  }
   0x1 LB: > { %s3282_s16 = sadd.s32 4294967295, %s3241_s15   ;;  %p2954_p0 = scmp.ge.s32.totalorder %s3241_s15, 1  ;;  %s3241_s15 = sphi %s3276_s15, %s14_s15  }
   0x2   : > { %p173_p1 = scmp.lt.s32.totalorder %s3241_s15, 3 }
   0x4   : > { %p174_p2 = pnand %p2954_p0, %p173_p1 }
   0x6   : > { %177 = sbr.rel (%p174_p2) target bundleno = 857 (0x359), region = 36 }
   0xb   : > { %s3287_s17 = sshll.u32 %s3282_s16, 6  ;;  %vm467_vm0 = vsmask.f32 7424  ;;  %s3243_s23 = smov 4   ;;  %vm792_vm1 = vcmask 1046528   ;;  %vm1718_vm3 = vcmask 31744  }
   0xc   : > { %p205_p3 = scmp.lt.s32.totalorder %s3287_s17, 191  ;;  %p210_p4 = scmp.lt.s32.totalorder %s3282_s16, 1  ;;  %vm988_vm2 = vsmask.f32 6400  ;;  %vm1783_vm4 = vcmask 64512   ;;  %vm1191_vm5 = vcmask 1045504  }
   0xd   : > { %s3244_s28 = smov 8   ;;  %s3245_s29 = smov 12   ;;  %vm2323_vm6 = vcmask 1041408   ;;  %vm1387_vm7 = vsmask.f32 5376  ;;  %vm1588_vm8 = vcmask 1044480  }
   0xe   : > { %s206_s18 = scalar_select %p205_p3, %s3287_s17, 191  ;;  %vm1848_vm9 = vcmask 97280   ;;  %vm1913_vm10 = vcmask 130048   ;;  %vm1978_vm11 = vcmask 162816   ;;  %vm2043_vm12 = vcmask 195584  }
   0xf   : > { %s6255_s16 = smov (!%p210_p4, %s3282_s16), 1  ;;  %s3246_s30 = smov 16   ;;  %vm2108_vm13 = vcmask 228352   ;;  %vm2173_vm14 = vcmask 261120   ;;  %vm2258_vm15 = vcmask 293888  }
  0x10   : > { %s2956_s19 = sshll.u32 %s206_s18, 2  ;;  %s3147_s24 = smul.u32 24, %s6255_s16 }
  0x11   : > { %s3294_s22 = scalar_lea.vmem %s5814_s0, %s2956_s19  ;;  %s3247_s5 = smov 20  }
  0x12   : > { %v3297_v0 = vld [vmem:[%s3294_s22 + $0x10] sm:$0xff]   ;;  %v3300_v1 = vld [vmem:[%s3294_s22 + $0x18] sm:$0xff]   ;;  %v3312_v5 = vld [vmem:[%s3294_s22] sm:$0xff]   ;;  %s3585_s27 = scalar_lea.vmem %s5815_s1, %s3147_s24  ;;  %s3248_s8 = smov 24  }
  0x13   : > { %v3303_v2 = vshll.u32 %v3297_v0, 16  ;;  %v3306_v3 = vshrl.u32 %v3297_v0, 16  ;;  %v3309_v4 = vshll.u32 %v3300_v1, 16  ;;  %v3315_v6 = vld [vmem:[%s3294_s22 + $0x8] sm:$0xff]   ;;  %v3318_v7 = vshrl.u32 %v3300_v1, 16  ;;  %v3325_v12 = vld [vmem:[%s3294_s22 + $0x20] sm:$0xff]  }
  0x14   : > { %v469_v10 = vshrl.u32 %v3312_v5, 16  ;;  %v471_v11 = vshll.u32 %v3312_v5, 16  ;;  %v3328_v13 = vld [vmem:[%s3294_s22 + $0x28] sm:$0xff]   ;;  %v5819_v14 = vshll.u32 %v3315_v6, 16  ;;  %v5820_v15 = vshrl.u32 %v3315_v6, 16  ;;  %v3340_v21 = vld [vmem:[%s3294_s22 + $0x30] sm:$0xff]  }
  0x15   : > { %v486_v8 = vrot.slane %v3303_v2, 1  ;;  %v494_v9 = vrot.slane %v3309_v4, 1  ;;  %v3335_v19 = vshll.u32 %v3325_v12, 16  ;;  %v3343_v22 = vshll.u32 %v3328_v13, 16  ;;  %v3352_v25 = vld [vmem:[%s3294_s22 + $0x38] sm:$0xff]   ;;  %v3357_v29 = vld [vmem:[%s3294_s22 + $0x40] sm:$0xff]  }
  0x16   : > { %v473_v17 = vrot.slane %v471_v11, 1  ;;  %v478_v20 = vrot.slane %v5819_v14, 1  ;;  %v3346_v23 = vshrl.u32 %v3328_v13, 16  ;;  %v3349_v24 = vshrl.u32 %v3325_v12, 16  ;;  %v3372_v36 = vld [vmem:[%s3294_s22 + $0x48] sm:$0xff]   ;;  %v3390_v45 = vld [vmem:[%s3294_s22 + $0x50] sm:$0xff]  }
  0x17   : > { %v490_v16 = vor.u32 %v3306_v3, %v486_v8  ;;  %v498_v18 = vor.u32 %v3318_v7, %v494_v9  ;;  %5962 = vst [vmem:[#allocation2_spill] sm:$0xff] %v3335_v19  ;;  %5963 = vst [vmem:[#allocation3_spill] sm:$0xff] %v3343_v22  ;;  %v502_v28 = vrot.slane %v3335_v19, 1  ;;  %v510_v31 = vrot.slane %v3343_v22, 1  ;;  %v3400_v48 = vld [vmem:[%s3294_s22 + $0x58] sm:$0xff]   ;;  %v3414_v55 = vld [vmem:[%s3294_s22 + $0x60] sm:$0xff]  }
  0x18   : > { %5964 = vst [vmem:[#allocation4_spill] sm:$0xff] %v3346_v23  ;;  %5965 = vst [vmem:[#allocation5_spill] sm:$0xff] %v3349_v24  ;;  %v474_v27 = vor.u32 %v473_v17, %v469_v10  ;;  %v482_v30 = vor.u32 %v5820_v15, %v478_v20  ;;  %v3364_v32 = vshll.u32 %v3340_v21, 16  ;;  %v3369_v35 = vshll.u32 %v3352_v25, 16  ;;  %v3420_v57 = vld [vmem:[%s3294_s22 + $0x68] sm:$0xff]   ;;  %v3433_v63 = vld [vmem:[%s3294_s22 + $0x70] sm:$0xff]  }
  0x19   : > { %v495_v26 = vsel %vm467_vm0, %v490_v16, %v494_v9  ;;  %v503_v34 = vsel %vm467_vm0, %v498_v18, %v502_v28  ;;  %v514_v37 = vor.u32 %v3346_v23, %v510_v31  ;;  %v506_v39 = vor.u32 %v3349_v24, %v502_v28  ;;  %5971 = vst [vmem:[#allocation11_spill] sm:$0xff] %v3390_v45  ;;  %v3455_v28 = vld [vmem:[%s3294_s22 + $0x80] sm:$0xff]   ;;  %v3625_v22 = vld [vmem:[%s3294_s22 + $0xe8] sm:$0xff]   ;;  %s3249_s13 = smov 28   ;;  %s3250_s14 = smov 32  }
  0x1a   : > { %732 = vrot.lane.b32.xlu1 %v495_v26, %s3243_s23  ;;  %5966 = vst [vmem:[#allocation6_spill] sm:$0xff] %v3364_v32  ;;  %v479_v33 = vsel %vm467_vm0, %v474_v27, %v478_v20  ;;  %5967 = vst [vmem:[#allocation7_spill] sm:$0xff] %v3369_v35  ;;  %v518_v38 = vrot.slane %v3364_v32, 1  ;;  %v3379_v40 = vshrl.u32 %v3352_v25, 16  ;;  %v487_v41 = vsel %vm467_vm0, %v482_v30, %v486_v8  ;;  %v3452_v27 = vld [vmem:[%s3294_s22 + $0x78] sm:$0xff]   ;;  %v3510_v15 = vld [vmem:[%s3294_s22 + $0xa0] sm:$0xff]  }
  0x1b   : > { %728 = vrot.lane.b32.xlu0 %v479_v33, %s3243_s23  ;;  %v526_v42 = vrot.slane %v3369_v35, 1  ;;  %v3384_v43 = vshll.u32 %v3357_v29, 16  ;;  %v3387_v44 = vshrl.u32 %v3340_v21, 16  ;;  %v3394_v46 = vshll.u32 %v3372_v36, 16  ;;  %5976 = vst [vmem:[#allocation16_spill] sm:$0xff] %v3414_v55  ;;  %5978 = vst [vmem:[#allocation18_spill] sm:$0xff] %v3420_v57 }
  0x1c   : > { %5968 = vst [vmem:[#allocation8_spill] sm:$0xff] %v3379_v40  ;;  %v3397_v47 = vshrl.u32 %v3372_v36, 16  ;;  %v519_v49 = vsel %vm467_vm0, %v514_v37, %v518_v38  ;;  %v3406_v52 = vshll.u32 %v3390_v45, 16  ;;  %v3411_v54 = vshrl.u32 %v3357_v29, 16  ;;  %5981 = vst [vmem:[#allocation21_spill] sm:$0xff] %v3433_v63  ;;  %v3610_v35 = vld [vmem:[%s3294_s22 + $0xd8] sm:$0xff]  }
  0x1d   : > { %5969 = vst [vmem:[#allocation9_spill] sm:$0xff] %v3384_v43  ;;  %5970 = vst [vmem:[#allocation10_spill] sm:$0xff] %v3387_v44  ;;  %v530_v50 = vor.u32 %v3379_v40, %v526_v42  ;;  %v534_v51 = vrot.slane %v3384_v43, 1  ;;  %v542_v53 = vrot.slane %v3394_v46, 1  ;;  %v3417_v56 = vshll.u32 %v3400_v48, 16  ;;  %p216_p5 = scmp.lt.s32.totalorder %s3287_s17, 127 }
  0x1e   : > { %734 = vrot.lane.b32.xlu1 %v503_v34, %s3243_s23  ;;  %5972 = vst [vmem:[#allocation12_spill] sm:$0xff] %v3394_v46  ;;  %5973 = vst [vmem:[#allocation13_spill] sm:$0xff] %v3397_v47  ;;  %v511_v58 = vsel %vm467_vm0, %v506_v39, %v510_v31  ;;  %v522_v59 = vor.u32 %v3387_v44, %v518_v38  ;;  %v550_v60 = vrot.slane %v3406_v52, 1  ;;  %v3426_v61 = vshrl.u32 %v3400_v48, 16  ;;  %v3462_v31 = vld [vmem:[%s3294_s22 + $0x88] sm:$0xff]  }
  0x1f   : > { %5974 = vst [vmem:[#allocation14_spill] sm:$0xff] %v3406_v52  ;;  %730 = vrot.lane.b32.xlu0 %v487_v41, %s3243_s23  ;;  %5975 = vst [vmem:[#allocation15_spill] sm:$0xff] %v3411_v54  ;;  %v3430_v62 = vshll.u32 %v3414_v55, 16  ;;  %v535_v8 = vsel %vm467_vm0, %v530_v50, %v534_v51  ;;  %v546_v9 = vor.u32 %v3397_v47, %v542_v53  ;;  %v558_v10 = vrot.slane %v3417_v56, 1  ;;  %v3566_v52 = vld [vmem:[%s3294_s22 + $0xc0] sm:$0xff]   ;;  %s6257_s17 = smov (!%p216_p5, %s3287_s17), 127 }
  0x20   : > { %5977 = vst [vmem:[#allocation17_spill] sm:$0xff] %v3417_v56  ;;  %5979 = vst [vmem:[#allocation19_spill] sm:$0xff] %v3426_v61  ;;  %v3439_v11 = vshll.u32 %v3420_v57, 16  ;;  %v3443_v16 = vshrl.u32 %v3390_v45, 16  ;;  %v527_v17 = vsel %vm467_vm0, %v522_v59, %v526_v42  ;;  %v538_v18 = vor.u32 %v3411_v54, %v534_v51  ;;  %v3601_v54 = vld [vmem:[%s3294_s22 + $0xd0] sm:$0xff]   ;;  %s2959_s21 = sshll.u32 %s6257_s17, 3 }
  0x21   : > { %5980 = vst [vmem:[#allocation20_spill] sm:$0xff] %v3430_v62  ;;  %v566_v20 = vrot.slane %v3430_v62, 1  ;;  %v3449_v26 = vshrl.u32 %v3420_v57, 16  ;;  %v3459_v30 = vshll.u32 %v3433_v63, 16  ;;  %5986 = vst [vmem:[#allocation26_spill] sm:$0xff] %v3462_v31  ;;  %v551_v33 = vsel %vm467_vm0, %v546_v9, %v550_v60  ;;  %v3494_v9 = vld [vmem:[%s3294_s22 + $0x98] sm:$0xff]  }
  0x22   : > { %738 = vrot.lane.b32.xlu1 %v519_v49, %s3243_s23  ;;  %5982 = vst [vmem:[#allocation22_spill] sm:$0xff] %v3439_v11  ;;  %5983 = vst [vmem:[#allocation23_spill] sm:$0xff] %v3443_v16  ;;  %v562_v34 = vor.u32 %v3426_v61, %v558_v10  ;;  %v574_v37 = vrot.slane %v3439_v11, 1  ;;  %v3468_v38 = vshll.u32 %v3452_v27, 16  ;;  %v543_v39 = vsel %vm467_vm0, %v538_v18, %v542_v53  ;;  %v3477_v49 = vld [vmem:[%s3294_s22 + $0x90] sm:$0xff]  }
  0x23   : > { %736 = vrot.lane.b32.xlu0 %v511_v58, %s3243_s23  ;;  %5984 = vst [vmem:[#allocation24_spill] sm:$0xff] %v3449_v26  ;;  %5985 = vst [vmem:[#allocation25_spill] sm:$0xff] %v3459_v30  ;;  %v554_v41 = vor.u32 %v3443_v16, %v550_v60  ;;  %v3474_v42 = vshrl.u32 %v3414_v55, 16  ;;  %v582_v50 = vrot.slane %v3459_v30, 1  ;;  %v3482_v51 = vshrl.u32 %v3452_v27, 16  ;;  %v3521_v30 = vld [vmem:[%s3294_s22 + $0xa8] sm:$0xff]  }
  0x24   : > { %5987 = vst [vmem:[#allocation27_spill] sm:$0xff] %v3468_v38  ;;  %5989 = vst [vmem:[#allocation29_spill] sm:$0xff] %v3477_v49  ;;  %v3485_v58 = vshll.u32 %v3455_v28, 16  ;;  %v3488_v53 = vshll.u32 %v3462_v31, 16  ;;  %v567_v59 = vsel %vm467_vm0, %v562_v34, %v566_v20  ;;  %v578_v60 = vor.u32 %v3449_v26, %v574_v37  ;;  %v3579_v16 = vld [vmem:[%s3294_s22 + $0xc8] sm:$0xff]  }
  0x25   : > { %5988 = vst [vmem:[#allocation28_spill] sm:$0xff] %v3474_v42  ;;  %5990 = vst [vmem:[#allocation30_spill] sm:$0xff] %v3482_v51  ;;  %v559_v18 = vsel %vm467_vm0, %v554_v41, %v558_v10  ;;  %v3504_v34 = vshrl.u32 %v3462_v31, 16  ;;  %v3507_v14 = vshll.u32 %v3477_v49, 16  ;;  %v3518_v41 = vshll.u32 %v3494_v9, 16 }
  0x26   : > { %742 = vrot.lane.b32.xlu1 %v535_v8, %s3243_s23  ;;  %5991 = vst [vmem:[#allocation31_spill] sm:$0xff] %v3485_v58  ;;  %5992 = vst [vmem:[#allocation32_spill] sm:$0xff] %v3488_v53  ;;  %v590_v8 = vrot.slane %v3468_v38, 1  ;;  %v606_v38 = vrot.slane %v3488_v53, 1  ;;  %v583_v10 = vsel %vm467_vm0, %v578_v60, %v582_v50  ;;  %v3535_v60 = vshll.u32 %v3510_v15, 16 }
  0x27   : > { %740 = vrot.lane.b32.xlu0 %v527_v17, %s3243_s23  ;;  %v3498_v17 = vshrl.u32 %v3433_v63, 16  ;;  %5994 = vst [vmem:[#allocation34_spill] sm:$0xff] %v3504_v34  ;;  %5995 = vst [vmem:[#allocation35_spill] sm:$0xff] %v3521_v30  ;;  %v622_v26 = vrot.slane %v3518_v41, 1  ;;  %v3552_v62 = vshll.u32 %v3521_v30, 16  ;;  %v3560_v61 = vshrl.u32 %v3477_v49, 16 }
  0x28   : > { %5997 = vst [vmem:[#allocation37_spill] sm:$0xff] %v3535_v60  ;;  %v630_v56 = vrot.slane %v3535_v60, 1  ;;  %6002 = vst [vmem:[#allocation42_spill] sm:$0xff] %v3566_v52  ;;  %v3642_v23 = vshrl.u32 %v3566_v52, 16 }
  0x29   : > { %5993 = vst [vmem:[#allocation33_spill] sm:$0xff] %v3498_v17  ;;  %v586_v11 = vor.u32 %v3498_v17, %v582_v50  ;;  %v3543_v50 = vld [vmem:[%s3294_s22 + $0xb0] sm:$0xff]   ;;  %v3546_v17 = vld [vmem:[%s3294_s22 + $0xb8] sm:$0xff]   ;;  %6000 = vst [vmem:[#allocation40_spill] sm:$0xff] %v3552_v62 }
  0x2a   : > { %746 = vrot.lane.b32.xlu1 %v551_v33, %s3243_s23  ;;  %v570_v33 = vor.u32 %v3474_v42, %v566_v20  ;;  %v594_v20 = vor.u32 %v3482_v51, %v590_v8  ;;  %v614_v51 = vrot.slane %v3507_v14, 1  ;;  %5998 = vst [vmem:[#allocation38_spill] sm:$0xff] %v3543_v50  ;;  %5999 = vst [vmem:[#allocation39_spill] sm:$0xff] %v3546_v17  ;;  %v3595_v43 = vshrl.u32 %v3546_v17, 16 }
  0x2b   : > { %744 = vrot.lane.b32.xlu0 %v543_v39, %s3243_s23  ;;  %v598_v39 = vrot.slane %v3485_v58, 1  ;;  %v3532_v58 = vshrl.u32 %v3455_v28, 16  ;;  %6005 = vst [vmem:[#allocation45_spill] sm:$0xff] %v3579_v16  ;;  %6009 = vst [vmem:[#allocation49_spill] sm:$0xff] %v3601_v54  ;;  %v3616_v32 = vshrl.u32 %v3543_v50, 16 }
  0x2c   : > { %v618_v46 = vor.u32 %v3560_v61, %v614_v51  ;;  %6007 = vst [vmem:[#allocation47_spill] sm:$0xff] %v3595_v43  ;;  %6011 = vst [vmem:[#allocation51_spill] sm:$0xff] %v3610_v35 }
  0x2d   : > { %5996 = vst [vmem:[#allocation36_spill] sm:$0xff] %v3532_v58  ;;  %v602_v42 = vor.u32 %v3532_v58, %v598_v39  ;;  %v638_v58 = vrot.slane %v3552_v62, 1  ;;  %6012 = vst [vmem:[#allocation52_spill] sm:$0xff] %v3616_v32  ;;  %v3648_v62 = vld [vmem:[%s3294_s22 + $0xf0] sm:$0xff]  }
  0x2e   : > { %750 = vrot.lane.b32.xlu1 %v567_v59, %s3243_s23  ;;  %v575_v59 = vsel %vm467_vm0, %v570_v33, %v574_v37  ;;  %v599_v37 = vsel %vm467_vm0, %v594_v20, %v598_v39  ;;  %v610_v33 = vor.u32 %v3504_v34, %v606_v38  ;;  %v3563_v20 = vshrl.u32 %v3521_v30, 16  ;;  %6014 = vst [vmem:[#allocation54_spill] sm:$0xff] %v3625_v22 }
  0x2f   : > { %748 = vrot.lane.b32.xlu0 %v559_v18, %s3243_s23  ;;  %v3540_v18 = vshrl.u32 %v3494_v9, 16  ;;  %v623_v40 = vsel %vm467_vm0, %v618_v46, %v622_v26  ;;  %6018 = vst [vmem:[#allocation58_spill] sm:$0xff] %v3642_v23  ;;  %6019 = vst [vmem:[#allocation59_spill] sm:$0xff] %v3648_v62  ;;  %v3676_v19 = vshll.u32 %v3648_v62, 16 }
  0x30   : > { %6001 = vst [vmem:[#allocation41_spill] sm:$0xff] %v3563_v20 }
  0x31   : > { %v626_v39 = vor.u32 %v3540_v18, %v622_v26  ;;  %v3633_v26 = vld [vmem:[%s3294_s22 + $0xe0] sm:$0xff]   ;;  %6025 = vst [vmem:[#allocation65_spill] sm:$0xff] %v3676_v19 }
  0x32   : > { %754 = vrot.lane.b32.xlu1 %v583_v10, %s3243_s23  ;;  %v591_v10 = vsel %vm467_vm0, %v586_v11, %v590_v8  ;;  %v3573_v11 = vshll.u32 %v3546_v17, 16  ;;  %v615_v8 = vsel %vm467_vm0, %v610_v33, %v614_v51  ;;  %v3590_v33 = vshrl.u32 %v3510_v15, 16  ;;  %6016 = vst [vmem:[#allocation56_spill] sm:$0xff] %v3633_v26 }
  0x33   : > { %752 = vrot.lane.b32.xlu0 %v575_v59, %s3243_s23  ;;  %v3570_v59 = vshll.u32 %v3543_v50, 16 }
  0x34   : > { %6004 = vst [vmem:[#allocation44_spill] sm:$0xff] %v3573_v11  ;;  %6006 = vst [vmem:[#allocation46_spill] sm:$0xff] %v3590_v33  ;;  %v654_v47 = vrot.slane %v3573_v11, 1  ;;  %v634_v11 = vor.u32 %v3590_v33, %v630_v56 }
  0x35   : > { %6003 = vst [vmem:[#allocation43_spill] sm:$0xff] %v3570_v59  ;;  %v646_v51 = vrot.slane %v3570_v59, 1  ;;  %v3622_v59 = vshll.u32 %v3601_v54, 16 }
  0x36   : > { %758 = vrot.lane.b32.xlu1 %v599_v37, %s3243_s23  ;;  %v607_v37 = vsel %vm467_vm0, %v602_v42, %v606_v38  ;;  %v631_v38 = vsel %vm467_vm0, %v626_v39, %v630_v56  ;;  %v642_v42 = vor.u32 %v3563_v20, %v638_v58  ;;  %v658_v39 = vor.u32 %v3595_v43, %v654_v47 }
  0x37   : > { %756 = vrot.lane.b32.xlu0 %v591_v10, %s3243_s23  ;;  %v3598_v10 = vshll.u32 %v3566_v52, 16  ;;  %6013 = vst [vmem:[#allocation53_spill] sm:$0xff] %v3622_v59  ;;  %v3630_v56 = vshrl.u32 %v3579_v16, 16  ;;  %v650_v43 = vor.u32 %v3616_v32, %v646_v51  ;;  %v3651_v20 = vshll.u32 %v3625_v22, 16 }
  0x38   : > { %v3668_v32 = vshrl.u32 %v3601_v54, 16 }
  0x39   : > { %6008 = vst [vmem:[#allocation48_spill] sm:$0xff] %v3598_v10  ;;  %v662_v44 = vrot.slane %v3598_v10, 1  ;;  %6015 = vst [vmem:[#allocation55_spill] sm:$0xff] %v3630_v56  ;;  %v639_v10 = vsel %vm467_vm0, %v634_v11, %v638_v58  ;;  %v3656_v11 = vshrl.u32 %v3610_v35, 16 }
  0x3a   : > { %762 = vrot.lane.b32.xlu1 %v615_v8, %s3243_s23  ;;  %v3607_v8 = vshll.u32 %v3579_v16, 16  ;;  %6020 = vst [vmem:[#allocation60_spill] sm:$0xff] %v3651_v20  ;;  %6023 = vst [vmem:[#allocation63_spill] sm:$0xff] %v3668_v32 }
  0x3b   : > { %760 = vrot.lane.b32.xlu0 %v607_v37, %s3243_s23  ;;  %v647_v37 = vsel %vm467_vm0, %v642_v42, %v646_v51  ;;  %v663_v42 = vsel %vm467_vm0, %v658_v39, %v662_v44  ;;  %6021 = vst [vmem:[#allocation61_spill] sm:$0xff] %v3656_v11  ;;  %v3659_v51 = vshll.u32 %v3633_v26, 16  ;;  %v655_v39 = vsel %vm467_vm0, %v650_v43, %v654_v47 }
  0x3c   : > { %6010 = vst [vmem:[#allocation50_spill] sm:$0xff] %v3607_v8  ;;  %v670_v46 = vrot.slane %v3607_v8, 1  ;;  %v678_v8 = vrot.slane %v3622_v59, 1  ;;  %v666_v59 = vor.u32 %v3642_v23, %v662_v44  ;;  %v3682_v44 = vld [vmem:[%s3585_s27] sm:$0xff]   ;;  %v3691_v23 = vshrl.u32 %v3633_v26, 16 }
  0x3d   : > { %6022 = vst [vmem:[#allocation62_spill] sm:$0xff] %v3659_v51  ;;  %v694_v43 = vrot.slane %v3659_v51, 1  ;;  %6026 = vst [vmem:[#allocation66_spill] sm:$0xff] %v3682_v44  ;;  %v710_v51 = vrot.slane %v3676_v19, 1 }
  0x3e   : > { %766 = vrot.lane.b32.xlu1 %v631_v38, %s3243_s23  ;;  %v3636_v38 = vshll.u32 %v3610_v35, 16  ;;  %6028 = vst [vmem:[#allocation68_spill] sm:$0xff] %v3691_v23 }
  0x3f   : > { %764 = vrot.lane.b32.xlu0 %v623_v40, %s3243_s23  ;;  %v674_v40 = vor.u32 %v3630_v56, %v670_v46  ;;  %v3673_v56 = vshrl.u32 %v3625_v22, 16 }
  0x40   : > { %6017 = vst [vmem:[#allocation57_spill] sm:$0xff] %v3636_v38  ;;  %v686_v58 = vrot.slane %v3636_v38, 1  ;;  %v702_v38 = vrot.slane %v3651_v20, 1  ;;  %v682_v20 = vor.u32 %v3668_v32, %v678_v8  ;;  %v1451_v32 = vrot.slane %v3560_v61, 2 }
  0x41   : > { %6024 = vst [vmem:[#allocation64_spill] sm:$0xff] %v3673_v56  ;;  %v679_v24 = vsel %vm467_vm0, %v674_v40, %v678_v8 }
  0x42   : > { %770 = vrot.lane.b32.xlu1 %v647_v37, %s3243_s23  ;;  %v3662_v37 = vld [vmem:[%s3294_s22 + $0xf8] sm:$0xff]   ;;  %v706_v40 = vor.u32 %v3673_v56, %v702_v38  ;;  %v687_v8 = vsel %vm467_vm0, %v682_v20, %v686_v58  ;;  %v794_v20 = vrot.slane %v3315_v6, 1 }
  0x43   : > { %768 = vrot.lane.b32.xlu0 %v639_v10, %s3243_s23  ;;  %v690_v10 = vor.u32 %v3656_v11, %v686_v58  ;;  %v3685_v47 = vshll.u32 %v3662_v37, 16  ;;  %v3699_v33 = vshrl.u32 %v3662_v37, 16 }
  0x45   : > { %6027 = vst [vmem:[#allocation67_spill] sm:$0xff] %v3685_v47  ;;  %v695_v11 = vsel %vm467_vm0, %v690_v10, %v694_v43  ;;  %v718_v60 = vrot.slane %v3685_v47, 1  ;;  %6029 = vst [vmem:[#allocation69_spill] sm:$0xff] %v3699_v33 }
  0x46   : > { %774 = vrot.lane.b32.xlu1 %v663_v42, %s3243_s23  ;;  %v671_v42 = vsel %vm467_vm0, %v666_v59, %v670_v46  ;;  %v3702_v59 = vshll.u32 %v3682_v44, 16  ;;  %v3708_v46 = vshrl.u32 %v3648_v62, 16 }
  0x47   : > { %772 = vrot.lane.b32.xlu0 %v655_v39, %s3243_s23  ;;  %v711_v39 = vsel %vm467_vm0, %v706_v40, %v710_v51  ;;  %v722_v10 = vor.u32 %v3699_v33, %v718_v60  ;;  %v1057_v40 = vrot.slane %v3507_v14, 2  ;;  %v800_v33 = vrot.slane %v3325_v12, 1 }
  0x48   : > { %6030 = vst [vmem:[#allocation70_spill] sm:$0xff] %v3702_v59  ;;  %6031 = vst [vmem:[#allocation71_spill] sm:$0xff] %v3708_v46  ;;  %v726_v47 = vrot.slane %v3702_v59, 1  ;;  %v798_v59 = vrot.slane %v3300_v1, 1 }
  0x4a   : > { %778 = vrot.lane.b32.xlu1 %v679_v24, %s3243_s23  ;;  %v698_v24 = vor.u32 %v3691_v23, %v694_v43  ;;  %v727_v58 = vsel %vm467_vm0, %v722_v10, %v726_v47  ;;  %v1056_v43 = vrot.slane %v3560_v61, 1  ;;  %v793_v47 = vrot.slane %v3312_v5, 1 }
  0x4b   : > { %776 = vrot.lane.b32.xlu0 %v671_v42, %s3243_s23  ;;  %v714_v42 = vor.u32 %v3708_v46, %v710_v51  ;;  %v6033_v51 = vshll.u32 %v3315_v6, 16  ;;  %v3753_v1 = vsel %vm792_vm1, %v798_v59, %v800_v33  ;;  %v816_v46 = vrot.slane %v3414_v55, 1 }
  0x4c   : > { %v703_v19 = vsel %vm467_vm0, %v698_v24, %v702_v38  ;;  %v3734_v10 = vor.u32 %v1057_v40, %v1056_v43  ;;  %v795_v5 = vsel %vm792_vm1, %v793_v47, %v794_v20  ;;  %v804_v43 = vrot.slane %v3340_v21, 1 }
  0x4d   : > { %v3730_v24 = vrot.slane %v6033_v51, 2  ;;  %v1060_v51 = vrot.slane %v3540_v18, 1  ;;  %v806_v47 = vrot.slane %v3352_v25, 1  ;;  %v820_v23 = vrot.slane %v3433_v63, 1 }
  0x4e   : > { %782 = vrot.lane.b32.xlu1 %v695_v11, %s3243_s23  ;;  %v796_v11 = vrot.slane %v3297_v0, 1 }
  0x4f   : > { %780 = vrot.lane.b32.xlu0 %v687_v8, %s3243_s23  ;;  %v6032_v8 = vshrl.u32 %v3315_v6, 16 }
  0x51   : > { %v3726_v38 = vrot.slane %v6032_v8, 1  ;;  %v3741_v8 = vsel %vm792_vm1, %v794_v20, %v796_v11  ;;  %v3764_v20 = vsel %vm792_vm1, %v796_v11, %v798_v59  ;;  %v810_v11 = vrot.slane %v3372_v36, 1 }
  0x52   : > { %786 = vrot.lane.b32.xlu1 %v711_v39, %s3243_s23  ;;  %v719_v39 = vsel %vm467_vm0, %v714_v42, %v718_v60  ;;  %v1061_v60 = vrot.slane %v3518_v41, 2 }
  0x53   : > { %784 = vrot.lane.b32.xlu0 %v703_v19, %s3243_s23  ;;  %v3788_v19 = vsel %vm792_vm1, %v804_v43, %v806_v47 }
  0x54   : > { %v3748_v42 = vor.u32 %v1061_v60, %v1060_v51  ;;  %v808_v51 = vrot.slane %v3357_v29, 1 }
  0x56   : > { %790 = vrot.lane.b32.xlu1 %v727_v58, %s3243_s23  ;;  %6034 = vst [vmem:[#allocation72_spill] sm:$0xff] %v3748_v42  ;;  %v802_v58 = vrot.slane %v3328_v13, 1  ;;  %v3760_v40 = vsel %vm988_vm2, %v3734_v10, %v3748_v42  ;;  %v3781_v59 = vsel %vm792_vm1, %v806_v47, %v808_v51  ;;  %v3800_v56 = vsel %vm792_vm1, %v808_v51, %v810_v11 }
  0x57   : > { %788 = vrot.lane.b32.xlu0 %v719_v39, %s3243_s23  ;;  %v1452_v42 = vrot.slane %v3507_v14, 3  ;;  %v1455_v51 = vrot.slane %v3540_v18, 2  ;;  %v822_v14 = vrot.slane %v3452_v27, 1  ;;  %v826_v18 = vrot.slane %v3462_v31, 1  ;;  %s5540_s23 = scalar_lea.vmem %s5818_s4, %s2959_s21 }
  0x58   : > { %v3769_v39 = vsel %vm792_vm1, %v802_v58, %v804_v43  ;;  %v3776_v60 = vsel %vm792_vm1, %v800_v33, %v802_v58  ;;  %v814_v58 = vrot.slane %v3400_v48, 1  ;;  %v818_v43 = vrot.slane %v3420_v57, 1 }
  0x59   : > { %v3818_v57 = vor.u32 %v1452_v42, %v1451_v32  ;;  %v828_v42 = vrot.slane %v3477_v49, 1 }
  0x5a   : > { %860 = vrot.lane.b32.xlu1 %v3741_v8, %s3244_s28  ;;  %v3806_v47 = vsel %vm792_vm1, %v814_v58, %v816_v46  ;;  %v3825_v61 = vsel %vm792_vm1, %v818_v43, %v820_v23 }
  0x5b   : > { %858 = vrot.lane.b32.xlu0 %v795_v5, %s3244_s28  ;;  %v812_v5 = vrot.slane %v3390_v45, 1  ;;  %6035 = vst [vmem:[#allocation73_spill] sm:$0xff] %v3818_v57  ;;  %v824_v45 = vrot.slane %v3455_v28, 1  ;;  %v3844_v28 = vsel %vm792_vm1, %v820_v23, %v822_v14  ;;  %v840_v57 = vrot.slane %v3566_v52, 1 }
  0x5d   : > { %v3793_v33 = vsel %vm792_vm1, %v810_v11, %v812_v5  ;;  %v1456_v11 = vrot.slane %v3518_v41, 3  ;;  %v3816_v55 = vsel %vm792_vm1, %v812_v5, %v814_v58  ;;  %v3832_v41 = vsel %vm792_vm1, %v816_v46, %v818_v43 }
  0x5e   : > { %864 = vrot.lane.b32.xlu1 %v3753_v1, %s3244_s28  ;;  %v3837_v32 = vsel %vm792_vm1, %v822_v14, %v824_v45  ;;  %v3849_v46 = vsel %vm792_vm1, %v826_v18, %v828_v42  ;;  %v830_v5 = vrot.slane %v3494_v9, 1  ;;  %v832_v58 = vrot.slane %v3510_v15, 1 }
  0x5f   : > { %862 = vrot.lane.b32.xlu0 %v3764_v20, %s3244_s28  ;;  %v3822_v63 = vor.u32 %v1456_v11, %v1455_v51  ;;  %v3856_v43 = vsel %vm792_vm1, %v824_v45, %v826_v18  ;;  %v834_v51 = vrot.slane %v3521_v30, 1  ;;  %v836_v11 = vrot.slane %v3543_v50, 1 }
  0x60   : > { %v3861_v23 = vsel %vm792_vm1, %v830_v5, %v832_v58  ;;  %v3868_v14 = vsel %vm792_vm1, %v828_v42, %v830_v5  ;;  %v838_v18 = vrot.slane %v3546_v17, 1  ;;  %v842_v5 = vrot.slane %v3579_v16, 1 }
  0x61   : > { %6036 = vst [vmem:[#allocation74_spill] sm:$0xff] %v3822_v63  ;;  %v3873_v45 = vsel %vm792_vm1, %v834_v51, %v836_v11  ;;  %v3880_v50 = vsel %vm792_vm1, %v832_v58, %v834_v51  ;;  %v844_v30 = vrot.slane %v3601_v54, 1  ;;  %v846_v51 = vrot.slane %v3610_v35, 1 }
  0x62   : > { %868 = vrot.lane.b32.xlu1 %v3769_v39, %s3244_s28  ;;  %v3885_v42 = vsel %vm792_vm1, %v838_v18, %v840_v57  ;;  %v3892_v52 = vsel %vm792_vm1, %v836_v11, %v838_v18  ;;  %v848_v17 = vrot.slane %v3633_v26, 1  ;;  %v3904_v54 = vsel %vm792_vm1, %v840_v57, %v842_v5 }
  0x63   : > { %866 = vrot.lane.b32.xlu0 %v3776_v60, %s3244_s28  ;;  %v3897_v58 = vsel %vm792_vm1, %v842_v5, %v844_v30  ;;  %v850_v18 = vrot.slane %v3625_v22, 1  ;;  %v852_v16 = vrot.slane %v3648_v62, 1  ;;  %v3918_v35 = vsel %vm792_vm1, %v844_v30, %v846_v51 }
  0x64   : > { %v3909_v11 = vsel %vm792_vm1, %v846_v51, %v848_v17  ;;  %v854_v22 = vrot.slane %v3662_v37, 1  ;;  %v5942_v62 = vrot.slane %v3682_v44, 1 }
  0x65   : > { %v3925_v5 = vsel %vm792_vm1, %v850_v18, %v852_v16  ;;  %v3934_v30 = vsel %vm792_vm1, %v848_v17, %v850_v18 }
  0x66   : > { %872 = vrot.lane.b32.xlu1 %v3781_v59, %s3244_s28 }
  0x67   : > { %870 = vrot.lane.b32.xlu0 %v3788_v19, %s3244_s28 }
  0x6a   : > { %876 = vrot.lane.b32.xlu1 %v3793_v33, %s3244_s28 }
  0x6b   : > { %874 = vrot.lane.b32.xlu0 %v3800_v56, %s3244_s28 }
  0x6e   : > { %880 = vrot.lane.b32.xlu1 %v3806_v47, %s3244_s28 }
  0x6f   : > { %878 = vrot.lane.b32.xlu0 %v3816_v55, %s3244_s28 }
  0x72   : > { %884 = vrot.lane.b32.xlu1 %v3825_v61, %s3244_s28 }
  0x73   : > { %882 = vrot.lane.b32.xlu0 %v3832_v41, %s3244_s28 }
  0x76   : > { %888 = vrot.lane.b32.xlu1 %v3837_v32, %s3244_s28 }
  0x77   : > { %886 = vrot.lane.b32.xlu0 %v3844_v28, %s3244_s28 }
  0x7a   : > { %892 = vrot.lane.b32.xlu1 %v3849_v46, %s3244_s28 }
  0x7b   : > { %890 = vrot.lane.b32.xlu0 %v3856_v43, %s3244_s28 }
  0x7e   : > { %896 = vrot.lane.b32.xlu1 %v3861_v23, %s3244_s28 }
  0x7f   : > { %894 = vrot.lane.b32.xlu0 %v3868_v14, %s3244_s28 }
  0x82   : > { %900 = vrot.lane.b32.xlu1 %v3873_v45, %s3244_s28 }
  0x83   : > { %898 = vrot.lane.b32.xlu0 %v3880_v50, %s3244_s28 }
  0x86   : > { %904 = vrot.lane.b32.xlu1 %v3885_v42, %s3244_s28 }
  0x87   : > { %902 = vrot.lane.b32.xlu0 %v3892_v52, %s3244_s28 }
  0x8a   : > { %908 = vrot.lane.b32.xlu1 %v3897_v58, %s3244_s28 }
  0x8b   : > { %906 = vrot.lane.b32.xlu0 %v3904_v54, %s3244_s28 }
  0x8c   : > { %v3915_v26 = vpop.permute.xlu1 %732 }
  0x8d   : > { %6037 = vst [vmem:[#allocation75_spill] sm:$0xff] %v3915_v26  ;;  %v3920_v57 = vpop.permute.xlu0 %728  ;;  %v3943_v26 = vsel %vm792_vm1, %v854_v22, %v5942_v62 }
  0x8e   : > { %6038 = vst [vmem:[#allocation76_spill] sm:$0xff] %v3920_v57  ;;  %912 = vrot.lane.b32.xlu1 %v3909_v11, %s3244_s28  ;;  %6040 = vst [vmem:[#allocation78_spill] sm:$0xff] %v3943_v26 }
  0x8f   : > { %910 = vrot.lane.b32.xlu0 %v3918_v35, %s3244_s28 }
  0x90   : > { %v3931_v63 = vpop.permute.xlu1 %734 }
  0x91   : > { %6039 = vst [vmem:[#allocation77_spill] sm:$0xff] %v3931_v63  ;;  %v3936_v51 = vpop.permute.xlu0 %730  ;;  %v3950_v63 = vsel %vm792_vm1, %v852_v16, %v854_v22 }
  0x92   : > { %916 = vrot.lane.b32.xlu1 %v3925_v5, %s3244_s28 }
  0x93   : > { %914 = vrot.lane.b32.xlu0 %v3934_v30, %s3244_s28 }
  0x94   : > { %v3947_v57 = vpop.permute.xlu1 %738 }
  0x95   : > { %v3952_v17 = vpop.permute.xlu0 %736 }
  0x96   : > { %920 = vrot.lane.b32.xlu1 %v3943_v26, %s3244_s28 }
  0x97   : > { %918 = vrot.lane.b32.xlu0 %v3950_v63, %s3244_s28 }
  0x98   : > { %v3958_v18 = vpop.permute.xlu1 %742 }
  0x99   : > { %v3960_v62 = vpop.permute.xlu0 %740 }
  0x9a   : > { %926 = vrot.lane.b32.xlu1 %v3764_v20, %s3245_s29 }
  0x9b   : > { %924 = vrot.lane.b32.xlu0 %v3741_v8, %s3245_s29 }
  0x9c   : > { %v3966_v22 = vpop.permute.xlu1 %746 }
  0x9d   : > { %v3968_v16 = vpop.permute.xlu0 %744 }
  0x9e   : > { %930 = vrot.lane.b32.xlu1 %v3776_v60, %s3245_s29 }
  0x9f   : > { %928 = vrot.lane.b32.xlu0 %v3753_v1, %s3245_s29 }
  0xa0   : > { %v3974_v26 = vpop.permute.xlu1 %750 }
  0xa1   : > { %v3976_v44 = vpop.permute.xlu0 %748 }
  0xa2   : > { %934 = vrot.lane.b32.xlu1 %v3788_v19, %s3245_s29 }
  0xa3   : > { %932 = vrot.lane.b32.xlu0 %v3769_v39, %s3245_s29 }
  0xa4   : > { %v3982_v8 = vpop.permute.xlu1 %754 }
  0xa5   : > { %v3984_v20 = vpop.permute.xlu0 %752 }
  0xa6   : > { %938 = vrot.lane.b32.xlu1 %v3800_v56, %s3245_s29 }
  0xa7   : > { %936 = vrot.lane.b32.xlu0 %v3781_v59, %s3245_s29 }
  0xa8   : > { %v3990_v1 = vpop.permute.xlu1 %758 }
  0xa9   : > { %v3992_v60 = vpop.permute.xlu0 %756 }
  0xaa   : > { %942 = vrot.lane.b32.xlu1 %v3816_v55, %s3245_s29 }
  0xab   : > { %940 = vrot.lane.b32.xlu0 %v3793_v33, %s3245_s29 }
  0xac   : > { %v3998_v19 = vpop.permute.xlu1 %762 }
  0xad   : > { %v4000_v39 = vpop.permute.xlu0 %760 }
  0xae   : > { %6041 = vst [vmem:[#allocation79_spill] sm:$0xff] %v4000_v39  ;;  %946 = vrot.lane.b32.xlu1 %v3832_v41, %s3245_s29 }
  0xaf   : > { %944 = vrot.lane.b32.xlu0 %v3806_v47, %s3245_s29 }
  0xb0   : > { %v4006_v56 = vpop.permute.xlu1 %766 }
  0xb1   : > { %6042 = vst [vmem:[#allocation80_spill] sm:$0xff] %v4006_v56  ;;  %v4008_v59 = vpop.permute.xlu0 %764 }
  0xb2   : > { %6043 = vst [vmem:[#allocation81_spill] sm:$0xff] %v4008_v59  ;;  %950 = vrot.lane.b32.xlu1 %v3844_v28, %s3245_s29 }
  0xb3   : > { %948 = vrot.lane.b32.xlu0 %v3825_v61, %s3245_s29 }
  0xb4   : > { %v4014_v55 = vpop.permute.xlu1 %770 }
  0xb5   : > { %v4016_v33 = vpop.permute.xlu0 %768 }
  0xb6   : > { %954 = vrot.lane.b32.xlu1 %v3856_v43, %s3245_s29 }
  0xb7   : > { %952 = vrot.lane.b32.xlu0 %v3837_v32, %s3245_s29 }
  0xb8   : > { %v4022_v47 = vpop.permute.xlu1 %774 }
  0xb9   : > { %v4024_v41 = vpop.permute.xlu0 %772 }
  0xba   : > { %958 = vrot.lane.b32.xlu1 %v3868_v14, %s3245_s29 }
  0xbb   : > { %956 = vrot.lane.b32.xlu0 %v3849_v46, %s3245_s29 }
  0xbc   : > { %v4030_v61 = vpop.permute.xlu1 %778 }
  0xbd   : > { %v4032_v28 = vpop.permute.xlu0 %776 }
  0xbe   : > { %962 = vrot.lane.b32.xlu1 %v3880_v50, %s3245_s29 }
  0xbf   : > { %960 = vrot.lane.b32.xlu0 %v3861_v23, %s3245_s29 }
  0xc0   : > { %v4038_v32 = vpop.permute.xlu1 %782 }
  0xc1   : > { %v4040_v43 = vpop.permute.xlu0 %780 }
  0xc2   : > { %966 = vrot.lane.b32.xlu1 %v3892_v52, %s3245_s29  ;;  %v1052_v52 = vrot.slane %v3504_v34, 1  ;;  %v997_v34 = vrot.slane %v3309_v4, 2 }
  0xc3   : > { %964 = vrot.lane.b32.xlu0 %v3873_v45, %s3245_s29  ;;  %v1053_v45 = vrot.slane %v3488_v53, 2 }
  0xc4   : > { %v4046_v46 = vpop.permute.xlu1 %786 }
  0xc5   : > { %v4048_v14 = vpop.permute.xlu0 %784  ;;  %v4072_v39 = vor.u32 %v1053_v45, %v1052_v52 }
  0xc6   : > { %970 = vrot.lane.b32.xlu1 %v3904_v54, %s3245_s29  ;;  %v992_v54 = vrot.slane %v3306_v3, 1 }
  0xc7   : > { %968 = vrot.lane.b32.xlu0 %v3885_v42, %s3245_s29  ;;  %v993_v42 = vrot.slane %v3303_v2, 2  ;;  %6045 = vst [vmem:[#allocation83_spill] sm:$0xff] %v4072_v39 }
  0xc8   : > { %v4054_v50 = vpop.permute.xlu1 %790 }
  0xc9   : > { %v4056_v23 = vpop.permute.xlu0 %788  ;;  %v994_v53 = vor.u32 %v993_v42, %v992_v54 }
  0xca   : > { %974 = vrot.lane.b32.xlu1 %v3918_v35, %s3245_s29 }
  0xcb   : > { %972 = vrot.lane.b32.xlu0 %v3897_v58, %s3245_s29  ;;  %v996_v58 = vrot.slane %v3318_v7, 1 }
  0xcc   : > { %v4064_v56 = vpop.permute.xlu1 %860 }
  0xcd   : > { %6044 = vst [vmem:[#allocation82_spill] sm:$0xff] %v4064_v56  ;;  %v4068_v59 = vpop.permute.xlu0 %858  ;;  %v4099_v42 = vor.u32 %v997_v34, %v996_v58  ;;  %v1734_v34 = vsel %vm1718_vm3, %v3352_v25, %v3958_v18  ;;  %v1193_v58 = vrot.slane %v3297_v0, 2  ;;  %v1738_v0 = vsel %vm1718_vm3, %v3372_v36, %v3966_v22 }
  0xce   : > { %978 = vrot.lane.b32.xlu1 %v3934_v30, %s3245_s29  ;;  %v1059_v30 = vsel %vm988_vm2, %v4072_v39, %v3734_v10  ;;  %v1728_v10 = vsel %vm1718_vm3, %v3325_v12, %v3952_v17  ;;  %v1192_v17 = vrot.slane %v3315_v6, 2  ;;  %v1227_v6 = vrot.slane %v3494_v9, 2  ;;  %v6136_v39 = vld [vmem:[#allocation9_spill] sm:$0xff] }
  0xcf   : > { %976 = vrot.lane.b32.xlu0 %v3909_v11, %s3245_s29  ;;  %v1730_v11 = vsel %vm1718_vm3, %v3328_v13, %v3947_v57 }
  0xd0   : > { %v4076_v35 = vpop.permute.xlu1 %864 }
  0xd1   : > { %v4080_v56 = vpop.permute.xlu0 %862 }
  0xd2   : > { %982 = vrot.lane.b32.xlu1 %v3950_v63, %s3245_s29  ;;  %v6047_v63 = vor.u32 %v3730_v24, %v3726_v38  ;;  %v999_v24 = vsel %vm988_vm2, %v994_v53, %v4099_v42 }
  0xd3   : > { %980 = vrot.lane.b32.xlu0 %v3925_v5, %s3245_s29  ;;  %v5947_v5 = vrot.slane %v3462_v31, 2 }
  0xd4   : > { %v869_v52 = vpop.permute.xlu1 %868  ;;  %v995_v54 = vsel %vm988_vm2, %v6047_v63, %v994_v53  ;;  %v1194_v53 = vsel %vm1191_vm5, %v1192_v17, %v1193_v58 }
  0xd5   : > { %v4093_v45 = vsel %vm1783_vm4, %v1730_v11, %v869_v52  ;;  %v867_v13 = vpop.permute.xlu0 %866  ;;  %v1225_v11 = vrot.slane %v3477_v49, 2 }
  0xd6   : > { %6046 = vst [vmem:[#allocation84_spill] sm:$0xff] %v4093_v45  ;;  %1159 = vrot.lane.b32.xlu1 %v1059_v30, %s3246_s30  ;;  %v4106_v57 = vsel %vm1783_vm4, %v1728_v10, %v867_v13  ;;  %v1732_v30 = vsel %vm1718_vm3, %v3340_v21, %v3960_v62  ;;  %v1742_v13 = vsel %vm1718_vm3, %v3400_v48, %v3974_v26  ;;  %v5949_v26 = vrot.slane %v3510_v15, 2  ;;  %v3217_v45 = vld [vmem:[%s3294_s22] sm:$0xff]  }
  0xd7   : > { %6048 = vst [vmem:[#allocation85_spill] sm:$0xff] %v4106_v57  ;;  %1127 = vrot.lane.b32.xlu0 %v995_v54, %s3246_s30  ;;  %v4132_v52 = vsel %vm1191_vm5, %v5947_v5, %v1225_v11  ;;  %v1736_v54 = vsel %vm1718_vm3, %v3357_v29, %v3968_v16  ;;  %v1228_v22 = vsel %vm1191_vm5, %v1225_v11, %v1227_v6  ;;  %v3197_v11 = vld [vmem:[%s5816_s2 + $0x10] ss:$0 sps:$4 sm:$0x33]   ;;  %v6155_v57 = vld [vmem:[#allocation14_spill] sm:$0xff] }
  0xd8   : > { %v873_v38 = vpop.permute.xlu1 %872  ;;  %6051 = vst [vmem:[#allocation88_spill] sm:$0xff] %v4132_v52  ;;  %3145 = vmatprep.subr.msk.bf16.mxu0 %vm2323_vm6, %v3197_v11  ;;  %3146 = vmatprep.subr.msk.bf16.mxu1 %vm2323_vm6, %v3197_v11 }
  0xd9   : > { %v4115_v12 = vsel %vm1783_vm4, %v1734_v34, %v873_v38  ;;  %v871_v25 = vpop.permute.xlu0 %870  ;;  %v6055_v38 = vld [vmem:[#allocation11_spill] sm:$0xff] }
  0xda   : > { %6049 = vst [vmem:[#allocation86_spill] sm:$0xff] %v4115_v12  ;;  %1161 = vrot.lane.b32.xlu1 %v3760_v40, %s3246_s30  ;;  %v4127_v18 = vsel %vm1783_vm4, %v1732_v30, %v871_v25  ;;  %v4144_v40 = vld [vmem:[%s3294_s22 + $0x18] sm:$0xff]   ;;  %v4176_v30 = vld [vmem:[%s3294_s22 + $0x20] sm:$0xff]  }
  0xdb   : > { %6050 = vst [vmem:[#allocation87_spill] sm:$0xff] %v4127_v18  ;;  %1129 = vrot.lane.b32.xlu0 %v999_v24, %s3246_s30  ;;  %v1195_v63 = vrot.slane %v4144_v40, 2  ;;  %v1740_v24 = vsel %vm1718_vm3, %v6055_v38, %v3976_v44  ;;  %v6057_v25 = vld [vmem:[#allocation18_spill] sm:$0xff] }
  0xdc   : > { %v877_v21 = vpop.permute.xlu1 %876  ;;  %v1746_v44 = vsel %vm1718_vm3, %v6057_v25, %v3982_v8  ;;  %v6059_v8 = vld [vmem:[#allocation16_spill] sm:$0xff] }
  0xdd   : > { %v4140_v62 = vsel %vm1783_vm4, %v1738_v0, %v877_v21  ;;  %v875_v10 = vpop.permute.xlu0 %874  ;;  %v1196_v16 = vsel %vm1191_vm5, %v1193_v58, %v1195_v63  ;;  %v5948_v58 = vrot.slane %v4176_v30, 2  ;;  %v1388_v21 = vrot.slane %v3306_v3, 2 }
  0xde   : > { %6052 = vst [vmem:[#allocation89_spill] sm:$0xff] %v4140_v62  ;;  %1289 = vrot.lane.b32.xlu1 %v4132_v52, %s3247_s5  ;;  %v4153_v36 = vsel %vm1783_vm4, %v1736_v54, %v875_v10  ;;  %v2325_v54 = vsel %vm2323_vm6, %v3197_v11, 0  ;;  %v1744_v38 = vsel %vm1718_vm3, %v6059_v8, %v3984_v20  ;;  %v6062_v20 = vld [vmem:[#allocation37_spill] sm:$0xff]  ;;  %v6119_v52 = vld [vmem:[#allocation8_spill] sm:$0xff] }
  0xdf   : > { %6053 = vst [vmem:[#allocation90_spill] sm:$0xff] %v4153_v36  ;;  %1257 = vrot.lane.b32.xlu0 %v1194_v53, %s3247_s5  ;;  %v1389_v53 = vrot.slane %v3303_v2, 3  ;;  %3070 = vmatpush3.bf16.msra.mxu0 %v2325_v54  ;;  %v3198_v2 = vld [vmem:[%s5816_s2 + $0x8] sm:$0xff]   ;;  %v1460_v11 = vrot.slane %v6062_v20, 3  ;;  %v6064_v8 = vld [vmem:[#allocation5_spill] sm:$0xff]  ;;  %v6132_v36 = vld [vmem:[#allocation48_spill] sm:$0xff] }
  0xe0   : > { %v881_v34 = vpop.permute.xlu1 %880  ;;  %3142 = vmatpush3.bf16.msra.mxu1 %v2325_v54  ;;  %3071 = vmatprep.subr.bf16.mxu0 %v3198_v2 }
  0xe1   : > { %v4161_v29 = vsel %vm1783_vm4, %v1742_v13, %v881_v34  ;;  %v879_v17 = vpop.permute.xlu0 %878  ;;  %v1391_v13 = vrot.slane %v3318_v7, 2  ;;  %v1392_v34 = vrot.slane %v3309_v4, 3  ;;  %v4203_v4 = vsel %vm1191_vm5, %v1227_v6, %v5949_v26  ;;  %v6061_v7 = vld [vmem:[#allocation46_spill] sm:$0xff]  ;;  %3140 = vmatprep.subr.bf16.mxu1 %v3198_v2 }
  0xe2   : > { %6054 = vst [vmem:[#allocation91_spill] sm:$0xff] %v4161_v29  ;;  %1291 = vrot.lane.b32.xlu1 %v1228_v22, %s3247_s5  ;;  %v4172_v48 = vsel %vm1783_vm4, %v1740_v24, %v879_v17  ;;  %v1459_v17 = vrot.slane %v6061_v7, 2 }
  0xe3   : > { %6056 = vst [vmem:[#allocation11_spill] sm:$0xff] %v4172_v48  ;;  %1259 = vrot.lane.b32.xlu0 %v1196_v16, %s3247_s5  ;;  %v1393_v54 = vor.u32 %v1392_v34, %v1391_v13  ;;  %3072 = vmatpush3.bf16.msra.mxu0 %v3198_v2  ;;  %v6069_v13 = vld [vmem:[#allocation73_spill] sm:$0xff] }
  0xe4   : > { %v885_v0 = vpop.permute.xlu1 %884  ;;  %3143 = vmatpush3.bf16.msra.mxu1 %v3198_v2 }
  0xe5   : > { %v4186_v10 = vsel %vm1783_vm4, %v1746_v44, %v885_v0  ;;  %v883_v24 = vpop.permute.xlu0 %882  ;;  %v4214_v44 = vsel %vm1191_vm5, %v1195_v63, %v5948_v58  ;;  %v1390_v0 = vor.u32 %v1389_v53, %v1388_v21  ;;  %v3199_v63 = vld [vmem:[%s5816_s2] sm:$0xff]   ;;  %v6071_v58 = vld [vmem:[#allocation35_spill] sm:$0xff] }
  0xe6   : > { %6058 = vst [vmem:[#allocation18_spill] sm:$0xff] %v4186_v10  ;;  %1355 = vrot.lane.b32.xlu1 %v1228_v22, %s3248_s8  ;;  %v4198_v3 = vsel %vm1783_vm4, %v1744_v38, %v883_v24  ;;  %v1750_v22 = vsel %vm1718_vm3, %v3452_v27, %v3990_v1  ;;  %v1395_v38 = vrot.slane %v6064_v8, 2  ;;  %v6065_v24 = vld [vmem:[#allocation2_spill] sm:$0xff]  ;;  %v6066_v27 = vld [vmem:[#allocation21_spill] sm:$0xff]  ;;  %3073 = vmatprep.subr.bf16.mxu0 %v3199_v63  ;;  %v6077_v10 = vld [vmem:[#allocation39_spill] sm:$0xff] }
  0xe7   : > { %6060 = vst [vmem:[#allocation16_spill] sm:$0xff] %v4198_v3  ;;  %1323 = vrot.lane.b32.xlu0 %v1196_v16, %s3248_s8  ;;  %v1396_v5 = vrot.slane %v6065_v24, 3  ;;  %v1748_v1 = vsel %vm1718_vm3, %v6066_v27, %v3992_v60  ;;  %v6068_v53 = vld [vmem:[#allocation74_spill] sm:$0xff]  ;;  %v1394_v2 = vsel %vm1387_vm7, %v1390_v0, %v1393_v54  ;;  %3141 = vmatprep.subr.bf16.mxu1 %v3199_v63 }
  0xe8   : > { %v889_v25 = vpop.permute.xlu1 %888  ;;  %v1458_v34 = vsel %vm1387_vm7, %v6069_v13, %v6068_v53  ;;  %3074 = vmatpush3.bf16.msra.mxu0 %v3199_v63  ;;  %3144 = vmatpush3.bf16.msra.mxu1 %v3199_v63  ;;  %v1590_v63 = vrot.slane %v4144_v40, 3  ;;  %v1762_v26 = vsel %vm1718_vm3, %v6071_v58, %v4014_v55  ;;  %v6073_v55 = vrot.slane %v3510_v15, 3 }
  0xe9   : > { %v4217_v6 = vsel %vm1783_vm4, %v1750_v22, %v889_v25  ;;  %v887_v16 = vpop.permute.xlu0 %886  ;;  %v4235_v22 = vor.u32 %v1460_v11, %v1459_v17  ;;  %v4242_v25 = vor.u32 %v1396_v5, %v1395_v38  ;;  %v5950_v11 = vrot.slane %v3477_v49, 3  ;;  %v4258_v38 = vld [vmem:[%s3294_s22 + $0x10] sm:$0xff]   ;;  %v6082_v49 = vld [vmem:[#allocation38_spill] sm:$0xff] }
  0xea   : > { %6063 = vst [vmem:[#allocation46_spill] sm:$0xff] %v4217_v6  ;;  %1357 = vrot.lane.b32.xlu1 %v4203_v4, %s3248_s8  ;;  %v4230_v21 = vsel %vm1783_vm4, %v1748_v1, %v887_v16  ;;  %v1622_v1 = vrot.slane %v3494_v9, 3  ;;  %v1589_v16 = vrot.slane %v4258_v38, 3  ;;  %v1764_v13 = vsel %vm1718_vm3, %v6082_v49, %v4024_v41 }
  0xeb   : > { %6067 = vst [vmem:[#allocation37_spill] sm:$0xff] %v4230_v21  ;;  %1325 = vrot.lane.b32.xlu0 %v4214_v44, %s3248_s8  ;;  %v1462_v17 = vsel %vm1387_vm7, %v6068_v53, %v4235_v22  ;;  %v1398_v0 = vsel %vm1387_vm7, %v1393_v54, %v4242_v25  ;;  %v1065_v54 = vrot.slane %v6062_v20, 2  ;;  %v1760_v20 = vsel %vm1718_vm3, %v3510_v15, %v4016_v33  ;;  %v6076_v21 = vld [vmem:[#allocation40_spill] sm:$0xff] }
  0xec   : > { %v4239_v60 = vpop.permute.xlu1 %892  ;;  %v1623_v53 = vsel %vm1588_vm8, %v5950_v11, %v1622_v1  ;;  %v1591_v9 = vsel %vm1588_vm8, %v1589_v16, %v1590_v63  ;;  %v1000_v11 = vrot.slane %v6064_v8, 1  ;;  %v6075_v16 = vld [vmem:[#allocation41_spill] sm:$0xff]  ;;  %v1766_v33 = vsel %vm1718_vm3, %v6077_v10, %v4022_v47 }
  0xed   : > { %v4244_v27 = vpop.permute.xlu0 %890  ;;  %v1068_v8 = vrot.slane %v6075_v16, 1 }
  0xee   : > { %1556 = vrot.lane.b32.xlu1 %v1458_v34, %s3249_s13 }
  0xef   : > { %1524 = vrot.lane.b32.xlu0 %v1394_v2, %s3249_s13  ;;  %v1064_v2 = vrot.slane %v6061_v7, 1  ;;  %v1001_v7 = vrot.slane %v6065_v24, 2  ;;  %v1069_v24 = vrot.slane %v6076_v21, 2 }
  0xf0   : > { %v4253_v5 = vpop.permute.xlu1 %896 }
  0xf1   : > { %6070 = vst [vmem:[#allocation5_spill] sm:$0xff] %v4253_v5  ;;  %v4262_v34 = vpop.permute.xlu0 %894 }
  0xf2   : > { %1558 = vrot.lane.b32.xlu1 %v1462_v17, %s3249_s13 }
  0xf3   : > { %1526 = vrot.lane.b32.xlu0 %v1398_v0, %s3249_s13  ;;  %v1625_v0 = vsel %vm1588_vm8, %v1622_v1, %v6073_v55 }
  0xf4   : > { %v901_v6 = vpop.permute.xlu1 %900 }
  0xf5   : > { %v4277_v17 = vsel %vm1783_vm4, %v1762_v26, %v901_v6  ;;  %v899_v3 = vpop.permute.xlu0 %898  ;;  %v1066_v6 = vor.u32 %v1065_v54, %v1064_v2  ;;  %v6080_v2 = vld [vmem:[#allocation4_spill] sm:$0xff] }
  0xf6   : > { %6072 = vst [vmem:[#allocation2_spill] sm:$0xff] %v4277_v17  ;;  %1686 = vrot.lane.b32.xlu1 %v1623_v53, %s3250_s14  ;;  %v4290_v26 = vsel %vm1783_vm4, %v1760_v20, %v899_v3  ;;  %v6078_v53 = vrot.slane %v4176_v30, 3  ;;  %v1002_v3 = vor.u32 %v1001_v7, %v1000_v11  ;;  %v1004_v54 = vrot.slane %v6080_v2, 1  ;;  %v6081_v20 = vld [vmem:[#allocation3_spill] sm:$0xff]  ;;  %v6085_v11 = vld [vmem:[#allocation45_spill] sm:$0xff] }
  0xf7   : > { %6074 = vst [vmem:[#allocation21_spill] sm:$0xff] %v4290_v26  ;;  %1654 = vrot.lane.b32.xlu0 %v1591_v9, %s3250_s14  ;;  %v1005_v55 = vrot.slane %v6081_v20, 2  ;;  %v6084_v9 = vld [vmem:[#allocation72_spill] sm:$0xff]  ;;  %v1770_v7 = vsel %vm1718_vm3, %v6085_v11, %v4030_v61 }
  0xf8   : > { %v905_v48 = vpop.permute.xlu1 %904  ;;  %v1593_v29 = vsel %vm1588_vm8, %v1590_v63, %v6078_v53  ;;  %v1067_v63 = vsel %vm988_vm2, %v6084_v9, %v1066_v6  ;;  %v6087_v53 = vld [vmem:[#allocation42_spill] sm:$0xff]  ;;  %v6091_v9 = vld [vmem:[#allocation49_spill] sm:$0xff] }
  0xf9   : > { %v4302_v1 = vsel %vm1783_vm4, %v1766_v33, %v905_v48  ;;  %v903_v47 = vpop.permute.xlu0 %902  ;;  %v4315_v48 = vor.u32 %v1069_v24, %v1068_v8  ;;  %v1768_v8 = vsel %vm1718_vm3, %v6087_v53, %v4032_v28  ;;  %v4362_v53 = vld [vmem:[%s3294_s22 + $0x28] sm:$0xff]  }
  0xfa   : > { %6079 = vst [vmem:[#allocation74_spill] sm:$0xff] %v4302_v1  ;;  %1688 = vrot.lane.b32.xlu1 %v1625_v0, %s3250_s14  ;;  %v4311_v10 = vsel %vm1783_vm4, %v1764_v13, %v903_v47  ;;  %v1003_v0 = vsel %vm988_vm2, %v4099_v42, %v1002_v3  ;;  %v4326_v13 = vor.u32 %v1005_v55, %v1004_v54  ;;  %v6089_v47 = vld [vmem:[#allocation51_spill] sm:$0xff] }
  0xfb   : > { %6083 = vst [vmem:[#allocation35_spill] sm:$0xff] %v4311_v10  ;;  %1656 = vrot.lane.b32.xlu0 %v1593_v29, %s3250_s14  ;;  %v1071_v29 = vsel %vm988_vm2, %v1066_v6, %v4315_v48  ;;  %v1774_v42 = vsel %vm1718_vm3, %v6089_v47, %v4038_v32  ;;  %v1231_v32 = vrot.slane %v6071_v58, 2  ;;  %v6097_v58 = vrot.slane %v3510_v15, 2  ;;  %v6152_v10 = vld [vmem:[#allocation63_spill] sm:$0xff] }
  0xfc   : > { %v909_v33 = vpop.permute.xlu1 %908  ;;  %v1007_v28 = vsel %vm988_vm2, %v1002_v3, %v4326_v13 }
  0xfd   : > { %v4322_v41 = vsel %vm1783_vm4, %v1770_v7, %v909_v33  ;;  %v907_v24 = vpop.permute.xlu0 %906  ;;  %v6093_v7 = vld [vmem:[#allocation54_spill] sm:$0xff]  ;;  %v1232_v47 = vsel %vm1191_vm5, %v6097_v58, %v1231_v32  ;;  %v6102_v58 = vld [vmem:[#allocation52_spill] sm:$0xff] }
  0xfe   : > { %6086 = vst [vmem:[#allocation41_spill] sm:$0xff] %v4322_v41  ;;  %1163 = vrot.lane.b32.xlu1 %v1067_v63, %s3246_s30  ;;  %v4333_v61 = vsel %vm1783_vm4, %v1768_v8, %v907_v24  ;;  %v1772_v63 = vsel %vm1718_vm3, %v6091_v9, %v4040_v43  ;;  %v1778_v33 = vsel %vm1718_vm3, %v6093_v7, %v4046_v46  ;;  %v1199_v43 = vrot.slane %v4362_v53, 2  ;;  %v6095_v8 = vld [vmem:[#allocation56_spill] sm:$0xff]  ;;  %v6100_v9 = vld [vmem:[#allocation59_spill] sm:$0xff] }
  0xff   : > { %6088 = vst [vmem:[#allocation40_spill] sm:$0xff] %v4333_v61  ;;  %1131 = vrot.lane.b32.xlu0 %v1003_v0, %s3246_s30  ;;  %v1776_v24 = vsel %vm1718_vm3, %v6095_v8, %v4048_v14  ;;  %v1464_v7 = vrot.slane %v6076_v21, 3  ;;  %v1399_v8 = vrot.slane %v6080_v2, 2  ;;  %v6120_v41 = vld [vmem:[#allocation7_spill] sm:$0xff] }
 0x100   : > { %v913_v54 = vpop.permute.xlu1 %912  ;;  %v1013_v62 = vrot.slane %v6120_v41, 2  ;;  %v6135_v61 = vld [vmem:[#allocation15_spill] sm:$0xff] }
 0x101   : > { %v4342_v55 = vsel %vm1783_vm4, %v1774_v42, %v913_v54  ;;  %v911_v11 = vpop.permute.xlu0 %910  ;;  %v1782_v42 = vsel %vm1718_vm3, %v3662_v37, %v4054_v50  ;;  %v5953_v50 = vrot.slane %v6082_v49, 2  ;;  %v1411_v31 = vrot.slane %v6135_v61, 2 }
 0x102   : > { %6090 = vst [vmem:[#allocation39_spill] sm:$0xff] %v4342_v55  ;;  %1165 = vrot.lane.b32.xlu1 %v1071_v29, %s3246_s30  ;;  %v4351_v6 = vsel %vm1783_vm4, %v1772_v63, %v911_v11  ;;  %v1780_v63 = vsel %vm1718_vm3, %v6100_v9, %v4056_v23 }
 0x103   : > { %6092 = vst [vmem:[#allocation4_spill] sm:$0xff] %v4351_v6  ;;  %1133 = vrot.lane.b32.xlu0 %v1007_v28, %s3246_s30  ;;  %v4412_v21 = vsel %vm1191_vm5, %v1231_v32, %v5953_v50  ;;  %v6106_v32 = vld [vmem:[#allocation6_spill] sm:$0xff] }
 0x104   : > { %v917_v0 = vpop.permute.xlu1 %916 }
 0x105   : > { %v4359_v3 = vsel %vm1783_vm4, %v1778_v33, %v917_v0  ;;  %v915_v29 = vpop.permute.xlu0 %914  ;;  %v4401_v0 = vld [vmem:[%s3294_s22 + $0x30] sm:$0xff]  }
 0x106   : > { %6094 = vst [vmem:[#allocation3_spill] sm:$0xff] %v4359_v3  ;;  %1293 = vrot.lane.b32.xlu1 %v4203_v4, %s3247_s5  ;;  %v4371_v46 = vsel %vm1783_vm4, %v1776_v24, %v915_v29  ;;  %v6099_v4 = vrot.slane %v4176_v30, 2  ;;  %v5952_v23 = vrot.slane %v4401_v0, 2  ;;  %v1400_v24 = vrot.slane %v6081_v20, 3 }
 0x107   : > { %6096 = vst [vmem:[#allocation38_spill] sm:$0xff] %v4371_v46  ;;  %1261 = vrot.lane.b32.xlu0 %v4214_v44, %s3247_s5  ;;  %v1463_v44 = vrot.slane %v6075_v16, 2  ;;  %v1009_v3 = vrot.slane %v6106_v32, 2 }
 0x108   : > { %v921_v14 = vpop.permute.xlu1 %920  ;;  %v1200_v28 = vsel %vm1191_vm5, %v6099_v4, %v1199_v43  ;;  %v4422_v2 = vsel %vm1191_vm5, %v1199_v43, %v5952_v23  ;;  %v1401_v20 = vor.u32 %v1400_v24, %v1399_v8 }
 0x109   : > { %v4382_v54 = vsel %vm1783_vm4, %v1782_v42, %v921_v14  ;;  %v919_v11 = vpop.permute.xlu0 %918  ;;  %v1465_v16 = vor.u32 %v1464_v7, %v1463_v44  ;;  %v1467_v42 = vrot.slane %v6102_v58, 2  ;;  %v6103_v14 = vld [vmem:[#allocation43_spill] sm:$0xff] }
 0x10a   : > { %6098 = vst [vmem:[#allocation72_spill] sm:$0xff] %v4382_v54  ;;  %1295 = vrot.lane.b32.xlu1 %v1232_v47, %s3247_s5  ;;  %v4392_v37 = vsel %vm1783_vm4, %v1780_v63, %v919_v11  ;;  %v1468_v4 = vrot.slane %v6103_v14, 3  ;;  %v1404_v11 = vrot.slane %v6106_v32, 3  ;;  %v1402_v8 = vsel %vm1387_vm7, %v4242_v25, %v1401_v20 }
 0x10b   : > { %6101 = vst [vmem:[#allocation45_spill] sm:$0xff] %v4392_v37  ;;  %1263 = vrot.lane.b32.xlu0 %v1200_v28, %s3247_s5  ;;  %v1594_v25 = vrot.slane %v4362_v53, 3  ;;  %v1073_v54 = vrot.slane %v6103_v14, 2  ;;  %v6114_v53 = vrot.slane %v4176_v30, 3  ;;  %v6116_v14 = vld [vmem:[#allocation47_spill] sm:$0xff]  ;;  %v6117_v30 = vld [vmem:[#allocation44_spill] sm:$0xff] }
 0x10c   : > { %v4398_v33 = vpop.permute.xlu1 %926  ;;  %v4432_v7 = vor.u32 %v1468_v4, %v1467_v42  ;;  %v3207_v42 = vld [vmem:[%s3294_s22 + $0xa8] sm:$0xff]   ;;  %v1076_v55 = vrot.slane %v6116_v14, 1  ;;  %v1077_v6 = vrot.slane %v6117_v30, 2 }
 0x10d   : > { %v4406_v29 = vpop.permute.xlu0 %924  ;;  %v1626_v4 = vrot.slane %v3207_v42, 3 }
 0x10e   : > { %1359 = vrot.lane.b32.xlu1 %v1232_v47, %s3248_s8  ;;  %v6105_v47 = vld [vmem:[#allocation10_spill] sm:$0xff] }
 0x10f   : > { %1327 = vrot.lane.b32.xlu0 %v1200_v28, %s3248_s8  ;;  %v1403_v63 = vrot.slane %v6105_v47, 2  ;;  %v1466_v28 = vsel %vm1387_vm7, %v4235_v22, %v1465_v16  ;;  %v1470_v22 = vsel %vm1387_vm7, %v1465_v16, %v4432_v7  ;;  %v4461_v16 = vld [vmem:[%s3294_s22 + $0xb0] sm:$0xff]  }
 0x110   : > { %v4417_v9 = vpop.permute.xlu1 %930  ;;  %v5956_v42 = vrot.slane %v4461_v16, 3 }
 0x111   : > { %6104 = vst [vmem:[#allocation42_spill] sm:$0xff] %v4417_v9  ;;  %v4426_v44 = vpop.permute.xlu0 %928  ;;  %v4440_v24 = vor.u32 %v1404_v11, %v1403_v63  ;;  %v6112_v11 = vrot.slane %v3510_v15, 3  ;;  %v5955_v15 = vrot.slane %v4401_v0, 3 }
 0x112   : > { %6107 = vst [vmem:[#allocation51_spill] sm:$0xff] %v4426_v44  ;;  %1361 = vrot.lane.b32.xlu1 %v4412_v21, %s3248_s8  ;;  %v3219_v44 = vld [vmem:[%s3294_s22 + $0x88] sm:$0xff]  }
 0x113   : > { %1329 = vrot.lane.b32.xlu0 %v4422_v2, %s3248_s8  ;;  %v1406_v37 = vsel %vm1387_vm7, %v1401_v20, %v4440_v24  ;;  %v1754_v9 = vsel %vm1718_vm3, %v3219_v44, %v3998_v19 }
 0x114   : > { %v4436_v43 = vpop.permute.xlu1 %934 }
 0x115   : > { %6108 = vst [vmem:[#allocation49_spill] sm:$0xff] %v4436_v43  ;;  %v4442_v23 = vpop.permute.xlu0 %932  ;;  %v6157_v43 = vld [vmem:[#allocation76_spill] sm:$0xff] }
 0x116   : > { %6109 = vst [vmem:[#allocation54_spill] sm:$0xff] %v4442_v23  ;;  %1560 = vrot.lane.b32.xlu1 %v1466_v28, %s3249_s13  ;;  %v1627_v28 = vsel %vm1588_vm8, %v6112_v11, %v1626_v4  ;;  %v1008_v11 = vrot.slane %v6105_v47, 1  ;;  %v1597_v47 = vsel %vm1588_vm8, %v1594_v25, %v5955_v15  ;;  %v1420_v23 = vrot.slane %v6155_v57, 3 }
 0x117   : > { %1528 = vrot.lane.b32.xlu0 %v1402_v8, %s3249_s13  ;;  %v1072_v8 = vrot.slane %v6102_v58, 1  ;;  %v1720_v26 = vsel %vm1718_vm3, %v3217_v45, %v6157_v43  ;;  %v4743_v45 = vld [vmem:[%s3294_s22 + $0x80] sm:$0xff]   ;;  %v6159_v43 = vld [vmem:[#allocation79_spill] sm:$0xff] }
 0x118   : > { %v4449_v50 = vpop.permute.xlu1 %938  ;;  %v1010_v32 = vor.u32 %v1009_v3, %v1008_v11 }
 0x119   : > { %6110 = vst [vmem:[#allocation56_spill] sm:$0xff] %v4449_v50  ;;  %v4454_v63 = vpop.permute.xlu0 %936  ;;  %v1074_v58 = vor.u32 %v1073_v54, %v1072_v8 }
 0x11a   : > { %6111 = vst [vmem:[#allocation59_spill] sm:$0xff] %v4454_v63  ;;  %1562 = vrot.lane.b32.xlu1 %v1470_v22, %s3249_s13  ;;  %v1595_v22 = vsel %vm1588_vm8, %v6114_v53, %v1594_v25  ;;  %v1011_v3 = vsel %vm988_vm2, %v4326_v13, %v1010_v32 }
 0x11b   : > { %1530 = vrot.lane.b32.xlu0 %v1406_v37, %s3249_s13  ;;  %v1629_v37 = vsel %vm1588_vm8, %v1626_v4, %v5956_v42  ;;  %v1075_v54 = vsel %vm988_vm2, %v4315_v48, %v1074_v58  ;;  %v4496_v4 = vor.u32 %v1077_v6, %v1076_v55  ;;  %v4547_v42 = vld [vmem:[%s3294_s22 + $0xc0] sm:$0xff]  }
 0x11c   : > { %v4467_v20 = vpop.permute.xlu1 %942 }
 0x11d   : > { %6113 = vst [vmem:[#allocation52_spill] sm:$0xff] %v4467_v20  ;;  %v4475_v46 = vpop.permute.xlu0 %940  ;;  %v1079_v11 = vsel %vm988_vm2, %v1074_v58, %v4496_v4  ;;  %v4526_v58 = vld [vmem:[%s3294_s22 + $0x38] sm:$0xff]  }
 0x11e   : > { %6115 = vst [vmem:[#allocation43_spill] sm:$0xff] %v4475_v46  ;;  %1690 = vrot.lane.b32.xlu1 %v1627_v28, %s3250_s14  ;;  %v1012_v28 = vrot.slane %v6119_v52, 1  ;;  %v1476_v46 = vrot.slane %v6132_v36, 3 }
 0x11f   : > { %1658 = vrot.lane.b32.xlu0 %v1595_v22, %s3250_s14 }
 0x120   : > { %v4484_v53 = vpop.permute.xlu1 %946  ;;  %v4503_v25 = vor.u32 %v1013_v62, %v1012_v28  ;;  %v4519_v62 = vld [vmem:[%s3294_s22 + $0xb8] sm:$0xff]  }
 0x121   : > { %6118 = vst [vmem:[#allocation10_spill] sm:$0xff] %v4484_v53  ;;  %v4491_v20 = vpop.permute.xlu0 %944  ;;  %v1235_v13 = vrot.slane %v4519_v62, 2 }
 0x122   : > { %6121 = vst [vmem:[#allocation6_spill] sm:$0xff] %v4491_v20  ;;  %1692 = vrot.lane.b32.xlu1 %v1629_v37, %s3250_s14  ;;  %v1015_v55 = vsel %vm988_vm2, %v1010_v32, %v4503_v25  ;;  %v6126_v32 = vrot.slane %v6082_v49, 2  ;;  %v1471_v49 = vrot.slane %v6116_v14, 2  ;;  %v6131_v20 = vld [vmem:[#allocation58_spill] sm:$0xff] }
 0x123   : > { %1660 = vrot.lane.b32.xlu0 %v1597_v47, %s3250_s14  ;;  %v1203_v47 = vrot.slane %v4526_v58, 2  ;;  %v1475_v53 = vrot.slane %v6131_v20, 2 }
 0x124   : > { %v4499_v8 = vpop.permute.xlu1 %950 }
 0x125   : > { %6122 = vst [vmem:[#allocation47_spill] sm:$0xff] %v4499_v8  ;;  %v4505_v22 = vpop.permute.xlu0 %948 }
 0x126   : > { %6123 = vst [vmem:[#allocation44_spill] sm:$0xff] %v4505_v22  ;;  %1167 = vrot.lane.b32.xlu1 %v1075_v54, %s3246_s30  ;;  %v1236_v54 = vsel %vm1191_vm5, %v6126_v32, %v1235_v13  ;;  %v1472_v32 = vrot.slane %v6117_v30, 3  ;;  %v1408_v22 = vrot.slane %v6120_v41, 3 }
 0x127   : > { %1135 = vrot.lane.b32.xlu0 %v1011_v3, %s3246_s30 }
 0x128   : > { %v4511_v48 = vpop.permute.xlu1 %954  ;;  %v1473_v30 = vor.u32 %v1472_v32, %v1471_v49  ;;  %v4587_v49 = vor.u32 %v1476_v46, %v1475_v53  ;;  %v1630_v46 = vrot.slane %v4519_v62, 3  ;;  %v1080_v62 = vrot.slane %v6131_v20, 1 }
 0x129   : > { %6124 = vst [vmem:[#allocation8_spill] sm:$0xff] %v4511_v48  ;;  %v4515_v6 = vpop.permute.xlu0 %952  ;;  %v4556_v48 = vld [vmem:[%s3294_s22 + $0x40] sm:$0xff]  }
 0x12a   : > { %6125 = vst [vmem:[#allocation7_spill] sm:$0xff] %v4515_v6  ;;  %1169 = vrot.lane.b32.xlu1 %v1079_v11, %s3246_s30  ;;  %v6128_v11 = vrot.slane %v4401_v0, 2  ;;  %v1407_v6 = vrot.slane %v6119_v52, 2  ;;  %v6134_v52 = vrot.slane %v4556_v48, 2 }
 0x12b   : > { %1137 = vrot.lane.b32.xlu0 %v1015_v55, %s3246_s30 }
 0x12c   : > { %v4523_v37 = vpop.permute.xlu1 %958  ;;  %v1204_v55 = vsel %vm1191_vm5, %v6128_v11, %v1203_v47  ;;  %v4577_v41 = vsel %vm1191_vm5, %v1203_v47, %v6134_v52  ;;  %v1478_v52 = vsel %vm1387_vm7, %v1473_v30, %v4587_v49 }
 0x12d   : > { %v4529_v28 = vpop.permute.xlu0 %956 }
 0x12e   : > { %1297 = vrot.lane.b32.xlu1 %v4412_v21, %s3247_s5  ;;  %v5959_v21 = vrot.slane %v4547_v42, 2 }
 0x12f   : > { %1265 = vrot.lane.b32.xlu0 %v4422_v2, %s3247_s5 }
 0x130   : > { %v4538_v3 = vpop.permute.xlu1 %962  ;;  %v4567_v14 = vsel %vm1191_vm5, %v1235_v13, %v5959_v21  ;;  %v1412_v13 = vrot.slane %v6136_v39, 3 }
 0x131   : > { %6127 = vst [vmem:[#allocation92_spill] sm:$0xff] %v4538_v3  ;;  %v4543_v15 = vpop.permute.xlu0 %960 }
 0x132   : > { %1299 = vrot.lane.b32.xlu1 %v1236_v54, %s3247_s5 }
 0x133   : > { %1267 = vrot.lane.b32.xlu0 %v1204_v55, %s3247_s5 }
 0x134   : > { %v4553_v2 = vpop.permute.xlu1 %966 }
 0x135   : > { %6129 = vst [vmem:[#allocation93_spill] sm:$0xff] %v4553_v2  ;;  %v4561_v8 = vpop.permute.xlu0 %964 }
 0x136   : > { %6130 = vst [vmem:[#allocation94_spill] sm:$0xff] %v4561_v8  ;;  %1363 = vrot.lane.b32.xlu1 %v1236_v54, %s3248_s8  ;;  %v1409_v54 = vor.u32 %v1408_v22, %v1407_v6  ;;  %v4595_v6 = vor.u32 %v1412_v13, %v1411_v31  ;;  %v6142_v13 = vrot.slane %v4461_v16, 3  ;;  %v1016_v16 = vrot.slane %v6135_v61, 1  ;;  %v3218_v8 = vld [vmem:[%s3294_s22 + $0x8] sm:$0xff]  }
 0x137   : > { %1331 = vrot.lane.b32.xlu0 %v1204_v55, %s3248_s8  ;;  %v1474_v55 = vsel %vm1387_vm7, %v4432_v7, %v1473_v30  ;;  %v5961_v30 = vrot.slane %v4547_v42, 3  ;;  %v1722_v3 = vsel %vm1718_vm3, %v3218_v8, %v3936_v51  ;;  %v1752_v51 = vsel %vm1718_vm3, %v4743_v45, %v6159_v43  ;;  %v6160_v8 = vld [vmem:[#allocation82_spill] sm:$0xff] }
 0x138   : > { %v4572_v11 = vpop.permute.xlu1 %970  ;;  %v1410_v22 = vsel %vm1387_vm7, %v4440_v24, %v1409_v54  ;;  %v1414_v53 = vsel %vm1387_vm7, %v1409_v54, %v4595_v6  ;;  %v1598_v24 = vrot.slane %v4526_v58, 3  ;;  %v6144_v58 = vrot.slane %v4401_v0, 3  ;;  %v6147_v0 = vld [vmem:[#allocation50_spill] sm:$0xff] }
 0x139   : > { %6133 = vst [vmem:[#allocation58_spill] sm:$0xff] %v4572_v11  ;;  %v4581_v21 = vpop.permute.xlu0 %968  ;;  %v4708_v11 = vld [vmem:[%s3294_s22 + $0x50] sm:$0xff]   ;;  %v1817_v44 = vsel %vm1783_vm4, %v1752_v51, %v4244_v27 }
 0x13a   : > { %6137 = vst [vmem:[#allocation48_spill] sm:$0xff] %v4581_v21  ;;  %1365 = vrot.lane.b32.xlu1 %v4567_v14, %s3248_s8  ;;  %v1599_v54 = vsel %vm1588_vm8, %v6144_v58, %v1598_v24 }
 0x13b   : > { %1333 = vrot.lane.b32.xlu0 %v4577_v41, %s3248_s8 }
 0x13c   : > { %v4591_v47 = vpop.permute.xlu1 %974 }
 0x13d   : > { %6138 = vst [vmem:[#allocation15_spill] sm:$0xff] %v4591_v47  ;;  %v4597_v32 = vpop.permute.xlu0 %972  ;;  %v1085_v47 = vrot.slane %v6147_v0, 2 }
 0x13e   : > { %6139 = vst [vmem:[#allocation9_spill] sm:$0xff] %v4597_v32  ;;  %1564 = vrot.lane.b32.xlu1 %v1474_v55, %s3249_s13  ;;  %v1631_v55 = vsel %vm1588_vm8, %v6142_v13, %v1630_v46  ;;  %v1017_v13 = vrot.slane %v6136_v39, 2  ;;  %v6149_v32 = vld [vmem:[#allocation12_spill] sm:$0xff] }
 0x13f   : > { %1532 = vrot.lane.b32.xlu0 %v1410_v22, %s3249_s13  ;;  %v1081_v22 = vrot.slane %v6132_v36, 2  ;;  %v1633_v36 = vsel %vm1588_vm8, %v1630_v46, %v5961_v30  ;;  %v1021_v12 = vrot.slane %v6149_v32, 2  ;;  %v4699_v30 = vld [vmem:[%s3294_s22 + $0xd0] sm:$0xff]   ;;  %v1416_v63 = vrot.slane %v6149_v32, 3 }
 0x140   : > { %v4604_v7 = vpop.permute.xlu1 %978  ;;  %v1018_v61 = vor.u32 %v1017_v13, %v1016_v16 }
 0x141   : > { %6140 = vst [vmem:[#allocation95_spill] sm:$0xff] %v4604_v7  ;;  %v4609_v31 = vpop.permute.xlu0 %976  ;;  %v1082_v20 = vor.u32 %v1081_v22, %v1080_v62 }
 0x142   : > { %6141 = vst [vmem:[#allocation96_spill] sm:$0xff] %v4609_v31  ;;  %1566 = vrot.lane.b32.xlu1 %v1478_v52, %s3249_s13  ;;  %v5960_v52 = vrot.slane %v4556_v48, 3 }
 0x143   : > { %1534 = vrot.lane.b32.xlu0 %v1414_v53, %s3249_s13  ;;  %v6146_v53 = vld [vmem:[#allocation55_spill] sm:$0xff]  ;;  %v1083_v46 = vsel %vm988_vm2, %v4496_v4, %v1082_v20 }
 0x144   : > { %v4619_v7 = vpop.permute.xlu1 %982  ;;  %v1601_v39 = vsel %vm1588_vm8, %v1598_v24, %v5960_v52  ;;  %v1019_v24 = vsel %vm988_vm2, %v4503_v25, %v1018_v61  ;;  %v1479_v1 = vrot.slane %v6146_v53, 2 }
 0x145   : > { %6143 = vst [vmem:[#allocation97_spill] sm:$0xff] %v4619_v7  ;;  %v4627_v31 = vpop.permute.xlu0 %980  ;;  %v1084_v7 = vrot.slane %v6146_v53, 1  ;;  %v6153_v53 = vld [vmem:[#allocation53_spill] sm:$0xff] }
 0x146   : > { %6145 = vst [vmem:[#allocation98_spill] sm:$0xff] %v4627_v31  ;;  %1694 = vrot.lane.b32.xlu1 %v1631_v55, %s3250_s14  ;;  %v6148_v31 = vld [vmem:[#allocation13_spill] sm:$0xff]  ;;  %v1484_v21 = vrot.slane %v6153_v53, 3  ;;  %v1089_v51 = vrot.slane %v6153_v53, 2 }
 0x147   : > { %1662 = vrot.lane.b32.xlu0 %v1599_v54, %s3250_s14  ;;  %v1020_v55 = vrot.slane %v6148_v31, 1  ;;  %v4648_v62 = vor.u32 %v1085_v47, %v1084_v7  ;;  %v1415_v18 = vrot.slane %v6148_v31, 2 }
 0x148   : > { %v4636_v58 = vpop.permute.xlu1 %1159 }
 0x149   : > { %v4643_v50 = vpop.permute.xlu0 %1127  ;;  %v4655_v54 = vor.u32 %v1021_v12, %v1020_v55  ;;  %v1087_v13 = vsel %vm988_vm2, %v1082_v20, %v4648_v62  ;;  %v4671_v12 = vld [vmem:[%s3294_s22 + $0xc8] sm:$0xff]  }
 0x14a   : > { %1696 = vrot.lane.b32.xlu1 %v1633_v36, %s3250_s14  ;;  %v1239_v25 = vrot.slane %v4671_v12, 2  ;;  %v4678_v20 = vld [vmem:[%s3294_s22 + $0x48] sm:$0xff]  }
 0x14b   : > { %1664 = vrot.lane.b32.xlu0 %v1601_v39, %s3250_s14  ;;  %v1023_v47 = vsel %vm988_vm2, %v1018_v61, %v4655_v54  ;;  %v1207_v39 = vrot.slane %v4678_v20, 2  ;;  %v6150_v61 = vrot.slane %v4547_v42, 2 }
 0x14c   : > { %v4651_v22 = vpop.permute.xlu1 %1161 }
 0x14d   : > { %v4657_v16 = vpop.permute.xlu0 %1129 }
 0x14e   : > { %1171 = vrot.lane.b32.xlu1 %v1083_v46, %s3246_s30  ;;  %v1240_v46 = vsel %vm1191_vm5, %v6150_v61, %v1239_v25  ;;  %v1480_v61 = vrot.slane %v6147_v0, 3  ;;  %v6154_v0 = vld [vmem:[#allocation23_spill] sm:$0xff] }
 0x14f   : > { %1139 = vrot.lane.b32.xlu0 %v1019_v24, %s3246_s30  ;;  %v1419_v2 = vrot.slane %v6154_v0, 2 }
 0x150   : > { %v4663_v4 = vpop.permute.xlu1 %1289  ;;  %v1481_v32 = vor.u32 %v1480_v61, %v1479_v1  ;;  %v1417_v61 = vor.u32 %v1416_v63, %v1415_v18  ;;  %v1785_v18 = vsel %vm1783_vm4, %v1720_v26, %v4068_v59 }
 0x151   : > { %v4667_v7 = vpop.permute.xlu0 %1257  ;;  %v4752_v19 = vor.u32 %v1420_v23, %v1419_v2 }
 0x152   : > { %1173 = vrot.lane.b32.xlu1 %v1087_v13, %s3246_s30  ;;  %v6151_v13 = vrot.slane %v4556_v48, 2  ;;  %v1482_v63 = vsel %vm1387_vm7, %v4587_v49, %v1481_v32  ;;  %v1418_v27 = vsel %vm1387_vm7, %v4595_v6, %v1417_v61  ;;  %v1819_v6 = vsel %vm1783_vm4, %v1754_v9, %v4239_v60 }
 0x153   : > { %1141 = vrot.lane.b32.xlu0 %v1023_v47, %s3246_s30  ;;  %v6161_v60 = vrot.slane %v4547_v42, 3 }
 0x154   : > { %v4675_v36 = vpop.permute.xlu1 %1291  ;;  %v1208_v47 = vsel %vm1191_vm5, %v6151_v13, %v1207_v39  ;;  %v6156_v13 = vrot.slane %v4699_v30, 2 }
 0x155   : > { %v4681_v55 = vpop.permute.xlu0 %1259 }
 0x156   : > { %1301 = vrot.lane.b32.xlu1 %v4567_v14, %s3247_s5  ;;  %v1483_v14 = vrot.slane %v6152_v10, 2  ;;  %v4723_v31 = vsel %vm1191_vm5, %v1239_v25, %v6156_v13  ;;  %v6158_v25 = vrot.slane %v4708_v11, 2 }
 0x157   : > { %1269 = vrot.lane.b32.xlu0 %v4577_v41, %s3247_s5 }
 0x158   : > { %v4690_v24 = vpop.permute.xlu1 %1355  ;;  %v4738_v1 = vsel %vm1191_vm5, %v1207_v39, %v6158_v25  ;;  %v4740_v13 = vor.u32 %v1484_v21, %v1483_v14  ;;  %v1634_v21 = vrot.slane %v4671_v12, 3  ;;  %v1422_v12 = vsel %vm1387_vm7, %v1417_v61, %v4752_v19 }
 0x159   : > { %v4695_v52 = vpop.permute.xlu0 %1323 }
 0x15a   : > { %1303 = vrot.lane.b32.xlu1 %v1240_v46, %s3247_s5  ;;  %v1486_v26 = vsel %vm1387_vm7, %v1481_v32, %v4740_v13 }
 0x15b   : > { %1271 = vrot.lane.b32.xlu0 %v1208_v47, %s3247_s5 }
 0x15c   : > { %v4705_v41 = vpop.permute.xlu1 %1357 }
 0x15d   : > { %v4715_v17 = vpop.permute.xlu0 %1325 }
 0x15e   : > { %1367 = vrot.lane.b32.xlu1 %v1240_v46, %s3248_s8 }
 0x15f   : > { %1335 = vrot.lane.b32.xlu0 %v1208_v47, %s3248_s8  ;;  %v1787_v47 = vsel %vm1783_vm4, %v1722_v3, %v6160_v8  ;;  %v1882_v3 = vsel %vm1848_vm9, %v1817_v44, %v4529_v28  ;;  %v1850_v28 = vsel %vm1848_vm9, %v1785_v18, %v4406_v29  ;;  %v1602_v29 = vrot.slane %v4678_v20, 3 }
 0x160   : > { %v1557_v46 = vpop.permute.xlu1 %1556  ;;  %v1947_v59 = vsel %vm1913_vm10, %v1882_v3, %v4636_v58  ;;  %v1915_v58 = vsel %vm1913_vm10, %v1850_v28, %v4643_v50  ;;  %v1635_v50 = vsel %vm1588_vm8, %v6161_v60, %v1634_v21  ;;  %v6162_v8 = vrot.slane %v4556_v48, 3 }
 0x161   : > { %v1525_v5 = vpop.permute.xlu0 %1524  ;;  %v2012_v2 = vsel %vm1978_vm11, %v1947_v59, %v4663_v4  ;;  %v1884_v4 = vsel %vm1848_vm9, %v1819_v6, %v4523_v37  ;;  %v1980_v14 = vsel %vm1978_vm11, %v1915_v58, %v4667_v7  ;;  %v1852_v7 = vsel %vm1848_vm9, %v1787_v47, %v4398_v33 }
 0x162   : > { %1369 = vrot.lane.b32.xlu1 %v4723_v31, %s3248_s8  ;;  %v2077_v39 = vsel %vm2043_vm12, %v2012_v2, %v4690_v24  ;;  %v1949_v9 = vsel %vm1913_vm10, %v1884_v4, %v4651_v22  ;;  %v2045_v20 = vsel %vm2043_vm12, %v1980_v14, %v4695_v52  ;;  %v1636_v24 = vrot.slane %v4699_v30, 3  ;;  %v6165_v2 = vld [vmem:[#allocation19_spill] sm:$0xff] }
 0x163   : > { %1337 = vrot.lane.b32.xlu0 %v4738_v1, %s3248_s8  ;;  %v2142_v32 = vsel %vm2108_vm13, %v2077_v39, %v1557_v46  ;;  %v2014_v46 = vsel %vm1978_vm11, %v1949_v9, %v4675_v36  ;;  %v2110_v42 = vsel %vm2108_vm13, %v2045_v20, %v1525_v5  ;;  %v1088_v22 = vrot.slane %v6152_v10, 1 }
 0x164   : > { %v1559_v23 = vpop.permute.xlu1 %1558  ;;  %v1917_v52 = vsel %vm1913_vm10, %v1852_v7, %v4657_v16  ;;  %v2079_v43 = vsel %vm2043_vm12, %v2014_v46, %v4705_v41  ;;  %v1603_v16 = vsel %vm1588_vm8, %v6162_v8, %v1602_v29  ;;  %v1604_v41 = vrot.slane %v4708_v11, 3 }
 0x165   : > { %v1527_v49 = vpop.permute.xlu0 %1526  ;;  %v1982_v5 = vsel %vm1978_vm11, %v1917_v52, %v4681_v55  ;;  %v2144_v36 = vsel %vm2108_vm13, %v2079_v43, %v1559_v23  ;;  %v1024_v55 = vrot.slane %v6154_v0, 1  ;;  %v1025_v18 = vrot.slane %v6155_v57, 2  ;;  %v6163_v23 = vld [vmem:[#allocation61_spill] sm:$0xff] }
 0x166   : > { %1568 = vrot.lane.b32.xlu1 %v1482_v63, %s3249_s13  ;;  %v2047_v47 = vsel %vm2043_vm12, %v1982_v5, %v4715_v17  ;;  %v1637_v48 = vsel %vm1588_vm8, %v1634_v21, %v1636_v24  ;;  %v1090_v17 = vor.u32 %v1089_v51, %v1088_v22  ;;  %v1092_v59 = vrot.slane %v6163_v23, 1  ;;  %v4898_v51 = vld [vmem:[%s3294_s22 + $0xe0] sm:$0xff]  }
 0x167   : > { %1536 = vrot.lane.b32.xlu0 %v1418_v27, %s3249_s13  ;;  %v2112_v44 = vsel %vm2108_vm13, %v2047_v47, %v1527_v49  ;;  %v6164_v27 = vld [vmem:[#allocation57_spill] sm:$0xff]  ;;  %v1026_v28 = vor.u32 %v1025_v18, %v1024_v55  ;;  %v1028_v21 = vrot.slane %v6165_v2, 1  ;;  %v6168_v52 = vrot.slane %v4708_v11, 2 }
 0x168   : > { %v1687_v25 = vpop.permute.xlu1 %1686  ;;  %v1093_v0 = vrot.slane %v6164_v27, 2  ;;  %v6166_v49 = vld [vmem:[#allocation17_spill] sm:$0xff]  ;;  %v1091_v58 = vsel %vm988_vm2, %v4648_v62, %v1090_v17  ;;  %v1245_v5 = vrot.slane %v4898_v51, 2 }
 0x169   : > { %v2207_v37 = vsel %vm2173_vm14, %v2142_v32, %v1687_v25  ;;  %v1655_v61 = vpop.permute.xlu0 %1654  ;;  %v1424_v47 = vrot.slane %v6166_v49, 3 }
 0x16a   : > { %1570 = vrot.lane.b32.xlu1 %v1486_v26, %s3249_s13  ;;  %3107 = vmatprep.mubr.msk.bf16.mxu1 %vm2258_vm15, %v2207_v37  ;;  %v2175_v33 = vsel %vm2173_vm14, %v2110_v42, %v1655_v61  ;;  %v1605_v26 = vsel %vm1588_vm8, %v1602_v29, %v1604_v41  ;;  %v4851_v39 = vor.u32 %v1093_v0, %v1092_v59  ;;  %v4881_v37 = vld [vmem:[%s3294_s22 + $0x58] sm:$0xff]   ;;  %v6167_v42 = vrot.slane %v4699_v30, 2  ;;  %v6172_v59 = vld [vmem:[#allocation20_spill] sm:$0xff] }
 0x16b   : > { %1538 = vrot.lane.b32.xlu0 %v1422_v12, %s3249_s13  ;;  %3075 = vmatprep.mubr.msk.bf16.mxu0 %vm2258_vm15, %v2175_v33  ;;  %v1029_v12 = vrot.slane %v6166_v49, 2  ;;  %v1027_v29 = vsel %vm988_vm2, %v4655_v54, %v1026_v28  ;;  %v4874_v54 = vld [vmem:[%s3294_s22 + $0xd8] sm:$0xff]   ;;  %v1211_v7 = vrot.slane %v4881_v37, 2  ;;  %v3225_v49 = vld [vmem:[%s3294_s22 + $0x90] sm:$0xff]  }
 0x16c   : > { %v1689_v10 = vpop.permute.xlu1 %1688  ;;  %v1095_v25 = vsel %vm988_vm2, %v1090_v17, %v4851_v39  ;;  %v1243_v9 = vrot.slane %v4874_v54, 2  ;;  %v6171_v17 = vld [vmem:[#allocation28_spill] sm:$0xff] }
 0x16d   : > { %v2209_v53 = vsel %vm2173_vm14, %v2144_v36, %v1689_v10  ;;  %v1657_v63 = vpop.permute.xlu0 %1656  ;;  %v4858_v14 = vor.u32 %v1029_v12, %v1028_v21  ;;  %v1212_v43 = vsel %vm1191_vm5, %v6168_v52, %v1211_v7  ;;  %v1488_v36 = vrot.slane %v6164_v27, 3  ;;  %v6174_v12 = vld [vmem:[#allocation81_spill] sm:$0xff]  ;;  %v6176_v52 = vld [vmem:[#allocation80_spill] sm:$0xff] }
 0x16e   : > { %1698 = vrot.lane.b32.xlu1 %v1635_v50, %s3250_s14  ;;  %3108 = vmatmul.mubr.msk.bf16.vlgmr.msra.gmra.mxu1 %vm2258_vm15, %v2209_v53  ;;  %v2177_v3 = vsel %vm2173_vm14, %v2112_v44, %v1657_v63  ;;  %v1244_v61 = vsel %vm1191_vm5, %v6167_v42, %v1243_v9  ;;  %v4918_v55 = vsel %vm1191_vm5, %v1243_v9, %v1245_v5  ;;  %v6169_v44 = vld [vmem:[#allocation68_spill] sm:$0xff]  ;;  %v1428_v27 = vrot.slane %v6172_v59, 3  ;;  %v6175_v42 = vld [vmem:[#allocation75_spill] sm:$0xff] }
 0x16f   : > { %1666 = vrot.lane.b32.xlu0 %v1603_v16, %s3250_s14  ;;  %3076 = vmatmul.mubr.msk.bf16.vlgmr.msra.gmra.mxu0 %vm2258_vm15, %v2177_v3  ;;  %v1031_v60 = vsel %vm988_vm2, %v1026_v28, %v4858_v14  ;;  %v1423_v16 = vrot.slane %v6165_v2, 2  ;;  %v1491_v63 = vrot.slane %v6169_v44, 2  ;;  %v6173_v2 = vld [vmem:[#allocation77_spill] sm:$0xff] }
 0x170   : > { %v4839_v57 = vpop.permute.xlu1 %1163  ;;  %v1726_v21 = vsel %vm1718_vm3, %v4144_v40, %v6173_v2  ;;  %v1724_v40 = vsel %vm1718_vm3, %v4258_v38, %v6175_v42 }
 0x171   : > { %v4846_v6 = vpop.permute.xlu0 %1131  ;;  %v1425_v28 = vor.u32 %v1424_v47, %v1423_v16  ;;  %v1638_v47 = vrot.slane %v4874_v54, 3 }
 0x172   : > { %1700 = vrot.lane.b32.xlu1 %v1637_v48, %s3250_s14  ;;  %v6170_v48 = vld [vmem:[#allocation62_spill] sm:$0xff] }
 0x173   : > { %1668 = vrot.lane.b32.xlu0 %v1605_v26, %s3250_s14  ;;  %v1492_v3 = vrot.slane %v6170_v48, 3  ;;  %v1426_v16 = vsel %vm1387_vm7, %v4752_v19, %v1425_v28 }
 0x174   : > { %v4854_v4 = vpop.permute.xlu1 %1165 }
 0x175   : > { %v4860_v32 = vpop.permute.xlu0 %1133  ;;  %v4942_v9 = vor.u32 %v1492_v3, %v1491_v63  ;;  %v6177_v63 = vld [vmem:[#allocation5_spill] sm:$0xff]  ;;  %v6178_v3 = vld [vmem:[#allocation42_spill] sm:$0xff] }
 0x176   : > { %1175 = vrot.lane.b32.xlu1 %v1091_v58, %s3246_s30  ;;  %v1756_v58 = vsel %vm1718_vm3, %v3225_v49, %v6174_v12  ;;  %v6180_v49 = vld [vmem:[#allocation92_spill] sm:$0xff] }
 0x177   : > { %1143 = vrot.lane.b32.xlu0 %v1027_v29, %s3246_s30 }
 0x178   : > { %v4866_v62 = vpop.permute.xlu1 %1293 }
 0x179   : > { %v4870_v50 = vpop.permute.xlu0 %1261 }
 0x17a   : > { %1177 = vrot.lane.b32.xlu1 %v1095_v25, %s3246_s30  ;;  %v1821_v25 = vsel %vm1783_vm4, %v1756_v58, %v4262_v34 }
 0x17b   : > { %1145 = vrot.lane.b32.xlu0 %v1031_v60, %s3246_s30  ;;  %v1886_v34 = vsel %vm1848_vm9, %v1821_v25, %v4543_v15 }
 0x17c   : > { %v4878_v20 = vpop.permute.xlu1 %1295  ;;  %v1951_v38 = vsel %vm1913_vm10, %v1886_v34, %v4839_v57  ;;  %v6181_v34 = vld [vmem:[#allocation64_spill] sm:$0xff] }
 0x17d   : > { %v4884_v46 = vpop.permute.xlu0 %1263 }
 0x17e   : > { %1305 = vrot.lane.b32.xlu1 %v4723_v31, %s3247_s5  ;;  %v1487_v31 = vrot.slane %v6163_v23, 2  ;;  %v1427_v23 = vrot.slane %v6171_v17, 2 }
 0x17f   : > { %1273 = vrot.lane.b32.xlu0 %v4738_v1, %s3247_s5  ;;  %v4907_v1 = vld [vmem:[%s3294_s22 + $0x60] sm:$0xff]  }
 0x180   : > { %v1360_v22 = vpop.permute.xlu1 %1359  ;;  %v1213_v8 = vrot.slane %v4907_v1, 2  ;;  %v1489_v18 = vor.u32 %v1488_v36, %v1487_v31  ;;  %v1791_v31 = vsel %vm1783_vm4, %v1726_v21, %v4076_v35  ;;  %v1789_v36 = vsel %vm1783_vm4, %v1724_v40, %v4080_v56 }
 0x181   : > { %v1328_v33 = vpop.permute.xlu0 %1327  ;;  %v1856_v15 = vsel %vm1848_vm9, %v1791_v31, %v6178_v3  ;;  %v2016_v56 = vsel %vm1978_vm11, %v1951_v38, %v4866_v62 }
 0x182   : > { %1307 = vrot.lane.b32.xlu1 %v1244_v61, %s3247_s5  ;;  %v4928_v26 = vsel %vm1191_vm5, %v1211_v7, %v1213_v8  ;;  %v1490_v60 = vsel %vm1387_vm7, %v4740_v13, %v1489_v18  ;;  %v4944_v7 = vor.u32 %v1428_v27, %v1427_v23  ;;  %v6179_v23 = vld [vmem:[#allocation51_spill] sm:$0xff]  ;;  %v2081_v57 = vsel %vm2043_vm12, %v2016_v56, %v1360_v22 }
 0x183   : > { %1275 = vrot.lane.b32.xlu0 %v1212_v43, %s3247_s5  ;;  %v1854_v27 = vsel %vm1848_vm9, %v1789_v36, %v6179_v23  ;;  %v1494_v54 = vsel %vm1387_vm7, %v1489_v18, %v4942_v9  ;;  %v6182_v36 = vld [vmem:[#allocation60_spill] sm:$0xff] }
 0x184   : > { %v4904_v10 = vpop.permute.xlu1 %1361  ;;  %v1919_v19 = vsel %vm1913_vm10, %v1854_v27, %v4846_v6  ;;  %v1430_v21 = vsel %vm1387_vm7, %v1425_v28, %v4944_v7  ;;  %v1606_v6 = vrot.slane %v4881_v37, 3  ;;  %v1096_v37 = vrot.slane %v6169_v44, 1 }
 0x185   : > { %v4912_v53 = vpop.permute.xlu0 %1329  ;;  %v1984_v62 = vsel %vm1978_vm11, %v1919_v19, %v4870_v50 }
 0x186   : > { %1371 = vrot.lane.b32.xlu1 %v1244_v61, %s3248_s8  ;;  %v3226_v61 = vld [vmem:[%s3294_s22 + $0x98] sm:$0xff]   ;;  %v2049_v18 = vsel %vm2043_vm12, %v1984_v62, %v1328_v33  ;;  %v1921_v33 = vsel %vm1913_vm10, %v1856_v15, %v4860_v32  ;;  %v1607_v32 = vsel %vm1588_vm8, %v1604_v41, %v1606_v6 }
 0x187   : > { %1339 = vrot.lane.b32.xlu0 %v1212_v43, %s3248_s8  ;;  %v1758_v43 = vsel %vm1718_vm3, %v3226_v61, %v6176_v52  ;;  %v1033_v52 = vrot.slane %v6172_v59, 2 }
 0x188   : > { %v1561_v0 = vpop.permute.xlu1 %1560  ;;  %v1823_v35 = vsel %vm1783_vm4, %v1758_v43, %v6177_v63  ;;  %v6183_v63 = vld [vmem:[#allocation24_spill] sm:$0xff] }
 0x189   : > { %v1529_v29 = vpop.permute.xlu0 %1528  ;;  %v1888_v12 = vsel %vm1848_vm9, %v1823_v35, %v6180_v49  ;;  %v2146_v58 = vsel %vm2108_vm13, %v2081_v57, %v1561_v0  ;;  %v6184_v35 = vld [vmem:[#allocation22_spill] sm:$0xff] }
 0x18a   : > { %1373 = vrot.lane.b32.xlu1 %v4918_v55, %s3248_s8  ;;  %v1953_v22 = vsel %vm1913_vm10, %v1888_v12, %v4854_v4  ;;  %v2114_v0 = vsel %vm2108_vm13, %v2049_v18, %v1529_v29  ;;  %v1640_v4 = vrot.slane %v4898_v51, 3  ;;  %v1986_v29 = vsel %vm1978_vm11, %v1921_v33, %v4884_v46 }
 0x18b   : > { %1341 = vrot.lane.b32.xlu0 %v4928_v26, %s3248_s8  ;;  %v2018_v50 = vsel %vm1978_vm11, %v1953_v22, %v4878_v20  ;;  %v1097_v20 = vrot.slane %v6170_v48, 2  ;;  %v2051_v61 = vsel %vm2043_vm12, %v1986_v29, %v4912_v53  ;;  %v1032_v46 = vrot.slane %v6171_v17, 1  ;;  %v6185_v29 = vld [vmem:[#allocation71_spill] sm:$0xff] }
 0x18c   : > { %v1563_v13 = vpop.permute.xlu1 %1562  ;;  %v2083_v30 = vsel %vm2043_vm12, %v2018_v50, %v4904_v10  ;;  %v1608_v10 = vrot.slane %v4907_v1, 3  ;;  %v1641_v11 = vsel %vm1588_vm8, %v1638_v47, %v1640_v4  ;;  %v1101_v17 = vrot.slane %v6182_v36, 2  ;;  %v5088_v50 = vld [vmem:[%s3294_s22 + $0xf0] sm:$0xff]  }
 0x18d   : > { %v1531_v2 = vpop.permute.xlu0 %1530  ;;  %v2148_v40 = vsel %vm2108_vm13, %v2083_v30, %v1563_v13  ;;  %v1098_v53 = vor.u32 %v1097_v20, %v1096_v37  ;;  %v1100_v13 = vrot.slane %v6181_v34, 1  ;;  %v1037_v3 = vrot.slane %v6184_v35, 2 }
 0x18e   : > { %1572 = vrot.lane.b32.xlu1 %v1490_v60, %s3249_s13  ;;  %v1639_v60 = vsel %vm1588_vm8, %v1636_v24, %v1638_v47  ;;  %v2116_v43 = vsel %vm2108_vm13, %v2051_v61, %v1531_v2  ;;  %v1609_v38 = vsel %vm1588_vm8, %v1606_v6, %v1608_v10  ;;  %v1036_v47 = vrot.slane %v6183_v63, 1 }
 0x18f   : > { %1540 = vrot.lane.b32.xlu0 %v1426_v16, %s3249_s13  ;;  %v1034_v16 = vor.u32 %v1033_v52, %v1032_v46  ;;  %v1099_v23 = vsel %vm988_vm2, %v4851_v39, %v1098_v53  ;;  %v5045_v27 = vor.u32 %v1101_v17, %v1100_v13  ;;  %v1432_v33 = vrot.slane %v6184_v35, 3  ;;  %v6188_v52 = vld [vmem:[#allocation25_spill] sm:$0xff]  ;;  %v6189_v13 = vld [vmem:[#allocation94_spill] sm:$0xff] }
 0x190   : > { %v1691_v25 = vpop.permute.xlu1 %1690  ;;  %v5052_v19 = vor.u32 %v1037_v3, %v1036_v47  ;;  %v6191_v35 = vld [vmem:[#allocation49_spill] sm:$0xff]  ;;  %v6192_v3 = vld [vmem:[#allocation84_spill] sm:$0xff] }
 0x191   : > { %v2211_v28 = vsel %vm2173_vm14, %v2146_v58, %v1691_v25  ;;  %v1659_v42 = vpop.permute.xlu0 %1658  ;;  %v1035_v2 = vsel %vm988_vm2, %v4858_v14, %v1034_v16  ;;  %v5064_v14 = vld [vmem:[%s3294_s22 + $0xe8] sm:$0xff]  }
 0x192   : > { %1574 = vrot.lane.b32.xlu1 %v1494_v54, %s3249_s13  ;;  %3111 = vmatprep.mubr.msk.bf16.mxu1 %vm2258_vm15, %v2211_v28  ;;  %v2179_v24 = vsel %vm2173_vm14, %v2114_v0, %v1659_v42  ;;  %v1103_v54 = vsel %vm988_vm2, %v1098_v53, %v5045_v27  ;;  %v1247_v12 = vrot.slane %v5064_v14, 2  ;;  %v5071_v58 = vld [vmem:[%s3294_s22 + $0x68] sm:$0xff]   ;;  %v1249_v0 = vrot.slane %v5088_v50, 2 }
 0x193   : > { %1542 = vrot.lane.b32.xlu0 %v1430_v21, %s3249_s13  ;;  %3079 = vmatprep.mubr.msk.bf16.mxu0 %vm2258_vm15, %v2179_v24  ;;  %v1039_v21 = vsel %vm988_vm2, %v1034_v16, %v5052_v19  ;;  %v1215_v25 = vrot.slane %v5071_v58, 2  ;;  %v1496_v42 = vrot.slane %v6182_v36, 3  ;;  %v6190_v36 = vld [vmem:[#allocation21_spill] sm:$0xff] }
 0x194   : > { %v1693_v44 = vpop.permute.xlu1 %1692  ;;  %v1248_v22 = vsel %vm1191_vm5, %v1245_v5, %v1247_v12  ;;  %v5104_v24 = vsel %vm1191_vm5, %v1247_v12, %v1249_v0  ;;  %v1890_v17 = vsel %vm1848_vm9, %v6190_v36, %v6189_v13 }
 0x195   : > { %v2213_v48 = vsel %vm2173_vm14, %v2148_v40, %v1693_v44  ;;  %v1661_v31 = vpop.permute.xlu0 %1660  ;;  %v1216_v28 = vsel %vm1191_vm5, %v1213_v8, %v1215_v25  ;;  %v1431_v8 = vrot.slane %v6183_v63, 2  ;;  %v1499_v40 = vrot.slane %v6185_v29, 2  ;;  %v6186_v44 = vld [vmem:[#allocation65_spill] sm:$0xff] }
 0x196   : > { %1702 = vrot.lane.b32.xlu1 %v1639_v60, %s3250_s14  ;;  %3112 = vmatmul.mubr.msk.bf16.gmra.mxu1 %vm2258_vm15, %v2213_v48  ;;  %v2181_v41 = vsel %vm2173_vm14, %v2116_v43, %v1661_v31  ;;  %v6187_v48 = vld [vmem:[#allocation33_spill] sm:$0xff]  ;;  %v1436_v43 = vrot.slane %v6188_v52, 3 }
 0x197   : > { %1670 = vrot.lane.b32.xlu0 %v1607_v32, %s3250_s14  ;;  %3080 = vmatmul.mubr.msk.bf16.gmra.mxu0 %vm2258_vm15, %v2181_v41  ;;  %v1500_v32 = vrot.slane %v6186_v44, 3  ;;  %v1435_v46 = vrot.slane %v6187_v48, 2 }
 0x198   : > { %v5033_v59 = vpop.permute.xlu1 %1167 }
 0x199   : > { %v5040_v15 = vpop.permute.xlu0 %1135  ;;  %v5127_v16 = vor.u32 %v1436_v43, %v1435_v46  ;;  %v1955_v63 = vsel %vm1913_vm10, %v1890_v17, %v5033_v59  ;;  %v6196_v59 = vld [vmem:[#allocation2_spill] sm:$0xff]  ;;  %v6197_v17 = vld [vmem:[#allocation69_spill] sm:$0xff] }
 0x19a   : > { %1704 = vrot.lane.b32.xlu1 %v1641_v11, %s3250_s14  ;;  %v1433_v11 = vor.u32 %v1432_v33, %v1431_v8 }
 0x19b   : > { %1672 = vrot.lane.b32.xlu0 %v1609_v38, %s3250_s14 }
 0x19c   : > { %v5048_v56 = vpop.permute.xlu1 %1169  ;;  %v1434_v47 = vsel %vm1387_vm7, %v4944_v7, %v1433_v11  ;;  %v1438_v33 = vsel %vm1387_vm7, %v1433_v11, %v5127_v16 }
 0x19d   : > { %v5054_v57 = vpop.permute.xlu0 %1137 }
 0x19e   : > { %1179 = vrot.lane.b32.xlu1 %v1099_v23, %s3246_s30  ;;  %v1860_v23 = vsel %vm1848_vm9, %v6192_v3, %v6191_v35  ;;  %v6199_v3 = vld [vmem:[#allocation30_spill] sm:$0xff] }
 0x19f   : > { %1147 = vrot.lane.b32.xlu0 %v1035_v2, %s3246_s30  ;;  %v6193_v2 = vld [vmem:[#allocation54_spill] sm:$0xff] }
 0x1a0   : > { %v1298_v39 = vpop.permute.xlu1 %1297 }
 0x1a1   : > { %v1266_v49 = vpop.permute.xlu0 %1265  ;;  %v2020_v12 = vsel %vm1978_vm11, %v1955_v63, %v1298_v39  ;;  %v6198_v63 = vld [vmem:[#allocation67_spill] sm:$0xff] }
 0x1a2   : > { %1181 = vrot.lane.b32.xlu1 %v1103_v54, %s3246_s30  ;;  %v6194_v54 = vld [vmem:[#allocation85_spill] sm:$0xff] }
 0x1a3   : > { %1149 = vrot.lane.b32.xlu0 %v1039_v21, %s3246_s30  ;;  %v1858_v21 = vsel %vm1848_vm9, %v6194_v54, %v6193_v2 }
 0x1a4   : > { %v5068_v62 = vpop.permute.xlu1 %1299  ;;  %v1923_v7 = vsel %vm1913_vm10, %v1858_v21, %v5040_v15 }
 0x1a5   : > { %v5074_v6 = vpop.permute.xlu0 %1267 }
 0x1a6   : > { %1309 = vrot.lane.b32.xlu1 %v4918_v55, %s3247_s5  ;;  %v1495_v55 = vrot.slane %v6181_v34, 2  ;;  %v5120_v34 = vor.u32 %v1500_v32, %v1499_v40  ;;  %v1610_v40 = vrot.slane %v5071_v58, 3  ;;  %v1104_v58 = vrot.slane %v6185_v29, 1 }
 0x1a7   : > { %1277 = vrot.lane.b32.xlu0 %v4928_v26, %s3247_s5  ;;  %v5095_v26 = vld [vmem:[%s3294_s22 + $0x70] sm:$0xff]  }
 0x1a8   : > { %v1364_v18 = vpop.permute.xlu1 %1363  ;;  %v1217_v37 = vrot.slane %v5095_v26, 2  ;;  %v1497_v20 = vor.u32 %v1496_v42, %v1495_v55  ;;  %v1988_v42 = vsel %vm1978_vm11, %v1923_v7, %v1266_v49 }
 0x1a9   : > { %v1332_v60 = vpop.permute.xlu0 %1331 }
 0x1aa   : > { %1311 = vrot.lane.b32.xlu1 %v1248_v22, %s3247_s5  ;;  %v5114_v31 = vsel %vm1191_vm5, %v1215_v25, %v1217_v37  ;;  %v1498_v53 = vsel %vm1387_vm7, %v4942_v9, %v1497_v20  ;;  %v1642_v9 = vrot.slane %v5064_v14, 3  ;;  %v2085_v14 = vsel %vm2043_vm12, %v2020_v12, %v1364_v18 }
 0x1ab   : > { %1279 = vrot.lane.b32.xlu0 %v1216_v28, %s3247_s5  ;;  %v1502_v55 = vsel %vm1387_vm7, %v1497_v20, %v5120_v34  ;;  %v2053_v18 = vsel %vm2043_vm12, %v1988_v42, %v1332_v60  ;;  %v1925_v60 = vsel %vm1913_vm10, %v1860_v23, %v5054_v57  ;;  %v1611_v57 = vsel %vm1588_vm8, %v1608_v10, %v1610_v40  ;;  %v6200_v23 = vld [vmem:[#allocation27_spill] sm:$0xff] }
 0x1ac   : > { %v1366_v5 = vpop.permute.xlu1 %1365  ;;  %v1643_v49 = vsel %vm1588_vm8, %v1640_v4, %v1642_v9  ;;  %v1990_v43 = vsel %vm1978_vm11, %v1925_v60, %v5074_v6  ;;  %v1041_v6 = vrot.slane %v6188_v52, 2  ;;  %v1045_v2 = vrot.slane %v6200_v23, 2 }
 0x1ad   : > { %v1334_v30 = vpop.permute.xlu0 %1333  ;;  %v1440_v60 = vrot.slane %v6200_v23, 3 }
 0x1ae   : > { %1375 = vrot.lane.b32.xlu1 %v1248_v22, %s3248_s8  ;;  %v6195_v22 = vld [vmem:[#allocation93_spill] sm:$0xff]  ;;  %v2055_v29 = vsel %vm2043_vm12, %v1990_v43, %v1334_v30 }
 0x1af   : > { %1343 = vrot.lane.b32.xlu0 %v1216_v28, %s3248_s8  ;;  %v1892_v28 = vsel %vm1848_vm9, %v6196_v59, %v6195_v22 }
 0x1b0   : > { %v1565_v61 = vpop.permute.xlu1 %1564  ;;  %v1957_v15 = vsel %vm1913_vm10, %v1892_v28, %v5048_v56  ;;  %v1644_v56 = vrot.slane %v5088_v50, 3 }
 0x1b1   : > { %v1533_v41 = vpop.permute.xlu0 %1532  ;;  %v2150_v8 = vsel %vm2108_vm13, %v2085_v14, %v1565_v61  ;;  %v2022_v20 = vsel %vm1978_vm11, %v1957_v15, %v5068_v62  ;;  %v1105_v62 = vrot.slane %v6186_v44, 2 }
 0x1b2   : > { %1377 = vrot.lane.b32.xlu1 %v5104_v24, %s3248_s8  ;;  %v2118_v61 = vsel %vm2108_vm13, %v2053_v18, %v1533_v41  ;;  %v2087_v51 = vsel %vm2043_vm12, %v2022_v20, %v1366_v5  ;;  %v1612_v5 = vrot.slane %v5095_v26, 3  ;;  %v1645_v1 = vsel %vm1588_vm8, %v1642_v9, %v1644_v56  ;;  %v5254_v20 = vld [vmem:[%s3585_s27] sm:$0xff]  }
 0x1b3   : > { %1345 = vrot.lane.b32.xlu0 %v5114_v31, %s3248_s8  ;;  %v1106_v30 = vor.u32 %v1105_v62, %v1104_v58  ;;  %v1044_v9 = vrot.slane %v6199_v3, 1  ;;  %v1221_v58 = vrot.slane %v4743_v45, 2 }
 0x1b4   : > { %v1567_v38 = vpop.permute.xlu1 %1566 }
 0x1b5   : > { %v1535_v25 = vpop.permute.xlu0 %1534  ;;  %v2152_v11 = vsel %vm2108_vm13, %v2087_v51, %v1567_v38  ;;  %v1108_v38 = vrot.slane %v6197_v17, 1  ;;  %v1107_v21 = vsel %vm988_vm2, %v5045_v27, %v1106_v30  ;;  %v5218_v59 = vor.u32 %v1045_v2, %v1044_v9  ;;  %v6206_v9 = vld [vmem:[#allocation59_spill] sm:$0xff] }
 0x1b6   : > { %1576 = vrot.lane.b32.xlu1 %v1498_v53, %s3249_s13  ;;  %v1040_v53 = vrot.slane %v6187_v48, 1  ;;  %v2120_v13 = vsel %vm2108_vm13, %v2055_v29, %v1535_v25  ;;  %v1109_v48 = vrot.slane %v6198_v63, 2  ;;  %v6202_v29 = vld [vmem:[#allocation36_spill] sm:$0xff] }
 0x1b7   : > { %1544 = vrot.lane.b32.xlu0 %v1434_v47, %s3249_s13  ;;  %v1613_v47 = vsel %vm1588_vm8, %v1610_v40, %v1612_v5 }
 0x1b8   : > { %v1695_v39 = vpop.permute.xlu1 %1694  ;;  %v1042_v35 = vor.u32 %v1041_v6, %v1040_v53  ;;  %v5211_v12 = vor.u32 %v1109_v48, %v1108_v38  ;;  %v6203_v53 = vld [vmem:[#allocation31_spill] sm:$0xff] }
 0x1b9   : > { %v2215_v32 = vsel %vm2173_vm14, %v2150_v8, %v1695_v39  ;;  %v1663_v46 = vpop.permute.xlu0 %1662  ;;  %v5237_v39 = vld [vmem:[%s3294_s22 + $0x78] sm:$0xff]   ;;  %v1444_v6 = vrot.slane %v6203_v53, 3  ;;  %v6205_v38 = vld [vmem:[#allocation35_spill] sm:$0xff] }
 0x1ba   : > { %1578 = vrot.lane.b32.xlu1 %v1502_v55, %s3249_s13  ;;  %3115 = vmatprep.mubr.msk.bf16.mxu1 %vm2258_vm15, %v2215_v32  ;;  %v2183_v4 = vsel %vm2173_vm14, %v2118_v61, %v1663_v46  ;;  %v1043_v22 = vsel %vm988_vm2, %v5052_v19, %v1042_v35  ;;  %v1111_v7 = vsel %vm988_vm2, %v1106_v30, %v5211_v12  ;;  %v5230_v19 = vld [vmem:[%s3294_s22 + $0xf8] sm:$0xff]   ;;  %v1253_v61 = vrot.slane %v5254_v20, 2 }
 0x1bb   : > { %1546 = vrot.lane.b32.xlu0 %v1438_v33, %s3249_s13  ;;  %3083 = vmatprep.mubr.msk.bf16.mxu0 %vm2258_vm15, %v2183_v4  ;;  %v1047_v14 = vsel %vm988_vm2, %v1042_v35, %v5218_v59  ;;  %v1251_v42 = vrot.slane %v5230_v19, 2  ;;  %v1219_v33 = vrot.slane %v5237_v39, 2  ;;  %v1504_v46 = vrot.slane %v6198_v63, 3 }
 0x1bc   : > { %v1697_v41 = vpop.permute.xlu1 %1696 }
 0x1bd   : > { %v2217_v44 = vsel %vm2173_vm14, %v2152_v11, %v1697_v41  ;;  %v1665_v36 = vpop.permute.xlu0 %1664  ;;  %v1252_v15 = vsel %vm1191_vm5, %v1249_v0, %v1251_v42  ;;  %v1220_v32 = vsel %vm1191_vm5, %v1217_v37, %v1219_v33  ;;  %v1112_v0 = vshrl.u32 %v5254_v20, 16  ;;  %v6201_v11 = vld [vmem:[#allocation70_spill] sm:$0xff] }
 0x1be   : > { %1706 = vrot.lane.b32.xlu1 %v1643_v49, %s3250_s14  ;;  %3116 = vmatmul.mubr.msk.bf16.gmra.mxu1 %vm2258_vm15, %v2217_v44  ;;  %v2185_v10 = vsel %vm2173_vm14, %v2120_v13, %v1665_v36  ;;  %v1439_v37 = vrot.slane %v6199_v3, 2  ;;  %v5268_v4 = vsel %vm1191_vm5, %v1251_v42, %v1253_v61  ;;  %v1508_v41 = vrot.slane %v6201_v11, 3  ;;  %v6209_v42 = vld [vmem:[#allocation74_spill] sm:$0xff] }
 0x1bf   : > { %1674 = vrot.lane.b32.xlu0 %v1611_v57, %s3250_s14  ;;  %3084 = vmatmul.mubr.msk.bf16.gmra.mxu0 %vm2258_vm15, %v2185_v10  ;;  %v1507_v43 = vrot.slane %v1112_v0, 2  ;;  %v1443_v44 = vrot.slane %v6202_v29, 2  ;;  %v5279_v13 = vsel %vm1191_vm5, %v1219_v33, %v1221_v58  ;;  %v1114_v26 = vrot.slane %v1112_v0, 1 }
 0x1c0   : > { %v5199_v52 = vpop.permute.xlu1 %1171  ;;  %v1441_v36 = vor.u32 %v1440_v60, %v1439_v37  ;;  %v6210_v37 = vld [vmem:[#allocation56_spill] sm:$0xff]  ;;  %v1049_v0 = vrot.slane %v6203_v53, 2 }
 0x1c1   : > { %v5206_v54 = vpop.permute.xlu0 %1139  ;;  %v5285_v30 = vor.u32 %v1508_v41, %v1507_v43 }
 0x1c2   : > { %1708 = vrot.lane.b32.xlu1 %v1645_v1, %s3250_s14  ;;  %v1442_v3 = vsel %vm1387_vm7, %v5127_v16, %v1441_v36  ;;  %v6208_v16 = vld [vmem:[#allocation58_spill] sm:$0xff] }
 0x1c3   : > { %1676 = vrot.lane.b32.xlu0 %v1613_v47, %s3250_s14  ;;  %v5292_v47 = vor.u32 %v1444_v6, %v1443_v44  ;;  %v1896_v33 = vsel %vm1848_vm9, %v6209_v42, %v6208_v16  ;;  %v6214_v42 = vld [vmem:[#allocation78_spill] sm:$0xff] }
 0x1c4   : > { %v5214_v25 = vpop.permute.xlu1 %1173 }
 0x1c5   : > { %v5220_v28 = vpop.permute.xlu0 %1141 }
 0x1c6   : > { %1183 = vrot.lane.b32.xlu1 %v1107_v21, %s3246_s30 }
 0x1c7   : > { %1151 = vrot.lane.b32.xlu0 %v1043_v22, %s3246_s30 }
 0x1c8   : > { %v1302_v27 = vpop.permute.xlu1 %1301 }
 0x1c9   : > { %v1270_v55 = vpop.permute.xlu0 %1269 }
 0x1ca   : > { %1185 = vrot.lane.b32.xlu1 %v1111_v7, %s3246_s30 }
 0x1cb   : > { %1153 = vrot.lane.b32.xlu0 %v1047_v14, %s3246_s30  ;;  %v1646_v14 = vrot.slane %v5230_v19, 3 }
 0x1cc   : > { %v5234_v8 = vpop.permute.xlu1 %1303 }
 0x1cd   : > { %v5240_v40 = vpop.permute.xlu0 %1271 }
 0x1ce   : > { %1313 = vrot.lane.b32.xlu1 %v5104_v24, %s3247_s5  ;;  %v1503_v24 = vrot.slane %v6197_v17, 2  ;;  %v6204_v17 = vld [vmem:[#allocation48_spill] sm:$0xff] }
 0x1cf   : > { %1281 = vrot.lane.b32.xlu0 %v5114_v31, %s3247_s5  ;;  %v1894_v63 = vsel %vm1848_vm9, %v6205_v38, %v6204_v17  ;;  %v1115_v38 = vrot.slane %v6201_v11, 2  ;;  %v6212_v11 = vld [vmem:[#allocation66_spill] sm:$0xff] }
 0x1d0   : > { %v1368_v18 = vpop.permute.xlu1 %1367  ;;  %v1505_v62 = vor.u32 %v1504_v46, %v1503_v24  ;;  %v1959_v35 = vsel %vm1913_vm10, %v1894_v63, %v5199_v52  ;;  %v1614_v46 = vrot.slane %v5237_v39, 3 }
 0x1d1   : > { %v1336_v49 = vpop.permute.xlu0 %1335  ;;  %v2024_v2 = vsel %vm1978_vm11, %v1959_v35, %v1302_v27 }
 0x1d2   : > { %1315 = vrot.lane.b32.xlu1 %v1252_v15, %s3247_s5  ;;  %v1506_v10 = vsel %vm1387_vm7, %v5120_v34, %v1505_v62  ;;  %v6207_v34 = vld [vmem:[#allocation87_spill] sm:$0xff]  ;;  %v2089_v7 = vsel %vm2043_vm12, %v2024_v2, %v1368_v18  ;;  %v1510_v52 = vsel %vm1387_vm7, %v1505_v62, %v5285_v30  ;;  %v1961_v18 = vsel %vm1913_vm10, %v1896_v33, %v5214_v25 }
 0x1d3   : > { %1283 = vrot.lane.b32.xlu0 %v1220_v32, %s3247_s5  ;;  %v1862_v23 = vsel %vm1848_vm9, %v6207_v34, %v6206_v9  ;;  %v2026_v62 = vsel %vm1978_vm11, %v1961_v18, %v5234_v8  ;;  %v1648_v25 = vrot.slane %v5254_v20, 3  ;;  %v1647_v8 = vsel %vm1588_vm8, %v1644_v56, %v1646_v14  ;;  %v6215_v18 = vld [vmem:[#allocation83_spill] sm:$0xff] }
 0x1d4   : > { %v1370_v31 = vpop.permute.xlu1 %1369  ;;  %v1927_v22 = vsel %vm1913_vm10, %v1862_v23, %v5206_v54  ;;  %v1446_v54 = vsel %vm1387_vm7, %v1441_v36, %v5292_v47  ;;  %v1615_v50 = vsel %vm1588_vm8, %v1612_v5, %v1614_v46  ;;  %v1616_v56 = vrot.slane %v4743_v45, 3 }
 0x1d5   : > { %v1338_v51 = vpop.permute.xlu0 %1337  ;;  %v1649_v17 = vsel %vm1588_vm8, %v1646_v14, %v1648_v25  ;;  %v1048_v9 = vrot.slane %v6202_v29, 1  ;;  %v6213_v23 = vrot.slane %v6212_v11, 1 }
 0x1d6   : > { %1379 = vrot.lane.b32.xlu1 %v1252_v15, %s3248_s8  ;;  %v1992_v15 = vsel %vm1978_vm11, %v1927_v22, %v1270_v55  ;;  %v6211_v55 = vld [vmem:[#allocation86_spill] sm:$0xff] }
 0x1d7   : > { %1347 = vrot.lane.b32.xlu0 %v1220_v32, %s3248_s8  ;;  %v2057_v19 = vsel %vm2043_vm12, %v1992_v15, %v1336_v49  ;;  %v1864_v60 = vsel %vm1848_vm9, %v6211_v55, %v6210_v37  ;;  %v5332_v49 = vld [vmem:[%s3585_s27 + $0x8] sm:$0xff]   ;;  %v1050_v14 = vor.u32 %v1049_v0, %v1048_v9  ;;  %v5404_v55 = vld [vmem:[%s3585_s27 + $0x10] sm:$0xff]  }
 0x1d8   : > { %v1569_v57 = vpop.permute.xlu1 %1568  ;;  %v1929_v39 = vsel %vm1913_vm10, %v1864_v60, %v5220_v28  ;;  %v1119_v63 = vshrl.u32 %v5332_v49, 16 }
 0x1d9   : > { %v1537_v1 = vpop.permute.xlu0 %1536  ;;  %v2154_v27 = vsel %vm2108_vm13, %v2089_v7, %v1569_v57  ;;  %v2091_v57 = vsel %vm2043_vm12, %v2026_v62, %v1370_v31  ;;  %v1994_v6 = vsel %vm1978_vm11, %v1929_v39, %v5240_v40  ;;  %v1051_v15 = vsel %vm988_vm2, %v5218_v59, %v1050_v14  ;;  %v6216_v62 = vld [vmem:[#allocation26_spill] sm:$0xff] }
 0x1da   : > { %1381 = vrot.lane.b32.xlu1 %v5268_v4, %s3248_s8  ;;  %v2122_v43 = vsel %vm2108_vm13, %v2057_v19, %v1537_v1  ;;  %v2059_v28 = vsel %vm2043_vm12, %v1994_v6, %v1338_v51  ;;  %v922_v51 = vrot.slane %v5332_v49, 1  ;;  %v1121_v22 = vrot.slane %v1119_v63, 1  ;;  %v6218_v6 = vld [vmem:[#allocation34_spill] sm:$0xff] }
 0x1db   : > { %1349 = vrot.lane.b32.xlu0 %v5279_v13, %s3248_s8 }
 0x1dc   : > { %v1571_v48 = vpop.permute.xlu1 %1570  ;;  %v923_v2 = vsel %vm792_vm1, %v6213_v23, %v922_v51  ;;  %v6221_v51 = vld [vmem:[#allocation40_spill] sm:$0xff] }
 0x1dd   : > { %v1539_v21 = vpop.permute.xlu0 %1538  ;;  %v2156_v36 = vsel %vm2108_vm13, %v2091_v57, %v1571_v48  ;;  %v1122_v48 = vshll.u32 %v5332_v49, 16  ;;  %v1519_v57 = vshll.u32 %v5404_v55, 16 }
 0x1de   : > { %1580 = vrot.lane.b32.xlu1 %v1506_v10, %s3249_s13  ;;  %v2124_v10 = vsel %vm2108_vm13, %v2059_v28, %v1539_v21  ;;  %v1116_v21 = vor.u32 %v1115_v38, %v1114_v26 }
 0x1df   : > { %1548 = vrot.lane.b32.xlu0 %v1442_v3, %s3249_s13  ;;  %v1617_v3 = vsel %vm1588_vm8, %v1614_v46, %v1616_v56  ;;  %v1124_v7 = vrot.slane %v1122_v48, 2 }
 0x1e0   : > { %v1699_v32 = vpop.permute.xlu1 %1698  ;;  %v1117_v29 = vsel %vm988_vm2, %v5211_v12, %v1116_v21  ;;  %v1055_v12 = vsel %vm988_vm2, %v1050_v14, %v6215_v18 }
 0x1e1   : > { %v2219_v24 = vsel %vm2173_vm14, %v2154_v27, %v1699_v32  ;;  %v1667_v41 = vpop.permute.xlu0 %1666  ;;  %v1125_v53 = vor.u32 %v1124_v7, %v1121_v22  ;;  %v6224_v7 = vld [vmem:[#allocation52_spill] sm:$0xff] }
 0x1e2   : > { %1582 = vrot.lane.b32.xlu1 %v1510_v52, %s3249_s13  ;;  %3119 = vmatprep.mubr.msk.bf16.mxu1 %vm2258_vm15, %v2219_v24  ;;  %v2187_v44 = vsel %vm2173_vm14, %v2122_v43, %v1667_v41  ;;  %v1255_v24 = vrot.slane %v5332_v49, 2  ;;  %v6217_v43 = vrot.slane %v6216_v62, 2 }
 0x1e3   : > { %1550 = vrot.lane.b32.xlu0 %v1446_v54, %s3249_s13  ;;  %3087 = vmatprep.mubr.msk.bf16.mxu0 %vm2258_vm15, %v2187_v44  ;;  %v1126_v32 = vsel %vm988_vm2, %v1116_v21, %v1125_v53  ;;  %v1511_v44 = vrot.slane %v1119_v63, 2  ;;  %v6227_v53 = vld [vmem:[#allocation41_spill] sm:$0xff] }
 0x1e4   : > { %v1701_v1 = vpop.permute.xlu1 %1700  ;;  %v1256_v37 = vsel %vm1191_vm5, %v1253_v61, %v1255_v24  ;;  %v1224_v41 = vsel %vm1191_vm5, %v1221_v58, %v6217_v43  ;;  %v1321_v61 = vrot.slane %v5404_v55, 2 }
 0x1e5   : > { %v2221_v31 = vsel %vm2173_vm14, %v2156_v36, %v1701_v1  ;;  %v1669_v40 = vpop.permute.xlu0 %1668  ;;  %v1447_v36 = vrot.slane %v6218_v6, 2  ;;  %v6219_v1 = vld [vmem:[#allocation32_spill] sm:$0xff]  ;;  %v1652_v6 = vrot.slane %v5404_v55, 3 }
 0x1e6   : > { %1710 = vrot.lane.b32.xlu1 %v1647_v8, %s3250_s14  ;;  %3120 = vmatmul.mubr.msk.bf16.gmra.mxu1 %vm2258_vm15, %v2221_v31  ;;  %v2189_v5 = vsel %vm2173_vm14, %v2124_v10, %v1669_v40  ;;  %v1512_v8 = vrot.slane %v1122_v48, 3  ;;  %v1448_v28 = vrot.slane %v6219_v1, 3  ;;  %v1322_v10 = vsel %vm1191_vm5, %v1255_v24, %v1321_v61  ;;  %v6222_v48 = vld [vmem:[#allocation43_spill] sm:$0xff]  ;;  %v6229_v61 = vld [vmem:[#allocation73_spill] sm:$0xff] }
 0x1e7   : > { %1678 = vrot.lane.b32.xlu0 %v1615_v50, %s3250_s14  ;;  %3088 = vmatmul.mubr.msk.bf16.gmra.mxu0 %vm2258_vm15, %v2189_v5  ;;  %v1521_v50 = vrot.slane %v1519_v57, 3 }
 0x1e8   : > { %v1176_v35 = vpop.permute.xlu1 %1175  ;;  %v1513_v40 = vor.u32 %v1512_v8, %v1511_v44  ;;  %v1449_v63 = vor.u32 %v1448_v28, %v1447_v36  ;;  %v3234_v44 = vld [vmem:[%s3294_s22 + $0x88] sm:$0xff]  }
 0x1e9   : > { %v1144_v34 = vpop.permute.xlu0 %1143  ;;  %v1618_v8 = vrot.slane %v3234_v44, 3 }
 0x1ea   : > { %1712 = vrot.lane.b32.xlu1 %v1649_v17, %s3250_s14  ;;  %v6220_v17 = vld [vmem:[#allocation9_spill] sm:$0xff]  ;;  %v1514_v22 = vsel %vm1387_vm7, %v5285_v30, %v1513_v40  ;;  %v1450_v24 = vsel %vm1387_vm7, %v5292_v47, %v1449_v63  ;;  %v1650_v47 = vrot.slane %v5332_v49, 3 }
 0x1eb   : > { %1680 = vrot.lane.b32.xlu0 %v1617_v3, %s3250_s14  ;;  %v1898_v26 = vsel %vm1848_vm9, %v6221_v51, %v6220_v17  ;;  %v6223_v3 = vld [vmem:[#allocation90_spill] sm:$0xff]  ;;  %v1619_v1 = vsel %vm1588_vm8, %v1616_v56, %v1618_v8 }
 0x1ec   : > { %v5377_v52 = vpop.permute.xlu1 %1177  ;;  %v1963_v38 = vsel %vm1913_vm10, %v1898_v26, %v1176_v35  ;;  %v1866_v9 = vsel %vm1848_vm9, %v6223_v3, %v6222_v48  ;;  %v6225_v35 = vld [vmem:[#allocation89_spill] sm:$0xff]  ;;  %v6232_v48 = vld [vmem:[#allocation96_spill] sm:$0xff] }
 0x1ed   : > { %v5379_v16 = vpop.permute.xlu0 %1145  ;;  %v1868_v14 = vsel %vm1848_vm9, %v6225_v35, %v6224_v7  ;;  %v6233_v3 = vld [vmem:[#allocation4_spill] sm:$0xff]  ;;  %v6236_v7 = vld [vmem:[#allocation6_spill] sm:$0xff]  ;;  %v6237_v35 = vld [vmem:[#allocation11_spill] sm:$0xff] }
 0x1ee   : > { %986 = vrot.lane.b32.xlu1 %v923_v2, %s3245_s29  ;;  %v1931_v2 = vsel %vm1913_vm10, %v1866_v9, %v1144_v34  ;;  %v1902_v9 = vsel %vm1848_vm9, %v6233_v3, %v6232_v48 }
 0x1ef   : > { %984 = vrot.lane.b32.xlu0 %v6214_v42, %s3245_s29 }
 0x1f0   : > { %v1306_v33 = vpop.permute.xlu1 %1305 }
 0x1f1   : > { %v1274_v27 = vpop.permute.xlu0 %1273  ;;  %v2028_v0 = vsel %vm1978_vm11, %v1963_v38, %v1306_v33 }
 0x1f2   : > { %1187 = vrot.lane.b32.xlu1 %v1117_v29, %s3246_s30  ;;  %v6226_v29 = vld [vmem:[#allocation15_spill] sm:$0xff]  ;;  %v1996_v33 = vsel %vm1978_vm11, %v1931_v2, %v1274_v27  ;;  %v6234_v2 = vld [vmem:[#allocation10_spill] sm:$0xff] }
 0x1f3   : > { %1155 = vrot.lane.b32.xlu0 %v1051_v15, %s3246_s30  ;;  %v1900_v42 = vsel %vm1848_vm9, %v6227_v53, %v6226_v29  ;;  %v6238_v29 = vld [vmem:[#allocation95_spill] sm:$0xff] }
 0x1f4   : > { %v1308_v54 = vpop.permute.xlu1 %1307  ;;  %v1965_v18 = vsel %vm1913_vm10, %v1900_v42, %v5377_v52  ;;  %v1933_v52 = vsel %vm1913_vm10, %v1868_v14, %v5379_v16  ;;  %v1870_v14 = vsel %vm1848_vm9, %v6237_v35, %v6236_v7  ;;  %v6239_v53 = vld [vmem:[#allocation39_spill] sm:$0xff] }
 0x1f5   : > { %v5393_v19 = vpop.permute.xlu0 %1275  ;;  %v1904_v42 = vsel %vm1848_vm9, %v6239_v53, %v6238_v29 }
 0x1f6   : > { %1189 = vrot.lane.b32.xlu1 %v1126_v32, %s3246_s30  ;;  %v6228_v32 = vld [vmem:[#allocation88_spill] sm:$0xff] }
 0x1f7   : > { %1157 = vrot.lane.b32.xlu0 %v1055_v12, %s3246_s30 }
 0x1f8   : > { %v1372_v59 = vpop.permute.xlu1 %1371 }
 0x1f9   : > { %v1340_v46 = vpop.permute.xlu0 %1339  ;;  %v2093_v21 = vsel %vm2043_vm12, %v2028_v0, %v1372_v59  ;;  %v2030_v59 = vsel %vm1978_vm11, %v1965_v18, %v1308_v54  ;;  %v1998_v54 = vsel %vm1978_vm11, %v1933_v52, %v5393_v19 }
 0x1fa   : > { %1317 = vrot.lane.b32.xlu1 %v5268_v4, %s3247_s5  ;;  %v1516_v4 = vshrl.u32 %v5404_v55, 16  ;;  %v2061_v30 = vsel %vm2043_vm12, %v1996_v33, %v1340_v46 }
 0x1fb   : > { %1285 = vrot.lane.b32.xlu0 %v5279_v13, %s3247_s5 }
 0x1fc   : > { %v1374_v60 = vpop.permute.xlu1 %1373  ;;  %v1518_v58 = vrot.slane %v1516_v4, 2 }
 0x1fd   : > { %v1342_v39 = vpop.permute.xlu0 %1341  ;;  %v2095_v46 = vsel %vm2043_vm12, %v2030_v59, %v1374_v60  ;;  %v1454_v60 = vsel %vm1387_vm7, %v1449_v63, %v6229_v61 }
 0x1fe   : > { %1319 = vrot.lane.b32.xlu1 %v1256_v37, %s3247_s5  ;;  %v1522_v23 = vor.u32 %v1521_v50, %v1518_v58  ;;  %v2063_v57 = vsel %vm2043_vm12, %v1998_v54, %v1342_v39  ;;  %v1651_v39 = vsel %vm1588_vm8, %v1648_v25, %v1650_v47  ;;  %v6230_v25 = vld [vmem:[#allocation29_spill] sm:$0xff] }
 0x1ff   : > { %1287 = vrot.lane.b32.xlu0 %v1224_v41, %s3247_s5  ;;  %v6231_v55 = vrot.slane %v6230_v25, 3 }
 0x200   : > { %v1573_v13 = vpop.permute.xlu1 %1572  ;;  %v1523_v62 = vsel %vm1387_vm7, %v1513_v40, %v1522_v23 }
 0x201   : > { %v1541_v31 = vpop.permute.xlu0 %1540  ;;  %v2158_v15 = vsel %vm2108_vm13, %v2093_v21, %v1573_v13  ;;  %v1621_v58 = vsel %vm1588_vm8, %v1618_v8, %v6231_v55  ;;  %v6235_v21 = vld [vmem:[#allocation91_spill] sm:$0xff] }
 0x202   : > { %1383 = vrot.lane.b32.xlu1 %v1256_v37, %s3248_s8  ;;  %v2126_v27 = vsel %vm2108_vm13, %v2061_v30, %v1541_v31  ;;  %v1653_v31 = vsel %vm1588_vm8, %v1650_v47, %v1652_v6 }
 0x203   : > { %1351 = vrot.lane.b32.xlu0 %v1224_v41, %s3248_s8 }
 0x204   : > { %v1575_v5 = vpop.permute.xlu1 %1574 }
 0x205   : > { %v1543_v11 = vpop.permute.xlu0 %1542  ;;  %v2160_v41 = vsel %vm2108_vm13, %v2095_v46, %v1575_v5 }
 0x206   : > { %1385 = vrot.lane.b32.xlu1 %v1322_v10, %s3248_s8  ;;  %v2128_v49 = vsel %vm2108_vm13, %v2063_v57, %v1543_v11  ;;  %v5503_v11 = vld [vmem:[%s5817_s3] ss:$0 sm:$0xff] }
 0x207   : > { %1353 = vrot.lane.b32.xlu0 %v6228_v32, %s3248_s8  ;;  %v5519_v32 = vld [vmem:[%s5817_s3 + $0x1] ss:$0 sm:$0xff] }
 0x208   : > { %v1703_v34 = vpop.permute.xlu1 %1702 }
 0x209   : > { %v2223_v12 = vsel %vm2173_vm14, %v2158_v15, %v1703_v34  ;;  %v1671_v37 = vpop.permute.xlu0 %1670 }
 0x20a   : > { %1584 = vrot.lane.b32.xlu1 %v1514_v22, %s3249_s13  ;;  %3123 = vmatprep.mubr.msk.bf16.mxu1 %vm2258_vm15, %v2223_v12  ;;  %v2191_v43 = vsel %vm2173_vm14, %v2126_v27, %v1671_v37  ;;  %v1872_v22 = vsel %vm1848_vm9, %v6235_v21, %v6234_v2 }
 0x20b   : > { %1552 = vrot.lane.b32.xlu0 %v1450_v24, %s3249_s13  ;;  %3091 = vmatprep.mubr.msk.bf16.mxu0 %vm2258_vm15, %v2191_v43 }
 0x20c   : > { %v1705_v4 = vpop.permute.xlu1 %1704 }
 0x20d   : > { %v2225_v16 = vsel %vm2173_vm14, %v2160_v41, %v1705_v4  ;;  %v1673_v13 = vpop.permute.xlu0 %1672 }
 0x20e   : > { %1586 = vrot.lane.b32.xlu1 %v1523_v62, %s3249_s13  ;;  %3124 = vmatmul.mubr.msk.bf16.gmra.mxu1 %vm2258_vm15, %v2225_v16  ;;  %v2193_v19 = vsel %vm2173_vm14, %v2128_v49, %v1673_v13 }
 0x20f   : > { %1554 = vrot.lane.b32.xlu0 %v1454_v60, %s3249_s13  ;;  %3092 = vmatmul.mubr.msk.bf16.gmra.mxu0 %vm2258_vm15, %v2193_v19 }
 0x210   : > { %v1180_v36 = vpop.permute.xlu1 %1179 }
 0x211   : > { %v1148_v28 = vpop.permute.xlu0 %1147  ;;  %v1967_v23 = vsel %vm1913_vm10, %v1902_v9, %v1180_v36 }
 0x212   : > { %1714 = vrot.lane.b32.xlu1 %v1651_v39, %s3250_s14  ;;  %v1935_v18 = vsel %vm1913_vm10, %v1870_v14, %v1148_v28 }
 0x213   : > { %1682 = vrot.lane.b32.xlu0 %v1619_v1, %s3250_s14 }
 0x214   : > { %v1182_v20 = vpop.permute.xlu1 %1181 }
 0x215   : > { %v1150_v50 = vpop.permute.xlu0 %1149  ;;  %v1969_v30 = vsel %vm1913_vm10, %v1904_v42, %v1182_v20 }
 0x216   : > { %1716 = vrot.lane.b32.xlu1 %v1653_v31, %s3250_s14  ;;  %v1937_v59 = vsel %vm1913_vm10, %v1872_v22, %v1150_v50 }
 0x217   : > { %1684 = vrot.lane.b32.xlu0 %v1621_v58, %s3250_s14 }
 0x218   : > { %v1310_v45 = vpop.permute.xlu1 %1309 }
 0x219   : > { %v1278_v56 = vpop.permute.xlu0 %1277  ;;  %v2032_v33 = vsel %vm1978_vm11, %v1967_v23, %v1310_v45 }
 0x21a   : > { %v2000_v27 = vsel %vm1978_vm11, %v1935_v18, %v1278_v56 }
 0x21c   : > { %v1312_v10 = vpop.permute.xlu1 %1311 }
 0x21d   : > { %v1280_v40 = vpop.permute.xlu0 %1279  ;;  %v2034_v37 = vsel %vm1978_vm11, %v1969_v30, %v1312_v10 }
 0x21e   : > { %v2002_v57 = vsel %vm1978_vm11, %v1937_v59, %v1280_v40 }
 0x220   : > { %v1376_v17 = vpop.permute.xlu1 %1375 }
 0x221   : > { %v1344_v51 = vpop.permute.xlu0 %1343  ;;  %v2097_v12 = vsel %vm2043_vm12, %v2032_v33, %v1376_v17 }
 0x222   : > { %v2065_v43 = vsel %vm2043_vm12, %v2000_v27, %v1344_v51  ;;  %v6240_v27 = vld [vmem:[#allocation98_spill] sm:$0xff] }
 0x224   : > { %v1378_v26 = vpop.permute.xlu1 %1377 }
 0x225   : > { %v1346_v5 = vpop.permute.xlu0 %1345  ;;  %v2099_v16 = vsel %vm2043_vm12, %v2034_v37, %v1378_v26  ;;  %v6241_v37 = vld [vmem:[#allocation38_spill] sm:$0xff] }
 0x226   : > { %v2067_v36 = vsel %vm2043_vm12, %v2002_v57, %v1346_v5 }
 0x228   : > { %v1577_v38 = vpop.permute.xlu1 %1576 }
 0x229   : > { %v1545_v63 = vpop.permute.xlu0 %1544  ;;  %v2162_v62 = vsel %vm2108_vm13, %v2097_v12, %v1577_v38 }
 0x22a   : > { %v2130_v61 = vsel %vm2108_vm13, %v2065_v43, %v1545_v63  ;;  %v6242_v43 = vld [vmem:[#allocation47_spill] sm:$0xff] }
 0x22c   : > { %v1579_v0 = vpop.permute.xlu1 %1578 }
 0x22d   : > { %v1547_v15 = vpop.permute.xlu0 %1546  ;;  %v2164_v1 = vsel %vm2108_vm13, %v2099_v16, %v1579_v0  ;;  %v6246_v16 = vld [vmem:[#allocation97_spill] sm:$0xff] }
 0x22e   : > { %v3109_v34 = vpop.f32.mrf.mxu1  ;;  %v2132_v10 = vsel %vm2108_vm13, %v2067_v36, %v1547_v15 }
 0x22f   : > { %v2655_v24 = vmul.f32 %v3109_v34, %v5503_v11  ;;  %v3077_v52 = vpop.f32.mrf.mxu0 }
 0x230   : > { %v1707_v46 = vpop.permute.xlu1 %1706  ;;  %v2623_v47 = vmul.f32 %v3077_v52, %v5503_v11  ;;  %v2489_v4 = vpop.f32.mrf.mxu1 }
 0x231   : > { %v2724_v54 = vadd.f32 %v5519_v32, %v2655_v24  ;;  %v2227_v41 = vsel %vm2173_vm14, %v2162_v62, %v1707_v46  ;;  %v2361_v60 = vpop.f32.mrf.mxu0  ;;  %v2653_v44 = vmul.f32 %v5503_v11, %v2489_v4  ;;  %v1675_v8 = vpop.permute.xlu0 %1674  ;;  %v1906_v62 = vsel %vm1848_vm9, %v6241_v37, %v6240_v27  ;;  %v6245_v4 = vld [vmem:[#allocation16_spill] sm:$0xff] }
 0x232   : > { %3127 = vmatprep.mubr.msk.bf16.mxu1 %vm2258_vm15, %v2227_v41  ;;  %v2692_v49 = vadd.f32 %v5519_v32, %v2623_v47  ;;  %v2621_v19 = vmul.f32 %v5503_v11, %v2361_v60  ;;  %v2195_v39 = vsel %vm2173_vm14, %v2130_v61, %v1675_v8  ;;  %v3110_v6 = vpop.f32.mrf.mxu1  ;;  %v6243_v47 = vld [vmem:[#allocation18_spill] sm:$0xff]  ;;  %v6244_v41 = vld [vmem:[#allocation44_spill] sm:$0xff]  ;;  %v6247_v61 = vld [vmem:[#allocation3_spill] sm:$0xff] }
 0x233   : > { %v2788_v13 = vmax.f32 %v2724_v54, 0.0  ;;  %v2722_v28 = vadd.f32 %v5519_v32, %v2653_v44  ;;  %v3078_v31 = vpop.f32.mrf.mxu0  ;;  %3095 = vmatprep.mubr.msk.bf16.mxu0 %vm2258_vm15, %v2195_v39  ;;  %v2656_v20 = vmul.f32 %v3110_v6, %v5503_v11  ;;  %v1876_v54 = vsel %vm1848_vm9, %v6243_v47, %v6242_v43 }
 0x234   : > { %v1709_v25 = vpop.permute.xlu1 %1708  ;;  %v2756_v55 = vmax.f32 %v2692_v49, 0.0  ;;  %v2690_v58 = vadd.f32 %v5519_v32, %v2621_v19  ;;  %v2624_v50 = vmul.f32 %v3078_v31, %v5503_v11  ;;  %v2492_v56 = vpop.f32.mrf.mxu1  ;;  %v1874_v57 = vsel %vm1848_vm9, %v6245_v4, %v6244_v41 }
 0x235   : > { %2852 = vst [vmem:[%s5540_s23 + $0x110] sm:$0xff] %v2788_v13  ;;  %v2229_v45 = vsel %vm2173_vm14, %v2164_v1, %v1709_v25  ;;  %v2786_v40 = vmax.f32 %v2722_v28, 0.0  ;;  %v2725_v17 = vadd.f32 %v5519_v32, %v2656_v20  ;;  %v2364_v51 = vpop.f32.mrf.mxu0  ;;  %v2654_v26 = vmul.f32 %v5503_v11, %v2492_v56  ;;  %v1677_v5 = vpop.permute.xlu0 %1676 }
 0x236   : > { %3128 = vmatmul.mubr.msk.bf16.gmra.mxu1 %vm2258_vm15, %v2229_v45  ;;  %2820 = vst [vmem:[%s5540_s23 + $0x10] sm:$0xff] %v2756_v55  ;;  %v2754_v38 = vmax.f32 %v2690_v58, 0.0  ;;  %v2693_v63 = vadd.f32 %v5519_v32, %v2624_v50  ;;  %v2622_v48 = vmul.f32 %v5503_v11, %v2364_v51  ;;  %v2197_v3 = vsel %vm2173_vm14, %v2132_v10, %v1677_v5 }
 0x237   : > { %2850 = vst [vmem:[%s5540_s23 + $0x100] sm:$0xff] %v2786_v40  ;;  %v2789_v9 = vmax.f32 %v2725_v17, 0.0  ;;  %v2723_v0 = vadd.f32 %v5519_v32, %v2654_v26  ;;  %3096 = vmatmul.mubr.msk.bf16.gmra.mxu0 %vm2258_vm15, %v2197_v3  ;;  %v1908_v60 = vsel %vm1848_vm9, %v6247_v61, %v6246_v16 }
 0x238   : > { %v1184_v23 = vpop.permute.xlu1 %1183  ;;  %2818 = vst [vmem:[%s5540_s23] sm:$0xff] %v2754_v38  ;;  %v2757_v2 = vmax.f32 %v2693_v63, 0.0  ;;  %v2691_v21 = vadd.f32 %v5519_v32, %v2622_v48 }
 0x239   : > { %2853 = vst [vmem:[%s5540_s23 + $0x118] sm:$0xff] %v2789_v9  ;;  %v2787_v22 = vmax.f32 %v2723_v0, 0.0  ;;  %v1152_v7 = vpop.permute.xlu0 %1151  ;;  %v1971_v46 = vsel %vm1913_vm10, %v1906_v62, %v1184_v23 }
 0x23a   : > { %2821 = vst [vmem:[%s5540_s23 + $0x18] sm:$0xff] %v2757_v2  ;;  %v2755_v35 = vmax.f32 %v2691_v21, 0.0  ;;  %v1939_v13 = vsel %vm1913_vm10, %v1874_v57, %v1152_v7 }
 0x23b   : > { %2851 = vst [vmem:[%s5540_s23 + $0x108] sm:$0xff] %v2787_v22 }
 0x23c   : > { %v1186_v14 = vpop.permute.xlu1 %1185  ;;  %2819 = vst [vmem:[%s5540_s23 + $0x8] sm:$0xff] %v2755_v35 }
 0x23d   : > { %v1154_v29 = vpop.permute.xlu0 %1153  ;;  %v1973_v19 = vsel %vm1913_vm10, %v1908_v60, %v1186_v14 }
 0x23e   : > { %v1941_v36 = vsel %vm1913_vm10, %v1876_v54, %v1154_v29 }
 0x240   : > { %v1314_v53 = vpop.permute.xlu1 %1313 }
 0x241   : > { %v1282_v42 = vpop.permute.xlu0 %1281  ;;  %v2036_v44 = vsel %vm1978_vm11, %v1971_v46, %v1314_v53 }
 0x242   : > { %v2004_v1 = vsel %vm1978_vm11, %v1939_v13, %v1282_v42 }
 0x244   : > { %v1316_v33 = vpop.permute.xlu1 %1315 }
 0x245   : > { %v1284_v15 = vpop.permute.xlu0 %1283  ;;  %v2038_v28 = vsel %vm1978_vm11, %v1973_v19, %v1316_v33 }
 0x246   : > { %v2006_v10 = vsel %vm1978_vm11, %v1941_v36, %v1284_v15 }
 0x248   : > { %v1380_v34 = vpop.permute.xlu1 %1379 }
 0x249   : > { %v1348_v18 = vpop.permute.xlu0 %1347  ;;  %v2101_v39 = vsel %vm2043_vm12, %v2036_v44, %v1380_v34 }
 0x24a   : > { %v2069_v55 = vsel %vm2043_vm12, %v2004_v1, %v1348_v18 }
 0x24c   : > { %v1382_v30 = vpop.permute.xlu1 %1381 }
 0x24d   : > { %v1350_v12 = vpop.permute.xlu0 %1349  ;;  %v2103_v40 = vsel %vm2043_vm12, %v2038_v28, %v1382_v30 }
 0x24e   : > { %v2071_v0 = vsel %vm2043_vm12, %v2006_v10, %v1350_v12 }
 0x250   : > { %v1581_v24 = vpop.permute.xlu1 %1580 }
 0x251   : > { %v1549_v59 = vpop.permute.xlu0 %1548  ;;  %v2166_v31 = vsel %vm2108_vm13, %v2101_v39, %v1581_v24 }
 0x252   : > { %v2134_v17 = vsel %vm2108_vm13, %v2069_v55, %v1549_v59 }
 0x254   : > { %v1583_v52 = vpop.permute.xlu1 %1582 }
 0x255   : > { %v1551_v8 = vpop.permute.xlu0 %1550  ;;  %v2168_v23 = vsel %vm2108_vm13, %v2103_v40, %v1583_v52  ;;  %v6252_v40 = vld [vmem:[#allocation8_spill] sm:$0xff] }
 0x256   : > { %v3113_v49 = vpop.f32.mrf.mxu1  ;;  %v2136_v33 = vsel %vm2108_vm13, %v2071_v0, %v1551_v8 }
 0x257   : > { %v2659_v6 = vmul.f32 %v3113_v49, %v5503_v11  ;;  %v3081_v20 = vpop.f32.mrf.mxu0 }
 0x258   : > { %v1711_v25 = vpop.permute.xlu1 %1710  ;;  %v2627_v58 = vmul.f32 %v3081_v20, %v5503_v11  ;;  %v2505_v56 = vpop.f32.mrf.mxu1  ;;  %v6248_v20 = vld [vmem:[#allocation7_spill] sm:$0xff] }
 0x259   : > { %v2728_v50 = vadd.f32 %v5519_v32, %v2659_v6  ;;  %v2231_v45 = vsel %vm2173_vm14, %v2166_v31, %v1711_v25  ;;  %v2377_v51 = vpop.f32.mrf.mxu0  ;;  %v2657_v26 = vmul.f32 %v5503_v11, %v2505_v56  ;;  %v1679_v5 = vpop.permute.xlu0 %1678  ;;  %v6249_v25 = vld [vmem:[#allocation37_spill] sm:$0xff] }
 0x25a   : > { %3131 = vmatprep.mubr.msk.bf16.mxu1 %vm2258_vm15, %v2231_v45  ;;  %v2696_v38 = vadd.f32 %v5519_v32, %v2627_v58  ;;  %v2625_v48 = vmul.f32 %v5503_v11, %v2377_v51  ;;  %v2199_v3 = vsel %vm2173_vm14, %v2134_v17, %v1679_v5  ;;  %v3114_v9 = vpop.f32.mrf.mxu1  ;;  %v1878_v55 = vsel %vm1848_vm9, %v6249_v25, %v6248_v20  ;;  %v6250_v58 = vld [vmem:[#allocation72_spill] sm:$0xff]  ;;  %v6251_v45 = vld [vmem:[#allocation45_spill] sm:$0xff]  ;;  %v6253_v17 = vld [vmem:[#allocation46_spill] sm:$0xff] }
 0x25b   : > { %v2792_v63 = vmax.f32 %v2728_v50, 0.0  ;;  %v2726_v2 = vadd.f32 %v5519_v32, %v2657_v26  ;;  %v3082_v21 = vpop.f32.mrf.mxu0  ;;  %3099 = vmatprep.mubr.msk.bf16.mxu0 %vm2258_vm15, %v2199_v3  ;;  %v2660_v22 = vmul.f32 %v3114_v9, %v5503_v11  ;;  %v1880_v51 = vsel %vm1848_vm9, %v6253_v17, %v6252_v40 }
 0x25c   : > { %v1713_v7 = vpop.permute.xlu1 %1712  ;;  %v2760_v35 = vmax.f32 %v2696_v38, 0.0  ;;  %v2694_v14 = vadd.f32 %v5519_v32, %v2625_v48  ;;  %v2628_v29 = vmul.f32 %v3082_v21, %v5503_v11  ;;  %v2508_v42 = vpop.f32.mrf.mxu1 }
 0x25d   : > { %2856 = vst [vmem:[%s5540_s23 + $0x130] sm:$0xff] %v2792_v63  ;;  %v2233_v53 = vsel %vm2173_vm14, %v2168_v23, %v1713_v7  ;;  %v2790_v15 = vmax.f32 %v2726_v2, 0.0  ;;  %v2729_v34 = vadd.f32 %v5519_v32, %v2660_v22  ;;  %v2380_v18 = vpop.f32.mrf.mxu0  ;;  %v2658_v30 = vmul.f32 %v5503_v11, %v2508_v42  ;;  %v1681_v12 = vpop.permute.xlu0 %1680 }
 0x25e   : > { %3132 = vmatmul.mubr.msk.bf16.gmra.mxu1 %vm2258_vm15, %v2233_v53  ;;  %2824 = vst [vmem:[%s5540_s23 + $0x30] sm:$0xff] %v2760_v35  ;;  %v2758_v24 = vmax.f32 %v2694_v14, 0.0  ;;  %v2697_v59 = vadd.f32 %v5519_v32, %v2628_v29  ;;  %v2626_v27 = vmul.f32 %v5503_v11, %v2380_v18  ;;  %v2201_v37 = vsel %vm2173_vm14, %v2136_v33, %v1681_v12 }
 0x25f   : > { %2854 = vst [vmem:[%s5540_s23 + $0x120] sm:$0xff] %v2790_v15  ;;  %v2793_v62 = vmax.f32 %v2729_v34, 0.0  ;;  %v2727_v52 = vadd.f32 %v5519_v32, %v2658_v30  ;;  %3100 = vmatmul.mubr.msk.bf16.gmra.mxu0 %vm2258_vm15, %v2201_v37 }
 0x260   : > { %v987_v46 = vpop.permute.xlu1 %986  ;;  %2822 = vst [vmem:[%s5540_s23 + $0x20] sm:$0xff] %v2758_v24  ;;  %v2761_v43 = vmax.f32 %v2697_v59, 0.0  ;;  %v2695_v47 = vadd.f32 %v5519_v32, %v2626_v27 }
 0x261   : > { %2857 = vst [vmem:[%s5540_s23 + $0x138] sm:$0xff] %v2793_v62  ;;  %v2791_v54 = vmax.f32 %v2727_v52, 0.0  ;;  %v985_v41 = vpop.permute.xlu0 %984  ;;  %v1912_v50 = vsel %vm1848_vm9, %v6250_v58, %v987_v46 }
 0x262   : > { %2825 = vst [vmem:[%s5540_s23 + $0x38] sm:$0xff] %v2761_v43  ;;  %v2759_v4 = vmax.f32 %v2695_v47, 0.0  ;;  %v1910_v56 = vsel %vm1848_vm9, %v6251_v45, %v985_v41 }
 0x263   : > { %2855 = vst [vmem:[%s5540_s23 + $0x128] sm:$0xff] %v2791_v54 }
 0x264   : > { %v1188_v57 = vpop.permute.xlu1 %1187  ;;  %2823 = vst [vmem:[%s5540_s23 + $0x28] sm:$0xff] %v2759_v4 }
 0x265   : > { %v1156_v16 = vpop.permute.xlu0 %1155  ;;  %v1975_v26 = vsel %vm1913_vm10, %v1910_v56, %v1188_v57 }
 0x266   : > { %v1943_v5 = vsel %vm1913_vm10, %v1878_v55, %v1156_v16 }
 0x268   : > { %v1190_v61 = vpop.permute.xlu1 %1189 }
 0x269   : > { %v1158_v60 = vpop.permute.xlu0 %1157  ;;  %v1977_v38 = vsel %vm1913_vm10, %v1912_v50, %v1190_v61 }
 0x26a   : > { %v1945_v3 = vsel %vm1913_vm10, %v1880_v51, %v1158_v60 }
 0x26c   : > { %v1318_v44 = vpop.permute.xlu1 %1317 }
 0x26d   : > { %v1286_v8 = vpop.permute.xlu0 %1285  ;;  %v2040_v9 = vsel %vm1978_vm11, %v1975_v26, %v1318_v44 }
 0x26e   : > { %v2008_v21 = vsel %vm1978_vm11, %v1943_v5, %v1286_v8 }
 0x270   : > { %v1320_v49 = vpop.permute.xlu1 %1319 }
 0x271   : > { %v1288_v13 = vpop.permute.xlu0 %1287  ;;  %v2042_v22 = vsel %vm1978_vm11, %v1977_v38, %v1320_v49 }
 0x272   : > { %v2010_v49 = vsel %vm1978_vm11, %v1945_v3, %v1288_v13 }
 0x274   : > { %v1384_v19 = vpop.permute.xlu1 %1383 }
 0x275   : > { %v1352_v39 = vpop.permute.xlu0 %1351  ;;  %v2105_v7 = vsel %vm2043_vm12, %v2040_v9, %v1384_v19 }
 0x276   : > { %v2073_v53 = vsel %vm2043_vm12, %v2008_v21, %v1352_v39 }
 0x278   : > { %v1386_v6 = vpop.permute.xlu1 %1385 }
 0x279   : > { %v1354_v36 = vpop.permute.xlu0 %1353  ;;  %v2107_v18 = vsel %vm2043_vm12, %v2042_v22, %v1386_v6 }
 0x27c   : > { %v1585_v1 = vpop.permute.xlu1 %1584 }
 0x27d   : > { %v1553_v28 = vpop.permute.xlu0 %1552  ;;  %v2170_v30 = vsel %vm2108_vm13, %v2105_v7, %v1585_v1 }
 0x27e   : > { %v3117_v31 = vpop.f32.mrf.mxu1  ;;  %v2138_v47 = vsel %vm2108_vm13, %v2073_v53, %v1553_v28  ;;  %v2075_v28 = vsel %vm2043_vm12, %v2010_v49, %v1354_v36 }
 0x27f   : > { %v2663_v10 = vmul.f32 %v3117_v31, %v5503_v11  ;;  %v3085_v63 = vpop.f32.mrf.mxu0 }
 0x280   : > { %v1587_v48 = vpop.permute.xlu1 %1586  ;;  %v2631_v0 = vmul.f32 %v3085_v63, %v5503_v11  ;;  %v2521_v2 = vpop.f32.mrf.mxu1 }
 0x281   : > { %v2732_v23 = vadd.f32 %v5519_v32, %v2663_v10  ;;  %v2393_v35 = vpop.f32.mrf.mxu0  ;;  %v2661_v14 = vmul.f32 %v5503_v11, %v2521_v2  ;;  %v1555_v29 = vpop.permute.xlu0 %1554  ;;  %v2172_v19 = vsel %vm2108_vm13, %v2107_v18, %v1587_v48 }
 0x282   : > { %v2700_v42 = vadd.f32 %v5519_v32, %v2631_v0  ;;  %v2629_v15 = vmul.f32 %v5503_v11, %v2393_v35  ;;  %v3118_v34 = vpop.f32.mrf.mxu1  ;;  %v2140_v25 = vsel %vm2108_vm13, %v2075_v28, %v1555_v29 }
 0x283   : > { %v2796_v33 = vmax.f32 %v2732_v23, 0.0  ;;  %v2730_v12 = vadd.f32 %v5519_v32, %v2661_v14  ;;  %v3086_v24 = vpop.f32.mrf.mxu0  ;;  %v2664_v59 = vmul.f32 %v3118_v34, %v5503_v11 }
 0x284   : > { %v1715_v27 = vpop.permute.xlu1 %1714  ;;  %v2764_v37 = vmax.f32 %v2700_v42, 0.0  ;;  %v2698_v62 = vadd.f32 %v5519_v32, %v2629_v15  ;;  %v2632_v52 = vmul.f32 %v3086_v24, %v5503_v11  ;;  %v2524_v43 = vpop.f32.mrf.mxu1 }
 0x285   : > { %2860 = vst [vmem:[%s5540_s23 + $0x150] sm:$0xff] %v2796_v33  ;;  %v2235_v46 = vsel %vm2173_vm14, %v2170_v30, %v1715_v27  ;;  %v2794_v54 = vmax.f32 %v2730_v12, 0.0  ;;  %v2733_v41 = vadd.f32 %v5519_v32, %v2664_v59  ;;  %v2396_v4 = vpop.f32.mrf.mxu0  ;;  %v2662_v57 = vmul.f32 %v5503_v11, %v2524_v43  ;;  %v1683_v16 = vpop.permute.xlu0 %1682 }
 0x286   : > { %3135 = vmatprep.mubr.msk.bf16.mxu1 %vm2258_vm15, %v2235_v46  ;;  %2828 = vst [vmem:[%s5540_s23 + $0x50] sm:$0xff] %v2764_v37  ;;  %v2762_v61 = vmax.f32 %v2698_v62, 0.0  ;;  %v2701_v60 = vadd.f32 %v5519_v32, %v2632_v52  ;;  %v2630_v44 = vmul.f32 %v5503_v11, %v2396_v4  ;;  %v2203_v8 = vsel %vm2173_vm14, %v2138_v47, %v1683_v16 }
 0x287   : > { %2858 = vst [vmem:[%s5540_s23 + $0x140] sm:$0xff] %v2794_v54  ;;  %v2797_v39 = vmax.f32 %v2733_v41, 0.0  ;;  %v2731_v6 = vadd.f32 %v5519_v32, %v2662_v57  ;;  %3103 = vmatprep.mubr.msk.bf16.mxu0 %vm2258_vm15, %v2203_v8 }
 0x288   : > { %v1717_v1 = vpop.permute.xlu1 %1716  ;;  %2826 = vst [vmem:[%s5540_s23 + $0x40] sm:$0xff] %v2762_v61  ;;  %v2765_v31 = vmax.f32 %v2701_v60, 0.0  ;;  %v2699_v20 = vadd.f32 %v5519_v32, %v2630_v44 }
 0x289   : > { %v2237_v13 = vsel %vm2173_vm14, %v2172_v19, %v1717_v1  ;;  %2861 = vst [vmem:[%s5540_s23 + $0x158] sm:$0xff] %v2797_v39  ;;  %v2795_v55 = vmax.f32 %v2731_v6, 0.0  ;;  %v1685_v58 = vpop.permute.xlu0 %1684 }
 0x28a   : > { %3136 = vmatmul.mubr.msk.bf16.gmra.mxu1 %vm2258_vm15, %v2237_v13  ;;  %2829 = vst [vmem:[%s5540_s23 + $0x58] sm:$0xff] %v2765_v31  ;;  %v2763_v50 = vmax.f32 %v2699_v20, 0.0  ;;  %v2205_v45 = vsel %vm2173_vm14, %v2140_v25, %v1685_v58 }
 0x28b   : > { %2859 = vst [vmem:[%s5540_s23 + $0x148] sm:$0xff] %v2795_v55  ;;  %3104 = vmatmul.mubr.msk.bf16.gmra.mxu0 %vm2258_vm15, %v2205_v45 }
 0x28c   : > { %2827 = vst [vmem:[%s5540_s23 + $0x48] sm:$0xff] %v2763_v50 }
 0x2a6   : > { %v3121_v36 = vpop.f32.mrf.mxu1 }
 0x2a7   : > { %v2667_v56 = vmul.f32 %v3121_v36, %v5503_v11  ;;  %v3089_v10 = vpop.f32.mrf.mxu0 }
 0x2a8   : > { %v2537_v40 = vpop.f32.mrf.mxu1  ;;  %v2635_v17 = vmul.f32 %v3089_v10, %v5503_v11 }
 0x2a9   : > { %v2736_v51 = vadd.f32 %v5519_v32, %v2667_v56  ;;  %v2665_v26 = vmul.f32 %v5503_v11, %v2537_v40  ;;  %v2409_v5 = vpop.f32.mrf.mxu0 }
 0x2aa   : > { %v3122_v38 = vpop.f32.mrf.mxu1  ;;  %v2704_v63 = vadd.f32 %v5519_v32, %v2635_v17  ;;  %v2633_v3 = vmul.f32 %v5503_v11, %v2409_v5 }
 0x2ab   : > { %v2800_v48 = vmax.f32 %v2736_v51, 0.0  ;;  %v2734_v9 = vadd.f32 %v5519_v32, %v2665_v26  ;;  %v3090_v0 = vpop.f32.mrf.mxu0  ;;  %v2668_v23 = vmul.f32 %v3122_v38, %v5503_v11 }
 0x2ac   : > { %v2540_v2 = vpop.f32.mrf.mxu1  ;;  %v2768_v21 = vmax.f32 %v2704_v63, 0.0  ;;  %v2702_v22 = vadd.f32 %v5519_v32, %v2633_v3  ;;  %v2636_v35 = vmul.f32 %v3090_v0, %v5503_v11 }
 0x2ad   : > { %2864 = vst [vmem:[%s5540_s23 + $0x170] sm:$0xff] %v2800_v48  ;;  %v2798_v7 = vmax.f32 %v2734_v9, 0.0  ;;  %v2737_v14 = vadd.f32 %v5519_v32, %v2668_v23  ;;  %v2412_v29 = vpop.f32.mrf.mxu0  ;;  %v2666_v53 = vmul.f32 %v5503_v11, %v2540_v2 }
 0x2ae   : > { %2832 = vst [vmem:[%s5540_s23 + $0x70] sm:$0xff] %v2768_v21  ;;  %v2766_v42 = vmax.f32 %v2702_v22, 0.0  ;;  %v2705_v33 = vadd.f32 %v5519_v32, %v2636_v35  ;;  %v2634_v15 = vmul.f32 %v5503_v11, %v2412_v29 }
 0x2af   : > { %2862 = vst [vmem:[%s5540_s23 + $0x160] sm:$0xff] %v2798_v7  ;;  %v2801_v34 = vmax.f32 %v2737_v14, 0.0  ;;  %v2735_v18 = vadd.f32 %v5519_v32, %v2666_v53 }
 0x2b0   : > { %2830 = vst [vmem:[%s5540_s23 + $0x60] sm:$0xff] %v2766_v42  ;;  %v2769_v30 = vmax.f32 %v2705_v33, 0.0  ;;  %v2703_v12 = vadd.f32 %v5519_v32, %v2634_v15 }
 0x2b1   : > { %2865 = vst [vmem:[%s5540_s23 + $0x178] sm:$0xff] %v2801_v34  ;;  %v2799_v24 = vmax.f32 %v2735_v18, 0.0 }
 0x2b2   : > { %2833 = vst [vmem:[%s5540_s23 + $0x78] sm:$0xff] %v2769_v30  ;;  %v2767_v59 = vmax.f32 %v2703_v12, 0.0 }
 0x2b3   : > { %2863 = vst [vmem:[%s5540_s23 + $0x168] sm:$0xff] %v2799_v24 }
 0x2b4   : > { %2831 = vst [vmem:[%s5540_s23 + $0x68] sm:$0xff] %v2767_v59 }
 0x2ce   : > { %v3125_v27 = vpop.f32.mrf.mxu1 }
 0x2cf   : > { %v2671_v37 = vmul.f32 %v3125_v27, %v5503_v11  ;;  %v3093_v62 = vpop.f32.mrf.mxu0 }
 0x2d0   : > { %v2553_v52 = vpop.f32.mrf.mxu1  ;;  %v2639_v46 = vmul.f32 %v3093_v62, %v5503_v11 }
 0x2d1   : > { %v2740_v43 = vadd.f32 %v5519_v32, %v2671_v37  ;;  %v2669_v47 = vmul.f32 %v5503_v11, %v2553_v52  ;;  %v2425_v54 = vpop.f32.mrf.mxu0 }
 0x2d2   : > { %v3126_v41 = vpop.f32.mrf.mxu1  ;;  %v2708_v4 = vadd.f32 %v5519_v32, %v2639_v46  ;;  %v2637_v16 = vmul.f32 %v5503_v11, %v2425_v54 }
 0x2d3   : > { %v2804_v57 = vmax.f32 %v2740_v43, 0.0  ;;  %v2738_v61 = vadd.f32 %v5519_v32, %v2669_v47  ;;  %v3094_v60 = vpop.f32.mrf.mxu0  ;;  %v2672_v44 = vmul.f32 %v3126_v41, %v5503_v11 }
 0x2d4   : > { %v2556_v8 = vpop.f32.mrf.mxu1  ;;  %v2772_v49 = vmax.f32 %v2708_v4, 0.0  ;;  %v2706_v19 = vadd.f32 %v5519_v32, %v2637_v16  ;;  %v2640_v6 = vmul.f32 %v3094_v60, %v5503_v11 }
 0x2d5   : > { %2868 = vst [vmem:[%s5540_s23 + $0x190] sm:$0xff] %v2804_v57  ;;  %v2802_v39 = vmax.f32 %v2738_v61, 0.0  ;;  %v2741_v1 = vadd.f32 %v5519_v32, %v2672_v44  ;;  %v2428_v28 = vpop.f32.mrf.mxu0  ;;  %v2670_v31 = vmul.f32 %v5503_v11, %v2556_v8 }
 0x2d6   : > { %2836 = vst [vmem:[%s5540_s23 + $0x90] sm:$0xff] %v2772_v49  ;;  %v2770_v20 = vmax.f32 %v2706_v19, 0.0  ;;  %v2709_v13 = vadd.f32 %v5519_v32, %v2640_v6  ;;  %v2638_v25 = vmul.f32 %v5503_v11, %v2428_v28 }
 0x2d7   : > { %2866 = vst [vmem:[%s5540_s23 + $0x180] sm:$0xff] %v2802_v39  ;;  %v2805_v55 = vmax.f32 %v2741_v1, 0.0  ;;  %v2739_v58 = vadd.f32 %v5519_v32, %v2670_v31 }
 0x2d8   : > { %2834 = vst [vmem:[%s5540_s23 + $0x80] sm:$0xff] %v2770_v20  ;;  %v2773_v50 = vmax.f32 %v2709_v13, 0.0  ;;  %v2707_v45 = vadd.f32 %v5519_v32, %v2638_v25 }
 0x2d9   : > { %2869 = vst [vmem:[%s5540_s23 + $0x198] sm:$0xff] %v2805_v55  ;;  %v2803_v36 = vmax.f32 %v2739_v58, 0.0 }
 0x2da   : > { %2837 = vst [vmem:[%s5540_s23 + $0x98] sm:$0xff] %v2773_v50  ;;  %v2771_v56 = vmax.f32 %v2707_v45, 0.0 }
 0x2db   : > { %2867 = vst [vmem:[%s5540_s23 + $0x188] sm:$0xff] %v2803_v36 }
 0x2dc   : > { %2835 = vst [vmem:[%s5540_s23 + $0x88] sm:$0xff] %v2771_v56 }
 0x2f6   : > { %v3129_v10 = vpop.f32.mrf.mxu1 }
 0x2f7   : > { %v2675_v40 = vmul.f32 %v3129_v10, %v5503_v11  ;;  %v3097_v17 = vpop.f32.mrf.mxu0 }
 0x2f8   : > { %v2569_v51 = vpop.f32.mrf.mxu1  ;;  %v2643_v26 = vmul.f32 %v3097_v17, %v5503_v11 }
 0x2f9   : > { %v2744_v5 = vadd.f32 %v5519_v32, %v2675_v40  ;;  %v2673_v38 = vmul.f32 %v5503_v11, %v2569_v51  ;;  %v2441_v63 = vpop.f32.mrf.mxu0 }
 0x2fa   : > { %v3130_v48 = vpop.f32.mrf.mxu1  ;;  %v2712_v3 = vadd.f32 %v5519_v32, %v2643_v26  ;;  %v2641_v0 = vmul.f32 %v5503_v11, %v2441_v63 }
 0x2fb   : > { %v2808_v9 = vmax.f32 %v2744_v5, 0.0  ;;  %v2742_v23 = vadd.f32 %v5519_v32, %v2673_v38  ;;  %v3098_v2 = vpop.f32.mrf.mxu0  ;;  %v2676_v21 = vmul.f32 %v3130_v48, %v5503_v11 }
 0x2fc   : > { %v2572_v22 = vpop.f32.mrf.mxu1  ;;  %v2776_v7 = vmax.f32 %v2712_v3, 0.0  ;;  %v2710_v35 = vadd.f32 %v5519_v32, %v2641_v0  ;;  %v2644_v29 = vmul.f32 %v3098_v2, %v5503_v11 }
 0x2fd   : > { %2872 = vst [vmem:[%s5540_s23 + $0x1b0] sm:$0xff] %v2808_v9  ;;  %v2806_v14 = vmax.f32 %v2742_v23, 0.0  ;;  %v2745_v53 = vadd.f32 %v5519_v32, %v2676_v21  ;;  %v2444_v42 = vpop.f32.mrf.mxu0  ;;  %v2674_v33 = vmul.f32 %v5503_v11, %v2572_v22 }
 0x2fe   : > { %2840 = vst [vmem:[%s5540_s23 + $0xb0] sm:$0xff] %v2776_v7  ;;  %v2774_v15 = vmax.f32 %v2710_v35, 0.0  ;;  %v2713_v34 = vadd.f32 %v5519_v32, %v2644_v29  ;;  %v2642_v18 = vmul.f32 %v5503_v11, %v2444_v42 }
 0x2ff   : > { %2870 = vst [vmem:[%s5540_s23 + $0x1a0] sm:$0xff] %v2806_v14  ;;  %v2809_v30 = vmax.f32 %v2745_v53, 0.0  ;;  %v2743_v12 = vadd.f32 %v5519_v32, %v2674_v33 }
 0x300   : > { %2838 = vst [vmem:[%s5540_s23 + $0xa0] sm:$0xff] %v2774_v15  ;;  %v2777_v24 = vmax.f32 %v2713_v34, 0.0  ;;  %v2711_v59 = vadd.f32 %v5519_v32, %v2642_v18 }
 0x301   : > { %2873 = vst [vmem:[%s5540_s23 + $0x1b8] sm:$0xff] %v2809_v30  ;;  %v2807_v27 = vmax.f32 %v2743_v12, 0.0 }
 0x302   : > { %2841 = vst [vmem:[%s5540_s23 + $0xb8] sm:$0xff] %v2777_v24  ;;  %v2775_v37 = vmax.f32 %v2711_v59, 0.0 }
 0x303   : > { %2871 = vst [vmem:[%s5540_s23 + $0x1a8] sm:$0xff] %v2807_v27 }
 0x304   : > { %2839 = vst [vmem:[%s5540_s23 + $0xa8] sm:$0xff] %v2775_v37 }
 0x31e   : > { %v3133_v62 = vpop.f32.mrf.mxu1 }
 0x31f   : > { %v2679_v52 = vmul.f32 %v3133_v62, %v5503_v11  ;;  %v3101_v46 = vpop.f32.mrf.mxu0 }
 0x320   : > { %v2585_v43 = vpop.f32.mrf.mxu1  ;;  %v2647_v47 = vmul.f32 %v3101_v46, %v5503_v11 }
 0x321   : > { %v2748_v54 = vadd.f32 %v5519_v32, %v2679_v52  ;;  %v2677_v41 = vmul.f32 %v5503_v11, %v2585_v43  ;;  %v2457_v4 = vpop.f32.mrf.mxu0 }
 0x322   : > { %v3134_v57 = vpop.f32.mrf.mxu1  ;;  %v2716_v16 = vadd.f32 %v5519_v32, %v2647_v47  ;;  %v2645_v60 = vmul.f32 %v5503_v11, %v2457_v4 }
 0x323   : > { %v2812_v61 = vmax.f32 %v2748_v54, 0.0  ;;  %v2746_v44 = vadd.f32 %v5519_v32, %v2677_v41  ;;  %v3102_v8 = vpop.f32.mrf.mxu0  ;;  %v2680_v49 = vmul.f32 %v3134_v57, %v5503_v11 }
 0x324   : > { %v2588_v19 = vpop.f32.mrf.mxu1  ;;  %v2780_v39 = vmax.f32 %v2716_v16, 0.0  ;;  %v2714_v6 = vadd.f32 %v5519_v32, %v2645_v60  ;;  %v2648_v28 = vmul.f32 %v3102_v8, %v5503_v11 }
 0x325   : > { %2876 = vst [vmem:[%s5540_s23 + $0x1d0] sm:$0xff] %v2812_v61  ;;  %v2810_v1 = vmax.f32 %v2746_v44, 0.0  ;;  %v2749_v31 = vadd.f32 %v5519_v32, %v2680_v49  ;;  %v2460_v20 = vpop.f32.mrf.mxu0  ;;  %v2678_v13 = vmul.f32 %v5503_v11, %v2588_v19 }
 0x326   : > { %2844 = vst [vmem:[%s5540_s23 + $0xd0] sm:$0xff] %v2780_v39  ;;  %v2778_v25 = vmax.f32 %v2714_v6, 0.0  ;;  %v2717_v55 = vadd.f32 %v5519_v32, %v2648_v28  ;;  %v2646_v58 = vmul.f32 %v5503_v11, %v2460_v20 }
 0x327   : > { %2874 = vst [vmem:[%s5540_s23 + $0x1c0] sm:$0xff] %v2810_v1  ;;  %v2813_v50 = vmax.f32 %v2749_v31, 0.0  ;;  %v2747_v45 = vadd.f32 %v5519_v32, %v2678_v13 }
 0x328   : > { %2842 = vst [vmem:[%s5540_s23 + $0xc0] sm:$0xff] %v2778_v25  ;;  %v2781_v36 = vmax.f32 %v2717_v55, 0.0  ;;  %v2715_v56 = vadd.f32 %v5519_v32, %v2646_v58 }
 0x329   : > { %2877 = vst [vmem:[%s5540_s23 + $0x1d8] sm:$0xff] %v2813_v50  ;;  %v2811_v10 = vmax.f32 %v2747_v45, 0.0 }
 0x32a   : > { %2845 = vst [vmem:[%s5540_s23 + $0xd8] sm:$0xff] %v2781_v36  ;;  %v2779_v40 = vmax.f32 %v2715_v56, 0.0 }
 0x32b   : > { %2875 = vst [vmem:[%s5540_s23 + $0x1c8] sm:$0xff] %v2811_v10 }
 0x32c   : > { %2843 = vst [vmem:[%s5540_s23 + $0xc8] sm:$0xff] %v2779_v40 }
 0x34a   : > { %v3137_v17 = vpop.f32.mrf.mxu1 }
 0x34b   : > { %v2683_v51 = vmul.f32 %v3137_v17, %v5503_v11  ;;  %v3105_v26 = vpop.f32.mrf.mxu0 }
 0x34c   : > { %v2601_v5 = vpop.f32.mrf.mxu1  ;;  %v2651_v38 = vmul.f32 %v3105_v26, %v5503_v11 }
 0x34d   : > { %v2752_v63 = vadd.f32 %v5519_v32, %v2683_v51  ;;  %v2681_v48 = vmul.f32 %v5503_v11, %v2601_v5  ;;  %v2473_v3 = vpop.f32.mrf.mxu0 }
 0x34e   : > { %v3138_v9 = vpop.f32.mrf.mxu1  ;;  %v2720_v0 = vadd.f32 %v5519_v32, %v2651_v38  ;;  %v2649_v2 = vmul.f32 %v5503_v11, %v2473_v3 }
 0x34f   : > { %v2816_v23 = vmax.f32 %v2752_v63, 0.0  ;;  %v2750_v21 = vadd.f32 %v5519_v32, %v2681_v48  ;;  %v3106_v22 = vpop.f32.mrf.mxu0  ;;  %v2684_v7 = vmul.f32 %v3138_v9, %v5503_v11 }
 0x350   : > { %v2604_v35 = vpop.f32.mrf.mxu1  ;;  %v2784_v14 = vmax.f32 %v2720_v0, 0.0  ;;  %v2718_v29 = vadd.f32 %v5519_v32, %v2649_v2  ;;  %v2652_v42 = vmul.f32 %v3106_v22, %v5503_v11 }
 0x351   : > { %2880 = vst [vmem:[%s5540_s23 + $0x1f0] sm:$0xff] %v2816_v23  ;;  %v2814_v53 = vmax.f32 %v2750_v21, 0.0  ;;  %v2753_v33 = vadd.f32 %v5519_v32, %v2684_v7  ;;  %v2476_v15 = vpop.f32.mrf.mxu0  ;;  %v2682_v34 = vmul.f32 %v5503_v11, %v2604_v35 }
 0x352   : > { %2848 = vst [vmem:[%s5540_s23 + $0xf0] sm:$0xff] %v2784_v14  ;;  %v2782_v18 = vmax.f32 %v2718_v29, 0.0  ;;  %v2721_v30 = vadd.f32 %v5519_v32, %v2652_v42  ;;  %v2650_v12 = vmul.f32 %v5503_v11, %v2476_v15 }
 0x353   : > { %2878 = vst [vmem:[%s5540_s23 + $0x1e0] sm:$0xff] %v2814_v53  ;;  %v2817_v24 = vmax.f32 %v2753_v33, 0.0  ;;  %v2751_v59 = vadd.f32 %v5519_v32, %v2682_v34 }
 0x354   : > { %2846 = vst [vmem:[%s5540_s23 + $0xe0] sm:$0xff] %v2782_v18  ;;  %v2785_v27 = vmax.f32 %v2721_v30, 0.0  ;;  %v2719_v37 = vadd.f32 %v5519_v32, %v2650_v12 }
 0x355   : > { %2881 = vst [vmem:[%s5540_s23 + $0x1f8] sm:$0xff] %v2817_v24  ;;  %v2815_v62 = vmax.f32 %v2751_v59, 0.0 }
 0x356   : > { %2849 = vst [vmem:[%s5540_s23 + $0xf8] sm:$0xff] %v2785_v27  ;;  %v2783_v52 = vmax.f32 %v2719_v37, 0.0 }
 0x357   : > { %2879 = vst [vmem:[%s5540_s23 + $0x1e8] sm:$0xff] %v2815_v62 }
 0x358   : > { %2847 = vst [vmem:[%s5540_s23 + $0xe8] sm:$0xff] %v2783_v52 }
 0x359 PF: > { %s14_s15 = sadd.s32 1, %s3241_s15  }
 0x35a   : > { %p11_p6 = scmp.ge.s32.totalorder %s14_s15, 4  }
 0x35c   :  { %13 = sbr.rel (!%p11_p6) target bundleno = 1 (0x1), region = 69 }

// kernel: conv_block_forward.2
= control target key start
LH: loop header
LB: loop body
LE: loop exit
PB: predicated region body
PF: predicated region fallthrough
CT: control target
= control target key end

     0   :  { %s5739_s12 = smov 0   ;;  %s10358_s0 = inlined_call_operand.vmem [shape: bf16[1536,4], index: 0, kind: input, shape index: {}]   ;;  %s10359_s1 = inlined_call_operand.vmem [shape: bf16[2,48,4], index: 1, kind: input, shape index: {}]   ;;  %s10360_s2 = inlined_call_operand.vmem [shape: bf16[36,128], index: 2, kind: input, shape index: {}]   ;;  %s10361_s3 = inlined_call_operand.vmem [shape: f32[2,2,128], index: 3, kind: output, shape index: {}]  }
   0x1 LB: > { %s5745_s13 = sadd.s32 4294967295, %s5709_s12   ;;  %p5039_p0 = scmp.ge.s32.totalorder %s5709_s12, 1  ;;  %s5709_s12 = sphi %s5739_s12, %s13_s12  }
   0x2   : > { %p148_p1 = scmp.lt.s32.totalorder %s5709_s12, 3 }
   0x4   : > { %p149_p2 = pnand %p5039_p0, %p148_p1 }
   0x6   : > { %152 = sbr.rel (%p149_p2) target bundleno = 1016 (0x3f8), region = 32 }
   0xb   : > { %s5040_s14 = sshll.u32 %s5745_s13, 6  ;;  %vm437_vm0 = vsmask.f32 7424  ;;  %s5711_s19 = smov 4   ;;  %vm958_vm1 = vsmask.f32 6400 }
   0xc   : > { %p177_p3 = scmp.lt.s32.totalorder %s5040_s14, 191  ;;  %p182_p4 = scmp.lt.s32.totalorder %s5745_s13, 1  ;;  %vm10541_vm2 = vsmask.f32 5376  ;;  %vm762_vm3 = vcmask 1046528   ;;  %vm2293_vm4 = vcmask 1041408  }
   0xd   : > { %s5712_s25 = smov 8   ;;  %s5713_s26 = smov 12   ;;  %vm1161_vm5 = vcmask 1045504   ;;  %vm10542_vm6 = vcmask 1044480   ;;  %vm1688_vm7 = vcmask 31744   ;;  %vm10487_vm8 = vcmask 64512  }
   0xe   : > { %s11197_s14 = smov (!%p177_p3, %s5040_s14), 191  ;;  %s5714_s29 = smov 16   ;;  %vm10569_vm9 = vcmask 97280   ;;  %vm10564_vm10 = vcmask 130048   ;;  %vm10560_vm11 = vcmask 162816   ;;  %vm10562_vm12 = vcmask 195584  }
   0xf   : > { %s5041_s15 = sshll.u32 %s11197_s14, 2  ;;  %s5715_s5 = smov 20   ;;  %vm10561_vm13 = vcmask 228352   ;;  %vm10563_vm14 = vcmask 261120   ;;  %vm10548_vm15 = vcmask 293888  }
  0x10   : > { %s5753_s18 = scalar_lea.vmem %s10358_s0, %s5041_s15  ;;  %s5716_s8 = smov 24  }
  0x11   : > { %v5756_v0 = vld [vmem:[%s5753_s18 + $0x10] sm:$0xff]   ;;  %v5759_v1 = vld [vmem:[%s5753_s18 + $0x18] sm:$0xff]   ;;  %v5771_v5 = vld [vmem:[%s5753_s18] sm:$0xff]   ;;  %s5987_s20 = scalar_select %p182_p4, %s5745_s13, 1 }
  0x12   : > { %v5762_v2 = vshll.u32 %v5756_v0, 16  ;;  %v5765_v3 = vshrl.u32 %v5756_v0, 16  ;;  %v5768_v4 = vshll.u32 %v5759_v1, 16  ;;  %v5774_v6 = vld [vmem:[%s5753_s18 + $0x8] sm:$0xff]   ;;  %v5777_v7 = vshrl.u32 %v5759_v1, 16  ;;  %v5784_v12 = vld [vmem:[%s5753_s18 + $0x20] sm:$0xff]  }
  0x13   : > { %v439_v10 = vshrl.u32 %v5771_v5, 16  ;;  %v441_v11 = vshll.u32 %v5771_v5, 16  ;;  %v5787_v13 = vld [vmem:[%s5753_s18 + $0x28] sm:$0xff]   ;;  %v10362_v14 = vshll.u32 %v5774_v6, 16  ;;  %v10363_v15 = vshrl.u32 %v5774_v6, 16  ;;  %v5799_v21 = vld [vmem:[%s5753_s18 + $0x30] sm:$0xff]  }
  0x14   : > { %v456_v8 = vrot.slane %v5762_v2, 1  ;;  %v464_v9 = vrot.slane %v5768_v4, 1  ;;  %v5794_v19 = vshll.u32 %v5784_v12, 16  ;;  %v5802_v22 = vshll.u32 %v5787_v13, 16  ;;  %v5811_v25 = vld [vmem:[%s5753_s18 + $0x38] sm:$0xff]   ;;  %v5816_v29 = vld [vmem:[%s5753_s18 + $0x40] sm:$0xff]  }
  0x15   : > { %v443_v17 = vrot.slane %v441_v11, 1  ;;  %v448_v20 = vrot.slane %v10362_v14, 1  ;;  %v5805_v23 = vshrl.u32 %v5787_v13, 16  ;;  %v5808_v24 = vshrl.u32 %v5784_v12, 16  ;;  %v5831_v36 = vld [vmem:[%s5753_s18 + $0x48] sm:$0xff]   ;;  %v5849_v45 = vld [vmem:[%s5753_s18 + $0x50] sm:$0xff]  }
  0x16   : > { %v460_v16 = vor.u32 %v5765_v3, %v456_v8  ;;  %v468_v18 = vor.u32 %v5777_v7, %v464_v9  ;;  %v472_v28 = vrot.slane %v5794_v19, 1  ;;  %v480_v31 = vrot.slane %v5802_v22, 1  ;;  %v5859_v48 = vld [vmem:[%s5753_s18 + $0x58] sm:$0xff]   ;;  %v5873_v55 = vld [vmem:[%s5753_s18 + $0x60] sm:$0xff]   ;;  %v5879_v57 = vld [vmem:[%s5753_s18 + $0x68] sm:$0xff]   ;;  %s5358_s21 = smul.u32 24, %s5987_s20 }
  0x17   : > { %v444_v27 = vor.u32 %v443_v17, %v439_v10  ;;  %v452_v30 = vor.u32 %v10363_v15, %v448_v20  ;;  %v5823_v32 = vshll.u32 %v5799_v21, 16  ;;  %v5828_v35 = vshll.u32 %v5811_v25, 16  ;;  %v5892_v63 = vld [vmem:[%s5753_s18 + $0x70] sm:$0xff]   ;;  %v5969_v15 = vld [vmem:[%s5753_s18 + $0xa0] sm:$0xff]   ;;  %s5717_s9 = smov 28   ;;  %s5718_s10 = smov 32  }
  0x18   : > { %v465_v26 = vsel %vm437_vm0, %v460_v16, %v464_v9  ;;  %v473_v34 = vsel %vm437_vm0, %v468_v18, %v472_v28  ;;  %v484_v37 = vor.u32 %v5805_v23, %v480_v31  ;;  %v476_v39 = vor.u32 %v5808_v24, %v472_v28  ;;  %v5914_v28 = vld [vmem:[%s5753_s18 + $0x80] sm:$0xff]   ;;  %s6034_s24 = scalar_lea.vmem %s10359_s1, %s5358_s21  ;;  %s5114_s11 = sshll.u32 %s5745_s13, 9 }
  0x19   : > { %702 = vrot.lane.b32.xlu1 %v465_v26, %s5711_s19  ;;  %v449_v33 = vsel %vm437_vm0, %v444_v27, %v448_v20  ;;  %v488_v38 = vrot.slane %v5823_v32, 1  ;;  %v5838_v40 = vshrl.u32 %v5811_v25, 16  ;;  %v457_v41 = vsel %vm437_vm0, %v452_v30, %v456_v8  ;;  %v5911_v27 = vld [vmem:[%s5753_s18 + $0x78] sm:$0xff]   ;;  %s5043_s13 = sshll.u32 %s5987_s20, 1 }
  0x1a   : > { %698 = vrot.lane.b32.xlu0 %v449_v33, %s5711_s19  ;;  %v496_v42 = vrot.slane %v5828_v35, 1  ;;  %v5843_v43 = vshll.u32 %v5816_v29, 16  ;;  %v5846_v44 = vshrl.u32 %v5799_v21, 16  ;;  %v5853_v46 = vshll.u32 %v5831_v36, 16  ;;  %s190_s16 = scalar_lea.vmem %s10361_s3, %s5043_s13 }
  0x1b   : > { %v5856_v47 = vshrl.u32 %v5831_v36, 16  ;;  %v489_v49 = vsel %vm437_vm0, %v484_v37, %v488_v38  ;;  %v5865_v52 = vshll.u32 %v5849_v45, 16  ;;  %v5870_v54 = vshrl.u32 %v5816_v29, 16 }
  0x1c   : > { %v500_v50 = vor.u32 %v5838_v40, %v496_v42  ;;  %v504_v51 = vrot.slane %v5843_v43, 1  ;;  %v512_v53 = vrot.slane %v5853_v46, 1  ;;  %v5876_v56 = vshll.u32 %v5859_v48, 16 }
  0x1d   : > { %704 = vrot.lane.b32.xlu1 %v473_v34, %s5711_s19  ;;  %10576 = vst [vmem:[#allocation2_spill] sm:$0xff] %v5865_v52  ;;  %v481_v58 = vsel %vm437_vm0, %v476_v39, %v480_v31  ;;  %v492_v59 = vor.u32 %v5846_v44, %v488_v38  ;;  %v520_v60 = vrot.slane %v5865_v52, 1  ;;  %v5885_v61 = vshrl.u32 %v5859_v48, 16  ;;  %v5921_v31 = vld [vmem:[%s5753_s18 + $0x88] sm:$0xff]  }
  0x1e   : > { %700 = vrot.lane.b32.xlu0 %v457_v41, %s5711_s19  ;;  %10577 = vst [vmem:[#allocation3_spill] sm:$0xff] %v5876_v56  ;;  %v5889_v62 = vshll.u32 %v5873_v55, 16  ;;  %v505_v8 = vsel %vm437_vm0, %v500_v50, %v504_v51  ;;  %v516_v9 = vor.u32 %v5856_v47, %v512_v53  ;;  %v528_v10 = vrot.slane %v5876_v56, 1  ;;  %v5657_v56 = vld [vmem:[%s5753_s18 + $0xd0] sm:$0xff]  }
  0x1f   : > { %10578 = vst [vmem:[#allocation4_spill] sm:$0xff] %v5885_v61  ;;  %v5898_v11 = vshll.u32 %v5879_v57, 16  ;;  %v5902_v16 = vshrl.u32 %v5849_v45, 16  ;;  %v497_v17 = vsel %vm437_vm0, %v492_v59, %v496_v42  ;;  %v508_v18 = vor.u32 %v5870_v54, %v504_v51 }
  0x20   : > { %10579 = vst [vmem:[#allocation5_spill] sm:$0xff] %v5889_v62  ;;  %v536_v20 = vrot.slane %v5889_v62, 1  ;;  %v5908_v26 = vshrl.u32 %v5879_v57, 16  ;;  %v5918_v30 = vshll.u32 %v5892_v63, 16  ;;  %v521_v33 = vsel %vm437_vm0, %v516_v9, %v520_v60  ;;  %v5953_v9 = vld [vmem:[%s5753_s18 + $0x98] sm:$0xff]  }
  0x21   : > { %708 = vrot.lane.b32.xlu1 %v489_v49, %s5711_s19  ;;  %10580 = vst [vmem:[#allocation6_spill] sm:$0xff] %v5898_v11  ;;  %10581 = vst [vmem:[#allocation7_spill] sm:$0xff] %v5902_v16  ;;  %v532_v34 = vor.u32 %v5885_v61, %v528_v10  ;;  %v544_v37 = vrot.slane %v5898_v11, 1  ;;  %v5927_v38 = vshll.u32 %v5911_v27, 16  ;;  %v513_v39 = vsel %vm437_vm0, %v508_v18, %v512_v53  ;;  %v5936_v49 = vld [vmem:[%s5753_s18 + $0x90] sm:$0xff]  }
  0x22   : > { %706 = vrot.lane.b32.xlu0 %v481_v58, %s5711_s19  ;;  %10582 = vst [vmem:[#allocation8_spill] sm:$0xff] %v5908_v26  ;;  %10583 = vst [vmem:[#allocation9_spill] sm:$0xff] %v5918_v30  ;;  %v524_v41 = vor.u32 %v5902_v16, %v520_v60  ;;  %v5933_v42 = vshrl.u32 %v5873_v55, 16  ;;  %v552_v50 = vrot.slane %v5918_v30, 1  ;;  %v5941_v51 = vshrl.u32 %v5911_v27, 16  ;;  %v5980_v30 = vld [vmem:[%s5753_s18 + $0xa8] sm:$0xff]  }
  0x23   : > { %10584 = vst [vmem:[#allocation10_spill] sm:$0xff] %v5927_v38  ;;  %v5944_v58 = vshll.u32 %v5914_v28, 16  ;;  %v5947_v53 = vshll.u32 %v5921_v31, 16  ;;  %v537_v59 = vsel %vm437_vm0, %v532_v34, %v536_v20  ;;  %v548_v60 = vor.u32 %v5908_v26, %v544_v37  ;;  %10593 = vst [vmem:[#allocation19_spill] sm:$0xff] %v5980_v30 }
  0x24   : > { %10585 = vst [vmem:[#allocation11_spill] sm:$0xff] %v5933_v42  ;;  %10586 = vst [vmem:[#allocation12_spill] sm:$0xff] %v5941_v51  ;;  %v529_v18 = vsel %vm437_vm0, %v524_v41, %v528_v10  ;;  %v5963_v34 = vshrl.u32 %v5921_v31, 16  ;;  %v5966_v14 = vshll.u32 %v5936_v49, 16  ;;  %v5977_v41 = vshll.u32 %v5953_v9, 16 }
  0x25   : > { %712 = vrot.lane.b32.xlu1 %v505_v8, %s5711_s19  ;;  %10587 = vst [vmem:[#allocation13_spill] sm:$0xff] %v5944_v58  ;;  %10588 = vst [vmem:[#allocation14_spill] sm:$0xff] %v5947_v53  ;;  %v560_v8 = vrot.slane %v5927_v38, 1  ;;  %v576_v38 = vrot.slane %v5947_v53, 1  ;;  %v553_v10 = vsel %vm437_vm0, %v548_v60, %v552_v50  ;;  %v5991_v53 = vshrl.u32 %v5914_v28, 16 }
  0x26   : > { %710 = vrot.lane.b32.xlu0 %v497_v17, %s5711_s19  ;;  %v5957_v17 = vshrl.u32 %v5892_v63, 16  ;;  %10590 = vst [vmem:[#allocation16_spill] sm:$0xff] %v5963_v34  ;;  %10591 = vst [vmem:[#allocation17_spill] sm:$0xff] %v5966_v14  ;;  %v5994_v60 = vshll.u32 %v5969_v15, 16  ;;  %v6007_v26 = vshll.u32 %v5980_v30, 16 }
  0x27   : > { %10592 = vst [vmem:[#allocation18_spill] sm:$0xff] %v5977_v41  ;;  %10594 = vst [vmem:[#allocation20_spill] sm:$0xff] %v5991_v53 }
  0x28   : > { %10589 = vst [vmem:[#allocation15_spill] sm:$0xff] %v5957_v17  ;;  %v556_v11 = vor.u32 %v5957_v17, %v552_v50  ;;  %10595 = vst [vmem:[#allocation21_spill] sm:$0xff] %v5994_v60  ;;  %v5653_v50 = vld [vmem:[%s5753_s18 + $0xb0] sm:$0xff]   ;;  %v600_v62 = vrot.slane %v5994_v60, 1  ;;  %v5656_v60 = vld [vmem:[%s5753_s18 + $0xc8] sm:$0xff]  }
  0x29   : > { %716 = vrot.lane.b32.xlu1 %v521_v33, %s5711_s19  ;;  %v540_v33 = vor.u32 %v5933_v42, %v536_v20  ;;  %v564_v20 = vor.u32 %v5941_v51, %v560_v8  ;;  %v5654_v51 = vld [vmem:[%s5753_s18 + $0xb8] sm:$0xff]   ;;  %10597 = vst [vmem:[#allocation23_spill] sm:$0xff] %v6007_v26  ;;  %v6015_v42 = vshrl.u32 %v5936_v49, 16 }
  0x2a   : > { %714 = vrot.lane.b32.xlu0 %v513_v39, %s5711_s19  ;;  %v568_v39 = vrot.slane %v5944_v58, 1  ;;  %v584_v58 = vrot.slane %v5966_v14, 1 }
  0x2b   : > { %10598 = vst [vmem:[#allocation24_spill] sm:$0xff] %v6015_v42 }
  0x2c   : > { %v569_v17 = vsel %vm437_vm0, %v564_v20, %v568_v39  ;;  %v572_v14 = vor.u32 %v5991_v53, %v568_v39  ;;  %v6018_v20 = vshrl.u32 %v5980_v30, 16  ;;  %v608_v39 = vrot.slane %v6007_v26, 1  ;;  %v5659_v30 = vld [vmem:[%s5753_s18 + $0xe0] sm:$0xff]  }
  0x2d   : > { %720 = vrot.lane.b32.xlu1 %v537_v59, %s5711_s19  ;;  %v545_v59 = vsel %vm437_vm0, %v540_v33, %v544_v37  ;;  %v580_v37 = vor.u32 %v5963_v34, %v576_v38  ;;  %v592_v33 = vrot.slane %v5977_v41, 1  ;;  %v5655_v41 = vld [vmem:[%s5753_s18 + $0xc0] sm:$0xff]   ;;  %v6022_v34 = vshll.u32 %v5653_v50, 16 }
  0x2e   : > { %718 = vrot.lane.b32.xlu0 %v529_v18, %s5711_s19  ;;  %v5999_v18 = vshrl.u32 %v5953_v9, 16  ;;  %10599 = vst [vmem:[#allocation25_spill] sm:$0xff] %v6018_v20  ;;  %v588_v53 = vor.u32 %v6015_v42, %v584_v58  ;;  %v612_v52 = vor.u32 %v6018_v20, %v608_v39  ;;  %v5660_v42 = vld [vmem:[%s5753_s18 + $0xe8] sm:$0xff]  }
  0x2f   : > { %10600 = vst [vmem:[#allocation26_spill] sm:$0xff] %v6022_v34 }
  0x30   : > { %10596 = vst [vmem:[#allocation22_spill] sm:$0xff] %v5999_v18 }
  0x31   : > { %724 = vrot.lane.b32.xlu1 %v553_v10, %s5711_s19  ;;  %v561_v10 = vsel %vm437_vm0, %v556_v11, %v560_v8  ;;  %v585_v11 = vsel %vm437_vm0, %v580_v37, %v584_v58  ;;  %v596_v8 = vor.u32 %v5999_v18, %v592_v33  ;;  %v6039_v37 = vshrl.u32 %v5969_v15, 16  ;;  %v5658_v58 = vld [vmem:[%s5753_s18 + $0xd8] sm:$0xff]  }
  0x32   : > { %722 = vrot.lane.b32.xlu0 %v545_v59, %s5711_s19  ;;  %v6024_v59 = vshll.u32 %v5654_v51, 16  ;;  %v6043_v18 = vshrl.u32 %v5654_v51, 16  ;;  %v593_v51 = vsel %vm437_vm0, %v588_v53, %v592_v33  ;;  %v6070_v53 = vshll.u32 %v5658_v58, 16 }
  0x33   : > { %10602 = vst [vmem:[#allocation28_spill] sm:$0xff] %v6039_v37  ;;  %v601_v61 = vsel %vm437_vm0, %v596_v8, %v600_v62 }
  0x34   : > { %10601 = vst [vmem:[#allocation27_spill] sm:$0xff] %v6024_v59  ;;  %v624_v26 = vrot.slane %v6024_v59, 1  ;;  %10603 = vst [vmem:[#allocation29_spill] sm:$0xff] %v6043_v18  ;;  %v604_v59 = vor.u32 %v6039_v37, %v600_v62  ;;  %v6074_v62 = vshrl.u32 %v5655_v41, 16 }
  0x35   : > { %728 = vrot.lane.b32.xlu1 %v569_v17, %s5711_s19  ;;  %v577_v17 = vsel %vm437_vm0, %v572_v14, %v576_v38  ;;  %v616_v14 = vrot.slane %v6022_v34, 1  ;;  %v6051_v38 = vshll.u32 %v5656_v60, 16  ;;  %v6063_v34 = vshll.u32 %v5657_v56, 16  ;;  %10609 = vst [vmem:[#allocation35_spill] sm:$0xff] %v6070_v53 }
  0x36   : > { %726 = vrot.lane.b32.xlu0 %v561_v10, %s5711_s19  ;;  %v6045_v10 = vshll.u32 %v5655_v41, 16  ;;  %v628_v8 = vor.u32 %v6043_v18, %v624_v26  ;;  %10610 = vst [vmem:[#allocation36_spill] sm:$0xff] %v6074_v62  ;;  %v609_v33 = vsel %vm437_vm0, %v604_v59, %v608_v39  ;;  %v5661_v18 = vld [vmem:[%s5753_s18 + $0xf0] sm:$0xff]   ;;  %v6087_v41 = vshrl.u32 %v5658_v58, 16  ;;  %v5663_v58 = vld [vmem:[%s6034_s24] sm:$0xff]  }
  0x37   : > { %10605 = vst [vmem:[#allocation31_spill] sm:$0xff] %v6051_v38  ;;  %10607 = vst [vmem:[#allocation33_spill] sm:$0xff] %v6063_v34  ;;  %v617_v16 = vsel %vm437_vm0, %v612_v52, %v616_v14  ;;  %v6080_v52 = vshll.u32 %v5660_v42, 16 }
  0x38   : > { %10604 = vst [vmem:[#allocation30_spill] sm:$0xff] %v6045_v10  ;;  %v632_v20 = vrot.slane %v6045_v10, 1  ;;  %v6077_v10 = vshrl.u32 %v5657_v56, 16  ;;  %10613 = vst [vmem:[#allocation39_spill] sm:$0xff] %v6087_v41  ;;  %v5662_v56 = vld [vmem:[%s5753_s18 + $0xf8] sm:$0xff]  }
  0x39   : > { %732 = vrot.lane.b32.xlu1 %v585_v11, %s5711_s19  ;;  %v6055_v11 = vshrl.u32 %v5653_v50, 16  ;;  %v6067_v50 = vshrl.u32 %v5656_v60, 16  ;;  %10612 = vst [vmem:[#allocation38_spill] sm:$0xff] %v6080_v52 }
  0x3a   : > { %730 = vrot.lane.b32.xlu0 %v577_v17, %s5711_s19  ;;  %v640_v17 = vrot.slane %v6051_v38, 1  ;;  %10611 = vst [vmem:[#allocation37_spill] sm:$0xff] %v6077_v10  ;;  %v633_v60 = vsel %vm437_vm0, %v628_v8, %v632_v20  ;;  %v648_v38 = vrot.slane %v6063_v34, 1  ;;  %v672_v8 = vrot.slane %v6080_v52, 1 }
  0x3b   : > { %10606 = vst [vmem:[#allocation32_spill] sm:$0xff] %v6055_v11  ;;  %10608 = vst [vmem:[#allocation34_spill] sm:$0xff] %v6067_v50  ;;  %v6097_v34 = vshrl.u32 %v5660_v42, 16  ;;  %v10619_v42 = vshrl.u32 %v5774_v6, 16 }
  0x3c   : > { %v652_v39 = vor.u32 %v6077_v10, %v648_v38  ;;  %v962_v10 = vrot.slane %v5765_v3, 1 }
  0x3d   : > { %736 = vrot.lane.b32.xlu1 %v601_v61, %s5711_s19  ;;  %v620_v61 = vor.u32 %v6055_v11, %v616_v14  ;;  %v656_v14 = vrot.slane %v6070_v53, 1  ;;  %v6089_v11 = vshll.u32 %v5659_v30, 16  ;;  %10615 = vst [vmem:[#allocation41_spill] sm:$0xff] %v6097_v34 }
  0x3e   : > { %734 = vrot.lane.b32.xlu0 %v593_v51, %s5711_s19  ;;  %v644_v51 = vor.u32 %v6067_v50, %v640_v17  ;;  %v6099_v50 = vshll.u32 %v5661_v18, 16 }
  0x3f   : > { %10614 = vst [vmem:[#allocation40_spill] sm:$0xff] %v6089_v11  ;;  %v625_v59 = vsel %vm437_vm0, %v620_v61, %v624_v26  ;;  %v660_v37 = vor.u32 %v6087_v41, %v656_v14  ;;  %v6106_v26 = vshll.u32 %v5662_v56, 16  ;;  %v959_v61 = vrot.slane %v10619_v42, 1 }
  0x40   : > { %10616 = vst [vmem:[#allocation42_spill] sm:$0xff] %v6099_v50  ;;  %v649_v53 = vsel %vm437_vm0, %v644_v51, %v648_v38  ;;  %v676_v38 = vor.u32 %v6097_v34, %v672_v8  ;;  %v680_v51 = vrot.slane %v6099_v50, 1  ;;  %v6120_v41 = vshll.u32 %v5663_v58, 16 }
  0x41   : > { %740 = vrot.lane.b32.xlu1 %v617_v16, %s5711_s19  ;;  %v636_v16 = vor.u32 %v6074_v62, %v632_v20  ;;  %10617 = vst [vmem:[#allocation43_spill] sm:$0xff] %v6106_v26  ;;  %v6109_v20 = vshrl.u32 %v5659_v30, 16  ;;  %v10622_v30 = vshll.u32 %v5774_v6, 16  ;;  %v967_v58 = vrot.slane %v5768_v4, 2 }
  0x42   : > { %738 = vrot.lane.b32.xlu0 %v609_v33, %s5711_s19  ;;  %v664_v33 = vrot.slane %v6089_v11, 1  ;;  %v6118_v11 = vshrl.u32 %v5662_v56, 16  ;;  %10621 = vst [vmem:[#allocation46_spill] sm:$0xff] %v6120_v41  ;;  %v6131_v56 = vshrl.u32 %v5661_v18, 16  ;;  %v696_v34 = vrot.slane %v6120_v41, 1 }
  0x43   : > { %10618 = vst [vmem:[#allocation44_spill] sm:$0xff] %v6109_v20  ;;  %v641_v52 = vsel %vm437_vm0, %v636_v16, %v640_v17  ;;  %v688_v17 = vrot.slane %v6106_v26, 1  ;;  %v966_v16 = vrot.slane %v5777_v7, 1  ;;  %v1359_v26 = vrot.slane %v5762_v2, 3 }
  0x44   : > { %10620 = vst [vmem:[#allocation45_spill] sm:$0xff] %v6118_v11  ;;  %v665_v42 = vsel %vm437_vm0, %v660_v37, %v664_v33  ;;  %10623 = vst [vmem:[#allocation47_spill] sm:$0xff] %v6131_v56  ;;  %v1358_v37 = vrot.slane %v5765_v3, 2  ;;  %v1362_v18 = vrot.slane %v5768_v4, 3  ;;  %v1365_v4 = vrot.slane %v5808_v24, 2 }
  0x45   : > { %744 = vrot.lane.b32.xlu1 %v633_v60, %s5711_s19  ;;  %v657_v60 = vsel %vm437_vm0, %v652_v39, %v656_v14  ;;  %v963_v14 = vrot.slane %v5762_v2, 2  ;;  %v968_v62 = vor.u32 %v967_v58, %v966_v16  ;;  %v764_v2 = vrot.slane %v5774_v6, 1 }
  0x46   : > { %742 = vrot.lane.b32.xlu0 %v625_v59, %s5711_s19  ;;  %v960_v59 = vrot.slane %v10622_v30, 2  ;;  %v681_v30 = vsel %vm437_vm0, %v676_v38, %v680_v51  ;;  %v1369_v58 = vrot.slane %v5805_v23, 2 }
  0x47   : > { %v964_v50 = vor.u32 %v963_v14, %v962_v10  ;;  %v1360_v10 = vor.u32 %v1359_v26, %v1358_v37  ;;  %v766_v26 = vrot.slane %v5756_v0, 1  ;;  %v970_v14 = vrot.slane %v5808_v24, 1 }
  0x48   : > { %v961_v39 = vor.u32 %v960_v59, %v959_v61  ;;  %v763_v24 = vrot.slane %v5771_v5, 1 }
  0x49   : > { %748 = vrot.lane.b32.xlu1 %v649_v53, %s5711_s19  ;;  %v668_v53 = vor.u32 %v6109_v20, %v664_v33  ;;  %v692_v33 = vor.u32 %v6118_v11, %v688_v17  ;;  %v6148_v3 = vsel %vm958_vm1, %v964_v50, %v968_v62  ;;  %v10638_v20 = vld [vmem:[#allocation7_spill] sm:$0xff] }
  0x4a   : > { %746 = vrot.lane.b32.xlu0 %v641_v52, %s5711_s19  ;;  %v1361_v52 = vrot.slane %v5777_v7, 2  ;;  %v6143_v61 = vsel %vm958_vm1, %v961_v39, %v964_v50  ;;  %v684_v7 = vor.u32 %v6131_v56, %v680_v51  ;;  %v971_v50 = vrot.slane %v5794_v19, 2 }
  0x4b   : > { %v673_v59 = vsel %vm437_vm0, %v668_v53, %v672_v8  ;;  %v697_v16 = vsel %vm437_vm0, %v692_v33, %v696_v34  ;;  %v974_v51 = vrot.slane %v5805_v23, 1  ;;  %v975_v53 = vrot.slane %v5802_v22, 2 }
  0x4c   : > { %v1363_v38 = vor.u32 %v1362_v18, %v1361_v52  ;;  %v972_v39 = vor.u32 %v971_v50, %v970_v14  ;;  %v689_v37 = vsel %vm437_vm0, %v684_v7, %v688_v17  ;;  %v768_v52 = vrot.slane %v5759_v1, 1 }
  0x4d   : > { %752 = vrot.lane.b32.xlu1 %v665_v42, %s5711_s19  ;;  %v1366_v42 = vrot.slane %v5794_v19, 3  ;;  %v976_v34 = vor.u32 %v975_v53, %v974_v51  ;;  %v1373_v23 = vrot.slane %v5846_v44, 2  ;;  %v770_v17 = vrot.slane %v5784_v12, 1 }
  0x4e   : > { %750 = vrot.lane.b32.xlu0 %v657_v60, %s5711_s19  ;;  %v6157_v60 = vsel %vm10541_vm2, %v1360_v10, %v1363_v38  ;;  %v6175_v18 = vsel %vm958_vm1, %v968_v62, %v972_v39  ;;  %v1374_v10 = vrot.slane %v5823_v32, 3  ;;  %v979_v7 = vrot.slane %v5823_v32, 2 }
  0x4f   : > { %v1367_v8 = vor.u32 %v1366_v42, %v1365_v4  ;;  %v6183_v5 = vsel %vm958_vm1, %v972_v39, %v976_v34  ;;  %v765_v4 = vsel %vm762_vm3, %v763_v24, %v764_v2  ;;  %v982_v14 = vrot.slane %v5838_v40, 1 }
  0x50   : > { %v1375_v42 = vor.u32 %v1374_v10, %v1373_v23  ;;  %v983_v50 = vrot.slane %v5828_v35, 2  ;;  %v6202_v32 = vsel %vm762_vm3, %v768_v52, %v770_v17  ;;  %v986_v23 = vrot.slane %v5870_v54, 1 }
  0x51   : > { %756 = vrot.lane.b32.xlu1 %v681_v30, %s5711_s19  ;;  %v1370_v30 = vrot.slane %v5802_v22, 3  ;;  %v6170_v19 = vsel %vm10541_vm2, %v1363_v38, %v1367_v8  ;;  %v6179_v22 = vsel %vm762_vm3, %v764_v2, %v766_v26  ;;  %v772_v38 = vrot.slane %v5787_v13, 1 }
  0x52   : > { %754 = vrot.lane.b32.xlu0 %v673_v59, %s5711_s19  ;;  %v978_v59 = vrot.slane %v5846_v44, 1  ;;  %v1378_v44 = vrot.slane %v5828_v35, 3  ;;  %v984_v53 = vor.u32 %v983_v50, %v982_v14  ;;  %v987_v10 = vrot.slane %v5843_v43, 2 }
  0x53   : > { %v1371_v33 = vor.u32 %v1370_v30, %v1369_v58  ;;  %v1381_v30 = vrot.slane %v5870_v54, 2  ;;  %v1386_v14 = vrot.slane %v5853_v46, 3  ;;  %v1570_v56 = vrot.slane %v5816_v29, 3 }
  0x54   : > { %v980_v51 = vor.u32 %v979_v7, %v978_v59  ;;  %v990_v59 = vrot.slane %v5856_v47, 1  ;;  %v991_v7 = vrot.slane %v5853_v46, 2  ;;  %v988_v50 = vor.u32 %v987_v10, %v986_v23 }
  0x55   : > { %760 = vrot.lane.b32.xlu1 %v697_v16, %s5711_s19  ;;  %v6189_v62 = vsel %vm10541_vm2, %v1367_v8, %v1371_v33  ;;  %v774_v16 = vrot.slane %v5799_v21, 1  ;;  %v1377_v8 = vrot.slane %v5838_v40, 2  ;;  %v6205_v2 = vsel %vm10541_vm2, %v1371_v33, %v1375_v42 }
  0x56   : > { %758 = vrot.lane.b32.xlu0 %v689_v37, %s5711_s19  ;;  %v6209_v39 = vsel %vm958_vm1, %v976_v34, %v980_v51  ;;  %v6213_v37 = vsel %vm762_vm3, %v766_v26, %v768_v52  ;;  %v6216_v35 = vsel %vm958_vm1, %v980_v51, %v984_v53  ;;  %v1382_v40 = vrot.slane %v5843_v43, 3 }
  0x57   : > { %v1379_v58 = vor.u32 %v1378_v44, %v1377_v8  ;;  %v6222_v24 = vsel %vm762_vm3, %v772_v38, %v774_v16  ;;  %v776_v34 = vrot.slane %v5811_v25, 1  ;;  %v778_v26 = vrot.slane %v5816_v29, 1 }
  0x58   : > { %v1383_v52 = vor.u32 %v1382_v40, %v1381_v30  ;;  %v6245_v43 = vor.u32 %v991_v7, %v990_v59  ;;  %v782_v46 = vrot.slane %v5849_v45, 1  ;;  %v784_v30 = vrot.slane %v5859_v48, 1 }
  0x59   : > { %830 = vrot.lane.b32.xlu1 %v6179_v22, %s5712_s25  ;;  %v6226_v33 = vsel %vm10541_vm2, %v1375_v42, %v1379_v58  ;;  %v6238_v42 = vsel %vm762_vm3, %v770_v17, %v772_v38  ;;  %v6250_v8 = vsel %vm762_vm3, %v776_v34, %v778_v26  ;;  %v6255_v17 = vsel %vm958_vm1, %v984_v53, %v988_v50 }
  0x5a   : > { %828 = vrot.lane.b32.xlu0 %v765_v4, %s5712_s25  ;;  %v1385_v4 = vrot.slane %v5856_v47, 2  ;;  %v6241_v54 = vsel %vm10541_vm2, %v1379_v58, %v1383_v52  ;;  %v780_v47 = vrot.slane %v5831_v36, 1  ;;  %v6261_v38 = vsel %vm958_vm1, %v988_v50, %v6245_v43 }
  0x5b   : > { %v6268_v58 = vsel %vm762_vm3, %v774_v16, %v776_v34  ;;  %v786_v40 = vrot.slane %v5873_v55, 1  ;;  %v788_v34 = vrot.slane %v5879_v57, 1  ;;  %v6292_v48 = vsel %vm762_vm3, %v782_v46, %v784_v30 }
  0x5c   : > { %v6247_v51 = vor.u32 %v1386_v14, %v1385_v4  ;;  %v6273_v53 = vsel %vm762_vm3, %v780_v47, %v782_v46  ;;  %v6280_v23 = vsel %vm762_vm3, %v778_v26, %v780_v47  ;;  %v792_v26 = vrot.slane %v5911_v27, 1  ;;  %v5664_v46 = vld [vmem:[%s10360_s2 + $0x10] ss:$0 sps:$4 sm:$0x33]  }
  0x5d   : > { %834 = vrot.lane.b32.xlu1 %v6202_v32, %s5712_s25  ;;  %v6285_v16 = vsel %vm762_vm3, %v784_v30, %v786_v40  ;;  %v794_v10 = vrot.slane %v5914_v28, 1  ;;  %v6304_v57 = vsel %vm762_vm3, %v786_v40, %v788_v34  ;;  %v796_v59 = vrot.slane %v5921_v31, 1  ;;  %5356 = vmatprep.subr.msk.bf16.mxu0 %vm2293_vm4, %v5664_v46 }
  0x5e   : > { %832 = vrot.lane.b32.xlu0 %v6213_v37, %s5712_s25  ;;  %v6265_v44 = vsel %vm10541_vm2, %v1383_v52, %v6247_v51  ;;  %v790_v52 = vrot.slane %v5892_v63, 1  ;;  %v798_v7 = vrot.slane %v5936_v49, 1  ;;  %v800_v4 = vrot.slane %v5953_v9, 1  ;;  %v10627_v9 = vld [vmem:[#allocation19_spill] sm:$0xff]  ;;  %5357 = vmatprep.subr.msk.bf16.mxu1 %vm2293_vm4, %v5664_v46 }
  0x5f   : > { %v6309_v63 = vsel %vm762_vm3, %v792_v26, %v794_v10  ;;  %v802_v14 = vrot.slane %v5969_v15, 1  ;;  %v6328_v31 = vsel %vm762_vm3, %v794_v10, %v796_v59  ;;  %v10448_v15 = vrot.slane %v10627_v9, 1 }
  0x60   : > { %v6297_v55 = vsel %vm762_vm3, %v788_v34, %v790_v52  ;;  %v6316_v27 = vsel %vm762_vm3, %v790_v52, %v792_v26  ;;  %v6321_v28 = vsel %vm762_vm3, %v796_v59, %v798_v7  ;;  %v6338_v50 = vsel %vm762_vm3, %v798_v7, %v800_v4 }
  0x61   : > { %838 = vrot.lane.b32.xlu1 %v6222_v24, %s5712_s25  ;;  %10624 = vst [vmem:[#allocation48_spill] sm:$0xff] %v6321_v28  ;;  %v6333_v49 = vsel %vm762_vm3, %v800_v4, %v802_v14  ;;  %10626 = vst [vmem:[#allocation50_spill] sm:$0xff] %v6338_v50  ;;  %v6348_v47 = vsel %vm762_vm3, %v802_v14, %v10448_v15  ;;  %v1162_v30 = vrot.slane %v5774_v6, 2  ;;  %v1163_v40 = vrot.slane %v5756_v0, 2 }
  0x62   : > { %836 = vrot.lane.b32.xlu0 %v6238_v42, %s5712_s25  ;;  %10625 = vst [vmem:[#allocation49_spill] sm:$0xff] %v6333_v49  ;;  %10628 = vst [vmem:[#allocation51_spill] sm:$0xff] %v6348_v47  ;;  %v2295_v34 = vsel %vm2293_vm4, %v5664_v46, 0  ;;  %v1165_v52 = vrot.slane %v5759_v1, 2  ;;  %v1559_v7 = vrot.slane %v5756_v0, 3  ;;  %v1560_v4 = vrot.slane %v5759_v1, 3 }
  0x63   : > { %5281 = vmatpush3.bf16.msra.mxu0 %v2295_v34  ;;  %5353 = vmatpush3.bf16.msra.mxu1 %v2295_v34  ;;  %v1164_v6 = vsel %vm1161_vm5, %v1162_v30, %v1163_v40  ;;  %v1562_v1 = vrot.slane %v5784_v12, 3 }
  0x64   : > { %v1166_v26 = vsel %vm1161_vm5, %v1163_v40, %v1165_v52  ;;  %v1561_v30 = vsel %vm10542_vm6, %v1559_v7, %v1560_v4 }
  0x65   : > { %842 = vrot.lane.b32.xlu1 %v6250_v8, %s5712_s25 }
  0x66   : > { %840 = vrot.lane.b32.xlu0 %v6268_v58, %s5712_s25 }
  0x69   : > { %846 = vrot.lane.b32.xlu1 %v6273_v53, %s5712_s25 }
  0x6a   : > { %844 = vrot.lane.b32.xlu0 %v6280_v23, %s5712_s25 }
  0x6d   : > { %850 = vrot.lane.b32.xlu1 %v6285_v16, %s5712_s25 }
  0x6e   : > { %848 = vrot.lane.b32.xlu0 %v6292_v48, %s5712_s25 }
  0x71   : > { %854 = vrot.lane.b32.xlu1 %v6297_v55, %s5712_s25 }
  0x72   : > { %852 = vrot.lane.b32.xlu0 %v6304_v57, %s5712_s25 }
  0x75   : > { %858 = vrot.lane.b32.xlu1 %v6309_v63, %s5712_s25 }
  0x76   : > { %856 = vrot.lane.b32.xlu0 %v6316_v27, %s5712_s25 }
  0x79   : > { %862 = vrot.lane.b32.xlu1 %v6321_v28, %s5712_s25 }
  0x7a   : > { %860 = vrot.lane.b32.xlu0 %v6328_v31, %s5712_s25 }
  0x7d   : > { %866 = vrot.lane.b32.xlu1 %v6333_v49, %s5712_s25  ;;  %v6535_v49 = vld [vmem:[%s5753_s18 + $0x48] sm:$0xff]  }
  0x7e   : > { %864 = vrot.lane.b32.xlu0 %v6338_v50, %s5712_s25 }
  0x81   : > { %894 = vrot.lane.b32.xlu1 %v6179_v22, %s5713_s26  ;;  %v5665_v22 = vld [vmem:[%s10360_s2 + $0x8] sm:$0xff]  }
  0x82   : > { %868 = vrot.lane.b32.xlu0 %v6348_v47, %s5712_s25  ;;  %5282 = vmatprep.subr.bf16.mxu0 %v5665_v22  ;;  %v10639_v47 = vld [vmem:[#allocation2_spill] sm:$0xff] }
  0x83   : > { %5283 = vmatpush3.bf16.msra.mxu0 %v5665_v22  ;;  %5351 = vmatprep.subr.bf16.mxu1 %v5665_v22  ;;  %v1390_v9 = vrot.slane %v10639_v47, 3 }
  0x84   : > { %5354 = vmatpush3.bf16.msra.mxu1 %v5665_v22 }
  0x85   : > { %1097 = vrot.lane.b32.xlu1 %v6143_v61, %s5714_s29  ;;  %v5666_v61 = vld [vmem:[%s10360_s2] sm:$0xff]  }
  0x86   : > { %896 = vrot.lane.b32.xlu0 %v6213_v37, %s5713_s26  ;;  %5284 = vmatprep.subr.bf16.mxu0 %v5666_v61  ;;  %v1167_v37 = vrot.slane %v5784_v12, 2 }
  0x87   : > { %5285 = vmatpush3.bf16.msra.mxu0 %v5666_v61  ;;  %5352 = vmatprep.subr.bf16.mxu1 %v5666_v61 }
  0x88   : > { %5355 = vmatpush3.bf16.msra.mxu1 %v5666_v61  ;;  %v1168_v14 = vsel %vm1161_vm5, %v1165_v52, %v1167_v37 }
  0x89   : > { %1227 = vrot.lane.b32.xlu1 %v1164_v6, %s5715_s5 }
  0x8a   : > { %1099 = vrot.lane.b32.xlu0 %v6148_v3, %s5714_s29 }
  0x8b   : > { %v6375_v10 = vpop.permute.xlu1 %702 }
  0x8c   : > { %v6378_v59 = vpop.permute.xlu0 %698 }
  0x8d   : > { %1293 = vrot.lane.b32.xlu1 %v1166_v26, %s5716_s8 }
  0x8e   : > { %1229 = vrot.lane.b32.xlu0 %v1166_v26, %s5715_s5 }
  0x8f   : > { %v6384_v3 = vpop.permute.xlu1 %704 }
  0x90   : > { %v6387_v46 = vpop.permute.xlu0 %700 }
  0x91   : > { %1494 = vrot.lane.b32.xlu1 %v6157_v60, %s5717_s9  ;;  %v1563_v60 = vsel %vm10542_vm6, %v1560_v4, %v1562_v1 }
  0x92   : > { %1295 = vrot.lane.b32.xlu0 %v1168_v14, %s5716_s8 }
  0x93   : > { %v6393_v0 = vpop.permute.xlu1 %708 }
  0x94   : > { %v6396_v40 = vpop.permute.xlu0 %706 }
  0x95   : > { %1624 = vrot.lane.b32.xlu1 %v1561_v30, %s5718_s10 }
  0x96   : > { %1496 = vrot.lane.b32.xlu0 %v6170_v19, %s5717_s9  ;;  %v1169_v19 = vrot.slane %v5787_v13, 2 }
  0x97   : > { %v6401_v34 = vpop.permute.xlu1 %712 }
  0x98   : > { %v6404_v22 = vpop.permute.xlu0 %710 }
  0x99   : > { %898 = vrot.lane.b32.xlu1 %v6202_v32, %s5713_s26  ;;  %v1170_v32 = vsel %vm1161_vm5, %v1167_v37, %v1169_v19 }
  0x9a   : > { %1626 = vrot.lane.b32.xlu0 %v1563_v60, %s5718_s10  ;;  %v1566_v60 = vrot.slane %v5799_v21, 3 }
  0x9b   : > { %v6409_v12 = vpop.permute.xlu1 %716 }
  0x9c   : > { %v6411_v6 = vpop.permute.xlu0 %714 }
  0x9d   : > { %1101 = vrot.lane.b32.xlu1 %v6175_v18, %s5714_s29  ;;  %v1171_v18 = vrot.slane %v5799_v21, 2 }
  0x9e   : > { %900 = vrot.lane.b32.xlu0 %v6238_v42, %s5713_s26  ;;  %v1564_v42 = vrot.slane %v5787_v13, 3 }
  0x9f   : > { %v6418_v52 = vpop.permute.xlu1 %720 }
  0xa0   : > { %v6420_v61 = vpop.permute.xlu0 %718 }
  0xa1   : > { %1231 = vrot.lane.b32.xlu1 %v1168_v14, %s5715_s5  ;;  %v1172_v14 = vsel %vm1161_vm5, %v1169_v19, %v1171_v18 }
  0xa2   : > { %1103 = vrot.lane.b32.xlu0 %v6183_v5, %s5714_s29  ;;  %v1565_v5 = vsel %vm10542_vm6, %v1562_v1, %v1564_v42 }
  0xa3   : > { %v6426_v26 = vpop.permute.xlu1 %724 }
  0xa4   : > { %v6429_v7 = vpop.permute.xlu0 %722 }
  0xa5   : > { %1297 = vrot.lane.b32.xlu1 %v1170_v32, %s5716_s8 }
  0xa6   : > { %1233 = vrot.lane.b32.xlu0 %v1170_v32, %s5715_s5  ;;  %v1567_v32 = vsel %vm10542_vm6, %v1564_v42, %v1566_v60 }
  0xa7   : > { %v6434_v4 = vpop.permute.xlu1 %728 }
  0xa8   : > { %v6437_v37 = vpop.permute.xlu0 %726 }
  0xa9   : > { %1498 = vrot.lane.b32.xlu1 %v6189_v62, %s5717_s9 }
  0xaa   : > { %1299 = vrot.lane.b32.xlu0 %v1172_v14, %s5716_s8 }
  0xab   : > { %v6443_v30 = vpop.permute.xlu1 %732 }
  0xac   : > { %v6446_v13 = vpop.permute.xlu0 %730 }
  0xad   : > { %1628 = vrot.lane.b32.xlu1 %v1565_v5, %s5718_s10 }
  0xae   : > { %1500 = vrot.lane.b32.xlu0 %v6205_v2, %s5717_s9  ;;  %v1173_v2 = vrot.slane %v5811_v25, 2 }
  0xaf   : > { %v6451_v19 = vpop.permute.xlu1 %736 }
  0xb0   : > { %v6454_v62 = vpop.permute.xlu0 %734 }
  0xb1   : > { %902 = vrot.lane.b32.xlu1 %v6222_v24, %s5713_s26  ;;  %v1174_v24 = vsel %vm1161_vm5, %v1171_v18, %v1173_v2 }
  0xb2   : > { %1630 = vrot.lane.b32.xlu0 %v1567_v32, %s5718_s10 }
  0xb3   : > { %v6459_v1 = vpop.permute.xlu1 %740 }
  0xb4   : > { %v6461_v21 = vpop.permute.xlu0 %738 }
  0xb5   : > { %1105 = vrot.lane.b32.xlu1 %v6209_v39, %s5714_s29  ;;  %v1175_v39 = vrot.slane %v5816_v29, 2 }
  0xb6   : > { %904 = vrot.lane.b32.xlu0 %v6268_v58, %s5713_s26  ;;  %v1568_v58 = vrot.slane %v5811_v25, 3 }
  0xb7   : > { %v6468_v42 = vpop.permute.xlu1 %744 }
  0xb8   : > { %v6470_v5 = vpop.permute.xlu0 %742 }
  0xb9   : > { %10629 = vst [vmem:[#allocation52_spill] sm:$0xff] %v6470_v5  ;;  %1235 = vrot.lane.b32.xlu1 %v1172_v14, %s5715_s5  ;;  %v1176_v14 = vsel %vm1161_vm5, %v1173_v2, %v1175_v39 }
  0xba   : > { %1107 = vrot.lane.b32.xlu0 %v6216_v35, %s5714_s29  ;;  %v1569_v35 = vsel %vm10542_vm6, %v1566_v60, %v1568_v58 }
  0xbb   : > { %v6476_v32 = vpop.permute.xlu1 %748 }
  0xbc   : > { %10630 = vst [vmem:[#allocation53_spill] sm:$0xff] %v6476_v32  ;;  %v6479_v15 = vpop.permute.xlu0 %746 }
  0xbd   : > { %10631 = vst [vmem:[#allocation54_spill] sm:$0xff] %v6479_v15  ;;  %1301 = vrot.lane.b32.xlu1 %v1174_v24, %s5716_s8 }
  0xbe   : > { %1237 = vrot.lane.b32.xlu0 %v1174_v24, %s5715_s5  ;;  %v1571_v24 = vsel %vm10542_vm6, %v1568_v58, %v1570_v56 }
  0xbf   : > { %v6484_v41 = vpop.permute.xlu1 %752 }
  0xc0   : > { %10632 = vst [vmem:[#allocation55_spill] sm:$0xff] %v6484_v41  ;;  %v6487_v18 = vpop.permute.xlu0 %750  ;;  %v10661_v41 = vld [vmem:[#allocation15_spill] sm:$0xff] }
  0xc1   : > { %10633 = vst [vmem:[#allocation56_spill] sm:$0xff] %v6487_v18  ;;  %1502 = vrot.lane.b32.xlu1 %v6226_v33, %s5717_s9 }
  0xc2   : > { %1303 = vrot.lane.b32.xlu0 %v1176_v14, %s5716_s8 }
  0xc3   : > { %v6493_v11 = vpop.permute.xlu1 %756 }
  0xc4   : > { %10634 = vst [vmem:[#allocation57_spill] sm:$0xff] %v6493_v11  ;;  %v6496_v25 = vpop.permute.xlu0 %754 }
  0xc5   : > { %10635 = vst [vmem:[#allocation58_spill] sm:$0xff] %v6496_v25  ;;  %1632 = vrot.lane.b32.xlu1 %v1569_v35, %s5718_s10  ;;  %v995_v25 = vrot.slane %v10639_v47, 2  ;;  %v10645_v47 = vld [vmem:[#allocation4_spill] sm:$0xff] }
  0xc6   : > { %1504 = vrot.lane.b32.xlu0 %v6241_v54, %s5717_s9  ;;  %v1177_v54 = vrot.slane %v5831_v36, 2  ;;  %v1389_v36 = vrot.slane %v10638_v20, 2 }
  0xc7   : > { %v6501_v2 = vpop.permute.xlu1 %760 }
  0xc8   : > { %10636 = vst [vmem:[#allocation59_spill] sm:$0xff] %v6501_v2  ;;  %v6504_v33 = vpop.permute.xlu0 %758  ;;  %v994_v2 = vrot.slane %v10638_v20, 1 }
  0xc9   : > { %10637 = vst [vmem:[#allocation60_spill] sm:$0xff] %v6504_v33  ;;  %906 = vrot.lane.b32.xlu1 %v6250_v8, %s5713_s26  ;;  %v1178_v8 = vsel %vm1161_vm5, %v1175_v39, %v1177_v54  ;;  %v1572_v39 = vrot.slane %v6535_v49, 3 }
  0xca   : > { %1634 = vrot.lane.b32.xlu0 %v1571_v24, %s5718_s10 }
  0xcb   : > { %v6509_v60 = vpop.permute.xlu1 %830  ;;  %v1573_v33 = vsel %vm10542_vm6, %v1570_v56, %v1572_v39  ;;  %v996_v56 = vor.u32 %v995_v25, %v994_v2 }
  0xcc   : > { %v6511_v29 = vpop.permute.xlu0 %828 }
  0xcd   : > { %1109 = vrot.lane.b32.xlu1 %v6255_v17, %s5714_s29  ;;  %v1179_v17 = vrot.slane %v5849_v45, 2  ;;  %v1391_v45 = vor.u32 %v1390_v9, %v1389_v36 }
  0xce   : > { %908 = vrot.lane.b32.xlu0 %v6280_v23, %s5713_s26 }
  0xcf   : > { %v6518_v58 = vpop.permute.xlu1 %834 }
  0xd0   : > { %v6520_v35 = vpop.permute.xlu0 %832 }
  0xd1   : > { %1239 = vrot.lane.b32.xlu1 %v1176_v14, %s5715_s5  ;;  %v1180_v14 = vsel %vm1161_vm5, %v1177_v54, %v1179_v17  ;;  %v6555_v54 = vld [vmem:[%s5753_s18 + $0x50] sm:$0xff]  }
  0xd2   : > { %1111 = vrot.lane.b32.xlu0 %v6261_v38, %s5714_s29  ;;  %v1574_v9 = vrot.slane %v6555_v54, 3 }
  0xd3   : > { %v6526_v24 = vpop.permute.xlu1 %838 }
  0xd4   : > { %v6531_v23 = vpop.permute.xlu0 %836 }
  0xd5   : > { %1305 = vrot.lane.b32.xlu1 %v1178_v8, %s5716_s8 }
  0xd6   : > { %1241 = vrot.lane.b32.xlu0 %v1178_v8, %s5715_s5  ;;  %v1392_v8 = vsel %vm10541_vm2, %v6247_v51, %v1391_v45 }
  0xd7   : > { %v6539_v38 = vpop.permute.xlu1 %842 }
  0xd8   : > { %10640 = vst [vmem:[#allocation7_spill] sm:$0xff] %v6539_v38  ;;  %v6542_v50 = vpop.permute.xlu0 %840 }
  0xd9   : > { %10641 = vst [vmem:[#allocation2_spill] sm:$0xff] %v6542_v50  ;;  %1506 = vrot.lane.b32.xlu1 %v6265_v44, %s5717_s9  ;;  %v1575_v44 = vsel %vm10542_vm6, %v1572_v39, %v1574_v9  ;;  %v10646_v50 = vld [vmem:[#allocation3_spill] sm:$0xff]  ;;  %v6580_v39 = vld [vmem:[%s5753_s18 + $0x58] sm:$0xff]  }
  0xda   : > { %1307 = vrot.lane.b32.xlu0 %v1180_v14, %s5716_s8  ;;  %v999_v51 = vrot.slane %v10646_v50, 2 }
  0xdb   : > { %v6550_v11 = vpop.permute.xlu1 %846 }
  0xdc   : > { %10642 = vst [vmem:[#allocation61_spill] sm:$0xff] %v6550_v11  ;;  %v6558_v36 = vpop.permute.xlu0 %844  ;;  %v998_v11 = vrot.slane %v10645_v47, 1 }
  0xdd   : > { %10643 = vst [vmem:[#allocation62_spill] sm:$0xff] %v6558_v36  ;;  %1636 = vrot.lane.b32.xlu1 %v1573_v33, %s5718_s10  ;;  %v997_v36 = vsel %vm958_vm1, %v6245_v43, %v996_v56 }
  0xde   : > { %1508 = vrot.lane.b32.xlu0 %v1392_v8, %s5717_s9  ;;  %v1000_v2 = vor.u32 %v999_v51, %v998_v11  ;;  %v1181_v8 = vrot.slane %v6580_v39, 2 }
  0xdf   : > { %v6562_v20 = vpop.permute.xlu1 %850 }
  0xe0   : > { %10644 = vst [vmem:[#allocation63_spill] sm:$0xff] %v6562_v20  ;;  %v6567_v38 = vpop.permute.xlu0 %848  ;;  %v1001_v11 = vsel %vm958_vm1, %v996_v56, %v1000_v2 }
  0xe1   : > { %10647 = vst [vmem:[#allocation4_spill] sm:$0xff] %v6567_v38  ;;  %910 = vrot.lane.b32.xlu1 %v6273_v53, %s5713_s26  ;;  %v1393_v38 = vrot.slane %v10645_v47, 2  ;;  %v1394_v53 = vrot.slane %v10646_v50, 3  ;;  %v6598_v47 = vld [vmem:[%s5753_s18 + $0x60] sm:$0xff]  }
  0xe2   : > { %1638 = vrot.lane.b32.xlu0 %v1575_v44, %s5718_s10  ;;  %v1183_v50 = vrot.slane %v6598_v47, 2 }
  0xe3   : > { %v6574_v25 = vpop.permute.xlu1 %854  ;;  %v1395_v51 = vor.u32 %v1394_v53, %v1393_v38 }
  0xe4   : > { %10648 = vst [vmem:[#allocation3_spill] sm:$0xff] %v6574_v25  ;;  %v6576_v33 = vpop.permute.xlu0 %852  ;;  %v1184_v53 = vsel %vm1161_vm5, %v1181_v8, %v1183_v50 }
  0xe5   : > { %10649 = vst [vmem:[#allocation64_spill] sm:$0xff] %v6576_v33  ;;  %1113 = vrot.lane.b32.xlu1 %v997_v36, %s5714_s29  ;;  %v1182_v36 = vsel %vm1161_vm5, %v1179_v17, %v1181_v8  ;;  %v1576_v17 = vrot.slane %v6580_v39, 3  ;;  %v10659_v8 = vld [vmem:[#allocation8_spill] sm:$0xff] }
  0xe6   : > { %912 = vrot.lane.b32.xlu0 %v6292_v48, %s5713_s26  ;;  %v10653_v48 = vld [vmem:[#allocation11_spill] sm:$0xff] }
  0xe7   : > { %v6587_v43 = vpop.permute.xlu1 %858  ;;  %v1397_v25 = vrot.slane %v10653_v48, 2 }
  0xe8   : > { %10650 = vst [vmem:[#allocation65_spill] sm:$0xff] %v6587_v43  ;;  %v6590_v44 = vpop.permute.xlu0 %856  ;;  %v10654_v43 = vld [vmem:[#allocation5_spill] sm:$0xff] }
  0xe9   : > { %10651 = vst [vmem:[#allocation66_spill] sm:$0xff] %v6590_v44  ;;  %1243 = vrot.lane.b32.xlu1 %v1180_v14, %s5715_s5  ;;  %v1398_v20 = vrot.slane %v10654_v43, 3  ;;  %v1396_v14 = vsel %vm10541_vm2, %v1391_v45, %v1395_v51  ;;  %v1577_v44 = vsel %vm10542_vm6, %v1574_v9, %v1576_v17  ;;  %v1003_v28 = vrot.slane %v10654_v43, 2 }
  0xea   : > { %1115 = vrot.lane.b32.xlu0 %v1001_v11, %s5714_s29  ;;  %v1006_v43 = vrot.slane %v10659_v8, 1 }
  0xeb   : > { %v6595_v33 = vpop.permute.xlu1 %862  ;;  %v1399_v11 = vor.u32 %v1398_v20, %v1397_v25 }
  0xec   : > { %10652 = vst [vmem:[#allocation67_spill] sm:$0xff] %v6595_v33  ;;  %v6603_v56 = vpop.permute.xlu0 %860 }
  0xed   : > { %10655 = vst [vmem:[#allocation11_spill] sm:$0xff] %v6603_v56  ;;  %1309 = vrot.lane.b32.xlu1 %v1182_v36, %s5716_s8  ;;  %v1002_v56 = vrot.slane %v10653_v48, 1  ;;  %v10660_v48 = vld [vmem:[#allocation6_spill] sm:$0xff] }
  0xee   : > { %1245 = vrot.lane.b32.xlu0 %v1182_v36, %s5715_s5  ;;  %v1400_v36 = vsel %vm10541_vm2, %v1395_v51, %v1399_v11 }
  0xef   : > { %v6609_v38 = vpop.permute.xlu1 %866  ;;  %v1004_v20 = vor.u32 %v1003_v28, %v1002_v56 }
  0xf0   : > { %10656 = vst [vmem:[#allocation5_spill] sm:$0xff] %v6609_v38  ;;  %v6612_v33 = vpop.permute.xlu0 %864  ;;  %v10462_v38 = vrot.slane %v6598_v47, 3 }
  0xf1   : > { %10657 = vst [vmem:[#allocation68_spill] sm:$0xff] %v6612_v33  ;;  %1510 = vrot.lane.b32.xlu1 %v1396_v14, %s5717_s9  ;;  %v1007_v14 = vrot.slane %v10660_v48, 2 }
  0xf2   : > { %1311 = vrot.lane.b32.xlu0 %v1184_v53, %s5716_s8  ;;  %v1579_v25 = vsel %vm10542_vm6, %v1576_v17, %v10462_v38  ;;  %v6638_v17 = vld [vmem:[%s5753_s18 + $0x68] sm:$0xff]   ;;  %v1401_v38 = vrot.slane %v10659_v8, 2 }
  0xf3   : > { %v895_v45 = vpop.permute.xlu1 %894 }
  0xf4   : > { %v6621_v18 = vpop.permute.xlu0 %868 }
  0xf5   : > { %10658 = vst [vmem:[#allocation69_spill] sm:$0xff] %v6621_v18  ;;  %1640 = vrot.lane.b32.xlu1 %v1577_v44, %s5718_s10  ;;  %v1005_v18 = vsel %vm958_vm1, %v1000_v2, %v1004_v20  ;;  %v6634_v44 = vor.u32 %v1007_v14, %v1006_v43 }
  0xf6   : > { %1512 = vrot.lane.b32.xlu0 %v1400_v36, %s5717_s9  ;;  %v1185_v36 = vrot.slane %v6638_v17, 2 }
  0xf7   : > { %v1098_v9 = vpop.permute.xlu1 %1097 }
  0xf8   : > { %v897_v51 = vpop.permute.xlu0 %896 }
  0xf9   : > { %914 = vrot.lane.b32.xlu1 %v6285_v16, %s5713_s26  ;;  %v1402_v16 = vrot.slane %v10660_v48, 3 }
  0xfa   : > { %1642 = vrot.lane.b32.xlu0 %v1579_v25, %s5718_s10  ;;  %v1009_v25 = vsel %vm958_vm1, %v1004_v20, %v6634_v44 }
  0xfb   : > { %v1228_v28 = vpop.permute.xlu1 %1227  ;;  %v1403_v48 = vor.u32 %v1402_v16, %v1401_v38 }
  0xfc   : > { %v1100_v56 = vpop.permute.xlu0 %1099 }
  0xfd   : > { %1117 = vrot.lane.b32.xlu1 %v1005_v18, %s5714_s29  ;;  %v5674_v18 = vld [vmem:[%s5753_s18] sm:$0xff]   ;;  %v1404_v16 = vsel %vm10541_vm2, %v1399_v11, %v1403_v48 }
  0xfe   : > { %916 = vrot.lane.b32.xlu0 %v6304_v57, %s5713_s26  ;;  %v1690_v43 = vsel %vm1688_vm7, %v5674_v18, %v6378_v59  ;;  %v1186_v57 = vsel %vm1161_vm5, %v1183_v50, %v1185_v36  ;;  %v6658_v18 = vld [vmem:[%s5753_s18 + $0x70] sm:$0xff]  }
  0xff   : > { %v1294_v2 = vpop.permute.xlu1 %1293  ;;  %v1755_v8 = vsel %vm10487_vm8, %v1690_v43, %v6511_v29  ;;  %v1405_v29 = vrot.slane %v10661_v41, 2  ;;  %v10662_v43 = vld [vmem:[#allocation9_spill] sm:$0xff] }
 0x100   : > { %v1230_v14 = vpop.permute.xlu0 %1229  ;;  %v1820_v33 = vsel %vm10569_vm9, %v1755_v8, %v895_v45  ;;  %v1406_v15 = vrot.slane %v10662_v43, 3 }
 0x101   : > { %1247 = vrot.lane.b32.xlu1 %v1184_v53, %s5715_s5  ;;  %v1885_v59 = vsel %vm10564_vm10, %v1820_v33, %v1098_v9  ;;  %v1187_v53 = vrot.slane %v6658_v18, 2  ;;  %v1580_v33 = vrot.slane %v6638_v17, 3  ;;  %v5676_v9 = vld [vmem:[%s5753_s18 + $0x8] sm:$0xff]  }
 0x102   : > { %1119 = vrot.lane.b32.xlu0 %v1009_v25, %s5714_s29  ;;  %v1950_v50 = vsel %vm10560_vm11, %v1885_v59, %v1228_v28  ;;  %v1692_v25 = vsel %vm1688_vm7, %v5676_v9, %v6387_v46 }
 0x103   : > { %v1495_v20 = vpop.permute.xlu1 %1494  ;;  %v2015_v45 = vsel %vm10562_vm12, %v1950_v50, %v1294_v2  ;;  %v1757_v59 = vsel %vm10487_vm8, %v1692_v25, %v6509_v60  ;;  %v1188_v2 = vsel %vm1161_vm5, %v1185_v36, %v1187_v53  ;;  %v1407_v50 = vor.u32 %v1406_v15, %v1405_v29  ;;  %v10665_v25 = vld [vmem:[#allocation10_spill] sm:$0xff] }
 0x104   : > { %v1296_v38 = vpop.permute.xlu0 %1295  ;;  %v2080_v8 = vsel %vm10561_vm13, %v2015_v45, %v1495_v20  ;;  %v1822_v32 = vsel %vm10569_vm9, %v1757_v59, %v897_v51  ;;  %v1010_v20 = vrot.slane %v10661_v41, 1  ;;  %v1011_v36 = vrot.slane %v10662_v43, 2 }
 0x105   : > { %1313 = vrot.lane.b32.xlu1 %v1186_v57, %s5716_s8  ;;  %v1887_v46 = vsel %vm10564_vm10, %v1822_v32, %v1100_v56  ;;  %v1408_v29 = vsel %vm10541_vm2, %v1403_v48, %v1407_v50 }
 0x106   : > { %1249 = vrot.lane.b32.xlu0 %v1186_v57, %s5715_s5  ;;  %v10663_v57 = vrot.slane %v6598_v47, 3  ;;  %v1952_v45 = vsel %vm10560_vm11, %v1887_v46, %v1230_v14  ;;  %v1012_v43 = vor.u32 %v1011_v36, %v1010_v20  ;;  %v5678_v36 = vld [vmem:[%s5753_s18 + $0x10] sm:$0xff]  }
 0x107   : > { %v1625_v28 = vpop.permute.xlu1 %1624  ;;  %v2017_v51 = vsel %vm10562_vm12, %v1952_v45, %v1296_v38  ;;  %v10664_v38 = vld [vmem:[#allocation12_spill] sm:$0xff]  ;;  %v1694_v45 = vsel %vm1688_vm7, %v5678_v36, %v6375_v10  ;;  %v6734_v10 = vld [vmem:[%s5753_s18 + $0x80] sm:$0xff]  }
 0x108   : > { %v2145_v11 = vsel %vm10563_vm14, %v2080_v8, %v1625_v28  ;;  %v1497_v5 = vpop.permute.xlu0 %1496  ;;  %v1581_v60 = vsel %vm10542_vm6, %v10663_v57, %v1580_v33  ;;  %v1014_v9 = vrot.slane %v10664_v38, 1  ;;  %v1013_v28 = vsel %vm958_vm1, %v6634_v44, %v1012_v43 }
 0x109   : > { %1514 = vrot.lane.b32.xlu1 %v1404_v16, %s5717_s9  ;;  %5286 = vmatprep.mubr.msk.bf16.mxu0 %vm10548_vm15, %v2145_v11  ;;  %v1582_v16 = vrot.slane %v6658_v18, 3  ;;  %v2082_v32 = vsel %vm10561_vm13, %v2017_v51, %v1497_v5  ;;  %v1015_v5 = vrot.slane %v10665_v25, 2 }
 0x10a   : > { %1315 = vrot.lane.b32.xlu0 %v1188_v2, %s5716_s8 }
 0x10b   : > { %v899_v15 = vpop.permute.xlu1 %898  ;;  %v1583_v48 = vsel %vm10542_vm6, %v1580_v33, %v1582_v16  ;;  %v6708_v11 = vor.u32 %v1015_v5, %v1014_v9  ;;  %v6712_v33 = vld [vmem:[%s5753_s18 + $0x78] sm:$0xff]  }
 0x10c   : > { %v1627_v56 = vpop.permute.xlu0 %1626  ;;  %v1189_v57 = vrot.slane %v6712_v33, 2 }
 0x10d   : > { %1644 = vrot.lane.b32.xlu1 %v1581_v60, %s5718_s10  ;;  %v2147_v41 = vsel %vm10563_vm14, %v2082_v32, %v1627_v56  ;;  %v1409_v60 = vrot.slane %v10664_v38, 2  ;;  %v1017_v20 = vsel %vm958_vm1, %v1012_v43, %v6708_v11 }
 0x10e   : > { %1516 = vrot.lane.b32.xlu0 %v1408_v29, %s5717_s9  ;;  %5287 = vmatmul.mubr.msk.bf16.vlgmr.msra.gmra.mxu0 %vm10548_vm15, %v2147_v41  ;;  %v1759_v29 = vsel %vm10487_vm8, %v1694_v45, %v6520_v35  ;;  %v1190_v32 = vsel %vm1161_vm5, %v1187_v53, %v1189_v57  ;;  %v10667_v35 = vld [vmem:[#allocation13_spill] sm:$0xff] }
 0x10f   : > { %v1102_v14 = vpop.permute.xlu1 %1101  ;;  %v1824_v56 = vsel %vm10569_vm9, %v1759_v29, %v899_v15  ;;  %v1414_v9 = vrot.slane %v10667_v35, 3 }
 0x110   : > { %v901_v8 = vpop.permute.xlu0 %900  ;;  %v1889_v43 = vsel %vm10564_vm10, %v1824_v56, %v1102_v14  ;;  %v5680_v14 = vld [vmem:[%s5753_s18 + $0x18] sm:$0xff]   ;;  %v1019_v56 = vrot.slane %v10667_v35, 2  ;;  %v10668_v35 = vld [vmem:[#allocation16_spill] sm:$0xff] }
 0x111   : > { %918 = vrot.lane.b32.xlu1 %v6297_v55, %s5713_s26  ;;  %v1410_v55 = vrot.slane %v10665_v25, 3 }
 0x112   : > { %1646 = vrot.lane.b32.xlu0 %v1583_v48, %s5718_s10  ;;  %v10666_v48 = vld [vmem:[#allocation20_spill] sm:$0xff] }
 0x113   : > { %v1232_v59 = vpop.permute.xlu1 %1231  ;;  %v1413_v38 = vrot.slane %v10666_v48, 2 }
 0x114   : > { %v1104_v46 = vpop.permute.xlu0 %1103  ;;  %v1954_v25 = vsel %vm10560_vm11, %v1889_v43, %v1232_v59 }
 0x115   : > { %1121 = vrot.lane.b32.xlu1 %v1013_v28, %s5714_s29  ;;  %v1584_v28 = vrot.slane %v6712_v33, 3 }
 0x116   : > { %920 = vrot.lane.b32.xlu0 %v6316_v27, %s5713_s26  ;;  %v1411_v27 = vor.u32 %v1410_v55, %v1409_v60  ;;  %v1696_v60 = vsel %vm1688_vm7, %v5680_v14, %v6384_v3 }
 0x117   : > { %v1298_v44 = vpop.permute.xlu1 %1297  ;;  %v1761_v59 = vsel %vm10487_vm8, %v1696_v60, %v6518_v58  ;;  %v1585_v58 = vsel %vm10542_vm6, %v1582_v16, %v1584_v28 }
 0x118   : > { %v1234_v51 = vpop.permute.xlu0 %1233  ;;  %v2019_v15 = vsel %vm10562_vm12, %v1954_v25, %v1298_v44  ;;  %v1412_v5 = vsel %vm10541_vm2, %v1407_v50, %v1411_v27  ;;  %v6755_v44 = vor.u32 %v1414_v9, %v1413_v38  ;;  %v1826_v45 = vsel %vm10569_vm9, %v1761_v59, %v901_v8 }
 0x119   : > { %1251 = vrot.lane.b32.xlu1 %v1188_v2, %s5715_s5  ;;  %v1191_v2 = vrot.slane %v6734_v10, 2  ;;  %v1891_v3 = vsel %vm10564_vm10, %v1826_v45, %v1104_v46  ;;  %v1586_v46 = vrot.slane %v6734_v10, 3  ;;  %v1022_v25 = vrot.slane %v10668_v35, 1  ;;  %v5682_v45 = vld [vmem:[%s5753_s18 + $0x20] sm:$0xff]  }
 0x11a   : > { %1123 = vrot.lane.b32.xlu0 %v1017_v20, %s5714_s29  ;;  %v1416_v43 = vsel %vm10541_vm2, %v1411_v27, %v6755_v44 }
 0x11b   : > { %v1499_v41 = vpop.permute.xlu1 %1498  ;;  %v1192_v50 = vsel %vm1161_vm5, %v1189_v57, %v1191_v2  ;;  %v1956_v57 = vsel %vm10560_vm11, %v1891_v3, %v1234_v51  ;;  %v1587_v27 = vsel %vm10542_vm6, %v1584_v28, %v1586_v46  ;;  %v6803_v3 = vld [vmem:[%s5753_s18 + $0x88] sm:$0xff]  }
 0x11c   : > { %v1300_v53 = vpop.permute.xlu0 %1299  ;;  %v2084_v55 = vsel %vm10561_vm13, %v2019_v15, %v1499_v41 }
 0x11d   : > { %1317 = vrot.lane.b32.xlu1 %v1190_v32, %s5716_s8  ;;  %v2021_v41 = vsel %vm10562_vm12, %v1956_v57, %v1300_v53  ;;  %v10669_v53 = vld [vmem:[#allocation14_spill] sm:$0xff]  ;;  %v5685_v57 = vld [vmem:[%s5753_s18 + $0x30] sm:$0xff]  }
 0x11e   : > { %1253 = vrot.lane.b32.xlu0 %v1190_v32, %s5715_s5  ;;  %v1018_v32 = vrot.slane %v10666_v48, 1  ;;  %v1023_v15 = vrot.slane %v10669_v53, 2  ;;  %v1418_v59 = vrot.slane %v10669_v53, 3  ;;  %v1588_v53 = vrot.slane %v6803_v3, 3 }
 0x11f   : > { %v1629_v20 = vpop.permute.xlu1 %1628 }
 0x120   : > { %v2149_v36 = vsel %vm10563_vm14, %v2084_v55, %v1629_v20  ;;  %v1501_v29 = vpop.permute.xlu0 %1500  ;;  %v1020_v48 = vor.u32 %v1019_v56, %v1018_v32  ;;  %v6789_v28 = vor.u32 %v1023_v15, %v1022_v25  ;;  %v1417_v20 = vrot.slane %v10668_v35, 2  ;;  %v5684_v32 = vld [vmem:[%s5753_s18 + $0x38] sm:$0xff]  }
 0x121   : > { %1518 = vrot.lane.b32.xlu1 %v1412_v5, %s5717_s9  ;;  %5290 = vmatprep.mubr.msk.bf16.mxu0 %vm10548_vm15, %v2149_v36  ;;  %v2086_v38 = vsel %vm10561_vm13, %v2021_v41, %v1501_v29  ;;  %v5681_v36 = vld [vmem:[%s5753_s18 + $0x28] sm:$0xff]   ;;  %v1698_v29 = vsel %vm1688_vm7, %v5682_v45, %v6396_v40  ;;  %v6809_v56 = vsel %vm1688_vm7, %v5684_v32, %v6401_v34  ;;  %v5686_v40 = vld [vmem:[%s5753_s18 + $0x40] sm:$0xff]   ;;  %v6949_v32 = vld [vmem:[%s5753_s18 + $0xb0] sm:$0xff]  }
 0x122   : > { %1319 = vrot.lane.b32.xlu0 %v1192_v50, %s5716_s8  ;;  %v1021_v14 = vsel %vm958_vm1, %v6708_v11, %v1020_v48  ;;  %v1700_v11 = vsel %vm1688_vm7, %v5681_v36, %v6393_v0  ;;  %v6814_v41 = vsel %vm1688_vm7, %v5685_v57, %v6404_v22  ;;  %v6819_v0 = vsel %vm1688_vm7, %v6535_v49, %v6409_v12  ;;  %v6933_v36 = vld [vmem:[%s5753_s18 + $0xb8] sm:$0xff]   ;;  %v10674_v57 = vld [vmem:[#allocation52_spill] sm:$0xff] }
 0x123   : > { %v903_v8 = vpop.permute.xlu1 %902  ;;  %v6836_v22 = vsel %vm1688_vm7, %v6555_v54, %v6420_v61  ;;  %v6841_v49 = vsel %vm1688_vm7, %v6638_v17, %v6426_v26  ;;  %v1025_v12 = vsel %vm958_vm1, %v1020_v48, %v6789_v28  ;;  %v1419_v61 = vor.u32 %v1418_v59, %v1417_v20  ;;  %v6902_v48 = vld [vmem:[%s5753_s18 + $0xa8] sm:$0xff]  }
 0x124   : > { %v1631_v9 = vpop.permute.xlu0 %1630  ;;  %v1763_v54 = vsel %vm10487_vm8, %v1698_v29, %v6531_v23  ;;  %v6878_v23 = vsel %vm1688_vm7, %v6734_v10, %v6446_v13  ;;  %v6938_v45 = vsel %vm1688_vm7, %v6933_v36, %v6468_v42  ;;  %v10678_v10 = vld [vmem:[#allocation18_spill] sm:$0xff] }
 0x125   : > { %1648 = vrot.lane.b32.xlu1 %v1585_v58, %s5718_s10  ;;  %v2151_v16 = vsel %vm10563_vm14, %v2086_v38, %v1631_v9  ;;  %v1193_v58 = vrot.slane %v6803_v3, 2  ;;  %v6831_v38 = vsel %vm1688_vm7, %v6580_v39, %v6418_v52  ;;  %v10670_v39 = vld [vmem:[#allocation24_spill] sm:$0xff]  ;;  %10673 = vst [vmem:[#allocation6_spill] sm:$0xff] %v6938_v45 }
 0x126   : > { %1520 = vrot.lane.b32.xlu0 %v1416_v43, %s5717_s9  ;;  %5291 = vmatmul.mubr.msk.bf16.gmra.mxu0 %vm10548_vm15, %v2151_v16  ;;  %v6824_v43 = vsel %vm1688_vm7, %v5686_v40, %v6411_v6  ;;  %v6853_v6 = vsel %vm1688_vm7, %v6712_v33, %v6434_v4  ;;  %v10671_v4 = vld [vmem:[#allocation17_spill] sm:$0xff]  ;;  %v6868_v33 = vsel %vm1688_vm7, %v6658_v18, %v6437_v37  ;;  %v1026_v59 = vrot.slane %v10670_v39, 1 }
 0x127   : > { %v1106_v51 = vpop.permute.xlu1 %1105  ;;  %v1422_v17 = vrot.slane %v10671_v4, 3  ;;  %v6884_v16 = vld [vmem:[%s5753_s18 + $0x98] sm:$0xff]   ;;  %v6954_v40 = vsel %vm1688_vm7, %v6949_v32, %v10674_v57 }
 0x128   : > { %v6782_v5 = vpop.permute.xlu0 %904  ;;  %v6889_v37 = vsel %vm1688_vm7, %v6884_v16, %v6451_v19  ;;  %10675 = vst [vmem:[#allocation15_spill] sm:$0xff] %v6954_v40 }
 0x129   : > { %922 = vrot.lane.b32.xlu1 %v6309_v63, %s5713_s26  ;;  %v2587_v63 = vlaneseq }
 0x12a   : > { %1650 = vrot.lane.b32.xlu0 %v1587_v27, %s5718_s10  ;;  %v6907_v27 = vsel %vm1688_vm7, %v6902_v48, %v6459_v1  ;;  %v6918_v1 = vstv %s5114_s11 }
 0x12b   : > { %v1236_v60 = vpop.permute.xlu1 %1235  ;;  %v6856_v26 = vshrl.u32 %v2587_v63, 7  ;;  %10672 = vst [vmem:[#allocation8_spill] sm:$0xff] %v6907_v27  ;;  %v1027_v63 = vrot.slane %v10671_v4, 2  ;;  %v1031_v4 = vrot.slane %v10678_v10, 2 }
 0x12c   : > { %v6791_v55 = vpop.permute.xlu0 %1107 }
 0x12d   : > { %1125 = vrot.lane.b32.xlu1 %v1021_v14, %s5714_s29  ;;  %v6921_v14 = vld [vmem:[%s5753_s18 + $0xa0] sm:$0xff]  }
 0x12e   : > { %924 = vrot.lane.b32.xlu0 %v6328_v31, %s5713_s26  ;;  %v6848_v31 = vsel %vm1688_vm7, %v6598_v47, %v6429_v7  ;;  %v1194_v7 = vsel %vm1161_vm5, %v1191_v2, %v1193_v58  ;;  %v1421_v47 = vrot.slane %v10670_v39, 2  ;;  %v1828_v2 = vsel %vm10569_vm9, %v1763_v54, %v903_v8 }
 0x12f   : > { %v1302_v34 = vpop.permute.xlu1 %1301  ;;  %v1893_v18 = vsel %vm10564_vm10, %v1828_v2, %v1106_v51  ;;  %v2590_v51 = vadd.s32 16, %v6856_v26  ;;  %v1028_v39 = vor.u32 %v1027_v63, %v1026_v59  ;;  %v6986_v2 = vld [vmem:[%s5753_s18 + $0xc8] sm:$0xff]  }
 0x130   : > { %v1238_v52 = vpop.permute.xlu0 %1237  ;;  %v1958_v19 = vsel %vm10560_vm11, %v1893_v18, %v1236_v60  ;;  %v6916_v15 = vor.u32 %v1422_v17, %v1421_v47  ;;  %v6926_v60 = vsel %vm1688_vm7, %v6921_v14, %v6461_v21  ;;  %v1765_v21 = vsel %vm10487_vm8, %v1700_v11, %v6526_v24  ;;  %v10684_v59 = vld [vmem:[#allocation55_spill] sm:$0xff] }
 0x131   : > { %1255 = vrot.lane.b32.xlu1 %v1192_v50, %s5715_s5  ;;  %v6873_v50 = vsel %vm1688_vm7, %v6803_v3, %v6443_v30  ;;  %v6892_v30 = vld [vmem:[%s5753_s18 + $0x90] sm:$0xff]   ;;  %v2023_v25 = vsel %vm10562_vm12, %v1958_v19, %v1302_v34  ;;  %v1830_v42 = vsel %vm10569_vm9, %v1765_v21, %v6782_v5  ;;  %v6961_v24 = vadd.s32 %v6918_v1, %v2590_v51  ;;  %v6994_v19 = vld [vmem:[%s5753_s18 + $0xc0] sm:$0xff]  }
 0x132   : > { %1127 = vrot.lane.b32.xlu0 %v1025_v12, %s5714_s29  ;;  %v6897_v13 = vsel %vm1688_vm7, %v6892_v30, %v6454_v62  ;;  %v10464_v8 = vrot.slane %v6892_v30, 2  ;;  %v1420_v62 = vsel %vm10541_vm2, %v6755_v44, %v1419_v61  ;;  %v1895_v11 = vsel %vm10564_vm10, %v1830_v42, %v6791_v55  ;;  %v10677_v55 = vld [vmem:[#allocation22_spill] sm:$0xff]  ;;  %v10687_v42 = vld [vmem:[#allocation21_spill] sm:$0xff] }
 0x133   : > { %v1503_v9 = vpop.permute.xlu1 %1502  ;;  %10676 = vst [vmem:[#allocation9_spill] sm:$0xff] %v6961_v24  ;;  %v1424_v5 = vsel %vm10541_vm2, %v1419_v61, %v6916_v15  ;;  %v10463_v12 = vrot.slane %v6892_v30, 3  ;;  %v1960_v54 = vsel %vm10560_vm11, %v1895_v11, %v1238_v52  ;;  %v1030_v47 = vrot.slane %v10677_v55, 1 }
 0x134   : > { %v1304_v35 = vpop.permute.xlu0 %1303  ;;  %v2088_v44 = vsel %vm10561_vm13, %v2023_v25, %v1503_v9  ;;  %v6946_v3 = vsel %vm1161_vm5, %v1193_v58, %v10464_v8  ;;  %v1589_v58 = vsel %vm10542_vm6, %v1586_v46, %v1588_v53  ;;  %v1425_v17 = vrot.slane %v10677_v55, 2  ;;  %v10680_v9 = vld [vmem:[#allocation53_spill] sm:$0xff] }
 0x135   : > { %1321 = vrot.lane.b32.xlu1 %v1194_v7, %s5716_s8  ;;  %v2025_v46 = vsel %vm10562_vm12, %v1960_v54, %v1304_v35  ;;  %v1426_v61 = vrot.slane %v10678_v10, 3  ;;  %v6983_v52 = vadd.s32 %v6918_v1, %v6856_v26  ;;  %v6991_v18 = vsel %vm1688_vm7, %v6986_v2, %v10680_v9  ;;  %v7016_v54 = vld [vmem:[%s5753_s18 + $0xd0] sm:$0xff]  }
 0x136   : > { %1257 = vrot.lane.b32.xlu0 %v1194_v7, %s5715_s5  ;;  %10681 = vst [vmem:[#allocation10_spill] sm:$0xff] %v6991_v18  ;;  %v1430_v11 = vrot.slane %v10687_v42, 3  ;;  %v1591_v10 = vsel %vm10542_vm6, %v1588_v53, %v10463_v12  ;;  %v1032_v9 = vor.u32 %v1031_v4, %v1030_v47  ;;  %v1592_v4 = vrot.slane %v6884_v16, 3  ;;  %v10692_v12 = vld [vmem:[#allocation23_spill] sm:$0xff] }
 0x137   : > { %v1633_v20 = vpop.permute.xlu1 %1632  ;;  %10679 = vst [vmem:[#allocation12_spill] sm:$0xff] %v6983_v52  ;;  %v1039_v8 = vrot.slane %v10692_v12, 2 }
 0x138   : > { %v2153_v29 = vsel %vm10563_vm14, %v2088_v44, %v1633_v20  ;;  %v1505_v34 = vpop.permute.xlu0 %1504  ;;  %v2719_v44 = vcvt.s32.f32 %v6961_v24  ;;  %v7005_v20 = vld [vmem:[%s5753_s18 + $0xd8] sm:$0xff]  }
 0x139   : > { %1522 = vrot.lane.b32.xlu1 %v1420_v62, %s5717_s9  ;;  %5294 = vmatprep.mubr.msk.bf16.mxu0 %vm10548_vm15, %v2153_v29  ;;  %v10682_v62 = vld [vmem:[#allocation54_spill] sm:$0xff]  ;;  %v2090_v51 = vsel %vm10561_vm13, %v2025_v46, %v1505_v34  ;;  %v7010_v63 = vsel %vm1688_vm7, %v7005_v20, %v10684_v59  ;;  %v10686_v29 = vld [vmem:[#allocation28_spill] sm:$0xff]  ;;  %v1029_v46 = vsel %vm958_vm1, %v6789_v28, %v1028_v39  ;;  %v1035_v28 = vrot.slane %v10687_v42, 2 }
 0x13a   : > { %1323 = vrot.lane.b32.xlu0 %v6946_v3, %s5716_s8  ;;  %v6999_v35 = vsel %vm1688_vm7, %v6994_v19, %v10682_v62  ;;  %10685 = vst [vmem:[#allocation13_spill] sm:$0xff] %v7010_v63  ;;  %v1429_v57 = vrot.slane %v10686_v29, 2  ;;  %v10688_v34 = vld [vmem:[#allocation56_spill] sm:$0xff]  ;;  %v1197_v62 = vrot.slane %v6884_v16, 2  ;;  %v1034_v53 = vrot.slane %v10686_v29, 1  ;;  %v10694_v63 = vld [vmem:[#allocation57_spill] sm:$0xff] }
 0x13b   : > { %v6974_v7 = vpop.permute.xlu1 %906  ;;  %10683 = vst [vmem:[#allocation20_spill] sm:$0xff] %v6999_v35  ;;  %v10690_v59 = vld [vmem:[#allocation48_spill] sm:$0xff]  ;;  %v2783_v47 = vmul.f32 0.0030864198, %v2719_v44  ;;  %v7055_v29 = vld [vmem:[%s5753_s18 + $0xe0] sm:$0xff]   ;;  %v7063_v16 = vld [vmem:[%s5753_s18 + $0xf8] sm:$0xff]  }
 0x13c   : > { %v1635_v25 = vpop.permute.xlu0 %1634  ;;  %10698 = vst [vmem:[#allocation52_spill] sm:$0xff] %v7063_v16  ;;  %v10702_v35 = vld [vmem:[#allocation60_spill] sm:$0xff]  ;;  %v1036_v27 = vor.u32 %v1035_v28, %v1034_v53  ;;  %v10708_v53 = vld [vmem:[#allocation50_spill] sm:$0xff] }
 0x13d   : > { %1652 = vrot.lane.b32.xlu1 %v1589_v58, %s5718_s10  ;;  %v2155_v21 = vsel %vm10563_vm14, %v2090_v51, %v1635_v25  ;;  %v7021_v58 = vsel %vm1688_vm7, %v7016_v54, %v10688_v34  ;;  %v1427_v51 = vor.u32 %v1426_v61, %v1425_v17  ;;  %v7042_v34 = vor.u32 %v1430_v11, %v1429_v57  ;;  %v10691_v17 = vld [vmem:[#allocation25_spill] sm:$0xff]  ;;  %v10699_v57 = vld [vmem:[#allocation59_spill] sm:$0xff] }
 0x13e   : > { %10689 = vst [vmem:[#allocation16_spill] sm:$0xff] %v7021_v58  ;;  %1524 = vrot.lane.b32.xlu0 %v1424_v5, %s5717_s9  ;;  %5295 = vmatmul.mubr.msk.bf16.gmra.mxu0 %vm10548_vm15, %v2155_v21  ;;  %v2717_v5 = vcvt.s32.f32 %v6983_v52  ;;  %v1038_v61 = vrot.slane %v10691_v17, 1  ;;  %v7047_v58 = vld [vmem:[%s5753_s18 + $0xe8] sm:$0xff]   ;;  %v10696_v21 = vld [vmem:[#allocation58_spill] sm:$0xff]  ;;  %v7068_v42 = vsel %vm1688_vm7, %v7063_v16, %v10699_v57  ;;  %v2847_v16 = vfloor.f32 %v2783_v47 }
 0x13f   : > { %v7025_v55 = vpop.permute.xlu1 %1109  ;;  %10693 = vst [vmem:[#allocation14_spill] sm:$0xff] %v7047_v58  ;;  %v7060_v44 = vsel %vm1688_vm7, %v7055_v29, %v10696_v21  ;;  %10700 = vst [vmem:[#allocation22_spill] sm:$0xff] %v7068_v42  ;;  %v1033_v21 = vsel %vm958_vm1, %v1028_v39, %v1032_v9  ;;  %v1428_v42 = vsel %vm10541_vm2, %v6916_v15, %v1427_v51  ;;  %v1433_v28 = vrot.slane %v10691_v17, 2 }
 0x140   : > { %v7034_v25 = vpop.permute.xlu0 %908  ;;  %10697 = vst [vmem:[#allocation17_spill] sm:$0xff] %v7060_v44  ;;  %v2781_v40 = vmul.f32 0.0030864198, %v2717_v5  ;;  %v10706_v5 = vrot.slane %v6892_v30, 3 }
 0x141   : > { %926 = vrot.lane.b32.xlu1 %v10690_v59, %s5713_s26  ;;  %v7052_v59 = vsel %vm1688_vm7, %v7047_v58, %v10694_v63  ;;  %v2591_v63 = vadd.s32 24, %v6856_v26  ;;  %v10721_v58 = vld [vmem:[#allocation65_spill] sm:$0xff] }
 0x142   : > { %10695 = vst [vmem:[#allocation24_spill] sm:$0xff] %v7052_v59  ;;  %1654 = vrot.lane.b32.xlu0 %v1591_v10, %s5718_s10  ;;  %v7073_v59 = vld [vmem:[%s5753_s18 + $0xf0] sm:$0xff]   ;;  %v10704_v10 = vrot.slane %v6892_v30, 2  ;;  %v7098_v44 = vsel %vm10542_vm6, %v10706_v5, %v1592_v4  ;;  %v1434_v30 = vrot.slane %v10692_v12, 3  ;;  %v2845_v17 = vfloor.f32 %v2781_v40  ;;  %v10713_v5 = vld [vmem:[#allocation62_spill] sm:$0xff] }
 0x143   : > { %v1240_v11 = vpop.permute.xlu1 %1239  ;;  %10701 = vst [vmem:[#allocation18_spill] sm:$0xff] %v7073_v59  ;;  %v7078_v18 = vsel %vm1688_vm7, %v7073_v59, %v10702_v35  ;;  %v10705_v35 = vrot.slane %v6921_v14, 2  ;;  %v7114_v47 = vadd.s32 %v6918_v1, %v2591_v63  ;;  %v7132_v12 = vsel %vm10487_vm8, %v6824_v43, %v10713_v5  ;;  %v10714_v63 = vld [vmem:[#allocation63_spill] sm:$0xff]  ;;  %v10720_v59 = vld [vmem:[#allocation64_spill] sm:$0xff] }
 0x144   : > { %10703 = vst [vmem:[#allocation53_spill] sm:$0xff] %v7078_v18  ;;  %v7082_v45 = vpop.permute.xlu0 %1111  ;;  %v1198_v57 = vsel %vm1161_vm5, %v10704_v10, %v1197_v62  ;;  %v7104_v10 = vor.u32 %v1039_v8, %v1038_v61  ;;  %v10707_v18 = vld [vmem:[#allocation7_spill] sm:$0xff]  ;;  %v2589_v5 = vadd.s32 8, %v6856_v26 }
 0x145   : > { %1129 = vrot.lane.b32.xlu1 %v1029_v46, %s5714_s29  ;;  %v7093_v39 = vsel %vm1161_vm5, %v1197_v62, %v10705_v35  ;;  %v7102_v46 = vsel %vm10541_vm2, %v1427_v51, %v7042_v34  ;;  %v1769_v15 = vsel %vm10487_vm8, %v6809_v56, %v10707_v18  ;;  %10709 = vst [vmem:[#allocation54_spill] sm:$0xff] %v7114_v47  ;;  %v10710_v35 = vld [vmem:[#allocation2_spill] sm:$0xff]  ;;  %v10711_v51 = vld [vmem:[#allocation61_spill] sm:$0xff]  ;;  %v10712_v56 = vrot.slane %v6921_v14, 3  ;;  %v10716_v43 = vld [vmem:[#allocation3_spill] sm:$0xff] }
 0x146   : > { %928 = vrot.lane.b32.xlu0 %v10708_v53, %s5713_s26  ;;  %v1767_v8 = vsel %vm10487_vm8, %v6814_v41, %v10710_v35  ;;  %v7122_v61 = vsel %vm10487_vm8, %v6819_v0, %v10711_v51  ;;  %v7137_v41 = vsel %vm10487_vm8, %v6831_v38, %v10714_v63  ;;  %v7142_v0 = vsel %vm958_vm1, %v1032_v9, %v1036_v27  ;;  %v10715_v35 = vld [vmem:[#allocation4_spill] sm:$0xff] }
 0x147   : > { %v1306_v62 = vpop.permute.xlu1 %1305  ;;  %v7127_v18 = vsel %vm10542_vm6, %v1592_v4, %v10712_v56  ;;  %v5363_v4 = vtrunc.f32 %v2847_v16  ;;  %v7147_v40 = vsel %vm10487_vm8, %v6836_v22, %v10715_v35  ;;  %v7152_v51 = vsel %vm10487_vm8, %v6841_v49, %v10716_v43  ;;  %v10718_v63 = vld [vmem:[#allocation32_spill] sm:$0xff] }
 0x148   : > { %v1242_v53 = vpop.permute.xlu0 %1241  ;;  %10717 = vst [vmem:[#allocation55_spill] sm:$0xff] %v7152_v51  ;;  %v7156_v38 = vsel %vm958_vm1, %v1036_v27, %v7104_v10  ;;  %v1832_v9 = vsel %vm10569_vm9, %v1767_v8, %v6974_v7  ;;  %v1435_v56 = vor.u32 %v1434_v30, %v1433_v28  ;;  %v2720_v22 = vcvt.s32.f32 %v7114_v47  ;;  %v10719_v27 = vld [vmem:[#allocation26_spill] sm:$0xff] }
 0x149   : > { %1259 = vrot.lane.b32.xlu1 %v6946_v3, %s5715_s5  ;;  %v1201_v3 = vrot.slane %v6902_v48, 2  ;;  %v1897_v49 = vsel %vm10564_vm10, %v1832_v9, %v7025_v55  ;;  %v1437_v35 = vrot.slane %v10718_v63, 2  ;;  %v1438_v43 = vrot.slane %v10719_v27, 3 }
 0x14a   : > { %1131 = vrot.lane.b32.xlu0 %v1033_v21, %s5714_s29  ;;  %v5359_v51 = vtrunc.f32 %v2845_v17  ;;  %v7171_v7 = vsel %vm10487_vm8, %v6848_v31, %v10720_v59  ;;  %v1962_v21 = vsel %vm10560_vm11, %v1897_v49, %v1240_v11  ;;  %v5364_v8 = vcvt.f32.s32 %v5363_v4  ;;  %v10724_v11 = vld [vmem:[#allocation66_spill] sm:$0xff] }
 0x14b   : > { %v1507_v16 = vpop.permute.xlu1 %1506  ;;  %v7179_v55 = vsel %vm10487_vm8, %v6853_v6, %v10721_v58  ;;  %v2027_v17 = vsel %vm10562_vm12, %v1962_v21, %v1306_v62  ;;  %v10723_v9 = vrot.slane %v6921_v14, 2  ;;  %v1596_v59 = vrot.slane %v6902_v48, 3 }
 0x14c   : > { %v1308_v28 = vpop.permute.xlu0 %1307  ;;  %10722 = vst [vmem:[#allocation28_spill] sm:$0xff] %v7179_v55  ;;  %v7191_v49 = vsel %vm10487_vm8, %v6868_v33, %v10724_v11  ;;  %v2092_v4 = vsel %vm10561_vm13, %v2027_v17, %v1507_v16  ;;  %v2784_v58 = vmul.f32 0.0030864198, %v2720_v22  ;;  %v7196_v62 = vadd.s32 %v6918_v1, %v2589_v5  ;;  %v10727_v33 = vld [vmem:[#allocation67_spill] sm:$0xff] }
 0x14d   : > { %1325 = vrot.lane.b32.xlu1 %v1198_v57, %s5716_s8  ;;  %v7185_v31 = vsel %vm1161_vm5, %v10723_v9, %v1201_v3  ;;  %10725 = vst [vmem:[#allocation21_spill] sm:$0xff] %v7191_v49  ;;  %v7201_v9 = vsel %vm10541_vm2, %v7042_v34, %v1435_v56  ;;  %v7203_v48 = vor.u32 %v1438_v43, %v1437_v35  ;;  %v5360_v30 = vcvt.f32.s32 %v5359_v51  ;;  %v10730_v51 = vld [vmem:[#allocation11_spill] sm:$0xff] }
 0x14e   : > { %1261 = vrot.lane.b32.xlu0 %v1198_v57, %s5715_s5  ;;  %10726 = vst [vmem:[#allocation56_spill] sm:$0xff] %v7196_v62  ;;  %v7208_v16 = vsel %vm10487_vm8, %v6873_v50, %v10727_v33  ;;  %v1834_v57 = vsel %vm10569_vm9, %v1769_v15, %v7034_v25  ;;  %v10729_v5 = vrot.slane %v6949_v32, 2  ;;  %v2975_v35 = vmul.u32 324, %v5364_v8 }
 0x14f   : > { %v1637_v6 = vpop.permute.xlu1 %1636  ;;  %10728 = vst [vmem:[#allocation48_spill] sm:$0xff] %v7208_v16  ;;  %v7222_v43 = vsel %vm10487_vm8, %v6878_v23, %v10730_v51  ;;  %v1899_v50 = vsel %vm10564_vm10, %v1834_v57, %v7082_v45  ;;  %v10732_v25 = vrot.slane %v6921_v14, 3  ;;  %v1042_v15 = vrot.slane %v10718_v63, 1  ;;  %v10733_v45 = vld [vmem:[#allocation5_spill] sm:$0xff] }
 0x150   : > { %v2157_v21 = vsel %vm10563_vm14, %v2092_v4, %v1637_v6  ;;  %v1509_v22 = vpop.permute.xlu0 %1508  ;;  %v7217_v34 = vsel %vm1161_vm5, %v1201_v3, %v10729_v5  ;;  %10731 = vst [vmem:[#allocation25_spill] sm:$0xff] %v7222_v43  ;;  %v1964_v17 = vsel %vm10560_vm11, %v1899_v50, %v1242_v53  ;;  %v1043_v23 = vrot.slane %v10719_v27, 2  ;;  %v10735_v57 = vld [vmem:[#allocation29_spill] sm:$0xff]  ;;  %v10736_v5 = vld [vmem:[#allocation27_spill] sm:$0xff] }
 0x151   : > { %1526 = vrot.lane.b32.xlu1 %v1428_v42, %s5717_s9  ;;  %5298 = vmatprep.mubr.msk.bf16.mxu0 %vm10548_vm15, %v2157_v21  ;;  %v7229_v42 = vsel %vm10542_vm6, %v10732_v25, %v1596_v59  ;;  %v2848_v8 = vfloor.f32 %v2784_v58  ;;  %v2718_v11 = vcvt.s32.f32 %v7196_v62  ;;  %v7242_v14 = vsel %vm10487_vm8, %v6889_v37, %v10733_v45 }
 0x152   : > { %1327 = vrot.lane.b32.xlu0 %v7093_v39, %s5716_s8  ;;  %10734 = vst [vmem:[#allocation23_spill] sm:$0xff] %v7242_v14  ;;  %v2029_v4 = vsel %vm10562_vm12, %v1964_v17, %v1308_v28  ;;  %v7247_v53 = vsel %vm10541_vm2, %v1435_v56, %v7203_v48  ;;  %v2973_v63 = vmul.u32 324, %v5360_v30  ;;  %v806_v27 = vrot.slane %v6949_v32, 1  ;;  %v10737_v17 = vld [vmem:[#allocation36_spill] sm:$0xff] }
 0x153   : > { %v7235_v3 = vpop.permute.xlu1 %910  ;;  %v2094_v6 = vsel %vm10561_vm13, %v2029_v4, %v1509_v22  ;;  %v10471_v58 = vrot.slane %v6949_v32, 3  ;;  %v3039_v37 = vsub.s32 %v6961_v24, %v2975_v35  ;;  %v1046_v56 = vrot.slane %v10735_v57, 1  ;;  %v10738_v4 = vld [vmem:[#allocation30_spill] sm:$0xff]  ;;  %v10739_v28 = vld [vmem:[#allocation68_spill] sm:$0xff] }
 0x154   : > { %v1639_v21 = vpop.permute.xlu0 %1638  ;;  %v1047_v30 = vrot.slane %v10736_v5, 2  ;;  %v1044_v22 = vor.u32 %v1043_v23, %v1042_v15  ;;  %v1441_v51 = vrot.slane %v10735_v57, 2  ;;  %v5365_v50 = vtrunc.f32 %v2848_v8  ;;  %v10741_v15 = vld [vmem:[#allocation49_spill] sm:$0xff]  ;;  %v10742_v23 = vld [vmem:[#allocation19_spill] sm:$0xff] }
 0x155   : > { %1656 = vrot.lane.b32.xlu1 %v7098_v44, %s5718_s10  ;;  %v2159_v33 = vsel %vm10563_vm14, %v2094_v6, %v1639_v21  ;;  %v2782_v35 = vmul.f32 0.0030864198, %v2718_v11  ;;  %v1442_v25 = vrot.slane %v10736_v5, 3  ;;  %v1445_v45 = vrot.slane %v10737_v17, 2  ;;  %v10744_v5 = vld [vmem:[#allocation69_spill] sm:$0xff] }
 0x156   : > { %1528 = vrot.lane.b32.xlu0 %v7102_v46, %s5717_s9  ;;  %5299 = vmatmul.mubr.msk.bf16.gmra.mxu0 %vm10548_vm15, %v2159_v33  ;;  %v1446_v6 = vrot.slane %v10738_v4, 3  ;;  %v3037_v21 = vsub.s32 %v6983_v52, %v2973_v63  ;;  %v7272_v46 = vsel %vm10487_vm8, %v6897_v13, %v10739_v28  ;;  %v10743_v8 = vrot.slane %v10742_v23, 1 }
 0x157   : > { %v7262_v44 = vpop.permute.xlu1 %1113  ;;  %10740 = vst [vmem:[#allocation57_spill] sm:$0xff] %v7272_v46  ;;  %v7286_v57 = vsel %vm10542_vm6, %v1596_v59, %v10471_v58  ;;  %v3167_v63 = vadd.s32 324, %v3039_v37  ;;  %v7291_v13 = vsel %vm10487_vm8, %v6926_v60, %v10744_v5  ;;  %v10746_v28 = vrot.slane %v6933_v36, 1 }
 0x158   : > { %v7274_v33 = vpop.permute.xlu0 %912  ;;  %v7281_v11 = vsel %vm762_vm3, %v10743_v8, %v806_v27  ;;  %10745 = vst [vmem:[#allocation58_spill] sm:$0xff] %v7291_v13  ;;  %v1048_v23 = vor.u32 %v1047_v30, %v1046_v56  ;;  %vm3103_vm0 = vcmp.lt.s32.totalorder %v3039_v37, 0  ;;  %v7302_v59 = vsel %vm958_vm1, %v7104_v10, %v1044_v22 }
 0x159   : > { %930 = vrot.lane.b32.xlu1 %v10741_v15, %s5713_s26  ;;  %v7296_v15 = vsel %vm762_vm3, %v806_v27, %v10746_v28  ;;  %v1205_v58 = vrot.slane %v6933_v36, 2  ;;  %v5366_v52 = vcvt.f32.s32 %v5365_v50  ;;  %v2846_v60 = vfloor.f32 %v2782_v35  ;;  %v10747_v28 = vld [vmem:[#allocation34_spill] sm:$0xff] }
 0x15a   : > { %1658 = vrot.lane.b32.xlu0 %v7127_v18, %s5718_s10  ;;  %v1443_v13 = vor.u32 %v1442_v25, %v1441_v51  ;;  %v7306_v24 = vor.u32 %v1446_v6, %v1445_v45  ;;  %v3165_v27 = vadd.s32 324, %v3037_v21  ;;  %v1600_v18 = vrot.slane %v6933_v36, 3  ;;  %v10748_v25 = vld [vmem:[#allocation31_spill] sm:$0xff] }
 0x15b   : > { %v1244_v8 = vpop.permute.xlu1 %1243  ;;  %v3231_v30 = vsel %vm3103_vm0, %v3167_v63, %v3039_v37  ;;  %vm3101_vm4 = vcmp.lt.s32.totalorder %v3037_v21, 0  ;;  %v1050_v50 = vrot.slane %v10737_v17, 1  ;;  %v1051_v35 = vrot.slane %v10738_v4, 2  ;;  %v10749_v6 = vld [vmem:[#allocation51_spill] sm:$0xff] }
 0x15c   : > { %v7308_v56 = vpop.permute.xlu0 %1115  ;;  %v1054_v51 = vrot.slane %v10747_v28, 1  ;;  %v1055_v45 = vrot.slane %v10748_v25, 2  ;;  %v10750_v14 = vrot.slane %v6949_v32, 2  ;;  %v2976_v63 = vmul.u32 324, %v5366_v52 }
 0x15d   : > { %1133 = vrot.lane.b32.xlu1 %v7142_v0, %s5714_s29  ;;  %v7321_v0 = vsel %vm958_vm1, %v1044_v22, %v1048_v23  ;;  %v5361_v17 = vtrunc.f32 %v2846_v60  ;;  %v10751_v4 = vrot.slane %v6994_v19, 2  ;;  %v5117_v46 = vadd.s32 4294966972, %v3231_v30 }
 0x15e   : > { %932 = vrot.lane.b32.xlu0 %v10749_v6, %s5713_s26  ;;  %v7326_v37 = vsel %vm1161_vm5, %v10750_v14, %v1205_v58  ;;  %v3229_v16 = vsel %vm3101_vm4, %v3165_v27, %v3037_v21  ;;  %v2594_v6 = vadd.s32 48, %v6856_v26  ;;  %v7338_v22 = vsel %vm10541_vm2, %v7203_v48, %v1443_v13 }
 0x15f   : > { %v1310_v5 = vpop.permute.xlu1 %1309  ;;  %v7331_v10 = vsel %vm1161_vm5, %v1205_v58, %v10751_v4  ;;  %v810_v52 = vrot.slane %v6994_v19, 1  ;;  %vm3295_vm7 = vcmp.ge.s32.totalorder %v3231_v30, 324  ;;  %v7344_v58 = vsel %vm10541_vm2, %v1443_v13, %v7306_v24 }
 0x160   : > { %v1246_v43 = vpop.permute.xlu0 %1245  ;;  %v10752_v21 = vrot.slane %v6994_v19, 3  ;;  %v1052_v27 = vor.u32 %v1051_v35, %v1050_v50  ;;  %v1836_v48 = vsel %vm10569_vm9, %v7132_v12, %v7235_v3  ;;  %v5115_v14 = vadd.s32 4294966972, %v3229_v16 }
 0x161   : > { %1263 = vrot.lane.b32.xlu1 %v7093_v39, %s5715_s5  ;;  %v7351_v39 = vor.u32 %v1055_v45, %v1054_v51  ;;  %v3040_v13 = vsub.s32 %v7114_v47, %v2976_v63  ;;  %v5362_v55 = vcvt.f32.s32 %v5361_v17  ;;  %v1901_v49 = vsel %vm10564_vm10, %v1836_v48, %v7262_v44 }
 0x162   : > { %v7349_v60 = vsel %vm10542_vm6, %v1600_v18, %v10752_v21  ;;  %1135 = vrot.lane.b32.xlu0 %v7156_v38, %s5714_s29  ;;  %v7361_v21 = vsel %vm3295_vm7, %v5117_v46, %v3231_v30  ;;  %vm3293_vm0 = vcmp.ge.s32.totalorder %v3229_v16, 324  ;;  %v7364_v50 = vadd.s32 %v6918_v1, %v2594_v6 }
 0x163   : > { %v1511_v4 = vpop.permute.xlu1 %1510  ;;  %10753 = vst [vmem:[#allocation59_spill] sm:$0xff] %v7361_v21  ;;  %v1966_v35 = vsel %vm10560_vm11, %v1901_v49, %v1244_v8  ;;  %v10755_v38 = vrot.slane %v6949_v32, 3  ;;  %v10756_v51 = vrot.slane %v6933_v36, 1  ;;  %v10757_v46 = vrot.slane %v6986_v2, 1 }
 0x164   : > { %10754 = vst [vmem:[#allocation60_spill] sm:$0xff] %v7364_v50  ;;  %v1312_v12 = vpop.permute.xlu0 %1311  ;;  %v2031_v49 = vsel %vm10562_vm12, %v1966_v35, %v1310_v5  ;;  %v7387_v8 = vsel %vm958_vm1, %v1052_v27, %v7351_v39  ;;  %v7390_v32 = vsel %vm958_vm1, %v1048_v23, %v1052_v27  ;;  %v3487_v63 = vcvt.s32.f32 %v7361_v21 }
 0x165   : > { %1329 = vrot.lane.b32.xlu1 %v7185_v31, %s5716_s8  ;;  %v7372_v3 = vsel %vm10542_vm6, %v10755_v38, %v1600_v18  ;;  %v7377_v44 = vsel %vm762_vm3, %v10756_v51, %v810_v52  ;;  %v7382_v30 = vsel %vm762_vm3, %v810_v52, %v10757_v46  ;;  %10758 = vst [vmem:[#allocation7_spill] sm:$0xff] %v7387_v8  ;;  %10759 = vst [vmem:[#allocation50_spill] sm:$0xff] %v7390_v32 }
 0x166   : > { %v1209_v18 = vrot.slane %v6986_v2, 2  ;;  %v2096_v36 = vsel %vm10561_vm13, %v2031_v49, %v1511_v4  ;;  %1265 = vrot.lane.b32.xlu0 %v7185_v31, %s5715_s5  ;;  %v7398_v17 = vsel %vm3293_vm0, %v5115_v14, %v3229_v16  ;;  %v2974_v5 = vmul.u32 324, %v5362_v55 }
 0x167   : > { %v1641_v45 = vpop.permute.xlu1 %1640  ;;  %10760 = vst [vmem:[#allocation2_spill] sm:$0xff] %v7398_v17  ;;  %v3168_v52 = vadd.s32 324, %v3040_v13  ;;  %v2723_v23 = vcvt.s32.f32 %v7364_v50  ;;  %v2592_v27 = vadd.s32 32, %v6856_v26  ;;  %v1838_v48 = vsel %vm10569_vm9, %v7122_v61, %v7274_v33 }
 0x168   : > { %v2161_v6 = vsel %vm10563_vm14, %v2096_v36, %v1641_v45  ;;  %v1513_v4 = vpop.permute.xlu0 %1512  ;;  %v1449_v31 = vrot.slane %v10747_v28, 2  ;;  %v1450_v55 = vrot.slane %v10748_v25, 3  ;;  %vm3104_vm4 = vcmp.lt.s32.totalorder %v3040_v13, 0  ;;  %v10763_v25 = vld [vmem:[#allocation37_spill] sm:$0xff] }
 0x169   : > { %1530 = vrot.lane.b32.xlu1 %v7201_v9, %s5717_s9  ;;  %5302 = vmatprep.mubr.msk.bf16.mxu0 %vm10548_vm15, %v2161_v6  ;;  %v1903_v16 = vsel %vm10564_vm10, %v1838_v48, %v7308_v56  ;;  %v10761_v14 = vrot.slane %v6994_v19, 2  ;;  %v10481_v61 = vrot.slane %v7016_v54, 2  ;;  %v3485_v33 = vcvt.s32.f32 %v7398_v17 }
 0x16a   : > { %v1968_v9 = vsel %vm10560_vm11, %v1903_v16, %v1246_v43  ;;  %1331 = vrot.lane.b32.xlu0 %v7217_v34, %s5716_s8  ;;  %v1453_v38 = vrot.slane %v10763_v25, 2  ;;  %v3551_v51 = vmul.f32 0.055555556, %v3487_v63  ;;  %v3038_v56 = vsub.s32 %v7196_v62, %v2974_v5  ;;  %v10765_v16 = vld [vmem:[#allocation33_spill] sm:$0xff] }
 0x16b   : > { %v7416_v35 = vsel %vm1161_vm5, %v10761_v14, %v1209_v18  ;;  %v7423_v28 = vpop.permute.xlu1 %914  ;;  %v2033_v46 = vsel %vm10562_vm12, %v1968_v9, %v1312_v12  ;;  %v3232_v49 = vsel %vm3104_vm4, %v3168_v52, %v3040_v13  ;;  %v2787_v36 = vmul.f32 0.0030864198, %v2723_v23  ;;  %v10766_v13 = vld [vmem:[#allocation39_spill] sm:$0xff] }
 0x16c   : > { %10762 = vst [vmem:[#allocation61_spill] sm:$0xff] %v7416_v35  ;;  %v7429_v45 = vadd.s32 %v6918_v1, %v2592_v27  ;;  %v2098_v6 = vsel %vm10561_vm13, %v2033_v46, %v1513_v4  ;;  %v1643_v43 = vpop.permute.xlu0 %1642  ;;  %v1451_v48 = vor.u32 %v1450_v55, %v1449_v31  ;;  %v1454_v14 = vrot.slane %v10765_v16, 3 }
 0x16d   : > { %1660 = vrot.lane.b32.xlu1 %v7229_v42, %s5718_s10  ;;  %v1058_v63 = vrot.slane %v10763_v25, 1  ;;  %v2163_v5 = vsel %vm10563_vm14, %v2098_v6, %v1643_v43  ;;  %v1059_v12 = vrot.slane %v10765_v16, 2  ;;  %v1062_v52 = vrot.slane %v10766_v13, 1  ;;  %v10767_v42 = vld [vmem:[#allocation35_spill] sm:$0xff] }
 0x16e   : > { %10764 = vst [vmem:[#allocation62_spill] sm:$0xff] %v7429_v45  ;;  %v3549_v23 = vmul.f32 0.055555556, %v3485_v33  ;;  %1532 = vrot.lane.b32.xlu0 %v7247_v53, %s5717_s9  ;;  %5303 = vmatmul.mubr.msk.bf16.gmra.mxu0 %vm10548_vm15, %v2163_v5  ;;  %v1063_v4 = vrot.slane %v10767_v42, 2  ;;  %v3615_v31 = vfloor.f32 %v3551_v51  ;;  %vm3296_vm7 = vcmp.ge.s32.totalorder %v3232_v49, 324 }
 0x16f   : > { %v7442_v27 = vpop.permute.xlu1 %1117  ;;  %v5118_v55 = vadd.s32 4294966972, %v3232_v49  ;;  %v3166_v9 = vadd.s32 324, %v3038_v56  ;;  %v2851_v25 = vfloor.f32 %v2787_v36  ;;  %v2721_v46 = vcvt.s32.f32 %v7429_v45 }
 0x170   : > { %v2595_v6 = vadd.s32 56, %v6856_v26  ;;  %v7447_v43 = vpop.permute.xlu0 %916  ;;  %v7451_v53 = vor.u32 %v1454_v14, %v1453_v38  ;;  %v1604_v33 = vrot.slane %v6986_v2, 3  ;;  %vm3102_vm0 = vcmp.lt.s32.totalorder %v3038_v56, 0 }
 0x171   : > { %870 = vrot.lane.b32.xlu1 %v7281_v11, %s5712_s25  ;;  %v7458_v51 = vsel %vm1161_vm5, %v1209_v18, %v10481_v61  ;;  %v814_v36 = vrot.slane %v7016_v54, 1  ;;  %v10483_v5 = vrot.slane %v7005_v20, 1  ;;  %v3613_v47 = vfloor.f32 %v3549_v23 }
 0x172   : > { %10768 = vst [vmem:[#allocation63_spill] sm:$0xff] %v7458_v51  ;;  %1662 = vrot.lane.b32.xlu0 %v7286_v57, %s5718_s10  ;;  %v1060_v14 = vor.u32 %v1059_v12, %v1058_v63  ;;  %v7464_v62 = vor.u32 %v1063_v4, %v1062_v52  ;;  %v5491_v35 = vtrunc.f32 %v3615_v31  ;;  %v7467_v16 = vsel %vm3296_vm7, %v5118_v55, %v3232_v49 }
 0x173   : > { %v1248_v38 = vpop.permute.xlu1 %1247  ;;  %10769 = vst [vmem:[#allocation4_spill] sm:$0xff] %v7467_v16  ;;  %v3230_v32 = vsel %vm3102_vm0, %v3166_v9, %v3038_v56  ;;  %v5371_v8 = vtrunc.f32 %v2851_v25  ;;  %v2785_v18 = vmul.f32 0.0030864198, %v2721_v46  ;;  %v7470_v61 = vadd.s32 %v6918_v1, %v2595_v6 }
 0x174   : > { %v7472_v51 = vpop.permute.xlu0 %1119  ;;  %v7478_v57 = vsel %vm10541_vm2, %v1451_v48, %v7451_v53  ;;  %v7482_v63 = vsel %vm10541_vm2, %v7306_v24, %v1451_v48  ;;  %v10771_v56 = vrot.slane %v7016_v54, 3  ;;  %v10772_v12 = vrot.slane %v6994_v19, 3 }
 0x175   : > { %10770 = vst [vmem:[#allocation3_spill] sm:$0xff] %v7470_v61  ;;  %936 = vrot.lane.b32.xlu1 %v7296_v15, %s5713_s26  ;;  %v10773_v23 = vrot.slane %v6986_v2, 1  ;;  %v7502_v24 = vsel %vm762_vm3, %v814_v36, %v10483_v5  ;;  %v5487_v48 = vtrunc.f32 %v3613_v47  ;;  %v3488_v31 = vcvt.s32.f32 %v7467_v16  ;;  %v10779_v5 = vld [vmem:[#allocation40_spill] sm:$0xff] }
 0x176   : > { %v7487_v49 = vsel %vm10542_vm6, %v1604_v33, %v10771_v56  ;;  %v7492_v52 = vsel %vm10542_vm6, %v10772_v12, %v1604_v33  ;;  %10775 = vst [vmem:[#allocation26_spill] sm:$0xff] %v7502_v24  ;;  %934 = vrot.lane.b32.xlu0 %v7281_v11, %s5713_s26  ;;  %v7509_v55 = vsel %vm958_vm1, %v1060_v14, %v7464_v62  ;;  %v5492_v9 = vcvt.f32.s32 %v5491_v35 }
 0x177   : > { %v7497_v4 = vsel %vm762_vm3, %v10773_v23, %v814_v36  ;;  %v1314_v19 = vpop.permute.xlu1 %1313  ;;  %10776 = vst [vmem:[#allocation64_spill] sm:$0xff] %v7509_v55  ;;  %v7513_v2 = vsel %vm958_vm1, %v7351_v39, %v1060_v14  ;;  %v5116_v25 = vadd.s32 4294966972, %v3230_v32  ;;  %vm3294_vm4 = vcmp.ge.s32.totalorder %v3230_v32, 324  ;;  %v10778_v14 = vld [vmem:[#allocation44_spill] sm:$0xff] }
 0x178   : > { %10774 = vst [vmem:[#allocation32_spill] sm:$0xff] %v7497_v4  ;;  %10777 = vst [vmem:[#allocation65_spill] sm:$0xff] %v7513_v2  ;;  %v5372_v46 = vcvt.f32.s32 %v5371_v8  ;;  %v2849_v6 = vfloor.f32 %v2785_v18  ;;  %v2724_v47 = vcvt.s32.f32 %v7470_v61  ;;  %v1250_v33 = vpop.permute.xlu0 %1249  ;;  %v1213_v11 = vrot.slane %v7005_v20, 2 }
 0x179   : > { %1139 = vrot.lane.b32.xlu1 %v7321_v0, %s5714_s29  ;;  %v1457_v36 = vrot.slane %v10766_v13, 2  ;;  %v1458_v56 = vrot.slane %v10767_v42, 3  ;;  %v2593_v39 = vadd.s32 40, %v6856_v26  ;;  %v1461_v12 = vrot.slane %v10778_v14, 2 }
 0x17a   : > { %v5488_v8 = vcvt.f32.s32 %v5487_v48  ;;  %v3552_v18 = vmul.f32 0.055555556, %v3488_v31  ;;  %v1840_v23 = vsel %vm10569_vm9, %v7147_v40, %v7423_v28  ;;  %1137 = vrot.lane.b32.xlu0 %v7302_v59, %s5714_s29  ;;  %v1462_v13 = vrot.slane %v10779_v5, 3 }
 0x17b   : > { %v1515_v0 = vpop.permute.xlu1 %1514  ;;  %v3743_v2 = vmul.u32 18, %v5492_v9  ;;  %v7531_v42 = vsel %vm3294_vm4, %v5116_v25, %v3230_v32  ;;  %v1905_v35 = vsel %vm10564_vm10, %v1840_v23, %v7442_v27  ;;  %v2979_v55 = vmul.u32 324, %v5372_v46 }
 0x17c   : > { %10780 = vst [vmem:[#allocation66_spill] sm:$0xff] %v7531_v42  ;;  %v5367_v48 = vtrunc.f32 %v2849_v6  ;;  %v2788_v31 = vmul.f32 0.0030864198, %v2724_v47  ;;  %v1970_v24 = vsel %vm10560_vm11, %v1905_v35, %v1248_v38  ;;  %v1316_v4 = vpop.permute.xlu0 %1315  ;;  %v10781_v40 = vrot.slane %v7016_v54, 2 }
 0x17d   : > { %1269 = vrot.lane.b32.xlu1 %v7326_v37, %s5715_s5  ;;  %v1459_v28 = vor.u32 %v1458_v56, %v1457_v36  ;;  %v7544_v32 = vadd.s32 %v6918_v1, %v2593_v39  ;;  %v2035_v27 = vsel %vm10562_vm12, %v1970_v24, %v1314_v19  ;;  %v10783_v9 = vrot.slane %v7055_v29, 2 }
 0x17e   : > { %v7541_v59 = vsel %vm1161_vm5, %v10781_v40, %v1213_v11  ;;  %v3741_v38 = vmul.u32 18, %v5488_v8  ;;  %v3616_v46 = vfloor.f32 %v3552_v18  ;;  %v2100_v6 = vsel %vm10561_vm13, %v2035_v27, %v1515_v0  ;;  %1267 = vrot.lane.b32.xlu0 %v7217_v34, %s5715_s5 }
 0x17f   : > { %10782 = vst [vmem:[#allocation67_spill] sm:$0xff] %v7544_v32  ;;  %v7550_v25 = vsel %vm1161_vm5, %v1213_v11, %v10783_v9  ;;  %v1645_v47 = vpop.permute.xlu1 %1644  ;;  %v7555_v35 = vor.u32 %v1462_v13, %v1461_v12  ;;  %v3807_v36 = vsub.s32 %v7361_v21, %v3743_v2  ;;  %v3486_v56 = vcvt.s32.f32 %v7531_v42 }
 0x180   : > { %v2165_v24 = vsel %vm10563_vm14, %v2100_v6, %v1645_v47  ;;  %v3043_v19 = vsub.s32 %v7364_v50, %v2979_v55  ;;  %v5368_v11 = vcvt.f32.s32 %v5367_v48  ;;  %v2852_v39 = vfloor.f32 %v2788_v31  ;;  %v1517_v18 = vpop.permute.xlu0 %1516 }
 0x181   : > { %v1842_v8 = vsel %vm10569_vm9, %v7137_v41, %v7447_v43  ;;  %1335 = vrot.lane.b32.xlu1 %v7331_v10, %s5716_s8  ;;  %5306 = vmatprep.mubr.msk.bf16.mxu0 %vm10548_vm15, %v2165_v24  ;;  %v7569_v34 = vsel %vm10541_vm2, %v7451_v53, %v1459_v28  ;;  %v1608_v2 = vrot.slane %v7005_v20, 3  ;;  %v2722_v55 = vcvt.s32.f32 %v7544_v32 }
 0x182   : > { %v1907_v12 = vsel %vm10564_vm10, %v1842_v8, %v7472_v51  ;;  %v10486_v23 = vrot.slane %v7055_v29, 3  ;;  %v3805_v41 = vsub.s32 %v7398_v17, %v3741_v38  ;;  %v5493_v43 = vtrunc.f32 %v3616_v46  ;;  %1333 = vrot.lane.b32.xlu0 %v7326_v37, %s5716_s8 }
 0x183   : > { %v1972_v0 = vsel %vm10560_vm11, %v1907_v12, %v1250_v33  ;;  %v7580_v13 = vpop.permute.xlu1 %918  ;;  %v1066_v53 = vrot.slane %v10778_v14, 1  ;;  %v3935_v48 = vadd.s32 18, %v3807_v36  ;;  %v3550_v31 = vmul.f32 0.055555556, %v3486_v56  ;;  %v10784_v56 = vld [vmem:[#allocation41_spill] sm:$0xff] }
 0x184   : > { %v2037_v40 = vsel %vm10562_vm12, %v1972_v0, %v1316_v4  ;;  %v3171_v27 = vadd.s32 324, %v3043_v19  ;;  %v2977_v51 = vmul.u32 324, %v5368_v11  ;;  %v5373_v9 = vtrunc.f32 %v2852_v39  ;;  %v1647_v38 = vpop.permute.xlu0 %1646  ;;  %v10785_v11 = vld [vmem:[#allocation38_spill] sm:$0xff] }
 0x185   : > { %v2102_v6 = vsel %vm10561_vm13, %v2037_v40, %v1517_v18  ;;  %1536 = vrot.lane.b32.xlu1 %v7344_v58, %s5717_s9  ;;  %vm3871_vm7 = vcmp.lt.s32.totalorder %v3807_v36, 0  ;;  %vm3107_vm0 = vcmp.lt.s32.totalorder %v3043_v19, 0  ;;  %v2786_v37 = vmul.f32 0.0030864198, %v2722_v55  ;;  %v10786_v0 = vld [vmem:[#allocation14_spill] sm:$0xff] }
 0x186   : > { %v2167_v33 = vsel %vm10563_vm14, %v2102_v6, %v1647_v38  ;;  %v1067_v14 = vrot.slane %v10779_v5, 2  ;;  %v3933_v46 = vadd.s32 18, %v3805_v41  ;;  %v5494_v47 = vcvt.f32.s32 %v5493_v43  ;;  %1534 = vrot.lane.b32.xlu0 %v7338_v22, %s5717_s9 }
 0x187   : > { %5307 = vmatmul.mubr.msk.bf16.gmra.mxu0 %vm10548_vm15, %v2167_v33  ;;  %v7592_v4 = vpop.permute.xlu1 %1121  ;;  %v1070_v24 = vrot.slane %v10784_v56, 1  ;;  %v1071_v58 = vrot.slane %v10785_v11, 2  ;;  %vm3869_vm4 = vcmp.lt.s32.totalorder %v3805_v41, 0  ;;  %v3614_v39 = vfloor.f32 %v3550_v31 }
 0x188   : > { %v3999_v8 = vsel %vm3871_vm7, %v3935_v48, %v3807_v36  ;;  %v3235_v18 = vsel %vm3107_vm0, %v3171_v27, %v3043_v19  ;;  %v3041_v55 = vsub.s32 %v7429_v45, %v2977_v51  ;;  %v5374_v5 = vcvt.f32.s32 %v5373_v9  ;;  %v7597_v12 = vpop.permute.xlu0 %920 }
 0x189   : > { %1666 = vrot.lane.b32.xlu1 %v7349_v60, %s5718_s10  ;;  %v7603_v22 = vsel %vm10541_vm2, %v1459_v28, %v7555_v35  ;;  %v7610_v43 = vsel %vm10542_vm6, %v1608_v2, %v10486_v23  ;;  %v818_v36 = vrot.slane %v7055_v29, 1  ;;  %v2850_v19 = vfloor.f32 %v2786_v37 }
 0x18a   : > { %v10488_v48 = vrot.slane %v10786_v0, 1  ;;  %v1068_v31 = vor.u32 %v1067_v14, %v1066_v53  ;;  %v3997_v40 = vsel %vm3869_vm4, %v3933_v46, %v3805_v41  ;;  %v3744_v27 = vmul.u32 18, %v5494_v47  ;;  %1664 = vrot.lane.b32.xlu0 %v7372_v3, %s5718_s10 }
 0x18b   : > { %v1252_v60 = vpop.permute.xlu1 %1251  ;;  %v7616_v28 = vor.u32 %v1071_v58, %v1070_v24  ;;  %vm4063_vm7 = vcmp.ge.s32.totalorder %v3999_v8, 18  ;;  %v5489_v51 = vtrunc.f32 %v3614_v39  ;;  %v5121_v9 = vadd.s32 4294966972, %v3235_v18 }
 0x18c   : > { %v5181_v6 = vadd.s32 4294967278, %v3999_v8  ;;  %vm3299_vm0 = vcmp.ge.s32.totalorder %v3235_v18, 324  ;;  %v3169_v38 = vadd.s32 324, %v3041_v55  ;;  %v2980_v33 = vmul.u32 324, %v5374_v5  ;;  %v7618_v23 = vpop.permute.xlu0 %1123 }
 0x18d   : > { %874 = vrot.lane.b32.xlu1 %v7377_v44, %s5712_s25  ;;  %v5179_v41 = vadd.s32 4294967278, %v3997_v40  ;;  %v10489_v53 = vrot.slane %v10786_v0, 2  ;;  %vm3105_vm4 = vcmp.lt.s32.totalorder %v3041_v55, 0  ;;  %v5369_v3 = vtrunc.f32 %v2850_v19 }
 0x18e   : > { %v10787_v37 = vrot.slane %v7016_v54, 3  ;;  %v10788_v46 = vrot.slane %v7005_v20, 1  ;;  %vm4061_vm8 = vcmp.ge.s32.totalorder %v3997_v40, 18  ;;  %v3808_v24 = vsub.s32 %v7467_v16, %v3744_v27  ;;  %872 = vrot.lane.b32.xlu0 %v7296_v15, %s5712_s25 }
 0x18f   : > { %v1318_v58 = vpop.permute.xlu1 %1317  ;;  %v7641_v39 = vsel %vm762_vm3, %v818_v36, %v10488_v48  ;;  %v7645_v54 = vsel %vm958_vm1, %v7464_v62, %v1068_v31  ;;  %v5490_v20 = vcvt.f32.s32 %v5489_v51  ;;  %v7652_v5 = vsel %vm958_vm1, %v1068_v31, %v7616_v28  ;;  %v10795_v48 = vld [vmem:[#allocation18_spill] sm:$0xff] }
 0x190   : > { %v7628_v14 = vsel %vm10542_vm6, %v10787_v37, %v1608_v2  ;;  %v7633_v47 = vsel %vm762_vm3, %v10788_v46, %v818_v36  ;;  %v7648_v2 = vsel %vm3299_vm0, %v5121_v9, %v3235_v18  ;;  %v7655_v15 = vsel %vm4063_vm7, %v5181_v6, %v3999_v8  ;;  %v1254_v36 = vpop.permute.xlu0 %1253 }
 0x191   : > { %10789 = vst [vmem:[#allocation11_spill] sm:$0xff] %v7648_v2  ;;  %10790 = vst [vmem:[#allocation5_spill] sm:$0xff] %v7655_v15  ;;  %v3233_v19 = vsel %vm3105_vm4, %v3169_v38, %v3041_v55  ;;  %v3044_v27 = vsub.s32 %v7470_v61, %v2980_v33  ;;  %940 = vrot.lane.b32.xlu1 %v7382_v30, %s5713_s26  ;;  %v7660_v62 = vsel %vm4061_vm8, %v5179_v41, %v3997_v40 }
 0x192   : > { %10791 = vst [vmem:[#allocation29_spill] sm:$0xff] %v7660_v62  ;;  %v10792_v18 = vrot.slane %v7055_v29, 2  ;;  %v5370_v31 = vcvt.f32.s32 %v5369_v3  ;;  %v2598_v8 = vadd.s32 80, %v6856_v26  ;;  %vm3872_vm7 = vcmp.lt.s32.totalorder %v3808_v24, 0  ;;  %938 = vrot.lane.b32.xlu0 %v7377_v44, %s5713_s26 }
 0x193   : > { %v1465_v55 = vrot.slane %v10784_v56, 2  ;;  %v1466_v9 = vrot.slane %v10785_v11, 3  ;;  %v3491_v6 = vcvt.s32.f32 %v7648_v2  ;;  %v1844_v40 = vsel %vm10569_vm9, %v7171_v7, %v7580_v13  ;;  %v1519_v38 = vpop.permute.xlu1 %1518 }
 0x194   : > { %v7667_v51 = vsel %vm1161_vm5, %v10792_v18, %v10489_v53  ;;  %v3936_v33 = vadd.s32 18, %v3808_v24  ;;  %v3742_v41 = vmul.u32 18, %v5490_v20  ;;  %vm3297_vm8 = vcmp.ge.s32.totalorder %v3233_v19, 324  ;;  %v1320_v46 = vpop.permute.xlu0 %1319  ;;  %v10793_v18 = vld [vmem:[#allocation7_spill] sm:$0xff]  ;;  %v10801_v53 = vld [vmem:[#allocation61_spill] sm:$0xff] }
 0x195   : > { %v1909_v3 = vsel %vm10564_vm10, %v1844_v40, %v7592_v4  ;;  %v5119_v37 = vadd.s32 4294966972, %v3233_v19  ;;  %vm3108_vm0 = vcmp.lt.s32.totalorder %v3044_v27, 0  ;;  %v3172_v56 = vadd.s32 324, %v3044_v27  ;;  %1143 = vrot.lane.b32.xlu1 %v10793_v18, %s5714_s29  ;;  %v10796_v4 = vld [vmem:[#allocation47_spill] sm:$0xff]  ;;  %v10798_v18 = vld [vmem:[#allocation42_spill] sm:$0xff] }
 0x196   : > { %v1974_v11 = vsel %vm10560_vm11, %v1909_v3, %v1252_v60  ;;  %v2978_v7 = vmul.u32 324, %v5370_v31  ;;  %v7684_v13 = vadd.s32 %v6918_v1, %v2598_v8  ;;  %v2596_v44 = vadd.s32 64, %v6856_v26  ;;  %v10797_v60 = vld [vmem:[#allocation50_spill] sm:$0xff] }
 0x197   : > { %v2039_v20 = vsel %vm10562_vm12, %v1974_v11, %v1318_v58  ;;  %v1469_v40 = vrot.slane %v10796_v4, 2  ;;  %v3555_v61 = vmul.f32 0.055555556, %v3491_v6  ;;  %1141 = vrot.lane.b32.xlu0 %v10797_v60, %s5714_s29  ;;  %v1649_v3 = vpop.permute.xlu1 %1648  ;;  %v4000_v31 = vsel %vm3872_vm7, %v3936_v33, %v3808_v24 }
 0x198   : > { %10794 = vst [vmem:[#allocation27_spill] sm:$0xff] %v7684_v13  ;;  %v2104_v50 = vsel %vm10561_vm13, %v2039_v20, %v1519_v38  ;;  %v3806_v8 = vsub.s32 %v7531_v42, %v3742_v41  ;;  %v1470_v45 = vrot.slane %v10798_v18, 3  ;;  %v1467_v58 = vor.u32 %v1466_v9, %v1465_v55  ;;  %v10800_v38 = vld [vmem:[#allocation55_spill] sm:$0xff]  ;;  %v1521_v60 = vpop.permute.xlu0 %1520 }
 0x199   : > { %v2169_v16 = vsel %vm10563_vm14, %v2104_v50, %v1649_v3  ;;  %v7698_v11 = vsel %vm3297_vm8, %v5119_v37, %v3233_v19  ;;  %v3236_v6 = vsel %vm3108_vm0, %v3172_v56, %v3044_v27  ;;  %v1846_v20 = vsel %vm10569_vm9, %v10800_v38, %v7597_v12  ;;  %1273 = vrot.lane.b32.xlu1 %v10801_v53, %s5715_s5 }
 0x19a   : > { %10799 = vst [vmem:[#allocation36_spill] sm:$0xff] %v7698_v11  ;;  %5310 = vmatprep.mubr.msk.bf16.mxu0 %vm10548_vm15, %v2169_v16  ;;  %v3042_v24 = vsub.s32 %v7544_v32, %v2978_v7  ;;  %v2727_v50 = vcvt.s32.f32 %v7684_v13  ;;  %v7710_v55 = vadd.s32 %v6918_v1, %v2596_v44  ;;  %v1911_v19 = vsel %vm10564_vm10, %v1846_v20, %v7618_v23 }
 0x19b   : > { %vm4064_vm4 = vcmp.ge.s32.totalorder %v4000_v31, 18  ;;  %v5182_v27 = vadd.s32 4294967278, %v4000_v31  ;;  %v3619_v9 = vfloor.f32 %v3555_v61  ;;  %v1976_v12 = vsel %vm10560_vm11, %v1911_v19, %v1254_v36  ;;  %1271 = vrot.lane.b32.xlu0 %v7331_v10, %s5715_s5  ;;  %v7717_v33 = vpop.permute.xlu1 %922  ;;  %v10803_v36 = vld [vmem:[#allocation63_spill] sm:$0xff] }
 0x19c   : > { %10802 = vst [vmem:[#allocation30_spill] sm:$0xff] %v7710_v55  ;;  %vm3870_vm7 = vcmp.lt.s32.totalorder %v3806_v8, 0  ;;  %v7719_v16 = vor.u32 %v1470_v45, %v1469_v40  ;;  %v3489_v41 = vcvt.s32.f32 %v7698_v11  ;;  %v2041_v37 = vsel %vm10562_vm12, %v1976_v12, %v1320_v46  ;;  %v1651_v61 = vpop.permute.xlu0 %1650 }
 0x19d   : > { %v3934_v56 = vadd.s32 18, %v3806_v8  ;;  %vm3300_vm8 = vcmp.ge.s32.totalorder %v3236_v6, 324  ;;  %v5122_v23 = vadd.s32 4294966972, %v3236_v6  ;;  %v2106_v7 = vsel %vm10561_vm13, %v2041_v37, %v1521_v60  ;;  %1339 = vrot.lane.b32.xlu1 %v10803_v36, %s5716_s8 }
 0x19e   : > { %v3170_v44 = vadd.s32 324, %v3042_v24  ;;  %v2791_v10 = vmul.f32 0.0030864198, %v2727_v50  ;;  %v2725_v3 = vcvt.s32.f32 %v7710_v55  ;;  %v2171_v45 = vsel %vm10563_vm14, %v2106_v7, %v1651_v61 }
 0x19f   : > { %v10804_v40 = vrot.slane %v10795_v48, 2  ;;  %v10805_v38 = vrot.slane %v10786_v0, 2  ;;  %v5499_v20 = vtrunc.f32 %v3619_v9  ;;  %vm3106_vm0 = vcmp.lt.s32.totalorder %v3042_v24, 0  ;;  %1337 = vrot.lane.b32.xlu0 %v10801_v53, %s5716_s8  ;;  %5311 = vmatmul.mubr.msk.bf16.gmra.mxu0 %vm10548_vm15, %v2171_v45  ;;  %v7738_v60 = vpop.permute.xlu1 %1125 }
 0x1a0   : > { %v7741_v50 = vsel %vm4064_vm4, %v5182_v27, %v4000_v31  ;;  %v7745_v19 = vsel %vm10541_vm2, %v1467_v58, %v7719_v16  ;;  %v7749_v12 = vsel %vm10541_vm2, %v7555_v35, %v1467_v58  ;;  %v3553_v9 = vmul.f32 0.055555556, %v3489_v41  ;;  %v7757_v31 = vpop.permute.xlu0 %924 }
 0x1a1   : > { %v7733_v46 = vsel %vm1161_vm5, %v10805_v38, %v10804_v40  ;;  %10806 = vst [vmem:[#allocation68_spill] sm:$0xff] %v7741_v50  ;;  %v3998_v37 = vsel %vm3870_vm7, %v3934_v56, %v3806_v8  ;;  %v1612_v53 = vrot.slane %v10786_v0, 3  ;;  %v7754_v7 = vsel %vm3300_vm8, %v5122_v23, %v3236_v6  ;;  %1540 = vrot.lane.b32.xlu1 %v7478_v57, %s5717_s9  ;;  %v10808_v56 = vld [vmem:[#allocation45_spill] sm:$0xff]  ;;  %v10809_v38 = vld [vmem:[#allocation43_spill] sm:$0xff] }
 0x1a2   : > { %10807 = vst [vmem:[#allocation49_spill] sm:$0xff] %v7754_v7  ;;  %v2599_v61 = vadd.s32 88, %v6856_v26  ;;  %v1074_v27 = vrot.slane %v10796_v4, 1  ;;  %v3234_v45 = vsel %vm3106_vm0, %v3170_v44, %v3042_v24  ;;  %v2855_v35 = vfloor.f32 %v2791_v10 }
 0x1a3   : > { %v2789_v58 = vmul.f32 0.0030864198, %v2725_v3  ;;  %v5500_v41 = vcvt.f32.s32 %v5499_v20  ;;  %v1075_v8 = vrot.slane %v10798_v18, 2  ;;  %v1078_v40 = vrot.slane %v10808_v56, 1  ;;  %1538 = vrot.lane.b32.xlu0 %v7482_v63, %s5717_s9  ;;  %v1256_v23 = vpop.permute.xlu1 %1255 }
 0x1a4   : > { %v1079_v6 = vrot.slane %v10809_v38, 2  ;;  %v822_v57 = vrot.slane %v10795_v48, 1  ;;  %v3617_v50 = vfloor.f32 %v3553_v9  ;;  %v3492_v4 = vcvt.s32.f32 %v7754_v7  ;;  %v7773_v10 = vpop.permute.xlu0 %1127  ;;  %v10811_v9 = vld [vmem:[#allocation52_spill] sm:$0xff] }
 0x1a5   : > { %vm4062_vm4 = vcmp.ge.s32.totalorder %v3998_v37, 18  ;;  %v5180_v24 = vadd.s32 4294967278, %v3998_v37  ;;  %v5120_v44 = vadd.s32 4294966972, %v3234_v45  ;;  %v7771_v18 = vadd.s32 %v6918_v1, %v2599_v61  ;;  %1670 = vrot.lane.b32.xlu1 %v7487_v49, %s5718_s10 }
 0x1a6   : > { %vm3298_vm7 = vcmp.ge.s32.totalorder %v3234_v45, 324  ;;  %v5379_v63 = vtrunc.f32 %v2855_v35  ;;  %v2853_v3 = vfloor.f32 %v2789_v58  ;;  %v2597_v20 = vadd.s32 72, %v6856_v26 }
 0x1a7   : > { %10810 = vst [vmem:[#allocation19_spill] sm:$0xff] %v7771_v18  ;;  %v3747_v62 = vmul.u32 18, %v5500_v41  ;;  %v1076_v15 = vor.u32 %v1075_v8, %v1074_v27  ;;  %v7779_v42 = vor.u32 %v1079_v6, %v1078_v40  ;;  %1668 = vrot.lane.b32.xlu0 %v7492_v52, %s5718_s10  ;;  %v1322_v61 = vpop.permute.xlu1 %1321  ;;  %v10812_v17 = vrot.slane %v10795_v48, 3  ;;  %v7801_v52 = vld [vmem:[%s5753_s18 + $0xf8] sm:$0xff]  }
 0x1a8   : > { %v10813_v35 = vrot.slane %v7055_v29, 3  ;;  %v5495_v21 = vtrunc.f32 %v3617_v50  ;;  %v3556_v32 = vmul.f32 0.055555556, %v3492_v4  ;;  %v10814_v27 = vrot.slane %v10786_v0, 1  ;;  %v1258_v6 = vpop.permute.xlu0 %1257  ;;  %v10816_v29 = vld [vmem:[#allocation32_spill] sm:$0xff] }
 0x1a9   : > { %v7786_v49 = vsel %vm10542_vm6, %v1612_v53, %v10812_v17  ;;  %v7798_v8 = vsel %vm3298_vm7, %v5120_v44, %v3234_v45  ;;  %v1221_v40 = vrot.slane %v7801_v52, 2  ;;  %v2728_v17 = vcvt.s32.f32 %v7771_v18  ;;  %878 = vrot.lane.b32.xlu1 %v10816_v29, %s5712_s25 }
 0x1aa   : > { %v7791_v58 = vsel %vm10542_vm6, %v10813_v35, %v1612_v53  ;;  %v7796_v41 = vsel %vm762_vm3, %v10814_v27, %v822_v57  ;;  %10815 = vst [vmem:[#allocation69_spill] sm:$0xff] %v7798_v8  ;;  %v7808_v50 = vsel %vm4062_vm4, %v5180_v24, %v3998_v37  ;;  %v5380_v0 = vcvt.f32.s32 %v5379_v63  ;;  %v10823_v24 = vld [vmem:[#allocation21_spill] sm:$0xff] }
 0x1ab   : > { %10817 = vst [vmem:[#allocation34_spill] sm:$0xff] %v7808_v50  ;;  %v5375_v53 = vtrunc.f32 %v2853_v3  ;;  %v7811_v4 = vadd.s32 %v6918_v1, %v2597_v20  ;;  %v10819_v45 = vrot.slane %v10811_v9, 1  ;;  %v3811_v35 = vsub.s32 %v7648_v2, %v3747_v62  ;;  %876 = vrot.lane.b32.xlu0 %v7382_v30, %s5712_s25  ;;  %v1523_v3 = vpop.permute.xlu1 %1522 }
 0x1ac   : > { %v7821_v27 = vsel %vm958_vm1, %v1076_v15, %v7779_v42  ;;  %v7825_v37 = vsel %vm958_vm1, %v7616_v28, %v1076_v15  ;;  %v1848_v63 = vsel %vm10569_vm9, %v10823_v24, %v7717_v33  ;;  %v3620_v20 = vfloor.f32 %v3556_v32  ;;  %v7841_v15 = vld [vmem:[%s6034_s24] sm:$0xff]   ;;  %v1324_v50 = vpop.permute.xlu0 %1323 }
 0x1ad   : > { %10818 = vst [vmem:[#allocation31_spill] sm:$0xff] %v7811_v4  ;;  %v7816_v44 = vsel %vm762_vm3, %v822_v57, %v10819_v45  ;;  %10821 = vst [vmem:[#allocation37_spill] sm:$0xff] %v7821_v27  ;;  %v5496_v57 = vcvt.f32.s32 %v5495_v21  ;;  %v3490_v62 = vcvt.s32.f32 %v7798_v8  ;;  %v1913_v45 = vsel %vm10564_vm10, %v1848_v63, %v7738_v60  ;;  %v10826_v21 = vld [vmem:[#allocation26_spill] sm:$0xff] }
 0x1ae   : > { %10820 = vst [vmem:[#allocation51_spill] sm:$0xff] %v7816_v44  ;;  %10822 = vst [vmem:[#allocation33_spill] sm:$0xff] %v7825_v37  ;;  %v10824_v2 = vrot.slane %v10795_v48, 2  ;;  %v2792_v24 = vmul.f32 0.0030864198, %v2728_v17  ;;  %v1978_v30 = vsel %vm10560_vm11, %v1913_v45, %v1256_v23  ;;  %944 = vrot.lane.b32.xlu1 %v10826_v21, %s5713_s26  ;;  %v2983_v32 = vmul.u32 324, %v5380_v0 }
 0x1af   : > { %v5376_v37 = vcvt.f32.s32 %v5375_v53  ;;  %v2726_v60 = vcvt.s32.f32 %v7811_v4  ;;  %v2043_v63 = vsel %vm10562_vm12, %v1978_v30, %v1322_v61  ;;  %vm3875_vm8 = vcmp.lt.s32.totalorder %v3811_v35, 0  ;;  %942 = vrot.lane.b32.xlu0 %v10816_v29, %s5713_s26  ;;  %v1653_v23 = vpop.permute.xlu1 %1652  ;;  %v10830_v29 = vld [vmem:[#allocation64_spill] sm:$0xff] }
 0x1b0   : > { %v7838_v28 = vsel %vm1161_vm5, %v10824_v2, %v1221_v40  ;;  %v3939_v2 = vadd.s32 18, %v3811_v35  ;;  %v2108_v27 = vsel %vm10561_vm13, %v2043_v63, %v1523_v3  ;;  %v3745_v17 = vmul.u32 18, %v5496_v57  ;;  %v1525_v63 = vpop.permute.xlu0 %1524 }
 0x1b1   : > { %10825 = vst [vmem:[#allocation39_spill] sm:$0xff] %v7838_v28  ;;  %v5501_v45 = vtrunc.f32 %v3620_v20  ;;  %v3554_v33 = vmul.f32 0.055555556, %v3490_v62  ;;  %v2173_v0 = vsel %vm10563_vm14, %v2108_v27, %v1653_v23  ;;  %v10827_v53 = vrot.slane %v7841_v15, 2  ;;  %v10829_v28 = vld [vmem:[#allocation28_spill] sm:$0xff] }
 0x1b2   : > { %v1473_v61 = vrot.slane %v10808_v56, 2  ;;  %v2856_v30 = vfloor.f32 %v2792_v24  ;;  %v1850_v3 = vsel %vm10569_vm9, %v10829_v28, %v7757_v31  ;;  %1147 = vrot.lane.b32.xlu1 %v10830_v29, %s5714_s29  ;;  %5314 = vmatprep.mubr.msk.bf16.mxu0 %vm10548_vm15, %v2173_v0  ;;  %v3047_v27 = vsub.s32 %v7684_v13, %v2983_v32  ;;  %v10831_v28 = vld [vmem:[#allocation65_spill] sm:$0xff] }
 0x1b3   : > { %v7857_v44 = vsel %vm1161_vm5, %v1221_v40, %v10827_v53  ;;  %v2981_v57 = vmul.u32 324, %v5376_v37  ;;  %v2790_v20 = vmul.f32 0.0030864198, %v2726_v60  ;;  %v1915_v40 = vsel %vm10564_vm10, %v1850_v3, %v7773_v10  ;;  %1145 = vrot.lane.b32.xlu0 %v10831_v28, %s5714_s29  ;;  %v7875_v23 = vpop.permute.xlu1 %926 }
 0x1b4   : > { %10828 = vst [vmem:[#allocation35_spill] sm:$0xff] %v7857_v44  ;;  %v4003_v56 = vsel %vm3875_vm8, %v3939_v2, %v3811_v35  ;;  %v1474_v62 = vrot.slane %v10809_v38, 3  ;;  %v2602_v24 = vadd.s32 112, %v6856_v26  ;;  %v1980_v31 = vsel %vm10560_vm11, %v1915_v40, %v1258_v6  ;;  %v10833_v2 = vld [vmem:[#allocation46_spill] sm:$0xff]  ;;  %v1655_v6 = vpop.permute.xlu0 %1654 }
 0x1b5   : > { %v3809_v32 = vsub.s32 %v7698_v11, %v3745_v17  ;;  %v5502_v37 = vcvt.f32.s32 %v5501_v45  ;;  %v3618_v60 = vfloor.f32 %v3554_v33  ;;  %v2045_v0 = vsel %vm10562_vm12, %v1980_v31, %v1324_v50 }
 0x1b6   : > { %v10832_v10 = vshrl.u32 %v7841_v15, 16  ;;  %v1478_v38 = vrot.slane %v10833_v2, 3  ;;  %v5381_v53 = vtrunc.f32 %v2856_v30  ;;  %v2110_v3 = vsel %vm10561_vm13, %v2045_v0, %v1525_v63  ;;  %1277 = vrot.lane.b32.xlu1 %v7541_v59, %s5715_s5 }
 0x1b7   : > { %v3175_v29 = vadd.s32 324, %v3047_v27  ;;  %v3045_v40 = vsub.s32 %v7710_v55, %v2981_v57  ;;  %v2854_v17 = vfloor.f32 %v2790_v20  ;;  %v2175_v33 = vsel %vm10563_vm14, %v2110_v3, %v1655_v6  ;;  %1275 = vrot.lane.b32.xlu0 %v10803_v36, %s5715_s5  ;;  %v7893_v30 = vpop.permute.xlu1 %1129 }
 0x1b8   : > { %v1477_v35 = vrot.slane %v10832_v10, 2  ;;  %v5185_v45 = vadd.s32 4294967278, %v4003_v56  ;;  %vm3111_vm0 = vcmp.lt.s32.totalorder %v3047_v27, 0  ;;  %v7888_v50 = vadd.s32 %v6918_v1, %v2602_v24  ;;  %5315 = vmatmul.mubr.msk.bf16.gmra.mxu0 %vm10548_vm15, %v2175_v33  ;;  %v7897_v10 = vpop.permute.xlu0 %928 }
 0x1b9   : > { %vm4067_vm4 = vcmp.ge.s32.totalorder %v4003_v56, 18  ;;  %v3937_v63 = vadd.s32 18, %v3809_v32  ;;  %v3748_v31 = vmul.u32 18, %v5502_v37  ;;  %v5497_v28 = vtrunc.f32 %v3618_v60 }
 0x1ba   : > { %10834 = vst [vmem:[#allocation44_spill] sm:$0xff] %v7888_v50  ;;  %vm3873_vm7 = vcmp.lt.s32.totalorder %v3809_v32, 0  ;;  %v1475_v57 = vor.u32 %v1474_v62, %v1473_v61  ;;  %v7895_v20 = vor.u32 %v1478_v38, %v1477_v35  ;;  %v5382_v0 = vcvt.f32.s32 %v5381_v53  ;;  %1343 = vrot.lane.b32.xlu1 %v7550_v25, %s5716_s8 }
 0x1bb   : > { %v3239_v24 = vsel %vm3111_vm0, %v3175_v29, %v3047_v27  ;;  %v3173_v36 = vadd.s32 324, %v3045_v40  ;;  %v5377_v3 = vtrunc.f32 %v2854_v17  ;;  %v2600_v6 = vadd.s32 96, %v6856_v26  ;;  %1341 = vrot.lane.b32.xlu0 %v7541_v59, %s5716_s8  ;;  %v1260_v62 = vpop.permute.xlu1 %1259 }
 0x1bc   : > { %v7902_v33 = vsel %vm4067_vm4, %v5185_v45, %v4003_v56  ;;  %v1616_v37 = vrot.slane %v7801_v52, 3  ;;  %vm3109_vm8 = vcmp.lt.s32.totalorder %v3045_v40, 0  ;;  %v2731_v61 = vcvt.s32.f32 %v7888_v50  ;;  %v7915_v29 = vpop.permute.xlu0 %1131 }
 0x1bd   : > { %10835 = vst [vmem:[#allocation40_spill] sm:$0xff] %v7902_v33  ;;  %v4001_v60 = vsel %vm3873_vm7, %v3937_v63, %v3809_v32  ;;  %v3812_v35 = vsub.s32 %v7754_v7, %v3748_v31  ;;  %v5498_v27 = vcvt.f32.s32 %v5497_v28  ;;  %v7913_v56 = vsel %vm10541_vm2, %v1475_v57, %v7895_v20 }
 0x1be   : > { %vm3303_vm0 = vcmp.ge.s32.totalorder %v3239_v24, 324  ;;  %v5125_v52 = vadd.s32 4294966972, %v3239_v24  ;;  %v2984_v53 = vmul.u32 324, %v5382_v0  ;;  %1544 = vrot.lane.b32.xlu1 %v7603_v22, %s5717_s9  ;;  %v3237_v59 = vsel %vm3109_vm8, %v3173_v36, %v3045_v40 }
 0x1bf   : > { %v5378_v17 = vcvt.f32.s32 %v5377_v3  ;;  %v7920_v32 = vadd.s32 %v6918_v1, %v2600_v6  ;;  %v2603_v45 = vadd.s32 120, %v6856_v26  ;;  %v5183_v63 = vadd.s32 4294967278, %v4001_v60  ;;  %1542 = vrot.lane.b32.xlu0 %v7569_v34, %s5717_s9  ;;  %v1326_v38 = vpop.permute.xlu1 %1325 }
 0x1c0   : > { %v7925_v31 = vsel %vm10541_vm2, %v7719_v16, %v1475_v57  ;;  %v2795_v0 = vmul.f32 0.0030864198, %v2731_v61  ;;  %vm4065_vm4 = vcmp.ge.s32.totalorder %v4001_v60, 18  ;;  %v3940_v22 = vadd.s32 18, %v3812_v35  ;;  %v1262_v61 = vpop.permute.xlu0 %1261 }
 0x1c1   : > { %10836 = vst [vmem:[#allocation41_spill] sm:$0xff] %v7920_v32  ;;  %v3746_v40 = vmul.u32 18, %v5498_v27  ;;  %v10837_v36 = vrot.slane %v7841_v15, 3  ;;  %vm3876_vm7 = vcmp.lt.s32.totalorder %v3812_v35, 0  ;;  %v7936_v16 = vsel %vm3303_vm0, %v5125_v52, %v3239_v24 }
 0x1c2   : > { %10838 = vst [vmem:[#allocation38_spill] sm:$0xff] %v7936_v16  ;;  %v5123_v57 = vadd.s32 4294966972, %v3237_v59  ;;  %v3048_v6 = vsub.s32 %v7771_v18, %v2984_v53  ;;  %1674 = vrot.lane.b32.xlu1 %v7610_v43, %s5718_s10  ;;  %vm3301_vm8 = vcmp.ge.s32.totalorder %v3237_v59, 324  ;;  %v2982_v34 = vmul.u32 324, %v5378_v17  ;;  %v7960_v17 = vld [vmem:[%s6034_s24 + $0x8] sm:$0xff]  }
 0x1c3   : > { %v7933_v3 = vsel %vm10542_vm6, %v1616_v37, %v10837_v36  ;;  %v2729_v27 = vcvt.s32.f32 %v7920_v32  ;;  %v7943_v28 = vadd.s32 %v6918_v1, %v2603_v45  ;;  %v7945_v36 = vsel %vm4065_vm4, %v5183_v63, %v4001_v60  ;;  %v10844_v45 = vld [vmem:[#allocation25_spill] sm:$0xff]  ;;  %1672 = vrot.lane.b32.xlu0 %v7628_v14, %s5718_s10 }
 0x1c4   : > { %10840 = vst [vmem:[#allocation7_spill] sm:$0xff] %v7945_v36  ;;  %v10841_v13 = vrot.slane %v10795_v48, 3  ;;  %v10842_v52 = vrot.slane %v7841_v15, 1  ;;  %v10843_v53 = vrot.slane %v10811_v9, 1  ;;  %v2859_v18 = vfloor.f32 %v2795_v0  ;;  %v1527_v48 = vpop.permute.xlu1 %1526  ;;  %v10882_v36 = vld [vmem:[#allocation29_spill] sm:$0xff] }
 0x1c5   : > { %10839 = vst [vmem:[#allocation14_spill] sm:$0xff] %v7943_v28  ;;  %v1852_v60 = vsel %vm10569_vm9, %v10844_v45, %v7875_v23  ;;  %v3495_v9 = vcvt.s32.f32 %v7936_v16  ;;  %v7975_v0 = vsel %vm3301_vm8, %v5123_v57, %v3237_v59  ;;  %vm3112_vm0 = vcmp.lt.s32.totalorder %v3048_v6, 0 }
 0x1c6   : > { %v7950_v24 = vsel %vm10542_vm6, %v10841_v13, %v1616_v37  ;;  %v7957_v43 = vsel %vm762_vm3, %v10843_v53, %v10842_v52  ;;  %v7968_v13 = vsel %vm3876_vm7, %v3940_v22, %v3812_v35  ;;  %v3810_v37 = vsub.s32 %v7798_v8, %v3746_v40  ;;  %10845 = vst [vmem:[#allocation18_spill] sm:$0xff] %v7975_v0  ;;  %v1328_v53 = vpop.permute.xlu0 %1327  ;;  %v10884_v8 = vld [vmem:[#allocation8_spill] sm:$0xff] }
 0x1c7   : > { %v1917_v63 = vsel %vm10564_vm10, %v1852_v60, %v7893_v30  ;;  %v3176_v52 = vadd.s32 324, %v3048_v6  ;;  %882 = vrot.lane.b32.xlu1 %v7633_v47, %s5712_s25  ;;  %v3046_v14 = vsub.s32 %v7811_v4, %v2982_v34  ;;  %v2793_v35 = vmul.f32 0.0030864198, %v2729_v27  ;;  %880 = vrot.lane.b32.xlu0 %v10826_v21, %s5712_s25 }
 0x1c8   : > { %v1982_v23 = vsel %vm10560_vm11, %v1917_v63, %v1260_v62  ;;  %v2732_v22 = vcvt.s32.f32 %v7943_v28  ;;  %v5387_v45 = vtrunc.f32 %v2859_v18  ;;  %v2601_v59 = vadd.s32 104, %v6856_v26  ;;  %v1657_v62 = vpop.permute.xlu1 %1656 }
 0x1c9   : > { %v2047_v40 = vsel %vm10562_vm12, %v1982_v23, %v1326_v38  ;;  %vm3874_vm4 = vcmp.lt.s32.totalorder %v3810_v37, 0  ;;  %v3559_v60 = vmul.f32 0.055555556, %v3495_v9  ;;  %v10846_v34 = vshrl.u32 %v7841_v15, 16 }
 0x1ca   : > { %v2112_v57 = vsel %vm10561_vm13, %v2047_v40, %v1527_v48  ;;  %vm4068_vm7 = vcmp.ge.s32.totalorder %v7968_v13, 18  ;;  %v3938_v38 = vadd.s32 18, %v3810_v37  ;;  %v3493_v18 = vcvt.s32.f32 %v7975_v0  ;;  %v10847_v48 = vld [vmem:[#allocation48_spill] sm:$0xff]  ;;  %v1529_v40 = vpop.permute.xlu0 %1528 }
 0x1cb   : > { %v7990_v27 = vrot.slane %v10846_v34, 1  ;;  %v2177_v63 = vsel %vm10563_vm14, %v2112_v57, %v1657_v62  ;;  %v3240_v23 = vsel %vm3112_vm0, %v3176_v52, %v3048_v6  ;;  %v1854_v21 = vsel %vm10569_vm9, %v10847_v48, %v7897_v10  ;;  %948 = vrot.lane.b32.xlu1 %v7641_v39, %s5713_s26  ;;  %946 = vrot.lane.b32.xlu0 %v7633_v47, %s5713_s26 }
 0x1cc   : > { %5318 = vmatprep.mubr.msk.bf16.mxu1 %vm10548_vm15, %v2177_v63  ;;  %v3174_v9 = vadd.s32 324, %v3046_v14  ;;  %v2857_v34 = vfloor.f32 %v2793_v35  ;;  %v2796_v57 = vmul.f32 0.0030864198, %v2732_v22  ;;  %v1919_v62 = vsel %vm10564_vm10, %v1854_v21, %v7915_v29  ;;  %v8010_v10 = vpop.permute.xlu1 %930 }
 0x1cd   : > { %vm3110_vm8 = vcmp.lt.s32.totalorder %v3046_v14, 0  ;;  %v5388_v30 = vcvt.f32.s32 %v5387_v45  ;;  %v8005_v6 = vadd.s32 %v6918_v1, %v2601_v59  ;;  %v1984_v52 = vsel %vm10560_vm11, %v1919_v62, %v1262_v61 }
 0x1ce   : > { %v3623_v48 = vfloor.f32 %v3559_v60  ;;  %v2049_v22 = vsel %vm10562_vm12, %v1984_v52, %v1328_v53  ;;  %v3557_v29 = vmul.f32 0.055555556, %v3493_v18  ;;  %vm3304_vm0 = vcmp.ge.s32.totalorder %v3240_v23, 324  ;;  %v1659_v21 = vpop.permute.xlu0 %1658 }
 0x1cf   : > { %10848 = vst [vmem:[#allocation47_spill] sm:$0xff] %v8005_v6  ;;  %v5126_v45 = vadd.s32 4294966972, %v3240_v23  ;;  %v2114_v59 = vsel %vm10561_vm13, %v2049_v22, %v1529_v40  ;;  %1151 = vrot.lane.b32.xlu1 %v7652_v5, %s5714_s29  ;;  %v3238_v47 = vsel %vm3110_vm8, %v3174_v9, %v3046_v14  ;;  %v5383_v61 = vtrunc.f32 %v2857_v34  ;;  %1149 = vrot.lane.b32.xlu0 %v7645_v54, %s5714_s29 }
 0x1d0   : > { %v2860_v62 = vfloor.f32 %v2796_v57  ;;  %v2179_v60 = vsel %vm10563_vm14, %v2114_v59, %v1659_v21  ;;  %v5186_v63 = vadd.s32 4294967278, %v7968_v13  ;;  %v2987_v35 = vmul.u32 324, %v5388_v30  ;;  %v8025_v18 = vpop.permute.xlu1 %1133  ;;  %v8049_v21 = vld [vmem:[%s6034_s24 + $0x10] sm:$0xff]  }
 0x1d1   : > { %v2730_v53 = vcvt.s32.f32 %v8005_v6  ;;  %5319 = vmatmul.mubr.msk.bf16.vlgmr.msra.gmra.mxu1 %vm10548_vm15, %v2179_v60  ;;  %v4002_v5 = vsel %vm3874_vm4, %v3938_v38, %v3810_v37  ;;  %v5507_v14 = vtrunc.f32 %v3623_v48  ;;  %v1085_v40 = vrot.slane %v10833_v2, 2 }
 0x1d2   : > { %v10849_v9 = vshrl.u32 %v7960_v17, 16  ;;  %v3621_v57 = vfloor.f32 %v3557_v29  ;;  %v8032_v30 = vsel %vm3304_vm0, %v5126_v45, %v3240_v23  ;;  %v5124_v52 = vadd.s32 4294966972, %v3238_v47  ;;  %v8035_v22 = vpop.permute.xlu0 %932 }
 0x1d3   : > { %10850 = vst [vmem:[#allocation50_spill] sm:$0xff] %v8032_v30  ;;  %v2606_v54 = vadd.s32 144, %v6856_v26  ;;  %1281 = vrot.lane.b32.xlu1 %v7667_v51, %s5715_s5  ;;  %vm3302_vm4 = vcmp.ge.s32.totalorder %v3238_v47, 324  ;;  %v10851_v37 = vshll.u32 %v7960_v17, 16  ;;  %v5384_v2 = vcvt.f32.s32 %v5383_v61  ;;  %1279 = vrot.lane.b32.xlu0 %v7550_v25, %s5715_s5 }
 0x1d4   : > { %v1091_v34 = vrot.slane %v10849_v9, 1  ;;  %v5389_v48 = vtrunc.f32 %v2860_v62  ;;  %v5184_v59 = vadd.s32 4294967278, %v4002_v5  ;;  %v10852_v29 = vrot.slane %v7960_v17, 1  ;;  %v1264_v4 = vpop.permute.xlu1 %1263 }
 0x1d5   : > { %v1094_v38 = vrot.slane %v10851_v37, 2  ;;  %v10853_v23 = vrot.slane %v7841_v15, 1  ;;  %v3051_v60 = vsub.s32 %v7888_v50, %v2987_v35  ;;  %v2794_v9 = vmul.f32 0.0030864198, %v2730_v53 }
 0x1d6   : > { %v8057_v61 = vsel %vm4068_vm7, %v5186_v63, %v7968_v13  ;;  %vm4066_vm8 = vcmp.ge.s32.totalorder %v4002_v5, 18  ;;  %v5508_v62 = vcvt.f32.s32 %v5507_v14  ;;  %v3496_v37 = vcvt.s32.f32 %v8032_v30  ;;  %v8067_v25 = vpop.permute.xlu0 %1135 }
 0x1d7   : > { %v8046_v45 = vsel %vm762_vm3, %v10853_v23, %v10852_v29  ;;  %10854 = vst [vmem:[#allocation42_spill] sm:$0xff] %v8057_v61  ;;  %v5503_v29 = vtrunc.f32 %v3621_v57  ;;  %v8061_v23 = vsel %vm3302_vm4, %v5124_v52, %v3238_v47  ;;  %v1086_v35 = vor.u32 %v1085_v40, %v7990_v27  ;;  %1347 = vrot.lane.b32.xlu1 %v7733_v46, %s5716_s8 }
 0x1d8   : > { %10855 = vst [vmem:[#allocation55_spill] sm:$0xff] %v8061_v23  ;;  %v8065_v53 = vadd.s32 %v6918_v1, %v2606_v54  ;;  %v1095_v13 = vor.u32 %v1094_v38, %v1091_v34  ;;  %v1225_v63 = vrot.slane %v7960_v17, 2  ;;  %v2985_v14 = vmul.u32 324, %v5384_v2  ;;  %1345 = vrot.lane.b32.xlu0 %v7667_v51, %s5716_s8  ;;  %v1330_v27 = vpop.permute.xlu1 %1329 }
 0x1d9   : > { %v5390_v50 = vcvt.f32.s32 %v5389_v48  ;;  %v8072_v55 = vsel %vm4066_vm8, %v5184_v59, %v4002_v5  ;;  %v1291_v47 = vrot.slane %v8049_v21, 2  ;;  %v3179_v57 = vadd.s32 324, %v3051_v60 }
 0x1da   : > { %10856 = vst [vmem:[#allocation61_spill] sm:$0xff] %v8065_v53  ;;  %10857 = vst [vmem:[#allocation63_spill] sm:$0xff] %v8072_v55  ;;  %v2858_v52 = vfloor.f32 %v2794_v9  ;;  %v3751_v40 = vmul.u32 18, %v5508_v62  ;;  %v3560_v54 = vmul.f32 0.055555556, %v3496_v37  ;;  %v3494_v61 = vcvt.s32.f32 %v8061_v23  ;;  %v1266_v48 = vpop.permute.xlu0 %1265  ;;  %v8227_v55 = vpop.f32.mrf.mxu0 }
 0x1db   : > { %vm3115_vm3 = vcmp.lt.s32.totalorder %v3051_v60, 0  ;;  %v5504_v34 = vcvt.f32.s32 %v5503_v29  ;;  %v8080_v38 = vsel %vm958_vm1, %v7779_v42, %v1086_v35  ;;  %v2735_v5 = vcvt.s32.f32 %v8065_v53  ;;  %1548 = vrot.lane.b32.xlu1 %v7745_v19, %s5717_s9 }
 0x1dc   : > { %v2604_v2 = vadd.s32 128, %v6856_v26  ;;  %v8087_v51 = vsel %vm958_vm1, %v1086_v35, %v1095_v13  ;;  %v10858_v59 = vrot.slane %v7841_v15, 2  ;;  %v3049_v62 = vsub.s32 %v7920_v32, %v2985_v14  ;;  %v10861_v35 = vld [vmem:[#allocation57_spill] sm:$0xff]  ;;  %1546 = vrot.lane.b32.xlu0 %v7749_v12, %s5717_s9 }
 0x1dd   : > { %v2988_v42 = vmul.u32 324, %v5390_v50  ;;  %v8096_v37 = vsel %vm1161_vm5, %v1225_v63, %v1291_v47  ;;  %v10860_v29 = vshrl.u32 %v7960_v17, 16  ;;  %v3243_v33 = vsel %vm3115_vm3, %v3179_v57, %v3051_v60 }
 0x1de   : > { %v8092_v9 = vsel %vm1161_vm5, %v10858_v59, %v1225_v63  ;;  %10859 = vst [vmem:[#allocation45_spill] sm:$0xff] %v8096_v37  ;;  %v5385_v19 = vtrunc.f32 %v2858_v52  ;;  %v1856_v13 = vsel %vm10569_vm9, %v10861_v35, %v8010_v10  ;;  %v1531_v59 = vpop.permute.xlu1 %1530  ;;  %v3815_v14 = vsub.s32 %v7936_v16, %v3751_v40  ;;  %v1332_v52 = vpop.permute.xlu0 %1331 }
 0x1df   : > { %v8100_v7 = vrot.slane %v10860_v29, 2  ;;  %v3624_v50 = vfloor.f32 %v3560_v54  ;;  %v3558_v32 = vmul.f32 0.055555556, %v3494_v61  ;;  %v1921_v63 = vsel %vm10564_vm10, %v1856_v13, %v8025_v18  ;;  %1678 = vrot.lane.b32.xlu1 %v7786_v49, %s5718_s10  ;;  %v10864_v13 = vld [vmem:[#allocation23_spill] sm:$0xff] }
 0x1e0   : > { %v3749_v47 = vmul.u32 18, %v5504_v34  ;;  %v2799_v29 = vmul.f32 0.0030864198, %v2735_v5  ;;  %v8111_v60 = vadd.s32 %v6918_v1, %v2604_v2  ;;  %v1986_v57 = vsel %vm10560_vm11, %v1921_v63, %v1264_v4  ;;  %1676 = vrot.lane.b32.xlu0 %v7791_v58, %s5718_s10 }
 0x1e1   : > { %v5129_v12 = vadd.s32 4294966972, %v3243_v33  ;;  %v3177_v10 = vadd.s32 324, %v3049_v62  ;;  %v3052_v40 = vsub.s32 %v7943_v28, %v2988_v42  ;;  %v2051_v61 = vsel %vm10562_vm12, %v1986_v57, %v1330_v27 }
 0x1e2   : > { %10862 = vst [vmem:[#allocation43_spill] sm:$0xff] %v8111_v60  ;;  %vm3307_vm1 = vcmp.ge.s32.totalorder %v3243_v33, 324  ;;  %vm3113_vm5 = vcmp.lt.s32.totalorder %v3049_v62, 0  ;;  %v5386_v18 = vcvt.f32.s32 %v5385_v19  ;;  %v2116_v54 = vsel %vm10561_vm13, %v2051_v61, %v1531_v59  ;;  %v1661_v34 = vpop.permute.xlu1 %1660  ;;  %v1533_v59 = vpop.permute.xlu0 %1532 }
 0x1e3   : > { %v5509_v4 = vtrunc.f32 %v3624_v50  ;;  %v3622_v5 = vfloor.f32 %v3558_v32  ;;  %v10863_v2 = vshll.u32 %v7960_v17, 16  ;;  %v2181_v35 = vsel %vm10563_vm14, %v2116_v54, %v1661_v34  ;;  %886 = vrot.lane.b32.xlu1 %v7796_v41, %s5712_s25 }
 0x1e4   : > { %vm3879_vm7 = vcmp.lt.s32.totalorder %v3815_v14, 0  ;;  %v2863_v42 = vfloor.f32 %v2799_v29  ;;  %v2733_v27 = vcvt.s32.f32 %v8111_v60  ;;  %v1858_v19 = vsel %vm10569_vm9, %v10864_v13, %v8035_v22  ;;  %5322 = vmatprep.mubr.msk.bf16.mxu1 %vm10548_vm15, %v2181_v35  ;;  %884 = vrot.lane.b32.xlu0 %v7641_v39, %s5712_s25 }
 0x1e5   : > { %v1482_v49 = vrot.slane %v10863_v2, 3  ;;  %v8132_v58 = vsel %vm3307_vm1, %v5129_v12, %v3243_v33  ;;  %v3241_v32 = vsel %vm3113_vm5, %v3177_v10, %v3049_v62  ;;  %v3180_v50 = vadd.s32 324, %v3052_v40 }
 0x1e6   : > { %v1923_v63 = vsel %vm10564_vm10, %v1858_v19, %v8067_v25  ;;  %v3813_v29 = vsub.s32 %v7975_v0, %v3749_v47  ;;  %vm3116_vm0 = vcmp.lt.s32.totalorder %v3052_v40, 0  ;;  %v2986_v57 = vmul.u32 324, %v5386_v18  ;;  %v8141_v61 = vpop.permute.xlu1 %870  ;;  %v1663_v2 = vpop.permute.xlu0 %1662  ;;  %v10865_v18 = vld [vmem:[#allocation51_spill] sm:$0xff] }
 0x1e7   : > { %v1988_v22 = vsel %vm10560_vm11, %v1923_v63, %v1266_v48  ;;  %v3943_v54 = vadd.s32 18, %v3815_v14  ;;  %v5510_v33 = vcvt.f32.s32 %v5509_v4  ;;  %v5505_v12 = vtrunc.f32 %v3622_v5  ;;  %952 = vrot.lane.b32.xlu1 %v10865_v18, %s5713_s26 }
 0x1e8   : > { %v2053_v62 = vsel %vm10562_vm12, %v1988_v22, %v1332_v52  ;;  %v3499_v10 = vcvt.s32.f32 %v8132_v58  ;;  %v5127_v34 = vadd.s32 4294966972, %v3241_v32  ;;  %v5395_v25 = vtrunc.f32 %v2863_v42  ;;  %950 = vrot.lane.b32.xlu0 %v7796_v41, %s5713_s26 }
 0x1e9   : > { %v2118_v47 = vsel %vm10561_vm13, %v2053_v62, %v1533_v59  ;;  %vm3305_vm4 = vcmp.ge.s32.totalorder %v3241_v32, 324  ;;  %v3244_v39 = vsel %vm3116_vm0, %v3180_v50, %v3052_v40  ;;  %v2797_v48 = vmul.f32 0.0030864198, %v2733_v27 }
 0x1ea   : > { %v2183_v35 = vsel %vm10563_vm14, %v2118_v47, %v1663_v2  ;;  %v3941_v4 = vadd.s32 18, %v3813_v29  ;;  %v1486_v5 = vshrl.u32 %v8049_v21, 16  ;;  %v3050_v52 = vsub.s32 %v8005_v6, %v2986_v57  ;;  %v8155_v42 = vpop.permute.xlu1 %936  ;;  %v8160_v22 = vpop.permute.xlu0 %934  ;;  %v10866_v57 = vld [vmem:[#allocation37_spill] sm:$0xff]  ;;  %v10874_v6 = vld [vmem:[#allocation59_spill] sm:$0xff] }
 0x1eb   : > { %5323 = vmatmul.mubr.msk.bf16.gmra.mxu1 %vm10548_vm15, %v2183_v35  ;;  %v4007_v13 = vsel %vm3879_vm7, %v3943_v54, %v3815_v14  ;;  %vm3877_vm8 = vcmp.lt.s32.totalorder %v3813_v29, 0  ;;  %v3752_v19 = vmul.u32 18, %v5510_v33  ;;  %v5506_v40 = vcvt.f32.s32 %v5505_v12  ;;  %1155 = vrot.lane.b32.xlu1 %v10866_v57, %s5714_s29  ;;  %v10867_v12 = vld [vmem:[#allocation33_spill] sm:$0xff]  ;;  %v10869_v35 = vld [vmem:[#allocation39_spill] sm:$0xff] }
 0x1ec   : > { %v3563_v27 = vmul.f32 0.055555556, %v3499_v10  ;;  %v8158_v59 = vsel %vm3305_vm4, %v5127_v34, %v3241_v32  ;;  %v5130_v50 = vadd.s32 4294966972, %v3244_v39  ;;  %v5396_v63 = vcvt.f32.s32 %v5395_v25  ;;  %1153 = vrot.lane.b32.xlu0 %v10867_v12, %s5714_s29 }
 0x1ed   : > { %v8165_v41 = vor.u32 %v1482_v49, %v8100_v7  ;;  %vm3308_vm3 = vcmp.ge.s32.totalorder %v3244_v39, 324  ;;  %v2861_v62 = vfloor.f32 %v2797_v48  ;;  %v2607_v14 = vadd.s32 152, %v6856_v26 }
 0x1ee   : > { %vm4071_vm1 = vcmp.ge.s32.totalorder %v4007_v13, 18  ;;  %v4005_v54 = vsel %vm3877_vm8, %v3941_v4, %v3813_v29  ;;  %v8168_v33 = vrot.slane %v1486_v5, 2  ;;  %v3178_v32 = vadd.s32 324, %v3050_v52  ;;  %v8172_v10 = vpop.permute.xlu1 %1139  ;;  %v8178_v29 = vpop.permute.xlu0 %1137 }
 0x1ef   : > { %v3816_v34 = vsub.s32 %v8032_v30, %v3752_v19  ;;  %v3750_v25 = vmul.u32 18, %v5506_v40  ;;  %v3497_v7 = vcvt.s32.f32 %v8158_v59  ;;  %vm3114_vm5 = vcmp.lt.s32.totalorder %v3050_v52, 0  ;;  %1285 = vrot.lane.b32.xlu1 %v10869_v35, %s5715_s5 }
 0x1f0   : > { %v5189_v49 = vadd.s32 4294967278, %v4007_v13  ;;  %v3627_v47 = vfloor.f32 %v3563_v27  ;;  %v8176_v2 = vsel %vm3308_vm3, %v5130_v50, %v3244_v39  ;;  %v2991_v48 = vmul.u32 324, %v5396_v63  ;;  %1283 = vrot.lane.b32.xlu0 %v7733_v46, %s5715_s5 }
 0x1f1   : > { %10868 = vst [vmem:[#allocation52_spill] sm:$0xff] %v8176_v2  ;;  %v1489_v4 = vshll.u32 %v8049_v21, 16  ;;  %v8186_v5 = vsel %vm10541_vm2, %v7895_v20, %v8165_v41  ;;  %v5391_v19 = vtrunc.f32 %v2861_v62  ;;  %v8189_v40 = vadd.s32 %v6918_v1, %v2607_v14 }
 0x1f2   : > { %10870 = vst [vmem:[#allocation32_spill] sm:$0xff] %v8186_v5  ;;  %vm4069_vm7 = vcmp.ge.s32.totalorder %v4005_v54, 18  ;;  %v5187_v39 = vadd.s32 4294967278, %v4005_v54  ;;  %v3242_v27 = vsel %vm3114_vm5, %v3178_v32, %v3050_v52  ;;  %v2605_v50 = vadd.s32 136, %v6856_v26  ;;  %v8194_v63 = vpop.permute.xlu1 %1269  ;;  %v10873_v32 = vld [vmem:[#allocation9_spill] sm:$0xff]  ;;  %v1268_v46 = vpop.permute.xlu0 %1267 }
 0x1f3   : > { %10871 = vst [vmem:[#allocation21_spill] sm:$0xff] %v8189_v40  ;;  %v3944_v57 = vadd.s32 18, %v3816_v34  ;;  %v3814_v12 = vsub.s32 %v8061_v23, %v3750_v25  ;;  %v3561_v28 = vmul.f32 0.055555556, %v3497_v7  ;;  %v3500_v20 = vcvt.s32.f32 %v8176_v2  ;;  %1351 = vrot.lane.b32.xlu1 %v7857_v44, %s5716_s8 }
 0x1f4   : > { %v8199_v62 = vsel %vm4071_vm1, %v5189_v49, %v4007_v13  ;;  %vm3880_vm0 = vcmp.lt.s32.totalorder %v3816_v34, 0  ;;  %v5515_v14 = vtrunc.f32 %v3627_v47  ;;  %v3055_v52 = vsub.s32 %v8065_v53, %v2991_v48  ;;  %v10875_v13 = vld [vmem:[#allocation12_spill] sm:$0xff]  ;;  %v10876_v49 = vld [vmem:[#allocation2_spill] sm:$0xff]  ;;  %1349 = vrot.lane.b32.xlu0 %v10869_v35, %s5716_s8 }
 0x1f5   : > { %10872 = vst [vmem:[#allocation26_spill] sm:$0xff] %v8199_v62  ;;  %vm4255_vm4 = vcmp.lt.s32.totalorder %v10873_v32, 648  ;;  %vm4319_vm8 = vcmp.lt.s32.totalorder %v10874_v6, 288  ;;  %v8206_v30 = vrot.slane %v1489_v4, 3  ;;  %v5128_v25 = vadd.s32 4294966972, %v3242_v27  ;;  %v10879_v62 = vld [vmem:[#allocation56_spill] sm:$0xff] }
 0x1f6   : > { %v5392_v7 = vcvt.f32.s32 %v5391_v19  ;;  %v2736_v16 = vcvt.s32.f32 %v8189_v40  ;;  %vm4253_vm3 = vcmp.lt.s32.totalorder %v10875_v13, 648  ;;  %vm4317_vm1 = vcmp.lt.s32.totalorder %v10876_v49, 288  ;;  %v10880_v4 = vld [vmem:[#allocation66_spill] sm:$0xff]  ;;  %v1336_v19 = vpop.permute.xlu1 %1335  ;;  %v1334_v37 = vpop.permute.xlu0 %1333  ;;  %v10893_v32 = vld [vmem:[#allocation68_spill] sm:$0xff] }
 0x1f7   : > { %v8212_v47 = vsel %vm4069_vm7, %v5187_v39, %v4005_v54  ;;  %vm3306_vm5 = vcmp.ge.s32.totalorder %v3242_v27, 324  ;;  %v8216_v53 = vadd.s32 %v6918_v1, %v2605_v50  ;;  %v8223_v23 = vsel %vm3880_vm0, %v3944_v57, %v3816_v34  ;;  %1552 = vrot.lane.b32.xlu1 %v7913_v56, %s5717_s9  ;;  %v10883_v57 = vld [vmem:[#allocation34_spill] sm:$0xff]  ;;  %v8253_v40 = vpop.f32.mrf.mxu0 }
 0x1f8   : > { %10877 = vst [vmem:[#allocation28_spill] sm:$0xff] %v8212_v47  ;;  %v3942_v0 = vadd.s32 18, %v3814_v12  ;;  %v3625_v54 = vfloor.f32 %v3561_v28  ;;  %v3564_v39 = vmul.f32 0.055555556, %v3500_v20  ;;  %v10881_v47 = vld [vmem:[#allocation5_spill] sm:$0xff]  ;;  %vm3878_vm15 = vcmp.lt.s32.totalorder %v3814_v12, 0  ;;  %1550 = vrot.lane.b32.xlu0 %v7925_v31, %s5717_s9 }
 0x1f9   : > { %10878 = vst [vmem:[#allocation64_spill] sm:$0xff] %v8216_v53  ;;  %v5516_v48 = vcvt.f32.s32 %v5515_v14  ;;  %v3183_v5 = vadd.s32 324, %v3055_v52  ;;  %v8233_v34 = vsel %vm3306_vm5, %v5128_v25, %v3242_v27  ;;  %vm3119_vm0 = vcmp.lt.s32.totalorder %v3055_v52, 0  ;;  %vm8278_vm5 = vmand %vm4255_vm4, %vm4319_vm8  ;;  %v8292_v6 = vpop.f32.mrf.mxu0 }
 0x1fa   : > { %v2989_v28 = vmul.u32 324, %v5392_v7  ;;  %v2800_v35 = vmul.f32 0.0030864198, %v2736_v16  ;;  %vm4446_vm7 = vcmp.lt.s32.totalorder %v10883_v57, 16  ;;  %vm4072_vm6 = vcmp.ge.s32.totalorder %v8223_v23, 18  ;;  %v1537_v27 = vpop.permute.xlu1 %1536 }
 0x1fb   : > { %v5190_v20 = vadd.s32 4294967278, %v8223_v23  ;;  %v2734_v50 = vcvt.s32.f32 %v8216_v53  ;;  %vm10885_vm2 = vcmask 64512   ;;  %v8247_v16 = vsel %vm3878_vm15, %v3942_v0, %v3814_v12  ;;  %1682 = vrot.lane.b32.xlu1 %v7933_v3, %s5718_s10 }
 0x1fc   : > { %v1797_v56 = vsel %vm10885_vm2, %v10884_v8, %v8141_v61  ;;  %v5511_v25 = vtrunc.f32 %v3625_v54  ;;  %v3628_v7 = vfloor.f32 %v3564_v39  ;;  %v3755_v11 = vmul.u32 18, %v5516_v48  ;;  %v10886_v8 = vld [vmem:[#allocation58_spill] sm:$0xff]  ;;  %v1535_v61 = vpop.permute.xlu0 %1534  ;;  %v10888_v54 = vld [vmem:[#allocation4_spill] sm:$0xff]  ;;  %1680 = vrot.lane.b32.xlu0 %v7950_v24, %s5718_s10 }
 0x1fd   : > { %v1862_v44 = vsel %vm10569_vm9, %v1797_v56, %v8155_v42  ;;  %v3498_v14 = vcvt.s32.f32 %v8233_v34  ;;  %v3247_v53 = vsel %vm3119_vm0, %v3183_v5, %v3055_v52  ;;  %v1860_v31 = vsel %vm10569_vm9, %v10886_v8, %v8160_v22  ;;  %v10887_v48 = vld [vmem:[#allocation54_spill] sm:$0xff] }
 0x1fe   : > { %v1927_v0 = vsel %vm10564_vm10, %v1862_v44, %v8172_v10  ;;  %v3053_v42 = vsub.s32 %v8111_v60, %v2989_v28  ;;  %v2864_v12 = vfloor.f32 %v2800_v35  ;;  %vm4256_vm2 = vcmp.lt.s32.totalorder %v10887_v48, 648  ;;  %v1667_v39 = vpop.permute.xlu1 %1666 }
 0x1ff   : > { %vm4320_vm15 = vcmp.lt.s32.totalorder %v10888_v54, 288  ;;  %v1925_v5 = vsel %vm10564_vm10, %v1860_v31, %v8178_v29  ;;  %v1992_v22 = vsel %vm10560_vm11, %v1927_v0, %v8194_v63  ;;  %v2798_v52 = vmul.f32 0.0030864198, %v2734_v50  ;;  %890 = vrot.lane.b32.xlu1 %v7957_v43, %s5712_s25 }
 0x200   : > { %v2610_v44 = vadd.s32 176, %v6856_v26  ;;  %v1990_v10 = vsel %vm10560_vm11, %v1925_v5, %v1268_v46  ;;  %v2057_v3 = vsel %vm10562_vm12, %v1992_v22, %v1336_v19  ;;  %v5512_v28 = vcvt.f32.s32 %v5511_v25  ;;  %vm8288_vm11 = vmand %vm4253_vm3, %vm4317_vm1  ;;  %v1665_v56 = vpop.permute.xlu0 %1664  ;;  %888 = vrot.lane.b32.xlu0 %v10865_v18, %s5712_s25 }
 0x201   : > { %v5517_v35 = vtrunc.f32 %v3628_v7  ;;  %v2055_v63 = vsel %vm10562_vm12, %v1990_v10, %v1334_v37  ;;  %v2122_v46 = vsel %vm10561_vm13, %v2057_v3, %v1537_v27  ;;  %v3562_v50 = vmul.f32 0.055555556, %v3498_v14 }
 0x202   : > { %vm3311_vm0 = vcmp.ge.s32.totalorder %v3247_v53, 324  ;;  %vm4448_vm4 = vcmp.lt.s32.totalorder %v10893_v32, 16  ;;  %v2120_v19 = vsel %vm10561_vm13, %v2055_v63, %v1535_v61  ;;  %v2187_v37 = vsel %vm10563_vm14, %v2122_v46, %v1667_v39  ;;  %v10921_v32 = vld [vmem:[#allocation21_spill] sm:$0xff] }
 0x203   : > { %v5133_v14 = vadd.s32 4294966972, %v3247_v53  ;;  %v3181_v49 = vadd.s32 324, %v3053_v42  ;;  %vm10894_vm8 = vcmp.lt.s32.totalorder %v10880_v4, 288  ;;  %vm10895_vm3 = vcmp.lt.s32.totalorder %v10879_v62, 648  ;;  %v8322_v62 = vpop.permute.xlu1 %874  ;;  %956 = vrot.lane.b32.xlu1 %v8046_v45, %s5713_s26 }
 0x204   : > { %vm8303_vm1 = vmand %vm10895_vm3, %vm10894_vm8  ;;  %v2185_v27 = vsel %vm10563_vm14, %v2120_v19, %v1665_v56  ;;  %v5397_v25 = vtrunc.f32 %v2864_v12  ;;  %v2862_v7 = vfloor.f32 %v2798_v52  ;;  %v8309_v8 = vadd.s32 %v6918_v1, %v2610_v44  ;;  %v2334_v52 = vpop.f32.mrf.mxu0  ;;  %954 = vrot.lane.b32.xlu0 %v7957_v43, %s5713_s26  ;;  %v10923_v44 = vld [vmem:[#allocation36_spill] sm:$0xff] }
 0x205   : > { %vm10899_vm13 = vcmp.lt.s32.totalorder %v10881_v47, 16  ;;  %vm10902_vm8 = vcmask 293888   ;;  %v10903_v4 = vrot.slane %v8049_v21, 3  ;;  %v10904_v0 = vrot.slane %v7960_v17, 3 }
 0x206   : > { %10898 = vst [vmem:[#allocation65_spill] sm:$0xff] %v8309_v8  ;;  %vm8315_vm12 = vmand %vm8278_vm5, %vm10899_vm13  ;;  %5326 = vmatprep.mubr.msk.bf16.mxu1 %vm10902_vm8, %v2185_v27  ;;  %vm10905_vm3 = vcmask 1044480   ;;  %v10907_v12 = vrot.slane %v7841_v15, 3  ;;  %vm3117_vm5 = vcmp.lt.s32.totalorder %v3053_v42, 0  ;;  %v2608_v18 = vadd.s32 160, %v6856_v26 }
 0x207   : > { %v8329_v61 = vsel %vm10905_vm3, %v10904_v0, %v10903_v4  ;;  %v10906_v47 = vmov %v10904_v0  ;;  %vm10908_vm13 = vmmov %vm10905_vm3  ;;  %vm10909_vm8 = vcmp.lt.s32.totalorder %v10882_v36, 16  ;;  %vm10912_vm3 = vcmask 293888   ;;  %1159 = vrot.lane.b32.xlu1 %v8087_v51, %s5714_s29 }
 0x208   : > { %v8336_v5 = vsel %vm10908_vm13, %v10907_v12, %v10906_v47  ;;  %vm8343_vm14 = vmand %vm8288_vm11, %vm10909_vm8  ;;  %5327 = vmatmul.mubr.msk.bf16.gmra.mxu1 %vm10912_vm3, %v2187_v37  ;;  %v8351_v15 = vsel %vm4072_vm6, %v5190_v20, %v8223_v23  ;;  %vm4070_vm13 = vcmp.ge.s32.totalorder %v8247_v16, 18  ;;  %v10913_v17 = vor.u32 %v8206_v30, %v8168_v33  ;;  %v8370_v23 = vpop.permute.xlu0 %872  ;;  %1157 = vrot.lane.b32.xlu0 %v8080_v38, %s5714_s29 }
 0x209   : > { %vm10914_vm10 = vsmask.f32 5376  ;;  %v3819_v22 = vsub.s32 %v8132_v58, %v3755_v11  ;;  %vm8366_vm11 = vmand %vm8303_vm1, %vm4446_vm7  ;;  %v3753_v30 = vmul.u32 18, %v5512_v28  ;;  %v5518_v33 = vcvt.f32.s32 %v5517_v35  ;;  %v8387_v28 = vpop.permute.xlu1 %940 }
 0x20a   : > { %v8359_v36 = vsel %vm10914_vm10, %v8165_v41, %v10913_v17  ;;  %v3626_v41 = vfloor.f32 %v3562_v50  ;;  %v8375_v20 = vsel %vm3311_vm0, %v5133_v14, %v3247_v53  ;;  %v3245_v11 = vsel %vm3117_vm5, %v3181_v49, %v3053_v42  ;;  %vm8400_vm10 = vmand %vm4256_vm2, %vm4320_vm15 }
 0x20b   : > { %v5398_v57 = vcvt.f32.s32 %v5397_v25  ;;  %v5393_v10 = vtrunc.f32 %v2862_v7  ;;  %v2739_v3 = vcvt.s32.f32 %v8309_v8  ;;  %v4703_v39 = vsel %vm8315_vm12, %v8227_v55, 0.0  ;;  %1289 = vrot.lane.b32.xlu1 %v8092_v9, %s5715_s5 }
 0x20c   : > { %v4701_v45 = vsel %vm8343_vm14, %v8253_v40, 0.0  ;;  %v5188_v53 = vadd.s32 4294967278, %v8247_v16  ;;  %v8391_v42 = vadd.s32 %v6918_v1, %v2608_v18  ;;  %v4702_v35 = vsel %vm8366_vm11, %v2334_v52, 0.0  ;;  %v8404_v40 = vpop.permute.xlu0 %938  ;;  %vm4512_vm14 = vmand %vm8400_vm10, %vm4448_vm4  ;;  %v10922_v52 = vld [vmem:[#allocation62_spill] sm:$0xff] }
 0x20d   : > { %vm3883_vm6 = vcmp.lt.s32.totalorder %v3819_v22, 0  ;;  %v3947_v29 = vadd.s32 18, %v3819_v22  ;;  %v3503_v55 = vcvt.s32.f32 %v8375_v20  ;;  %v3817_v63 = vsub.s32 %v8158_v59, %v3753_v30  ;;  %v8416_v51 = vpop.permute.xlu1 %1143  ;;  %v10924_v30 = vld [vmem:[#allocation35_spill] sm:$0xff] }
 0x20e   : > { %10917 = vst [vmem:[#allocation46_spill] sm:$0xff] %v8391_v42  ;;  %v3756_v46 = vmul.u32 18, %v5518_v33  ;;  %v5513_v50 = vtrunc.f32 %v3626_v41  ;;  %v5131_v24 = vadd.s32 4294966972, %v3245_v11  ;;  %vm3309_vm12 = vcmp.ge.s32.totalorder %v3245_v11, 324  ;;  %1287 = vrot.lane.b32.xlu0 %v10924_v30, %s5715_s5 }
 0x20f   : > { %v2992_v19 = vmul.u32 324, %v5398_v57  ;;  %v5394_v37 = vcvt.f32.s32 %v5393_v10  ;;  %v2803_v54 = vmul.f32 0.0030864198, %v2739_v3  ;;  %v4765_v56 = vadd.f32 %v4702_v35, %v4701_v45  ;;  %v10925_v3 = vld [vmem:[#allocation67_spill] sm:$0xff] }
 0x210   : > { %v4835_v48 = vmul.f32 %v4702_v35, %v4702_v35  ;;  %v8412_v14 = vsel %vm4070_vm13, %v5188_v53, %v8247_v16  ;;  %v2737_v49 = vcvt.s32.f32 %v8391_v42  ;;  %v4836_v13 = vmul.f32 %v4703_v39, %v4703_v39  ;;  %v8424_v31 = vpop.permute.xlu0 %1141 }
 0x211   : > { %v4834_v27 = vmul.f32 %v4701_v45, %v4701_v45  ;;  %v4011_v25 = vsel %vm3883_vm6, %v3947_v29, %v3819_v22  ;;  %v3567_v7 = vmul.f32 0.055555556, %v3503_v55  ;;  %vm3881_vm7 = vcmp.lt.s32.totalorder %v3817_v63, 0  ;;  %v8438_v33 = vpop.permute.xlu1 %1273  ;;  %v10927_v45 = vld [vmem:[#allocation45_spill] sm:$0xff]  ;;  %v10928_v55 = vld [vmem:[#allocation7_spill] sm:$0xff] }
 0x212   : > { %v3945_v38 = vadd.s32 18, %v3817_v63  ;;  %v3820_v16 = vsub.s32 %v8176_v2, %v3756_v46  ;;  %v8430_v4 = vsel %vm3309_vm12, %v5131_v24, %v3245_v11  ;;  %v5514_v0 = vcvt.f32.s32 %v5513_v50  ;;  %1355 = vrot.lane.b32.xlu1 %v10927_v45, %s5716_s8  ;;  %v10929_v50 = vld [vmem:[#allocation64_spill] sm:$0xff]  ;;  %1353 = vrot.lane.b32.xlu0 %v8092_v9, %s5716_s8  ;;  %v10936_v45 = vld [vmem:[#allocation6_spill] sm:$0xff] }
 0x213   : > { %10920 = vst [vmem:[#allocation25_spill] sm:$0xff] %v8430_v4  ;;  %v3056_v47 = vsub.s32 %v10921_v32, %v2992_v19  ;;  %v2990_v12 = vmul.u32 324, %v5394_v37  ;;  %v2867_v18 = vfloor.f32 %v2803_v54  ;;  %v4704_v21 = vsel %vm4512_vm14, %v8292_v6, 0.0  ;;  %v10926_v6 = vld [vmem:[#allocation69_spill] sm:$0xff] }
 0x214   : > { %v4766_v17 = vadd.f32 %v4765_v56, %v4703_v39  ;;  %v4898_v22 = vadd.f32 %v4835_v48, %v4834_v27  ;;  %vm4257_vm2 = vcmp.lt.s32.totalorder %v10922_v52, 648  ;;  %vm4321_vm15 = vcmp.lt.s32.totalorder %v10923_v44, 288  ;;  %v8443_v39 = vpop.permute.xlu0 %1271  ;;  %v8457_v56 = vpop.f32.mrf.mxu0  ;;  %v10930_v48 = vld [vmem:[#allocation60_spill] sm:$0xff] }
 0x215   : > { %v2801_v41 = vmul.f32 0.0030864198, %v2737_v49  ;;  %vm4075_vm0 = vcmp.ge.s32.totalorder %v4011_v25, 18  ;;  %v5193_v11 = vadd.s32 4294967278, %v4011_v25  ;;  %v3631_v57 = vfloor.f32 %v3567_v7  ;;  %v1340_v49 = vpop.permute.xlu1 %1339 }
 0x216   : > { %v3501_v10 = vcvt.s32.f32 %v8430_v4  ;;  %vm4258_vm4 = vcmp.lt.s32.totalorder %v10925_v3, 648  ;;  %vm4322_vm1 = vcmp.lt.s32.totalorder %v10926_v6, 288  ;;  %v8448_v53 = vsel %vm3881_vm7, %v3945_v38, %v3817_v63  ;;  %v10931_v63 = vld [vmem:[#allocation11_spill] sm:$0xff]  ;;  %1556 = vrot.lane.b32.xlu1 %v8359_v36, %s5717_s9  ;;  %v2347_v36 = vpop.f32.mrf.mxu0 }
 0x217   : > { %vm3884_vm5 = vcmp.lt.s32.totalorder %v3820_v16, 0  ;;  %v3948_v35 = vadd.s32 18, %v3820_v16  ;;  %v2611_v29 = vadd.s32 184, %v6856_v26  ;;  %vm4449_vm8 = vcmp.lt.s32.totalorder %v10928_v55, 16  ;;  %v10932_v38 = vld [vmem:[#allocation63_spill] sm:$0xff] }
 0x218   : > { %v3754_v43 = vmul.u32 18, %v5514_v0  ;;  %v3184_v46 = vadd.s32 324, %v3056_v47  ;;  %v3054_v24 = vsub.s32 %v10929_v50, %v2990_v12  ;;  %v5403_v19 = vtrunc.f32 %v2867_v18  ;;  %v1338_v18 = vpop.permute.xlu0 %1337 }
 0x219   : > { %v8453_v37 = vmul.f32 %v4704_v21, %v4704_v21  ;;  %v8455_v54 = vadd.f32 %v4898_v22, %v4836_v13  ;;  %vm4259_vm3 = vcmp.lt.s32.totalorder %v10930_v48, 648  ;;  %vm4323_vm13 = vcmp.lt.s32.totalorder %v10931_v63, 288 }
 0x21a   : > { %vm3120_vm11 = vcmp.lt.s32.totalorder %v3056_v47, 0  ;;  %v2865_v27 = vfloor.f32 %v2801_v41  ;;  %v8463_v7 = vadd.f32 %v4766_v17, %v4704_v21  ;;  %vm4450_vm6 = vcmp.lt.s32.totalorder %v10932_v38, 16  ;;  %v10933_v17 = vld [vmem:[#allocation40_spill] sm:$0xff]  ;;  %1686 = vrot.lane.b32.xlu1 %v8329_v61, %s5718_s10 }
 0x21b   : > { %v8467_v0 = vsel %vm4075_vm0, %v5193_v11, %v4011_v25  ;;  %v5523_v13 = vtrunc.f32 %v3631_v57  ;;  %v3565_v12 = vmul.f32 0.055555556, %v3501_v10  ;;  %vm4073_vm10 = vcmp.ge.s32.totalorder %v8448_v53, 18  ;;  %v10934_v57 = vld [vmem:[#allocation3_spill] sm:$0xff]  ;;  %v10935_v10 = vld [vmem:[#allocation49_spill] sm:$0xff] }
 0x21c   : > { %v8473_v9 = vadd.s32 4294967278, %v8448_v53  ;;  %v8476_v22 = vsel %vm3884_vm5, %v3948_v35, %v3820_v16  ;;  %v8479_v21 = vadd.s32 %v6918_v1, %v2611_v29  ;;  %vm4451_vm12 = vcmp.lt.s32.totalorder %v10933_v17, 16  ;;  %v10938_v35 = vld [vmem:[#allocation32_spill] sm:$0xff]  ;;  %v1541_v29 = vpop.permute.xlu1 %1540 }
 0x21d   : > { %v8483_v25 = vsub.s32 %v8233_v34, %v3754_v43  ;;  %v3248_v30 = vsel %vm3120_vm11, %v3184_v46, %v3056_v47  ;;  %v3182_v41 = vadd.s32 324, %v3054_v24  ;;  %v5404_v11 = vcvt.f32.s32 %v5403_v19  ;;  %1554 = vrot.lane.b32.xlu0 %v10938_v35, %s5717_s9  ;;  %v10939_v47 = vld [vmem:[#allocation15_spill] sm:$0xff]  ;;  %v1539_v35 = vpop.permute.xlu0 %1538 }
 0x21e   : > { %vm10937_vm0 = vcmask 64512   ;;  %vm3118_vm5 = vcmp.lt.s32.totalorder %v3054_v24, 0  ;;  %v5399_v32 = vtrunc.f32 %v2865_v27  ;;  %v2609_v43 = vadd.s32 168, %v6856_v26 }
 0x21f   : > { %v1801_v16 = vsel %vm10937_vm0, %v10936_v45, %v8322_v62  ;;  %vm10940_vm11 = vmmov %vm10937_vm0  ;;  %v5524_v50 = vcvt.f32.s32 %v5523_v13  ;;  %v3629_v60 = vfloor.f32 %v3565_v12  ;;  %vm10941_vm0 = vcmask 130048   ;;  %v8519_v12 = vpop.f32.mrf.mxu0 }
 0x220   : > { %v1799_v46 = vsel %vm10940_vm11, %v10939_v47, %v8370_v23  ;;  %v1866_v19 = vsel %vm10569_vm9, %v1801_v16, %v8387_v28  ;;  %v5134_v27 = vadd.s32 4294966972, %v3248_v30  ;;  %v2740_v2 = vcvt.s32.f32 %v8479_v21  ;;  %vm8509_vm11 = vmand %vm4257_vm2, %vm4321_vm15  ;;  %v10944_v28 = vld [vmem:[#allocation42_spill] sm:$0xff]  ;;  %v1671_v16 = vpop.permute.xlu1 %1670 }
 0x221   : > { %v1864_v62 = vsel %vm10569_vm9, %v1799_v46, %v8404_v40  ;;  %v1931_v45 = vsel %vm10941_vm0, %v1866_v19, %v8416_v51  ;;  %vm4452_vm9 = vcmp.lt.s32.totalorder %v10944_v28, 16  ;;  %vm10945_vm14 = vmmov %vm10941_vm0  ;;  %vm10946_vm0 = vcmask 162816   ;;  %1684 = vrot.lane.b32.xlu0 %v8336_v5, %s5718_s10  ;;  %v1669_v6 = vpop.permute.xlu0 %1668  ;;  %v2350_v46 = vpop.f32.mrf.mxu0  ;;  %v10971_v23 = vld [vmem:[#allocation18_spill] sm:$0xff] }
 0x222   : > { %v1929_v40 = vsel %vm10945_vm14, %v1864_v62, %v8424_v31  ;;  %v1996_v51 = vsel %vm10946_vm0, %v1931_v45, %v8438_v33  ;;  %v3246_v61 = vsel %vm3118_vm5, %v3182_v41, %v3054_v24  ;;  %v2995_v13 = vmul.u32 324, %v5404_v11  ;;  %vm10947_vm7 = vmmov %vm10946_vm0 }
 0x223   : > { %v1994_v52 = vsel %vm10947_vm7, %v1929_v40, %v8443_v39  ;;  %vm10948_vm2 = vcmask 195584   ;;  %v5400_v47 = vcvt.f32.s32 %v5399_v32  ;;  %v8527_v31 = vadd.s32 %v6918_v1, %v2609_v43  ;;  %vm8533_vm15 = vmand %vm4258_vm4, %vm4322_vm1  ;;  %v8655_v62 = vpop.f32.mrf.mxu0 }
 0x224   : > { %v2061_v44 = vsel %vm10948_vm2, %v1996_v51, %v1340_v49  ;;  %vm10951_vm14 = vmmov %vm10948_vm2  ;;  %vm10952_vm7 = vcmask 228352   ;;  %v3759_v49 = vmul.u32 18, %v5524_v50  ;;  %vm3312_vm5 = vcmp.ge.s32.totalorder %v3248_v30, 324  ;;  %v8570_v48 = vpop.permute.xlu1 %878 }
 0x225   : > { %v2059_v39 = vsel %vm10951_vm14, %v1994_v52, %v1338_v18  ;;  %v2126_v24 = vsel %vm10952_vm7, %v2061_v44, %v1541_v29  ;;  %vm8543_vm0 = vmand %vm8509_vm11, %vm4449_vm8  ;;  %vm10956_vm4 = vcmask 261120   ;;  %v5132_v41 = vadd.s32 4294966972, %v3246_v61 }
 0x226   : > { %vm10955_vm2 = vmmov %vm10952_vm7  ;;  %v2191_v3 = vsel %vm10956_vm4, %v2126_v24, %v1671_v16  ;;  %v2804_v11 = vmul.f32 0.0030864198, %v2740_v2  ;;  %v5519_v18 = vtrunc.f32 %v3629_v60  ;;  %vm3310_vm8 = vcmp.ge.s32.totalorder %v3246_v61, 324  ;;  %v10976_v2 = vld [vmem:[#allocation55_spill] sm:$0xff] }
 0x227   : > { %v2124_v32 = vsel %vm10955_vm2, %v2059_v39, %v1539_v35  ;;  %vm8553_vm1 = vmand %vm4259_vm3, %vm4323_vm13  ;;  %v3059_v29 = vsub.s32 %v8309_v8, %v2995_v13  ;;  %v4900_v43 = vadd.f32 %v8455_v54, %v8453_v37  ;;  %vm10962_vm3 = vcmask 293888  }
 0x228   : > { %vm10959_vm14 = vmmov %vm10956_vm4  ;;  %v8573_v60 = vsel %vm3312_vm5, %v5134_v27, %v3248_v30  ;;  %v2993_v63 = vmul.u32 324, %v5400_v47  ;;  %v2738_v19 = vcvt.s32.f32 %v8527_v31  ;;  %v4705_v37 = vsel %vm8543_vm0, %v2347_v36, 0.0  ;;  %v8598_v36 = vpop.permute.xlu0 %876  ;;  %v10970_v27 = vld [vmem:[#allocation30_spill] sm:$0xff]  ;;  %v8617_v52 = vpop.permute.xlu1 %944 }
 0x229   : > { %v2189_v55 = vsel %vm10959_vm14, %v2124_v32, %v1669_v6  ;;  %vm8565_vm11 = vmand %vm8533_vm15, %vm4450_vm6  ;;  %v8582_v54 = vsel %vm4073_vm10, %v8473_v9, %v8448_v53  ;;  %v8585_v38 = vadd.s32 4294967278, %v8476_v22  ;;  %v3946_v30 = vadd.s32 18, %v8483_v25 }
 0x22a   : > { %5330 = vmatprep.mubr.msk.bf16.mxu1 %vm10962_vm3, %v2189_v55  ;;  %vm10963_vm13 = vmmov %vm10962_vm3  ;;  %vm3882_vm15 = vcmp.lt.s32.totalorder %v8483_v25, 0  ;;  %v3823_v53 = vsub.s32 %v8375_v20, %v3759_v49  ;;  %v8602_v9 = vsel %vm3310_vm8, %v5132_v41, %v3246_v61  ;;  %v2868_v45 = vfloor.f32 %v2804_v11  ;;  %v10974_v49 = vld [vmem:[#allocation28_spill] sm:$0xff] }
 0x22b   : > { %5331 = vmatmul.mubr.msk.bf16.gmra.mxu1 %vm10963_vm13, %v2191_v3  ;;  %vm8593_vm6 = vmand %vm8553_vm1, %vm4451_vm12  ;;  %vm10966_vm10 = vcmp.lt.s32.totalorder %v10935_v10, 288  ;;  %vm10967_vm7 = vcmp.lt.s32.totalorder %v10934_v57, 648  ;;  %v4706_v35 = vsel %vm8565_vm11, %v2350_v46, 0.0  ;;  %vm4261_vm12 = vcmp.lt.s32.totalorder %v10970_v27, 648  ;;  %v10975_v46 = vld [vmem:[#allocation31_spill] sm:$0xff] }
 0x22c   : > { %vm8608_vm5 = vmand %vm10967_vm7, %vm10966_vm10  ;;  %vm4325_vm0 = vcmp.lt.s32.totalorder %v10971_v23, 288  ;;  %v5520_v40 = vcvt.f32.s32 %v5519_v18  ;;  %v3504_v51 = vcvt.s32.f32 %v8573_v60  ;;  %v3187_v61 = vadd.s32 324, %v3059_v29  ;;  %v8645_v41 = vpop.permute.xlu1 %1147  ;;  %v10981_v23 = vld [vmem:[#allocation26_spill] sm:$0xff] }
 0x22d   : > { %v4838_v13 = vmul.f32 %v4705_v37, %v4705_v37  ;;  %vm3123_vm2 = vcmp.lt.s32.totalorder %v3059_v29, 0  ;;  %v3057_v57 = vsub.s32 %v8391_v42, %v2993_v63  ;;  %v2802_v10 = vmul.f32 0.0030864198, %v2738_v19  ;;  %vm8634_vm4 = vmand %vm8608_vm5, %vm4452_vm9 }
 0x22e   : > { %v4707_v44 = vsel %vm8593_vm6, %v8457_v56, 0.0  ;;  %v4768_v16 = vadd.f32 %v8463_v7, %v4705_v37  ;;  %v8627_v47 = vsel %vm3882_vm15, %v3946_v30, %v8483_v25  ;;  %v3502_v33 = vcvt.s32.f32 %v8602_v9  ;;  %v8640_v56 = vpop.permute.xlu0 %942 }
 0x22f   : > { %v4839_v24 = vmul.f32 %v4706_v35, %v4706_v35  ;;  %vm4453_vm1 = vcmp.lt.s32.totalorder %v10974_v49, 16  ;;  %vm4076_vm14 = vcmp.ge.s32.totalorder %v8476_v22, 18  ;;  %vm3887_vm8 = vcmp.lt.s32.totalorder %v3823_v53, 0 }
 0x230   : > { %v3951_v7 = vadd.s32 18, %v3823_v53  ;;  %v5405_v25 = vtrunc.f32 %v2868_v45  ;;  %v3757_v5 = vmul.u32 18, %v5520_v40  ;;  %v3568_v32 = vmul.f32 0.055555556, %v3504_v51  ;;  %v8663_v51 = vpop.permute.xlu1 %1277 }
 0x231   : > { %v3251_v28 = vsel %vm3123_vm2, %v3187_v61, %v3059_v29  ;;  %v2614_v3 = vadd.s32 208, %v6856_v26  ;;  %v4901_v6 = vadd.f32 %v4900_v43, %v4838_v13  ;;  %vm4074_vm9 = vcmp.ge.s32.totalorder %v8627_v47, 18  ;;  %vm8671_vm2 = vmand %vm4261_vm12, %vm4325_vm0 }
 0x232   : > { %v3185_v11 = vadd.s32 324, %v3057_v57  ;;  %v2866_v50 = vfloor.f32 %v2802_v10  ;;  %v4708_v55 = vsel %vm8634_vm4, %v8519_v12, 0.0  ;;  %v4769_v18 = vadd.f32 %v4768_v16, %v4706_v35  ;;  %v8652_v19 = vpop.permute.xlu0 %1145  ;;  %v10977_v16 = vld [vmem:[#allocation27_spill] sm:$0xff] }
 0x233   : > { %vm4262_vm11 = vcmp.lt.s32.totalorder %v10975_v46, 648  ;;  %vm4326_vm3 = vcmp.lt.s32.totalorder %v10976_v2, 288  ;;  %v3566_v63 = vmul.f32 0.055555556, %v3502_v33  ;;  %vm3121_vm13 = vcmp.lt.s32.totalorder %v3057_v57, 0  ;;  %v10978_v33 = vld [vmem:[#allocation38_spill] sm:$0xff] }
 0x234   : > { %v4902_v29 = vadd.f32 %v4901_v6, %v4839_v24  ;;  %v4015_v43 = vsel %vm3887_vm8, %v3951_v7, %v3823_v53  ;;  %v5137_v37 = vadd.s32 4294966972, %v3251_v28  ;;  %v5406_v30 = vcvt.f32.s32 %v5405_v25  ;;  %v1344_v27 = vpop.permute.xlu1 %1343  ;;  %vm8687_vm8 = vmand %vm8671_vm2, %vm4453_vm1  ;;  %v10991_v2 = vld [vmem:[#allocation20_spill] sm:$0xff] }
 0x235   : > { %v3821_v45 = vsub.s32 %v8430_v4, %v3757_v5  ;;  %v3632_v17 = vfloor.f32 %v3568_v32  ;;  %vm3315_vm6 = vcmp.ge.s32.totalorder %v3251_v28, 324  ;;  %v8659_v12 = vadd.s32 %v6918_v1, %v2614_v3  ;;  %v2363_v32 = vpop.f32.mrf.mxu0 }
 0x236   : > { %v4840_v35 = vmul.f32 %v4707_v44, %v4707_v44  ;;  %vm4454_vm15 = vcmp.lt.s32.totalorder %v8412_v14, 16  ;;  %v5192_v40 = vadd.s32 4294967278, %v8627_v47  ;;  %v3249_v61 = vsel %vm3121_vm13, %v3185_v11, %v3057_v57  ;;  %v1276_v25 = vpop.permute.xlu0 %1275 }
 0x237   : > { %v5401_v53 = vtrunc.f32 %v2866_v50  ;;  %v4841_v13 = vmul.f32 %v4708_v55, %v4708_v55  ;;  %v4770_v10 = vadd.f32 %v4769_v18, %v4707_v44  ;;  %vm4263_vm10 = vcmp.lt.s32.totalorder %v10977_v16, 648 }
 0x238   : > { %vm4327_vm7 = vcmp.lt.s32.totalorder %v10978_v33, 288  ;;  %vm4079_vm5 = vcmp.ge.s32.totalorder %v4015_v43, 18  ;;  %v3630_v39 = vfloor.f32 %v3566_v63  ;;  %v4903_v24 = vadd.f32 %v4902_v29, %v4840_v35  ;;  %v10984_v29 = vld [vmem:[#allocation19_spill] sm:$0xff] }
 0x239   : > { %v5197_v57 = vadd.s32 4294967278, %v4015_v43  ;;  %v8676_v5 = vsel %vm3315_vm6, %v5137_v37, %v3251_v28  ;;  %v2996_v44 = vmul.u32 324, %v5406_v30  ;;  %v3949_v3 = vadd.s32 18, %v3821_v45  ;;  %v10985_v37 = vld [vmem:[#allocation50_spill] sm:$0xff] }
 0x23a   : > { %v8678_v6 = vtrunc.f32 %v3632_v17  ;;  %v5135_v11 = vadd.s32 4294966972, %v3249_v61  ;;  %v2743_v50 = vcvt.s32.f32 %v8659_v12  ;;  %vm4455_vm4 = vcmp.lt.s32.totalorder %v10981_v23, 16  ;;  %v1342_v42 = vpop.permute.xlu0 %1341 }
 0x23b   : > { %vm3885_vm12 = vcmp.lt.s32.totalorder %v3821_v45, 0  ;;  %vm3313_vm0 = vcmp.ge.s32.totalorder %v3249_v61, 324  ;;  %v5402_v18 = vcvt.f32.s32 %v5401_v53  ;;  %v2612_v63 = vadd.s32 192, %v6856_v26 }
 0x23c   : > { %vm4264_vm13 = vcmp.lt.s32.totalorder %v10984_v29, 648  ;;  %vm4328_vm6 = vcmp.lt.s32.totalorder %v10985_v37, 288  ;;  %v8697_v30 = vsel %vm4076_vm14, %v8585_v38, %v8476_v22  ;;  %v8702_v49 = vsel %vm4074_vm9, %v5192_v40, %v8627_v47  ;;  %v8713_v22 = vpop.f32.mrf.mxu0  ;;  %vm8731_vm14 = vmand %vm4262_vm11, %vm4326_vm3 }
 0x23d   : > { %v5521_v17 = vtrunc.f32 %v3630_v39  ;;  %v3507_v35 = vcvt.s32.f32 %v8676_v5  ;;  %v8705_v53 = vadd.f32 %v4770_v10, %v4708_v55  ;;  %v8707_v7 = vadd.f32 %v4903_v24, %v4841_v13  ;;  %v1545_v10 = vpop.permute.xlu1 %1544 }
 0x23e   : > { %v8710_v8 = vsel %vm4079_vm5, %v5197_v57, %v4015_v43  ;;  %v3060_v4 = vsub.s32 %v8479_v21, %v2996_v44  ;;  %v8716_v38 = vsel %vm3885_vm12, %v3949_v3, %v3821_v45  ;;  %v5526_v47 = vcvt.f32.s32 %v8678_v6  ;;  %v10988_v45 = vld [vmem:[#allocation10_spill] sm:$0xff]  ;;  %v10990_v57 = vld [vmem:[#allocation41_spill] sm:$0xff] }
 0x23f   : > { %v8720_v40 = vsel %vm3313_vm0, %v5135_v11, %v3249_v61  ;;  %v2807_v55 = vmul.f32 0.0030864198, %v2743_v50  ;;  %v8724_v13 = vsel %vm8687_vm8, %v2363_v32, 0.0  ;;  %vm4456_vm1 = vcmp.lt.s32.totalorder %v8351_v15, 16  ;;  %v1543_v11 = vpop.permute.xlu0 %1542 }
 0x240   : > { %vm10989_vm9 = vcmask 64512   ;;  %v2994_v39 = vmul.u32 324, %v5402_v18  ;;  %v8739_v24 = vadd.s32 %v6918_v1, %v2612_v63  ;;  %vm4265_vm5 = vcmp.lt.s32.totalorder %v10990_v57, 648  ;;  %v2366_v18 = vpop.f32.mrf.mxu0 }
 0x241   : > { %v1805_v61 = vsel %vm10989_vm9, %v10988_v45, %v8570_v48  ;;  %vm4329_vm2 = vcmp.lt.s32.totalorder %v8158_v59, 288  ;;  %vm10992_vm12 = vmmov %vm10989_vm9  ;;  %vm10993_vm11 = vcmask 97280   ;;  %v5522_v32 = vcvt.f32.s32 %v5521_v17 }
 0x242   : > { %v1803_v46 = vsel %vm10992_vm12, %v10991_v2, %v8598_v36  ;;  %v1870_v44 = vsel %vm10993_vm11, %v1805_v61, %v8617_v52  ;;  %v3571_v3 = vmul.f32 0.055555556, %v3507_v35  ;;  %vm10994_vm3 = vmmov %vm10993_vm11  ;;  %vm10995_vm0 = vcmask 130048   ;;  %v5300_v14 = vpop.f32.mrf.mxu0 }
 0x243   : > { %v1868_v48 = vsel %vm10994_vm3, %v1803_v46, %v8640_v56  ;;  %v1935_v6 = vsel %vm10995_vm0, %v1870_v44, %v8645_v41  ;;  %v3505_v50 = vcvt.s32.f32 %v8720_v40  ;;  %vm3124_vm8 = vcmp.lt.s32.totalorder %v3060_v4, 0  ;;  %vm8757_vm9 = vmand %vm8731_vm14, %vm4454_vm15  ;;  %v1673_v2 = vpop.permute.xlu0 %1672 }
 0x244   : > { %vm10998_vm12 = vmmov %vm10995_vm0  ;;  %vm10999_vm11 = vcmask 162816   ;;  %v3188_v41 = vadd.s32 324, %v3060_v4  ;;  %v2871_v63 = vfloor.f32 %v2807_v55  ;;  %vm4457_vm15 = vcmp.lt.s32.totalorder %v8582_v54, 16  ;;  %v11004_v55 = vld [vmem:[#allocation44_spill] sm:$0xff] }
 0x245   : > { %v1933_v52 = vsel %vm10998_vm12, %v1868_v48, %v8652_v19  ;;  %v2000_v56 = vsel %vm10999_vm11, %v1935_v6, %v8663_v51  ;;  %vm8769_vm3 = vmand %vm4263_vm10, %vm4327_vm7  ;;  %vm11003_vm0 = vcmask 195584   ;;  %v1675_v19 = vpop.permute.xlu1 %1674  ;;  %v3058_v35 = vsub.s32 %v8527_v31, %v2994_v39 }
 0x246   : > { %vm11002_vm14 = vmmov %vm10999_vm11  ;;  %v2065_v17 = vsel %vm11003_vm0, %v2000_v56, %v1344_v27  ;;  %v2741_v51 = vcvt.s32.f32 %v8739_v24  ;;  %v4842_v33 = vmul.f32 %v8724_v13, %v8724_v13  ;;  %vm4331_vm10 = vcmp.lt.s32.totalorder %v8132_v58, 288 }
 0x247   : > { %v1998_v28 = vsel %vm11002_vm14, %v1933_v52, %v1276_v25  ;;  %vm11005_vm7 = vmmov %vm11003_vm0  ;;  %vm11006_vm11 = vcmask 228352   ;;  %v3760_v45 = vmul.u32 18, %v5526_v47  ;;  %v4710_v25 = vsel %vm8757_vm9, %v2366_v18, 0.0  ;;  %v8822_v52 = vpop.permute.xlu0 %880 }
 0x248   : > { %v2063_v16 = vsel %vm11005_vm7, %v1998_v28, %v1342_v42  ;;  %v2130_v43 = vsel %vm11006_vm11, %v2065_v17, %v1545_v10  ;;  %vm11007_vm14 = vmmov %vm11006_vm11  ;;  %vm11008_vm0 = vcmask 261120   ;;  %v3758_v39 = vmul.u32 18, %v5522_v32 }
 0x249   : > { %v2128_v27 = vsel %vm11007_vm14, %v2063_v16, %v1543_v11  ;;  %v2195_v61 = vsel %vm11008_vm0, %v2130_v43, %v1675_v19  ;;  %vm8792_vm12 = vmand %vm8769_vm3, %vm4455_vm4  ;;  %v3635_v47 = vfloor.f32 %v3571_v3  ;;  %v3252_v10 = vsel %vm3124_vm8, %v3188_v41, %v3060_v4  ;;  %v8809_v23 = vpop.permute.xlu1 %882  ;;  %v11015_v11 = vld [vmem:[#allocation47_spill] sm:$0xff] }
 0x24a   : > { %vm11011_vm7 = vmmov %vm11008_vm0  ;;  %v5411_v44 = vtrunc.f32 %v2871_v63  ;;  %vm4459_vm11 = vcmp.lt.s32.totalorder %v8467_v0, 16  ;;  %vm4077_vm4 = vcmp.ge.s32.totalorder %v8716_v38, 18  ;;  %vm11014_vm3 = vcmask 293888  }
 0x24b   : > { %v2193_v42 = vsel %vm11011_vm7, %v2128_v27, %v1673_v2  ;;  %vm8802_vm9 = vmand %vm4264_vm13, %vm4328_vm6  ;;  %v3569_v3 = vmul.f32 0.055555556, %v3505_v50  ;;  %v3186_v48 = vadd.s32 324, %v3058_v35  ;;  %v2805_v4 = vmul.f32 0.0030864198, %v2741_v51 }
 0x24c   : > { %5334 = vmatprep.mubr.msk.bf16.mxu1 %vm11014_vm3, %v2193_v42  ;;  %v4843_v6 = vmul.f32 %v4710_v25, %v4710_v25  ;;  %vm4266_vm8 = vcmp.lt.s32.totalorder %v11015_v11, 648  ;;  %vm4330_vm14 = vcmp.lt.s32.totalorder %v8233_v34, 288  ;;  %v5195_v29 = vadd.s32 4294967278, %v8716_v38  ;;  %vm11016_vm13 = vmmov %vm11014_vm3 }
 0x24d   : > { %v3824_v37 = vsub.s32 %v8573_v60, %v3760_v45  ;;  %5335 = vmatmul.mubr.msk.bf16.gmra.mxu1 %vm11016_vm13, %v2195_v61  ;;  %vm3122_vm6 = vcmp.lt.s32.totalorder %v3058_v35, 0  ;;  %v4711_v18 = vsel %vm8792_vm12, %v8655_v62, 0.0  ;;  %v4772_v50 = vadd.f32 %v8705_v53, %v8724_v13  ;;  %vm8829_vm0 = vmand %vm8802_vm9, %vm4456_vm1  ;;  %v8842_v15 = vpop.permute.xlu1 %948  ;;  %v8849_v45 = vpop.permute.xlu0 %946 }
 0x24e   : > { %v3822_v36 = vsub.s32 %v8602_v9, %v3758_v39  ;;  %v5138_v56 = vadd.s32 4294966972, %v3252_v10  ;;  %v4905_v41 = vadd.f32 %v8707_v7, %v4842_v33  ;;  %v5531_v62 = vtrunc.f32 %v3635_v47  ;;  %vm8837_vm7 = vmand %vm4265_vm5, %vm4329_vm2  ;;  %v2379_v61 = vpop.f32.mrf.mxu0 }
 0x24f   : > { %vm3316_vm12 = vcmp.ge.s32.totalorder %v3252_v10, 324  ;;  %v5412_v28 = vcvt.f32.s32 %v5411_v44  ;;  %vm4458_vm3 = vcmp.lt.s32.totalorder %v8702_v49, 16  ;;  %v3633_v7 = vfloor.f32 %v3569_v3  ;;  %vm8858_vm5 = vmand %vm8837_vm7, %vm4457_vm15 }
 0x250   : > { %v3250_v13 = vsel %vm3122_vm6, %v3186_v48, %v3058_v35  ;;  %v2869_v17 = vfloor.f32 %v2805_v4  ;;  %v2615_v19 = vadd.s32 216, %v6856_v26  ;;  %v4844_v51 = vmul.f32 %v4711_v18, %v4711_v18 }
 0x251   : > { %v4773_v33 = vadd.f32 %v4772_v50, %v4710_v25  ;;  %v4906_v16 = vadd.f32 %v4905_v41, %v4843_v6  ;;  %v3952_v59 = vadd.s32 18, %v3824_v37  ;;  %v4712_v57 = vsel %vm8829_vm0, %v8713_v22, 0.0  ;;  %v8870_v46 = vpop.permute.xlu1 %1151  ;;  %v8885_v6 = vpop.permute.xlu0 %1149  ;;  %v11029_v41 = vld [vmem:[#allocation52_spill] sm:$0xff] }
 0x252   : > { %vm3888_vm1 = vcmp.lt.s32.totalorder %v3824_v37, 0  ;;  %v3950_v43 = vadd.s32 18, %v3822_v36  ;;  %v8852_v27 = vsel %vm3316_vm12, %v5138_v56, %v3252_v10  ;;  %vm3886_vm2 = vcmp.lt.s32.totalorder %v3822_v36, 0 }
 0x253   : > { %v5532_v25 = vcvt.f32.s32 %v5531_v62  ;;  %v5136_v39 = vadd.s32 4294966972, %v3250_v13  ;;  %v2999_v22 = vmul.u32 324, %v5412_v28  ;;  %vm11023_vm9 = vcmp.lt.s32.totalorder %v11004_v55, 648 }
 0x254   : > { %vm8866_vm13 = vmand %vm11023_vm9, %vm4331_vm10  ;;  %v5527_v54 = vtrunc.f32 %v3633_v7  ;;  %vm3314_vm6 = vcmp.ge.s32.totalorder %v3250_v13, 324  ;;  %v5407_v42 = vtrunc.f32 %v2869_v17  ;;  %v8873_v47 = vadd.s32 %v6918_v1, %v2615_v19 }
 0x255   : > { %v4774_v10 = vadd.f32 %v4773_v33, %v4711_v18  ;;  %v4907_v44 = vadd.f32 %v4906_v16, %v4844_v51  ;;  %v4016_v32 = vsel %vm3888_vm1, %v3952_v59, %v3824_v37  ;;  %v3508_v58 = vcvt.s32.f32 %v8852_v27  ;;  %vm8891_vm15 = vmand %vm8866_vm13, %vm4459_vm11  ;;  %v8895_v18 = vpop.f32.mrf.mxu0  ;;  %v1282_v63 = vpop.permute.xlu1 %1281 }
 0x256   : > { %v4845_v3 = vmul.f32 %v4712_v57, %v4712_v57  ;;  %v4713_v55 = vsel %vm8858_vm5, %v2379_v61, 0.0  ;;  %v8882_v48 = vsel %vm4077_vm4, %v5195_v29, %v8716_v38  ;;  %v4014_v4 = vsel %vm3886_vm2, %v3950_v43, %v3822_v36  ;;  %v11028_v36 = vld [vmem:[#allocation14_spill] sm:$0xff]  ;;  %vm8907_vm11 = vmand %vm4266_vm8, %vm4330_vm14  ;;  %v1280_v33 = vpop.permute.xlu0 %1279 }
 0x257   : > { %v3763_v50 = vmul.u32 18, %v5532_v25  ;;  %v8897_v56 = vsel %vm3314_vm6, %v5136_v39, %v3250_v13  ;;  %v3063_v38 = vsub.s32 %v8659_v12, %v2999_v22  ;;  %v2613_v29 = vadd.s32 200, %v6856_v26  ;;  %v2382_v59 = vpop.f32.mrf.mxu0  ;;  %vm4522_vm14 = vmand %vm8907_vm11, %vm4458_vm3 }
 0x258   : > { %vm4268_vm10 = vcmp.lt.s32.totalorder %v11028_v36, 648  ;;  %vm4332_vm4 = vcmp.lt.s32.totalorder %v11029_v41, 288  ;;  %vm4080_vm0 = vcmp.ge.s32.totalorder %v4016_v32, 18  ;;  %v5528_v62 = vcvt.f32.s32 %v5527_v54 }
 0x259   : > { %v5408_v28 = vcvt.f32.s32 %v5407_v42  ;;  %v2744_v53 = vcvt.s32.f32 %v8873_v47  ;;  %v4775_v7 = vadd.f32 %v4774_v10, %v4712_v57  ;;  %v4908_v13 = vadd.f32 %v4907_v44, %v4845_v3  ;;  %v1348_v61 = vpop.permute.xlu1 %1347 }
 0x25a   : > { %v5198_v17 = vadd.s32 4294967278, %v4016_v32  ;;  %v3572_v19 = vmul.f32 0.055555556, %v3508_v58  ;;  %v8914_v51 = vsel %vm8891_vm15, %v5300_v14, 0.0  ;;  %v4846_v34 = vmul.f32 %v4713_v55, %v4713_v55  ;;  %v1346_v58 = vpop.permute.xlu0 %1345 }
 0x25b   : > { %v5196_v11 = vadd.s32 4294967278, %v4014_v4  ;;  %v3506_v16 = vcvt.s32.f32 %v8897_v56  ;;  %vm4460_vm8 = vcmp.lt.s32.totalorder %v8697_v30, 16  ;;  %vm4078_vm12 = vcmp.ge.s32.totalorder %v4014_v4, 18 }
 0x25c   : > { %v8923_v57 = vsub.s32 %v8676_v5, %v3763_v50  ;;  %v3191_v43 = vadd.s32 324, %v3063_v38  ;;  %v8926_v14 = vadd.s32 %v6918_v1, %v2613_v29  ;;  %v3761_v35 = vmul.u32 18, %v5528_v62 }
 0x25d   : > { %vm3127_vm7 = vcmp.lt.s32.totalorder %v3063_v38, 0  ;;  %v2997_v25 = vmul.u32 324, %v5408_v28  ;;  %v2808_v39 = vmul.f32 0.0030864198, %v2744_v53  ;;  %v8930_v22 = vmul.f32 %v8914_v51, %v8914_v51  ;;  %v1549_v62 = vpop.permute.xlu1 %1548 }
 0x25e   : > { %v4776_v49 = vadd.f32 %v4775_v7, %v4713_v55  ;;  %v8933_v2 = vsel %vm4080_vm0, %v5198_v17, %v4016_v32  ;;  %v3636_v54 = vfloor.f32 %v3572_v19  ;;  %v8935_v42 = vadd.f32 %v4908_v13, %v4846_v34  ;;  %v11032_v55 = vld [vmem:[#allocation61_spill] sm:$0xff]  ;;  %v11035_v7 = vld [vmem:[#allocation43_spill] sm:$0xff]  ;;  %v11037_v13 = vld [vmem:[#allocation16_spill] sm:$0xff] }
 0x25f   : > { %v4714_v10 = vsel %vm4522_vm14, %v2382_v59, 0.0  ;;  %v8937_v44 = vsel %vm4078_vm12, %v5196_v11, %v4014_v4  ;;  %v3570_v3 = vmul.f32 0.055555556, %v3506_v16  ;;  %vm3891_vm3 = vcmp.lt.s32.totalorder %v8923_v57, 0  ;;  %v11033_v32 = vld [vmem:[#allocation13_spill] sm:$0xff]  ;;  %vm8969_vm12 = vmand %vm4268_vm10, %vm4332_vm4 }
 0x260   : > { %v8941_v37 = vadd.s32 18, %v8923_v57  ;;  %v3255_v50 = vsel %vm3127_vm7, %v3191_v43, %v3063_v38  ;;  %v2742_v29 = vcvt.s32.f32 %v8926_v14  ;;  %vm4271_vm1 = vcmp.lt.s32.totalorder %v11032_v55, 648  ;;  %v11036_v38 = vld [vmem:[#allocation25_spill] sm:$0xff]  ;;  %v1547_v43 = vpop.permute.xlu0 %1546 }
 0x261   : > { %vm4335_vm5 = vcmp.lt.s32.totalorder %v8375_v20, 288  ;;  %vm11034_vm2 = vcmask 64512   ;;  %v8950_v4 = vsub.s32 %v8720_v40, %v3761_v35  ;;  %v3061_v28 = vsub.s32 %v8739_v24, %v2997_v25  ;;  %v1679_v36 = vpop.permute.xlu1 %1678 }
 0x262   : > { %v1809_v0 = vsel %vm11034_vm2, %v11033_v32, %v8809_v23  ;;  %v2872_v53 = vfloor.f32 %v2808_v39  ;;  %vm4269_vm9 = vcmp.lt.s32.totalorder %v11035_v7, 648  ;;  %vm4333_vm13 = vcmp.lt.s32.totalorder %v11036_v38, 288  ;;  %vm11038_vm6 = vmmov %vm11034_vm2 }
 0x263   : > { %v1807_v17 = vsel %vm11038_vm6, %v11037_v13, %v8822_v52  ;;  %vm11039_vm15 = vcmask 97280   ;;  %v5533_v34 = vtrunc.f32 %v3636_v54  ;;  %v2618_v23 = vadd.s32 240, %v6856_v26 }
 0x264   : > { %v1874_v19 = vsel %vm11039_vm15, %v1809_v0, %v8842_v15  ;;  %vm11040_vm11 = vmmov %vm11039_vm15  ;;  %vm11041_vm0 = vcmask 130048   ;;  %v3634_v59 = vfloor.f32 %v3570_v3  ;;  %vm3319_vm14 = vcmp.ge.s32.totalorder %v3255_v50, 324  ;;  %v11048_v3 = vld [vmem:[#allocation64_spill] sm:$0xff] }
 0x265   : > { %v1872_v11 = vsel %vm11040_vm11, %v1807_v17, %v8849_v45  ;;  %v1939_v16 = vsel %vm11041_vm0, %v1874_v19, %v8870_v46  ;;  %vm11044_vm2 = vmmov %vm11041_vm0  ;;  %vm11045_vm6 = vcmask 162816   ;;  %v5141_v35 = vadd.s32 4294966972, %v3255_v50 }
 0x266   : > { %v1937_v15 = vsel %vm11044_vm2, %v1872_v11, %v8885_v6  ;;  %v2004_v45 = vsel %vm11045_vm6, %v1939_v16, %v1282_v63  ;;  %v2806_v46 = vmul.f32 0.0030864198, %v2742_v29  ;;  %vm4461_vm15 = vcmp.lt.s32.totalorder %v8882_v48, 16  ;;  %vm11046_vm11 = vmmov %vm11045_vm6  ;;  %v9004_v11 = vpop.permute.xlu1 %886 }
 0x267   : > { %v2002_v25 = vsel %vm11046_vm11, %v1937_v15, %v1280_v33  ;;  %vm11047_vm0 = vcmask 195584   ;;  %v3189_v39 = vadd.s32 324, %v3061_v28  ;;  %v5413_v54 = vtrunc.f32 %v2872_v53  ;;  %vm8991_vm11 = vmand %vm8969_vm12, %vm4460_vm8  ;;  %v1677_v53 = vpop.permute.xlu0 %1676 }
 0x268   : > { %v2069_v41 = vsel %vm11047_vm0, %v2004_v45, %v1348_v61  ;;  %vm4334_vm4 = vcmp.lt.s32.totalorder %v8602_v9, 288  ;;  %vm11049_vm7 = vmmov %vm11047_vm0  ;;  %vm11050_vm2 = vcmask 228352   ;;  %vm3125_vm6 = vcmp.lt.s32.totalorder %v3061_v28, 0 }
 0x269   : > { %v2067_v32 = vsel %vm11049_vm7, %v2002_v25, %v1346_v58  ;;  %v2134_v6 = vsel %vm11050_vm2, %v2069_v41, %v1549_v62  ;;  %v8985_v63 = vadd.s32 %v6918_v1, %v2618_v23  ;;  %v4847_v61 = vmul.f32 %v4714_v10, %v4714_v10  ;;  %vm11053_vm0 = vmmov %vm11050_vm2  ;;  %v8997_v62 = vpop.f32.mrf.mxu0 }
 0x26a   : > { %v5534_v29 = vcvt.f32.s32 %v5533_v34  ;;  %v2132_v0 = vsel %vm11053_vm0, %v2067_v32, %v1547_v43  ;;  %vm11054_vm10 = vcmask 261120   ;;  %v5529_v13 = vtrunc.f32 %v3634_v59  ;;  %vm9028_vm2 = vmand %vm4271_vm1, %vm4335_vm5  ;;  %v9041_v20 = vpop.permute.xlu1 %952 }
 0x26b   : > { %v2199_v58 = vsel %vm11054_vm10, %v2134_v6, %v1679_v36  ;;  %vm11055_vm7 = vmmov %vm11054_vm10  ;;  %v9001_v30 = vsel %vm3319_vm14, %v5141_v35, %v3255_v50  ;;  %v2870_v19 = vfloor.f32 %v2806_v46  ;;  %v4777_v23 = vadd.f32 %v4776_v49, %v4714_v10  ;;  %v9021_v52 = vpop.permute.xlu0 %884 }
 0x26c   : > { %v2197_v17 = vsel %vm11055_vm7, %v2132_v0, %v1677_v53  ;;  %vm11056_vm8 = vcmask 293888   ;;  %v3253_v34 = vsel %vm3125_vm6, %v3189_v39, %v3061_v28  ;;  %v5414_v16 = vcvt.f32.s32 %v5413_v54 }
 0x26d   : > { %5338 = vmatprep.mubr.msk.bf16.mxu1 %vm11056_vm8, %v2197_v17  ;;  %v2616_v43 = vadd.s32 224, %v6856_v26  ;;  %v4716_v59 = vsel %vm8991_vm11, %v8895_v18, 0.0  ;;  %vm4462_vm12 = vcmp.lt.s32.totalorder %v8937_v44, 16  ;;  %v3953_v50 = vadd.s32 18, %v8950_v4  ;;  %vm11057_vm14 = vmmov %vm11056_vm8 }
 0x26e   : > { %5339 = vmatmul.mubr.msk.bf16.gmra.mxu1 %vm11057_vm14, %v2199_v58  ;;  %v2747_v49 = vcvt.s32.f32 %v8985_v63  ;;  %v4910_v10 = vadd.f32 %v8935_v42, %v4847_v61  ;;  %v4019_v28 = vsel %vm3891_vm3, %v8941_v37, %v8923_v57  ;;  %vm3889_vm10 = vcmp.lt.s32.totalorder %v8950_v4, 0  ;;  %v2395_v42 = vpop.f32.mrf.mxu0  ;;  %vm9037_vm3 = vmand %vm4269_vm9, %vm4333_vm13 }
 0x26f   : > { %v3511_v18 = vcvt.s32.f32 %v9001_v30  ;;  %v3764_v45 = vmul.u32 18, %v5534_v29  ;;  %v5530_v35 = vcvt.f32.s32 %v5529_v13  ;;  %v5139_v46 = vadd.s32 4294966972, %v3253_v34  ;;  %v9059_v6 = vpop.permute.xlu0 %950  ;;  %vm9065_vm6 = vmand %vm9037_vm3, %vm4461_vm15  ;;  %v9083_v13 = vpop.permute.xlu1 %1155 }
 0x270   : > { %v5409_v25 = vtrunc.f32 %v2870_v19  ;;  %v4778_v57 = vadd.f32 %v4777_v23, %v8914_v51  ;;  %vm3317_vm1 = vcmp.ge.s32.totalorder %v3253_v34, 324  ;;  %v3000_v55 = vmul.u32 324, %v5414_v16 }
 0x271   : > { %v9044_v41 = vadd.s32 %v6918_v1, %v2616_v43  ;;  %v5201_v36 = vadd.s32 4294967278, %v4019_v28  ;;  %v4017_v51 = vsel %vm3889_vm10, %v3953_v50, %v8950_v4  ;;  %v2811_v39 = vmul.f32 0.0030864198, %v2747_v49 }
 0x272   : > { %v2619_v38 = vadd.s32 248, %v6856_v26  ;;  %v4849_v7 = vmul.f32 %v4716_v59, %v4716_v59  ;;  %v4911_v54 = vadd.f32 %v4910_v10, %v8930_v22  ;;  %vm11062_vm5 = vcmp.lt.s32.totalorder %v8710_v8, 16  ;;  %v9069_v22 = vpop.f32.mrf.mxu0 }
 0x273   : > { %vm9055_vm9 = vmand %vm9028_vm2, %vm11062_vm5  ;;  %vm4083_vm13 = vcmp.ge.s32.totalorder %v4019_v28, 18  ;;  %v3575_v33 = vmul.f32 0.055555556, %v3511_v18  ;;  %v3828_v8 = vsub.s32 %v8852_v27, %v3764_v45  ;;  %v3762_v61 = vmul.u32 18, %v5530_v35  ;;  %v9094_v43 = vpop.permute.xlu0 %1153  ;;  %v11072_v45 = vld [vmem:[#allocation21_spill] sm:$0xff]  ;;  %v1286_v35 = vpop.permute.xlu1 %1285 }
 0x274   : > { %v9073_v29 = vsel %vm3317_vm1, %v5139_v46, %v3253_v34  ;;  %v5410_v0 = vcvt.f32.s32 %v5409_v25  ;;  %v4779_v58 = vadd.f32 %v4778_v57, %v4716_v59  ;;  %vm11067_vm11 = vcmp.lt.s32.totalorder %v11048_v3, 648  ;;  %v2398_v10 = vpop.f32.mrf.mxu0 }
 0x275   : > { %vm9079_vm0 = vmand %vm11067_vm11, %vm4334_vm4  ;;  %v5199_v53 = vadd.s32 4294967278, %v4017_v51  ;;  %v3064_v17 = vsub.s32 %v8873_v47, %v3000_v55  ;;  %v2745_v19 = vcvt.s32.f32 %v9044_v41  ;;  %v9087_v23 = vsel %vm4083_vm13, %v5201_v36, %v4019_v28  ;;  %v11073_v28 = vld [vmem:[#allocation65_spill] sm:$0xff] }
 0x276   : > { %vm4081_vm15 = vcmp.ge.s32.totalorder %v4017_v51, 18  ;;  %v2875_v34 = vfloor.f32 %v2811_v39  ;;  %v9090_v16 = vadd.s32 %v6918_v1, %v2619_v38  ;;  %v4717_v9 = vsel %vm9065_vm6, %v2395_v42, 0.0  ;;  %vm9106_vm4 = vmand %vm9079_vm0, %vm4462_vm12 }
 0x277   : > { %v4912_v3 = vadd.f32 %v4911_v54, %v4849_v7  ;;  %v3639_v59 = vfloor.f32 %v3575_v33  ;;  %v3509_v50 = vcvt.s32.f32 %v9073_v29  ;;  %v9100_v49 = vsel %vm9055_vm9, %v8997_v62, 0.0 }
 0x278   : > { %v3956_v18 = vadd.s32 18, %v3828_v8  ;;  %v3826_v15 = vsub.s32 %v8897_v56, %v3762_v61  ;;  %v2998_v42 = vmul.u32 324, %v5410_v0  ;;  %vm4272_vm7 = vcmp.lt.s32.totalorder %v11072_v45, 648  ;;  %v1352_v61 = vpop.permute.xlu1 %1351 }
 0x279   : > { %vm4336_vm8 = vcmp.lt.s32.totalorder %v8573_v60, 288  ;;  %v9114_v62 = vsel %vm4081_vm15, %v5199_v53, %v4017_v51  ;;  %vm3892_vm14 = vcmp.lt.s32.totalorder %v3828_v8, 0  ;;  %v3192_v44 = vadd.s32 324, %v3064_v17  ;;  %v1284_v51 = vpop.permute.xlu0 %1283 }
 0x27a   : > { %v2809_v46 = vmul.f32 0.0030864198, %v2745_v19  ;;  %v4850_v25 = vmul.f32 %v4717_v9, %v4717_v9  ;;  %vm3128_vm12 = vcmp.lt.s32.totalorder %v3064_v17, 0  ;;  %v5419_v57 = vtrunc.f32 %v2875_v34 }
 0x27b   : > { %v2748_v37 = vcvt.s32.f32 %v9090_v16  ;;  %v9119_v55 = vmul.f32 %v9100_v49, %v9100_v49  ;;  %v4718_v36 = vsel %vm9106_vm4, %v2398_v10, 0.0  ;;  %v5539_v39 = vtrunc.f32 %v3639_v59 }
 0x27c   : > { %v3573_v38 = vmul.f32 0.055555556, %v3509_v50  ;;  %v4780_v7 = vadd.f32 %v4779_v58, %v4717_v9  ;;  %vm4464_vm10 = vcmp.lt.s32.totalorder %v8933_v2, 16  ;;  %v9124_v54 = vsel %vm3892_vm14, %v3956_v18, %v3828_v8 }
 0x27d   : > { %v3954_v32 = vadd.s32 18, %v3826_v15  ;;  %v3062_v33 = vsub.s32 %v8926_v14, %v2998_v42  ;;  %vm3890_vm2 = vcmp.lt.s32.totalorder %v3826_v15, 0  ;;  %v3256_v4 = vsel %vm3128_vm12, %v3192_v44, %v3064_v17  ;;  %v1350_v10 = vpop.permute.xlu0 %1349  ;;  %v11074_v42 = vld [vmem:[#allocation24_spill] sm:$0xff] }
 0x27e   : > { %v2873_v0 = vfloor.f32 %v2809_v46  ;;  %v2617_v48 = vadd.s32 232, %v6856_v26  ;;  %v4913_v53 = vadd.f32 %v4912_v3, %v4850_v25  ;;  %v9128_v19 = vadd.f32 %v4780_v7, %v4718_v36  ;;  %v1553_v46 = vpop.permute.xlu1 %1552 }
 0x27f   : > { %v5420_v34 = vcvt.f32.s32 %v5419_v57  ;;  %v2812_v59 = vmul.f32 0.0030864198, %v2748_v37  ;;  %v4851_v50 = vmul.f32 %v4718_v36, %v4718_v36  ;;  %v9131_v58 = vadd.s32 4294967278, %v9124_v54  ;;  %v11076_v37 = vld [vmem:[#allocation46_spill] sm:$0xff] }
 0x280   : > { %v5540_v8 = vcvt.f32.s32 %v5539_v39  ;;  %v3637_v9 = vfloor.f32 %v3573_v38  ;;  %vm4275_vm3 = vcmp.lt.s32.totalorder %v11073_v28, 648  ;;  %vm4339_vm1 = vcmp.lt.s32.totalorder %v8676_v5, 288 }
 0x281   : > { %vm4084_vm5 = vcmp.ge.s32.totalorder %v9124_v54, 18  ;;  %v9137_v17 = vsel %vm3890_vm2, %v3954_v32, %v3826_v15  ;;  %vm3320_vm9 = vcmp.ge.s32.totalorder %v3256_v4, 324  ;;  %v5142_v3 = vadd.s32 4294966972, %v3256_v4  ;;  %v11077_v15 = vld [vmem:[#allocation17_spill] sm:$0xff] }
 0x282   : > { %v3190_v18 = vadd.s32 324, %v3062_v33  ;;  %vm11075_vm13 = vcmask 64512   ;;  %vm3126_vm6 = vcmp.lt.s32.totalorder %v3062_v33, 0  ;;  %v5415_v25 = vtrunc.f32 %v2873_v0 }
 0x283   : > { %v1813_v44 = vsel %vm11075_vm13, %v11074_v42, %v9004_v11  ;;  %v9143_v57 = vadd.s32 %v6918_v1, %v2617_v48  ;;  %vm4273_vm11 = vcmp.lt.s32.totalorder %v11076_v37, 648  ;;  %vm4337_vm0 = vcmp.lt.s32.totalorder %v8720_v40, 288  ;;  %vm11078_vm15 = vmmov %vm11075_vm13  ;;  %v1551_v42 = vpop.permute.xlu0 %1550 }
 0x284   : > { %v1811_v36 = vsel %vm11078_vm15, %v11077_v15, %v9021_v52  ;;  %vm11079_vm4 = vcmask 97280   ;;  %v3003_v38 = vmul.u32 324, %v5420_v34  ;;  %v2876_v7 = vfloor.f32 %v2812_v59  ;;  %vm9161_vm13 = vmand %vm4272_vm7, %vm4336_vm8  ;;  %v1683_v59 = vpop.permute.xlu1 %1682 }
 0x285   : > { %v1878_v39 = vsel %vm11079_vm4, %v1813_v44, %v9041_v20  ;;  %vm11080_vm12 = vmmov %vm11079_vm4  ;;  %vm11081_vm2 = vcmask 130048   ;;  %v3767_v0 = vmul.u32 18, %v5540_v8  ;;  %v5535_v48 = vtrunc.f32 %v3637_v9 }
 0x286   : > { %v1876_v11 = vsel %vm11080_vm12, %v1811_v36, %v9059_v6  ;;  %v1943_v32 = vsel %vm11081_vm2, %v1878_v39, %v9083_v13  ;;  %vm11084_vm15 = vmmov %vm11081_vm2  ;;  %vm11085_vm4 = vcmask 162816   ;;  %v9169_v6 = vsel %vm3320_vm9, %v5142_v3, %v3256_v4 }
 0x287   : > { %v1941_v20 = vsel %vm11084_vm15, %v1876_v11, %v9094_v43  ;;  %v2008_v34 = vsel %vm11085_vm4, %v1943_v32, %v1286_v35  ;;  %v3254_v13 = vsel %vm3126_vm6, %v3190_v18, %v3062_v33  ;;  %vm4465_vm12 = vcmp.lt.s32.totalorder %v9114_v62, 16  ;;  %vm11086_vm2 = vmmov %vm11085_vm4 }
 0x288   : > { %v2006_v60 = vsel %vm11086_vm2, %v1941_v20, %v1284_v51  ;;  %vm11087_vm14 = vcmask 195584   ;;  %v5416_v8 = vcvt.f32.s32 %v5415_v25  ;;  %v2746_v9 = vcvt.s32.f32 %v9143_v57  ;;  %vm9184_vm9 = vmand %vm9161_vm13, %vm4464_vm10  ;;  %v5308_v25 = vpop.f32.mrf.mxu0 }
 0x289   : > { %v2073_v45 = vsel %vm11087_vm14, %v2008_v34, %v1352_v61  ;;  %vm4274_vm7 = vcmp.lt.s32.totalorder %v8527_v31, 648  ;;  %vm11088_vm8 = vmmov %vm11087_vm14  ;;  %vm11089_vm15 = vcmask 228352   ;;  %v3067_v4 = vsub.s32 %v8985_v63, %v3003_v38 }
 0x28a   : > { %v2071_v43 = vsel %vm11088_vm8, %v2006_v60, %v1350_v10  ;;  %v2138_v35 = vsel %vm11089_vm15, %v2073_v45, %v1553_v46  ;;  %v5421_v3 = vtrunc.f32 %v2876_v7  ;;  %v4914_v33 = vadd.f32 %v4913_v53, %v4851_v50  ;;  %vm11092_vm6 = vmmov %vm11089_vm15  ;;  %v1681_v10 = vpop.permute.xlu0 %1680  ;;  %v9197_v50 = vpop.permute.xlu1 %890 }
 0x28b   : > { %v5536_v61 = vcvt.f32.s32 %v5535_v48  ;;  %v2136_v18 = vsel %vm11092_vm6, %v2071_v43, %v1551_v42  ;;  %vm11093_vm14 = vcmask 261120   ;;  %vm4276_vm4 = vcmp.lt.s32.totalorder %v8479_v21, 648 }
 0x28c   : > { %v2203_v44 = vsel %vm11093_vm14, %v2138_v35, %v1683_v59  ;;  %vm4340_vm2 = vcmp.lt.s32.totalorder %v8852_v27, 288  ;;  %v3831_v2 = vsub.s32 %v9001_v30, %v3767_v0  ;;  %v3512_v46 = vcvt.s32.f32 %v9169_v6  ;;  %vm11094_vm10 = vmmov %vm11093_vm14 }
 0x28d   : > { %v5140_v15 = vadd.s32 4294966972, %v3254_v13  ;;  %v2201_v36 = vsel %vm11094_vm10, %v2136_v18, %v1681_v10  ;;  %v5200_v53 = vadd.s32 4294967278, %v9137_v17  ;;  %vm3318_vm13 = vcmp.ge.s32.totalorder %v3254_v13, 324  ;;  %vm9210_vm14 = vmand %vm4275_vm3, %vm4339_vm1 }
 0x28e   : > { %vm11095_vm8 = vcmask 293888   ;;  %v3001_v39 = vmul.u32 324, %v5416_v8  ;;  %v2810_v38 = vmul.f32 0.0030864198, %v2746_v9  ;;  %v4720_v7 = vsel %vm9184_vm9, %v9069_v22, 0.0  ;;  %v9218_v52 = vpop.permute.xlu0 %888  ;;  %vm9228_vm3 = vmand %vm4273_vm11, %vm4337_vm0 }
 0x28f   : > { %5342 = vmatprep.mubr.msk.bf16.mxu1 %vm11095_vm8, %v2201_v36  ;;  %vm4082_vm15 = vcmp.ge.s32.totalorder %v9137_v17, 18  ;;  %vm11096_vm6 = vmmov %vm11095_vm8  ;;  %v3195_v11 = vadd.s32 324, %v3067_v4  ;;  %v5422_v32 = vcvt.f32.s32 %v5421_v3  ;;  %v4782_v0 = vadd.f32 %v9128_v19, %v9100_v49  ;;  %v2411_v49 = vpop.f32.mrf.mxu0 }
 0x290   : > { %5343 = vmatmul.mubr.msk.bf16.gmra.mxu1 %vm11096_vm6, %v2203_v44  ;;  %v4212_v22 = vsel %vm4084_vm5, %v9131_v58, %v9124_v54  ;;  %v3765_v42 = vmul.u32 18, %v5536_v61  ;;  %vm3131_vm9 = vcmp.lt.s32.totalorder %v3067_v4, 0  ;;  %v4915_v20 = vadd.f32 %v4914_v33, %v9119_v55  ;;  %v9235_v55 = vpop.permute.xlu1 %956 }
 0x291   : > { %v3959_v19 = vadd.s32 18, %v3831_v2  ;;  %v3576_v5 = vmul.f32 0.055555556, %v3512_v46  ;;  %v9222_v28 = vsel %vm3318_vm13, %v5140_v15, %v3254_v13  ;;  %v4210_v54 = vsel %vm4082_vm15, %v5200_v53, %v9137_v17  ;;  %vm9251_vm13 = vmand %vm9228_vm3, %vm4465_vm12  ;;  %v5309_v43 = vpop.f32.mrf.mxu0 }
 0x292   : > { %vm3895_vm1 = vcmp.lt.s32.totalorder %v3831_v2, 0  ;;  %v3065_v58 = vsub.s32 %v9044_v41, %v3001_v39  ;;  %v2874_v60 = vfloor.f32 %v2810_v38  ;;  %v4853_v13 = vmul.f32 %v4720_v7, %v4720_v7  ;;  %v9245_v8 = vpop.permute.xlu0 %954 }
 0x293   : > { %vm11101_vm5 = vcmp.lt.s32.totalorder %v9087_v23, 16  ;;  %vm4338_vm11 = vcmp.lt.s32.totalorder %v8897_v56, 288  ;;  %v3259_v40 = vsel %vm3131_vm9, %v3195_v11, %v3067_v4  ;;  %v3004_v37 = vmul.u32 324, %v5422_v32  ;;  %v2414_v36 = vpop.f32.mrf.mxu0 }
 0x294   : > { %vm4531_vm10 = vmand %vm9210_vm14, %vm11101_vm5  ;;  %v4783_v45 = vadd.f32 %v4782_v0, %v4720_v7  ;;  %vm4468_vm0 = vcmp.lt.s32.totalorder %v4212_v22, 16  ;;  %v3829_v17 = vsub.s32 %v9073_v29, %v3765_v42  ;;  %v3510_v59 = vcvt.s32.f32 %v9222_v28  ;;  %v9266_v33 = vpop.permute.xlu1 %1159 }
 0x295   : > { %v4916_v9 = vadd.f32 %v4915_v20, %v4853_v13  ;;  %vm4466_vm8 = vcmp.lt.s32.totalorder %v4210_v54, 16  ;;  %v4023_v35 = vsel %vm3895_vm1, %v3959_v19, %v3831_v2  ;;  %v3640_v4 = vfloor.f32 %v3576_v5  ;;  %vm9262_vm15 = vmand %vm4274_vm7, %vm4338_vm11 }
 0x296   : > { %v9256_v3 = vsel %vm4531_vm10, %v5308_v25, 0.0  ;;  %v5145_v51 = vadd.s32 4294966972, %v3259_v40  ;;  %v3193_v61 = vadd.s32 324, %v3065_v58  ;;  %v5417_v18 = vtrunc.f32 %v2874_v60  ;;  %vm9276_vm7 = vmand %vm4276_vm4, %vm4340_vm2  ;;  %v9280_v46 = vpop.permute.xlu0 %1157 }
 0x297   : > { %vm3323_vm12 = vcmp.ge.s32.totalorder %v3259_v40, 324  ;;  %vm3129_vm6 = vcmp.lt.s32.totalorder %v3065_v58, 0  ;;  %v3068_v44 = vsub.s32 %v9090_v16, %v3004_v37  ;;  %v2622_v10 = vadd.s32 272, %v6856_v26  ;;  %vm4530_vm9 = vmand %vm9262_vm15, %vm4466_vm8 }
 0x298   : > { %v4721_v56 = vsel %vm9251_vm13, %v2411_v49, 0.0  ;;  %vm4087_vm14 = vcmp.ge.s32.totalorder %v4023_v35, 18  ;;  %v3957_v25 = vadd.s32 18, %v3829_v17  ;;  %v3574_v2 = vmul.f32 0.055555556, %v3510_v59  ;;  %v1290_v38 = vpop.permute.xlu1 %1289  ;;  %vm4532_vm4 = vmand %vm9276_vm7, %vm4468_vm0 }
 0x299   : > { %v9284_v15 = vmul.f32 %v9256_v3, %v9256_v3  ;;  %v5205_v27 = vadd.s32 4294967278, %v4023_v35  ;;  %vm3893_vm3 = vcmp.lt.s32.totalorder %v3829_v17, 0  ;;  %v5541_v21 = vtrunc.f32 %v3640_v4 }
 0x29a   : > { %v9290_v53 = vsel %vm3323_vm12, %v5145_v51, %v3259_v40  ;;  %v3257_v39 = vsel %vm3129_vm6, %v3193_v61, %v3065_v58  ;;  %v5418_v7 = vcvt.f32.s32 %v5417_v18  ;;  %v2620_v11 = vadd.s32 256, %v6856_v26  ;;  %v1288_v5 = vpop.permute.xlu0 %1287 }
 0x29b   : > { %v4784_v32 = vadd.f32 %v4783_v45, %v4721_v56  ;;  %v4854_v0 = vmul.f32 %v4721_v56, %v4721_v56  ;;  %v3196_v48 = vadd.s32 324, %v3068_v44  ;;  %v9298_v42 = vadd.s32 %v6918_v1, %v2622_v10  ;;  %v11108_v56 = vld [vmem:[#allocation22_spill] sm:$0xff] }
 0x29c   : > { %v4722_v20 = vsel %vm4530_vm9, %v2414_v36, 0.0  ;;  %v9300_v49 = vsel %vm3893_vm3, %v3957_v25, %v3829_v17  ;;  %v3638_v19 = vfloor.f32 %v3574_v2  ;;  %vm3132_vm2 = vcmp.lt.s32.totalorder %v3068_v44, 0  ;;  %v1356_v37 = vpop.permute.xlu1 %1355 }
 0x29d   : > { %v5542_v34 = vcvt.f32.s32 %v5541_v21  ;;  %v3515_v54 = vcvt.s32.f32 %v9290_v53  ;;  %v5143_v58 = vadd.s32 4294966972, %v3257_v39  ;;  %v9304_v60 = vadd.s32 %v6918_v1, %v2620_v11 }
 0x29e   : > { %v9306_v22 = vsel %vm4532_vm4, %v5309_v43, 0.0  ;;  %v9309_v13 = vsel %vm4087_vm14, %v5205_v27, %v4023_v35  ;;  %vm3321_vm1 = vcmp.ge.s32.totalorder %v3257_v39, 324  ;;  %v3002_v40 = vmul.u32 324, %v5418_v7  ;;  %v1354_v51 = vpop.permute.xlu0 %1353 }
 0x29f   : > { %v4917_v45 = vadd.f32 %v4916_v9, %v4854_v0  ;;  %v4785_v17 = vadd.f32 %v4784_v32, %v4722_v20  ;;  %v3260_v59 = vsel %vm3132_vm2, %v3196_v48, %v3068_v44  ;;  %v2751_v23 = vcvt.s32.f32 %v9298_v42  ;;  %v11110_v44 = vld [vmem:[#allocation53_spill] sm:$0xff] }
 0x2a0   : > { %v4855_v4 = vmul.f32 %v4722_v20, %v4722_v20  ;;  %vm4085_vm5 = vcmp.ge.s32.totalorder %v9300_v49, 18  ;;  %v5537_v62 = vtrunc.f32 %v3638_v19  ;;  %v2749_v61 = vcvt.s32.f32 %v9304_v60  ;;  %v1557_v36 = vpop.permute.xlu1 %1556 }
 0x2a1   : > { %v5203_v43 = vadd.s32 4294967278, %v9300_v49  ;;  %v3768_v18 = vmul.u32 18, %v5542_v34  ;;  %v3579_v35 = vmul.f32 0.055555556, %v3515_v54  ;;  %v9315_v10 = vsel %vm3321_vm1, %v5143_v58, %v3257_v39 }
 0x2a2   : > { %vm11109_vm10 = vcmask 64512   ;;  %v5146_v25 = vadd.s32 4294966972, %v3260_v59  ;;  %v3066_v2 = vsub.s32 %v9143_v57, %v3002_v40  ;;  %vm11112_vm0 = vcmask 97280   ;;  %v1555_v11 = vpop.permute.xlu0 %1554 }
 0x2a3   : > { %v1817_v9 = vsel %vm11109_vm10, %v11108_v56, %v9197_v50  ;;  %vm11111_vm11 = vmmov %vm11109_vm10  ;;  %vm3324_vm13 = vcmp.ge.s32.totalorder %v3260_v59, 324  ;;  %v2815_v21 = vmul.f32 0.0030864198, %v2751_v23  ;;  %v2813_v7 = vmul.f32 0.0030864198, %v2749_v61 }
 0x2a4   : > { %v1815_v31 = vsel %vm11111_vm11, %v11110_v44, %v9218_v52  ;;  %v1882_v27 = vsel %vm11112_vm0, %v1817_v9, %v9235_v55  ;;  %vm4279_vm8 = vcmp.lt.s32.totalorder %v8659_v12, 648  ;;  %vm4343_vm15 = vcmp.lt.s32.totalorder %v9001_v30, 288  ;;  %vm11113_vm12 = vmmov %vm11112_vm0  ;;  %v1687_v54 = vpop.permute.xlu1 %1686 }
 0x2a5   : > { %v5538_v39 = vcvt.f32.s32 %v5537_v62  ;;  %v1880_v50 = vsel %vm11113_vm12, %v1815_v31, %v9245_v8  ;;  %vm11114_vm6 = vcmask 130048   ;;  %v2623_v32 = vadd.s32 280, %v6856_v26 }
 0x2a6   : > { %v1947_v52 = vsel %vm11114_vm6, %v1882_v27, %v9266_v33  ;;  %vm4277_vm7 = vcmp.lt.s32.totalorder %v8739_v24, 648  ;;  %vm4341_vm14 = vcmp.lt.s32.totalorder %v9073_v29, 288  ;;  %v3643_v55 = vfloor.f32 %v3579_v35  ;;  %vm11115_vm9 = vmmov %vm11114_vm6 }
 0x2a7   : > { %v3513_v0 = vcvt.s32.f32 %v9315_v10  ;;  %v1945_v48 = vsel %vm11115_vm9, %v1880_v50, %v9280_v46  ;;  %vm11116_vm3 = vcmask 162816   ;;  %v9340_v8 = vsel %vm3324_vm13, %v5146_v25, %v3260_v59 }
 0x2a8   : > { %v2012_v20 = vsel %vm11116_vm3, %v1947_v52, %v1290_v38  ;;  %v3194_v19 = vadd.s32 324, %v3066_v2  ;;  %vm11117_vm4 = vmmov %vm11116_vm3  ;;  %vm11118_vm2 = vcmask 195584   ;;  %vm11120_vm10 = vcmask 228352   ;;  %v1685_v38 = vpop.permute.xlu0 %1684 }
 0x2a9   : > { %v2010_v33 = vsel %vm11117_vm4, %v1945_v48, %v1288_v5  ;;  %v2077_v34 = vsel %vm11118_vm2, %v2012_v20, %v1356_v37  ;;  %vm11119_vm1 = vmmov %vm11118_vm2  ;;  %v2879_v23 = vfloor.f32 %v2815_v21  ;;  %v2877_v62 = vfloor.f32 %v2813_v7 }
 0x2aa   : > { %v2075_v58 = vsel %vm11119_vm1, %v2010_v33, %v1354_v51  ;;  %v2142_v40 = vsel %vm11120_vm10, %v2077_v34, %v1557_v36  ;;  %vm11121_vm11 = vmmov %vm11120_vm10  ;;  %vm11122_vm0 = vcmask 261120   ;;  %v9349_v59 = vadd.s32 %v6918_v1, %v2623_v32 }
 0x2ab   : > { %v2140_v61 = vsel %vm11121_vm11, %v2075_v58, %v1555_v11  ;;  %v2207_v46 = vsel %vm11122_vm0, %v2142_v40, %v1687_v54  ;;  %v2621_v35 = vadd.s32 264, %v6856_v26  ;;  %v3766_v5 = vmul.u32 18, %v5538_v39  ;;  %vm11123_vm12 = vmmov %vm11122_vm0  ;;  %v5312_v11 = vpop.f32.mrf.mxu0 }
 0x2ac   : > { %v3577_v56 = vmul.f32 0.055555556, %v3513_v0  ;;  %vm3130_vm13 = vcmp.lt.s32.totalorder %v3066_v2, 0  ;;  %v2205_v37 = vsel %vm11123_vm12, %v2140_v61, %v1685_v38  ;;  %v4918_v51 = vadd.f32 %v4917_v45, %v4855_v4  ;;  %vm9382_vm2 = vmand %vm4277_vm7, %vm4341_vm14 }
 0x2ad   : > { %v5547_v9 = vtrunc.f32 %v3643_v55  ;;  %v3516_v44 = vcvt.s32.f32 %v9340_v8  ;;  %vm11124_vm6 = vcmask 293888   ;;  %v2752_v31 = vcvt.s32.f32 %v9349_v59  ;;  %v2427_v34 = vpop.f32.mrf.mxu0 }
 0x2ae   : > { %5346 = vmatprep.mubr.msk.bf16.mxu1 %vm11124_vm6, %v2205_v37  ;;  %v4786_v25 = vadd.f32 %v4785_v17, %v9256_v3  ;;  %v4213_v36 = vsel %vm4085_vm5, %v5203_v43, %v9300_v49  ;;  %v3832_v27 = vsub.s32 %v9169_v6, %v3768_v18  ;;  %vm11125_vm9 = vmmov %vm11124_vm6  ;;  %v9363_v21 = vadd.s32 %v6918_v1, %v2621_v35 }
 0x2af   : > { %5347 = vmatmul.mubr.msk.bf16.gmra.mxu1 %vm11125_vm9, %v2207_v46  ;;  %v3258_v45 = vsel %vm3130_vm13, %v3194_v19, %v3066_v2  ;;  %v5427_v4 = vtrunc.f32 %v2879_v23  ;;  %v5423_v7 = vtrunc.f32 %v2877_v62  ;;  %v2816_v39 = vmul.f32 0.0030864198, %v2752_v31  ;;  %vm4407_vm5 = vmand %vm4279_vm8, %vm4343_vm15 }
 0x2b0   : > { %v4857_v50 = vmul.f32 %v9306_v22, %v9306_v22  ;;  %vm4471_vm3 = vcmp.lt.s32.totalorder %v9309_v13, 16  ;;  %v3830_v3 = vsub.s32 %v9222_v28, %v3766_v5  ;;  %v3641_v17 = vfloor.f32 %v3577_v56 }
 0x2b1   : > { %v4919_v49 = vadd.f32 %v4918_v51, %v9284_v15  ;;  %v5548_v43 = vcvt.f32.s32 %v5547_v9  ;;  %v3580_v18 = vmul.f32 0.055555556, %v3516_v44  ;;  %v2880_v52 = vfloor.f32 %v2816_v39  ;;  %vm9388_vm15 = vmand %vm4407_vm5, %vm4471_vm3 }
 0x2b2   : > { %vm4469_vm4 = vcmp.lt.s32.totalorder %v4213_v36, 16  ;;  %v9375_v2 = vadd.f32 %v4786_v25, %v9306_v22  ;;  %v5144_v32 = vadd.s32 4294966972, %v3258_v45  ;;  %v2750_v55 = vcvt.s32.f32 %v9363_v21 }
 0x2b3   : > { %v3960_v0 = vadd.s32 18, %v3832_v27  ;;  %vm3322_vm1 = vcmp.ge.s32.totalorder %v3258_v45, 324  ;;  %v5428_v30 = vcvt.f32.s32 %v5427_v4  ;;  %v5424_v12 = vcvt.f32.s32 %v5423_v7  ;;  %vm4533_vm14 = vmand %vm9382_vm2, %vm4469_vm4 }
 0x2b4   : > { %vm3896_vm8 = vcmp.lt.s32.totalorder %v3832_v27, 0  ;;  %v3958_v48 = vadd.s32 18, %v3830_v3  ;;  %v5543_v20 = vtrunc.f32 %v3641_v17  ;;  %v5429_v22 = vtrunc.f32 %v2880_v52 }
 0x2b5   : > { %v9392_v29 = vadd.f32 %v4919_v49, %v4857_v50  ;;  %vm3894_vm7 = vcmp.lt.s32.totalorder %v3830_v3, 0  ;;  %v3771_v24 = vmul.u32 18, %v5548_v43  ;;  %v3644_v33 = vfloor.f32 %v3580_v18 }
 0x2b6   : > { %vm4280_vm10 = vcmp.lt.s32.totalorder %v8873_v47, 648  ;;  %vm4344_vm11 = vcmp.lt.s32.totalorder %v9169_v6, 288  ;;  %v9400_v13 = vsel %vm3322_vm1, %v5144_v32, %v3258_v45  ;;  %v2814_v54 = vmul.f32 0.0030864198, %v2750_v55 }
 0x2b7   : > { %v2626_v58 = vadd.s32 304, %v6856_v26  ;;  %v4024_v40 = vsel %vm3896_vm8, %v3960_v0, %v3832_v27  ;;  %vm4278_vm0 = vcmp.lt.s32.totalorder %v8926_v14, 648  ;;  %vm4342_vm13 = vcmp.lt.s32.totalorder %v9222_v28, 288  ;;  %vm9434_vm4 = vmand %vm4280_vm10, %vm4344_vm11 }
 0x2b8   : > { %v3007_v23 = vmul.u32 324, %v5428_v30  ;;  %v3005_v62 = vmul.u32 324, %v5424_v12  ;;  %v9408_v61 = vsel %vm9388_vm15, %v5312_v11, 0.0  ;;  %v4022_v46 = vsel %vm3894_vm7, %v3958_v48, %v3830_v3  ;;  %v5313_v12 = vpop.f32.mrf.mxu0  ;;  %vm9443_vm1 = vmand %vm4278_vm0, %vm4342_vm13 }
 0x2b9   : > { %v5544_v38 = vcvt.f32.s32 %v5543_v20  ;;  %v5430_v35 = vcvt.f32.s32 %v5429_v22  ;;  %v4725_v5 = vsel %vm4533_vm14, %v2427_v34, 0.0  ;;  %v3835_v56 = vsub.s32 %v9290_v53, %v3771_v24 }
 0x2ba   : > { %v5549_v37 = vtrunc.f32 %v3644_v33  ;;  %v3514_v51 = vcvt.s32.f32 %v9400_v13  ;;  %vm4088_vm12 = vcmp.ge.s32.totalorder %v4024_v40, 18  ;;  %v5206_v9 = vadd.s32 4294967278, %v4024_v40 }
 0x2bb   : > { %v2878_v44 = vfloor.f32 %v2814_v54  ;;  %v9414_v31 = vadd.s32 %v6918_v1, %v2626_v58  ;;  %v5204_v25 = vadd.s32 4294967278, %v4022_v46  ;;  %v3071_v36 = vsub.s32 %v9298_v42, %v3007_v23 }
 0x2bc   : > { %v3069_v27 = vsub.s32 %v9304_v60, %v3005_v62  ;;  %v2624_v45 = vadd.s32 288, %v6856_v26  ;;  %v9421_v4 = vmul.f32 %v9408_v61, %v9408_v61  ;;  %vm4086_vm6 = vcmp.ge.s32.totalorder %v4022_v46, 18 }
 0x2bd   : > { %v3769_v7 = vmul.u32 18, %v5544_v38  ;;  %v3008_v39 = vmul.u32 324, %v5430_v35  ;;  %v4858_v50 = vmul.f32 %v4725_v5, %v4725_v5  ;;  %v3963_v3 = vadd.s32 18, %v3835_v56 }
 0x2be   : > { %v5550_v17 = vcvt.f32.s32 %v5549_v37  ;;  %v3578_v49 = vmul.f32 0.055555556, %v3514_v51  ;;  %v4216_v43 = vsel %vm4088_vm12, %v5206_v9, %v4024_v40  ;;  %vm3899_vm9 = vcmp.lt.s32.totalorder %v3835_v56, 0  ;;  %v2430_v40 = vpop.f32.mrf.mxu0 }
 0x2bf   : > { %v5425_v18 = vtrunc.f32 %v2878_v44  ;;  %v2755_v52 = vcvt.s32.f32 %v9414_v31  ;;  %v4214_v11 = vsel %vm4086_vm6, %v5204_v25, %v4022_v46  ;;  %v3199_v32 = vadd.s32 324, %v3071_v36 }
 0x2c0   : > { %v3197_v55 = vadd.s32 324, %v3069_v27  ;;  %v9426_v15 = vadd.s32 %v6918_v1, %v2624_v45  ;;  %v3833_v0 = vsub.s32 %v9315_v10, %v3769_v7  ;;  %vm3135_vm3 = vcmp.lt.s32.totalorder %v3071_v36, 0 }
 0x2c1   : > { %vm3133_vm5 = vcmp.lt.s32.totalorder %v3069_v27, 0  ;;  %v3072_v30 = vsub.s32 %v9349_v59, %v3008_v39  ;;  %vm4472_vm2 = vcmp.lt.s32.totalorder %v4216_v43, 16  ;;  %v4027_v20 = vsel %vm3899_vm9, %v3963_v3, %v3835_v56 }
 0x2c2   : > { %v3772_v22 = vmul.u32 18, %v5550_v17  ;;  %v3642_v19 = vfloor.f32 %v3578_v49  ;;  %v4788_v24 = vadd.f32 %v9375_v2, %v4725_v5  ;;  %vm4470_vm8 = vcmp.lt.s32.totalorder %v4214_v11, 16  ;;  %vm9458_vm14 = vmand %vm9434_vm4, %vm4472_vm2 }
 0x2c3   : > { %v5426_v47 = vcvt.f32.s32 %v5425_v18  ;;  %v2819_v6 = vmul.f32 0.0030864198, %v2755_v52  ;;  %v9448_v34 = vadd.f32 %v9392_v29, %v4858_v50  ;;  %vm4283_vm15 = vcmp.lt.s32.totalorder %v8985_v63, 648  ;;  %vm4534_vm0 = vmand %vm9443_vm1, %vm4470_vm8  ;;  %v5316_v63 = vpop.f32.mrf.mxu0 }
 0x2c4   : > { %vm4347_vm7 = vcmp.lt.s32.totalorder %v9290_v53, 288  ;;  %v3263_v2 = vsel %vm3135_vm3, %v3199_v32, %v3071_v36  ;;  %v3261_v28 = vsel %vm3133_vm5, %v3197_v55, %v3069_v27  ;;  %v2753_v14 = vcvt.s32.f32 %v9426_v15 }
 0x2c5   : > { %vm4091_vm10 = vcmp.ge.s32.totalorder %v4027_v20, 18  ;;  %v5209_v29 = vadd.s32 4294967278, %v4027_v20  ;;  %vm3897_vm11 = vcmp.lt.s32.totalorder %v3833_v0, 0  ;;  %v3200_v58 = vadd.s32 324, %v3072_v30  ;;  %vm9494_vm2 = vmand %vm4283_vm15, %vm4347_vm7 }
 0x2c6   : > { %v3961_v23 = vadd.s32 18, %v3833_v0  ;;  %v3836_v62 = vsub.s32 %v9340_v8, %v3772_v22  ;;  %v5545_v46 = vtrunc.f32 %v3642_v19  ;;  %vm3136_vm13 = vcmp.lt.s32.totalorder %v3072_v30, 0 }
 0x2c7   : > { %v5149_v38 = vadd.s32 4294966972, %v3263_v2  ;;  %v5147_v35 = vadd.s32 4294966972, %v3261_v28  ;;  %v3006_v5 = vmul.u32 324, %v5426_v47  ;;  %v2883_v56 = vfloor.f32 %v2819_v6 }
 0x2c8   : > { %vm3327_vm12 = vcmp.ge.s32.totalorder %v3263_v2, 324  ;;  %vm3325_vm6 = vcmp.ge.s32.totalorder %v3261_v28, 324  ;;  %v2817_v37 = vmul.f32 0.0030864198, %v2753_v14  ;;  %v2627_v51 = vadd.s32 312, %v6856_v26 }
 0x2c9   : > { %v9469_v9 = vsel %vm9458_vm14, %v5313_v12, 0.0  ;;  %v4726_v44 = vsel %vm4534_vm0, %v2430_v40, 0.0  ;;  %v4219_v25 = vsel %vm4091_vm10, %v5209_v29, %v4027_v20  ;;  %v3264_v36 = vsel %vm3136_vm13, %v3200_v58, %v3072_v30 }
 0x2ca   : > { %v4025_v27 = vsel %vm3897_vm11, %v3961_v23, %v3833_v0  ;;  %vm3900_vm9 = vcmp.lt.s32.totalorder %v3836_v62, 0  ;;  %v3964_v45 = vadd.s32 18, %v3836_v62  ;;  %v5546_v7 = vcvt.f32.s32 %v5545_v46 }
 0x2cb   : > { %v9473_v39 = vsel %vm3327_vm12, %v5149_v38, %v3263_v2  ;;  %v9475_v50 = vsel %vm3325_vm6, %v5147_v35, %v3261_v28  ;;  %v3070_v3 = vsub.s32 %v9363_v21, %v3006_v5  ;;  %v5435_v17 = vtrunc.f32 %v2883_v56 }
 0x2cc   : > { %v9480_v49 = vmul.f32 %v9469_v9, %v9469_v9  ;;  %v5150_v43 = vadd.s32 4294966972, %v3264_v36  ;;  %v2881_v18 = vfloor.f32 %v2817_v37  ;;  %v9483_v52 = vadd.s32 %v6918_v1, %v2627_v51 }
 0x2cd   : > { %v4789_v11 = vadd.f32 %v4788_v24, %v4726_v44  ;;  %vm4475_vm3 = vcmp.lt.s32.totalorder %v4219_v25, 16  ;;  %v5207_v32 = vadd.s32 4294967278, %v4025_v27  ;;  %vm4281_vm5 = vcmp.lt.s32.totalorder %v9044_v41, 648 }
 0x2ce   : > { %vm3328_vm4 = vcmp.ge.s32.totalorder %v3264_v36, 324  ;;  %v4028_v55 = vsel %vm3900_vm9, %v3964_v45, %v3836_v62  ;;  %v3519_v0 = vcvt.s32.f32 %v9473_v39  ;;  %v3517_v30 = vcvt.s32.f32 %v9475_v50  ;;  %vm4539_vm7 = vmand %vm9494_vm2, %vm4475_vm3 }
 0x2cf   : > { %v2756_v12 = vcvt.s32.f32 %v9483_v52  ;;  %vm4089_vm1 = vcmp.ge.s32.totalorder %v4025_v27, 18  ;;  %v3770_v20 = vmul.u32 18, %v5546_v7  ;;  %v3198_v22 = vadd.s32 324, %v3070_v3 }
 0x2d0   : > { %v5436_v19 = vcvt.f32.s32 %v5435_v17  ;;  %v9498_v24 = vsel %vm3328_vm4, %v5150_v43, %v3264_v36  ;;  %vm3134_vm8 = vcmp.lt.s32.totalorder %v3070_v3, 0  ;;  %v5431_v33 = vtrunc.f32 %v2881_v18 }
 0x2d1   : > { %v2625_v47 = vadd.s32 296, %v6856_v26  ;;  %v4859_v6 = vmul.f32 %v4726_v44, %v4726_v44  ;;  %vm4345_vm14 = vcmp.lt.s32.totalorder %v9315_v10, 288  ;;  %vm4092_vm10 = vcmp.ge.s32.totalorder %v4028_v55, 18 }
 0x2d2   : > { %v5210_v53 = vadd.s32 4294967278, %v4028_v55  ;;  %vm4284_vm15 = vcmp.lt.s32.totalorder %v9090_v16, 648  ;;  %v4217_v2 = vsel %vm4089_vm1, %v5207_v32, %v4025_v27  ;;  %v3583_v28 = vmul.f32 0.055555556, %v3519_v0  ;;  %vm4409_vm13 = vmand %vm4281_vm5, %vm4345_vm14 }
 0x2d3   : > { %v3581_v14 = vmul.f32 0.055555556, %v3517_v30  ;;  %v2820_v54 = vmul.f32 0.0030864198, %v2756_v12  ;;  %v4790_v29 = vadd.f32 %v4789_v11, %v9408_v61  ;;  %v3834_v58 = vsub.s32 %v9400_v13, %v3770_v20 }
 0x2d4   : > { %v3520_v40 = vcvt.s32.f32 %v9498_v24  ;;  %v3262_v23 = vsel %vm3134_vm8, %v3198_v22, %v3070_v3  ;;  %v3011_v62 = vmul.u32 324, %v5436_v19  ;;  %v5432_v46 = vcvt.f32.s32 %v5431_v33 }
 0x2d5   : > { %v2884_v38 = vfloor.f32 %v2820_v54  ;;  %v9512_v35 = vadd.s32 %v6918_v1, %v2625_v47  ;;  %v4922_v5 = vadd.f32 %v9448_v34, %v4859_v6  ;;  %v9515_v56 = vsel %vm4539_vm7, %v5316_v63, 0.0 }
 0x2d6   : > { %vm4473_vm11 = vcmp.lt.s32.totalorder %v4217_v2, 16  ;;  %v4220_v37 = vsel %vm4092_vm10, %v5210_v53, %v4028_v55  ;;  %v3647_v61 = vfloor.f32 %v3583_v28  ;;  %v3645_v51 = vfloor.f32 %v3581_v14  ;;  %v2443_v55 = vpop.f32.mrf.mxu0 }
 0x2d7   : > { %v5148_v44 = vadd.s32 4294966972, %v3262_v23  ;;  %v5437_v25 = vtrunc.f32 %v2884_v38  ;;  %v3962_v36 = vadd.s32 18, %v3834_v58  ;;  %v3584_v27 = vmul.f32 0.055555556, %v3520_v40  ;;  %vm4537_vm9 = vmand %vm4409_vm13, %vm4473_vm11 }
 0x2d8   : > { %vm3326_vm0 = vcmp.ge.s32.totalorder %v3262_v23, 324  ;;  %v2754_v45 = vcvt.s32.f32 %v9512_v35  ;;  %vm3898_vm12 = vcmp.lt.s32.totalorder %v3834_v58, 0  ;;  %v3075_v34 = vsub.s32 %v9414_v31, %v3011_v62  ;;  %v5317_v63 = vpop.f32.mrf.mxu0 }
 0x2d9   : > { %v3009_v7 = vmul.u32 324, %v5432_v46  ;;  %v5438_v3 = vcvt.f32.s32 %v5437_v25  ;;  %v4923_v17 = vadd.f32 %v4922_v5, %v9421_v4  ;;  %v4791_v43 = vadd.f32 %v4790_v29, %v9469_v9 }
 0x2da   : > { %vm4348_vm6 = vcmp.lt.s32.totalorder %v9340_v8, 288  ;;  %v2818_v18 = vmul.f32 0.0030864198, %v2754_v45  ;;  %v9529_v11 = vmul.f32 %v9515_v56, %v9515_v56  ;;  %v5555_v10 = vtrunc.f32 %v3647_v61 }
 0x2db   : > { %v5551_v32 = vtrunc.f32 %v3645_v51  ;;  %v9531_v41 = vsel %vm3326_vm0, %v5148_v44, %v3262_v23  ;;  %vm4476_vm3 = vcmp.lt.s32.totalorder %v4220_v37, 16  ;;  %v4026_v0 = vsel %vm3898_vm12, %v3962_v36, %v3834_v58  ;;  %vm9536_vm5 = vmand %vm4284_vm15, %vm4348_vm6 }
 0x2dc   : > { %v3648_v30 = vfloor.f32 %v3584_v27  ;;  %v2882_v4 = vfloor.f32 %v2818_v18  ;;  %v3203_v9 = vadd.s32 324, %v3075_v34  ;;  %v3073_v12 = vsub.s32 %v9426_v15, %v3009_v7  ;;  %vm4540_vm1 = vmand %vm9536_vm5, %vm4476_vm3 }
 0x2dd   : > { %v3012_v48 = vmul.u32 324, %v5438_v3  ;;  %v2630_v20 = vadd.s32 336, %v6856_v26  ;;  %v4924_v22 = vadd.f32 %v4923_v17, %v9480_v49  ;;  %vm4282_vm4 = vcmp.lt.s32.totalorder %v9143_v57, 648 }
 0x2de   : > { %v3518_v19 = vcvt.s32.f32 %v9531_v41  ;;  %vm3139_vm2 = vcmp.lt.s32.totalorder %v3075_v34, 0  ;;  %v5433_v33 = vtrunc.f32 %v2882_v4  ;;  %v4729_v47 = vsel %vm4537_vm9, %v2443_v55, 0.0 }
 0x2df   : > { %v5208_v16 = vadd.s32 4294967278, %v4026_v0  ;;  %v5556_v6 = vcvt.f32.s32 %v5555_v10  ;;  %v5552_v53 = vcvt.f32.s32 %v5551_v32  ;;  %vm4090_vm8 = vcmp.ge.s32.totalorder %v4026_v0, 18 }
 0x2e0   : > { %vm4346_vm14 = vcmp.lt.s32.totalorder %v9400_v13, 288  ;;  %v5557_v2 = vtrunc.f32 %v3648_v30  ;;  %v9550_v49 = vadd.s32 %v6918_v1, %v2630_v20  ;;  %v3267_v28 = vsel %vm3139_vm2, %v3203_v9, %v3075_v34 }
 0x2e1   : > { %v3201_v14 = vadd.s32 324, %v3073_v12  ;;  %v3076_v54 = vsub.s32 %v9483_v52, %v3012_v48  ;;  %v5434_v29 = vcvt.f32.s32 %v5433_v33  ;;  %v9553_v58 = vadd.f32 %v4791_v43, %v4729_v47  ;;  %vm4410_vm0 = vmand %vm4282_vm4, %vm4346_vm14 }
 0x2e2   : > { %v4862_v40 = vmul.f32 %v4729_v47, %v4729_v47  ;;  %v3582_v23 = vmul.f32 0.055555556, %v3518_v19  ;;  %vm3137_vm10 = vcmp.lt.s32.totalorder %v3073_v12, 0  ;;  %v9555_v62 = vsel %vm4540_vm1, %v5317_v63, 0.0 }
 0x2e3   : > { %v4218_v46 = vsel %vm4090_vm8, %v5208_v16, %v4026_v0  ;;  %v3775_v38 = vmul.u32 18, %v5556_v6  ;;  %v3773_v5 = vmul.u32 18, %v5552_v53  ;;  %v5558_v37 = vcvt.f32.s32 %v5557_v2 }
 0x2e4   : > { %v5153_v61 = vadd.s32 4294966972, %v3267_v28  ;;  %v3010_v51 = vmul.u32 324, %v5434_v29  ;;  %v2759_v44 = vcvt.s32.f32 %v9550_v49  ;;  %vm3331_vm15 = vcmp.ge.s32.totalorder %v3267_v28, 324 }
 0x2e5   : > { %v3265_v25 = vsel %vm3137_vm10, %v3201_v14, %v3073_v12  ;;  %v3204_v36 = vadd.s32 324, %v3076_v54  ;;  %v2628_v27 = vadd.s32 320, %v6856_v26  ;;  %v9559_v45 = vadd.f32 %v4924_v22, %v4862_v40  ;;  %v2446_v22 = vpop.f32.mrf.mxu0 }
 0x2e6   : > { %v3646_v34 = vfloor.f32 %v3582_v23  ;;  %vm3140_vm7 = vcmp.lt.s32.totalorder %v3076_v54, 0  ;;  %v3074_v7 = vsub.s32 %v9512_v35, %v3010_v51  ;;  %v9564_v3 = vmul.f32 %v9555_v62, %v9555_v62 }
 0x2e7   : > { %v3839_v17 = vsub.s32 %v9473_v39, %v3775_v38  ;;  %v3837_v43 = vsub.s32 %v9475_v50, %v3773_v5  ;;  %v2823_v18 = vmul.f32 0.0030864198, %v2759_v44  ;;  %vm4474_vm11 = vcmp.lt.s32.totalorder %v4218_v46, 16 }
 0x2e8   : > { %v3776_v10 = vmul.u32 18, %v5558_v37  ;;  %v9568_v32 = vsel %vm3331_vm15, %v5153_v61, %v3267_v28  ;;  %v5151_v55 = vadd.s32 4294966972, %v3265_v25  ;;  %vm3329_vm13 = vcmp.ge.s32.totalorder %v3265_v25, 324  ;;  %vm4538_vm3 = vmand %vm4410_vm0, %vm4474_vm11 }
 0x2e9   : > { %v3268_v0 = vsel %vm3140_vm7, %v3204_v36, %v3076_v54  ;;  %v3202_v30 = vadd.s32 324, %v3074_v7  ;;  %v9575_v4 = vadd.s32 %v6918_v1, %v2628_v27  ;;  %v5553_v8 = vtrunc.f32 %v3646_v34 }
 0x2ea   : > { %vm3138_vm12 = vcmp.lt.s32.totalorder %v3074_v7, 0  ;;  %v2887_v9 = vfloor.f32 %v2823_v18  ;;  %v2631_v12 = vadd.s32 344, %v6856_v26  ;;  %vm3903_vm6 = vcmp.lt.s32.totalorder %v3839_v17, 0 }
 0x2eb   : > { %v3967_v48 = vadd.s32 18, %v3839_v17  ;;  %vm3901_vm9 = vcmp.lt.s32.totalorder %v3837_v43, 0  ;;  %v3965_v20 = vadd.s32 18, %v3837_v43  ;;  %v3523_v57 = vcvt.s32.f32 %v9568_v32 }
 0x2ec   : > { %v9580_v13 = vsel %vm3329_vm13, %v5151_v55, %v3265_v25  ;;  %v5154_v19 = vadd.s32 4294966972, %v3268_v0  ;;  %v2757_v33 = vcvt.s32.f32 %v9575_v4  ;;  %v3840_v47 = vsub.s32 %v9498_v24, %v3776_v10 }
 0x2ed   : > { %vm3332_vm5 = vcmp.ge.s32.totalorder %v3268_v0, 324  ;;  %v3266_v16 = vsel %vm3138_vm12, %v3202_v30, %v3074_v7  ;;  %v9585_v6 = vadd.s32 %v6918_v1, %v2631_v12  ;;  %v5554_v53 = vcvt.f32.s32 %v5553_v8 }
 0x2ee   : > { %v5443_v63 = vtrunc.f32 %v2887_v9  ;;  %v2821_v2 = vmul.f32 0.0030864198, %v2757_v33  ;;  %v2629_v28 = vadd.s32 328, %v6856_v26  ;;  %v4730_v14 = vsel %vm4538_vm3, %v2446_v22, 0.0 }
 0x2ef   : > { %v4031_v54 = vsel %vm3903_vm6, %v3967_v48, %v3839_v17  ;;  %v4029_v29 = vsel %vm3901_vm9, %v3965_v20, %v3837_v43  ;;  %v3521_v40 = vcvt.s32.f32 %v9580_v13  ;;  %v3587_v23 = vmul.f32 0.055555556, %v3523_v57 }
 0x2f0   : > { %v9591_v46 = vsel %vm3332_vm5, %v5154_v19, %v3268_v0  ;;  %v5152_v38 = vadd.s32 4294966972, %v3266_v16  ;;  %v2885_v5 = vfloor.f32 %v2821_v2  ;;  %vm3904_vm4 = vcmp.lt.s32.totalorder %v3840_v47, 0 }
 0x2f1   : > { %v3968_v37 = vadd.s32 18, %v3840_v47  ;;  %vm3330_vm2 = vcmp.ge.s32.totalorder %v3266_v16, 324  ;;  %v2760_v61 = vcvt.s32.f32 %v9585_v6  ;;  %vm4287_vm1 = vcmp.lt.s32.totalorder %v9298_v42, 648 }
 0x2f2   : > { %vm4351_vm8 = vcmp.lt.s32.totalorder %v9473_v39, 288  ;;  %v3774_v51 = vmul.u32 18, %v5554_v53  ;;  %v5444_v44 = vcvt.f32.s32 %v5443_v63  ;;  %v5439_v25 = vtrunc.f32 %v2885_v5 }
 0x2f3   : > { %v9597_v36 = vadd.s32 %v6918_v1, %v2629_v28  ;;  %v4793_v27 = vadd.f32 %v9553_v58, %v4730_v14  ;;  %v4863_v34 = vmul.f32 %v4730_v14, %v4730_v14  ;;  %vm4285_vm14 = vcmp.lt.s32.totalorder %v9304_v60, 648  ;;  %vm9622_vm9 = vmand %vm4287_vm1, %vm4351_vm8 }
 0x2f4   : > { %v3585_v7 = vmul.f32 0.055555556, %v3521_v40  ;;  %v3524_v17 = vcvt.s32.f32 %v9591_v46  ;;  %vm4095_vm10 = vcmp.ge.s32.totalorder %v4031_v54, 18  ;;  %v5213_v43 = vadd.s32 4294967278, %v4031_v54 }
 0x2f5   : > { %v3651_v18 = vfloor.f32 %v3587_v23  ;;  %v9603_v10 = vsel %vm3330_vm2, %v5152_v38, %v3266_v16  ;;  %vm4093_vm15 = vcmp.ge.s32.totalorder %v4029_v29, 18  ;;  %v5211_v55 = vadd.s32 4294967278, %v4029_v29 }
 0x2f6   : > { %v4032_v0 = vsel %vm3904_vm4, %v3968_v37, %v3840_v47  ;;  %v2824_v30 = vmul.f32 0.0030864198, %v2760_v61  ;;  %v3838_v8 = vsub.s32 %v9531_v41, %v3774_v51  ;;  %v3015_v58 = vmul.u32 324, %v5444_v44 }
 0x2f7   : > { %v5440_v9 = vcvt.f32.s32 %v5439_v25  ;;  %v2758_v12 = vcvt.s32.f32 %v9597_v36  ;;  %vm4349_vm7 = vcmp.lt.s32.totalorder %v9475_v50, 288  ;;  %vm4288_vm11 = vcmp.lt.s32.totalorder %v9349_v59, 648 }
 0x2f8   : > { %v3649_v48 = vfloor.f32 %v3585_v7  ;;  %v3588_v20 = vmul.f32 0.055555556, %v3524_v17  ;;  %v3522_v22 = vcvt.s32.f32 %v9603_v10  ;;  %v4794_v57 = vadd.f32 %v4793_v27, %v9515_v56  ;;  %vm9632_vm5 = vmand %vm4285_vm14, %vm4349_vm7 }
 0x2f9   : > { %v4926_v19 = vadd.f32 %v9559_v45, %v4863_v34  ;;  %v4223_v33 = vsel %vm4095_vm10, %v5213_v43, %v4031_v54  ;;  %v5563_v47 = vtrunc.f32 %v3651_v18  ;;  %v4221_v16 = vsel %vm4093_vm15, %v5211_v55, %v4029_v29  ;;  %v5320_v54 = vpop.f32.mrf.mxu1 }
 0x2fa   : > { %vm4096_vm0 = vcmp.ge.s32.totalorder %v4032_v0, 18  ;;  %v5214_v53 = vadd.s32 4294967278, %v4032_v0  ;;  %v2888_v63 = vfloor.f32 %v2824_v30  ;;  %v3966_v2 = vadd.s32 18, %v3838_v8 }
 0x2fb   : > { %v3079_v28 = vsub.s32 %v9550_v49, %v3015_v58  ;;  %v3013_v14 = vmul.u32 324, %v5440_v9  ;;  %v2822_v40 = vmul.f32 0.0030864198, %v2758_v12  ;;  %vm3902_vm13 = vcmp.lt.s32.totalorder %v3838_v8, 0  ;;  %v2459_v18 = vpop.f32.mrf.mxu1 }
 0x2fc   : > { %v5559_v23 = vtrunc.f32 %v3649_v48  ;;  %v3652_v38 = vfloor.f32 %v3588_v20  ;;  %v3586_v5 = vmul.f32 0.055555556, %v3522_v22  ;;  %v4927_v56 = vadd.f32 %v4926_v19, %v9529_v11 }
 0x2fd   : > { %vm4479_vm12 = vcmp.lt.s32.totalorder %v4223_v33, 16  ;;  %vm4352_vm6 = vcmp.lt.s32.totalorder %v9498_v24, 288  ;;  %v5564_v45 = vcvt.f32.s32 %v5563_v47  ;;  %vm4477_vm3 = vcmp.lt.s32.totalorder %v4221_v16, 16  ;;  %v5321_v59 = vpop.f32.mrf.mxu1 }
 0x2fe   : > { %v4224_v37 = vsel %vm4096_vm0, %v5214_v53, %v4032_v0  ;;  %v5445_v61 = vtrunc.f32 %v2888_v63  ;;  %v2634_v51 = vadd.s32 368, %v6856_v26  ;;  %v4030_v42 = vsel %vm3902_vm13, %v3966_v2, %v3838_v8  ;;  %vm9642_vm1 = vmand %vm9622_vm9, %vm4479_vm12 }
 0x2ff   : > { %vm4286_vm4 = vcmp.lt.s32.totalorder %v9363_v21, 648  ;;  %v3207_v39 = vadd.s32 324, %v3079_v28  ;;  %v3077_v44 = vsub.s32 %v9575_v4, %v3013_v14  ;;  %v2886_v25 = vfloor.f32 %v2822_v40  ;;  %vm4541_vm14 = vmand %vm9632_vm5, %vm4477_vm3 }
 0x300   : > { %v5560_v27 = vcvt.f32.s32 %v5559_v23  ;;  %v5565_v34 = vtrunc.f32 %v3652_v38  ;;  %v3650_v7 = vfloor.f32 %v3586_v5  ;;  %vm3143_vm2 = vcmp.lt.s32.totalorder %v3079_v28, 0  ;;  %vm4416_vm15 = vmand %vm4288_vm11, %vm4352_vm6 }
 0x301   : > { %v4795_v50 = vadd.f32 %v4794_v57, %v9555_v62  ;;  %v4928_v17 = vadd.f32 %v4927_v56, %v9564_v3  ;;  %vm4480_vm8 = vcmp.lt.s32.totalorder %v4224_v37, 16  ;;  %v3779_v43 = vmul.u32 18, %v5564_v45 }
 0x302   : > { %vm4094_vm10 = vcmp.ge.s32.totalorder %v4030_v42, 18  ;;  %v5212_v55 = vadd.s32 4294967278, %v4030_v42  ;;  %v5446_v0 = vcvt.f32.s32 %v5445_v61  ;;  %v9652_v30 = vadd.s32 %v6918_v1, %v2634_v51  ;;  %vm4544_vm11 = vmand %vm4416_vm15, %vm4480_vm8 }
 0x303   : > { %v3271_v62 = vsel %vm3143_vm2, %v3207_v39, %v3079_v28  ;;  %v3205_v3 = vadd.s32 324, %v3077_v44  ;;  %v5441_v8 = vtrunc.f32 %v2886_v25  ;;  %v2632_v58 = vadd.s32 352, %v6856_v26  ;;  %v2462_v25 = vpop.f32.mrf.mxu1 }
 0x304   : > { %v3777_v9 = vmul.u32 18, %v5560_v27  ;;  %v5566_v12 = vcvt.f32.s32 %v5565_v34  ;;  %v5561_v48 = vtrunc.f32 %v3650_v7  ;;  %vm3141_vm7 = vcmp.lt.s32.totalorder %v3077_v44, 0 }
 0x305   : > { %v9661_v20 = vsel %vm9642_vm1, %v5320_v54, 0.0  ;;  %v4733_v22 = vsel %vm4541_vm14, %v2459_v18, 0.0  ;;  %vm4350_vm0 = vcmp.lt.s32.totalorder %v9531_v41, 288  ;;  %v3843_v24 = vsub.s32 %v9568_v32, %v3779_v43 }
 0x306   : > { %v4222_v57 = vsel %vm4094_vm10, %v5212_v55, %v4030_v42  ;;  %v5157_v19 = vadd.s32 4294966972, %v3271_v62  ;;  %v3016_v33 = vmul.u32 324, %v5446_v0  ;;  %v2763_v47 = vcvt.s32.f32 %v9652_v30  ;;  %vm9682_vm6 = vmand %vm4286_vm4, %vm4350_vm0 }
 0x307   : > { %vm3335_vm13 = vcmp.ge.s32.totalorder %v3271_v62, 324  ;;  %v3269_v16 = vsel %vm3141_vm7, %v3205_v3, %v3077_v44  ;;  %v5442_v53 = vcvt.f32.s32 %v5441_v8  ;;  %v9669_v63 = vadd.s32 %v6918_v1, %v2632_v58 }
 0x308   : > { %v9673_v2 = vmul.f32 %v9661_v20, %v9661_v20  ;;  %v3841_v28 = vsub.s32 %v9580_v13, %v3777_v9  ;;  %v3780_v14 = vmul.u32 18, %v5566_v12  ;;  %v5562_v40 = vcvt.f32.s32 %v5561_v48 }
 0x309   : > { %v4866_v23 = vmul.f32 %v4733_v22, %v4733_v22  ;;  %v9676_v38 = vsel %vm4544_vm11, %v5321_v59, 0.0  ;;  %vm4478_vm12 = vcmp.lt.s32.totalorder %v4222_v57, 16  ;;  %v3971_v5 = vadd.s32 18, %v3843_v24 }
 0x30a   : > { %v9686_v45 = vsel %vm3335_vm13, %v5157_v19, %v3271_v62  ;;  %v5155_v54 = vadd.s32 4294966972, %v3269_v16  ;;  %v3080_v29 = vsub.s32 %v9585_v6, %v3016_v33  ;;  %v2827_v37 = vmul.f32 0.0030864198, %v2763_v47  ;;  %vm4542_vm5 = vmand %vm9682_vm6, %vm4478_vm12 }
 0x30b   : > { %vm3907_vm9 = vcmp.lt.s32.totalorder %v3843_v24, 0  ;;  %vm3333_vm3 = vcmp.ge.s32.totalorder %v3269_v16, 324  ;;  %v3014_v61 = vmul.u32 324, %v5442_v53  ;;  %v2761_v51 = vcvt.s32.f32 %v9669_v63 }
 0x30c   : > { %v4796_v11 = vadd.f32 %v4795_v50, %v4733_v22  ;;  %v3969_v42 = vadd.s32 18, %v3841_v28  ;;  %v3844_v41 = vsub.s32 %v9591_v46, %v3780_v14  ;;  %v3778_v21 = vmul.u32 18, %v5562_v40 }
 0x30d   : > { %v9691_v39 = vadd.f32 %v4928_v17, %v4866_v23  ;;  %v9695_v44 = vmul.f32 %v9676_v38, %v9676_v38  ;;  %vm3905_vm4 = vcmp.lt.s32.totalorder %v3841_v28, 0  ;;  %v3527_v27 = vcvt.s32.f32 %v9686_v45 }
 0x30e   : > { %v4035_v34 = vsel %vm3907_vm9, %v3971_v5, %v3843_v24  ;;  %v9701_v7 = vsel %vm3333_vm3, %v5155_v54, %v3269_v16  ;;  %v3208_v60 = vadd.s32 324, %v3080_v29  ;;  %v2891_v50 = vfloor.f32 %v2827_v37 }
 0x30f   : > { %vm3144_vm2 = vcmp.lt.s32.totalorder %v3080_v29, 0  ;;  %v3078_v17 = vsub.s32 %v9597_v36, %v3014_v61  ;;  %v2825_v43 = vmul.f32 0.0030864198, %v2761_v51  ;;  %v2635_v18 = vadd.s32 376, %v6856_v26 }
 0x310   : > { %v4734_v55 = vsel %vm4542_vm5, %v2462_v25, 0.0  ;;  %v4033_v0 = vsel %vm3905_vm4, %v3969_v42, %v3841_v28  ;;  %v3972_v62 = vadd.s32 18, %v3844_v41  ;;  %v3842_v3 = vsub.s32 %v9603_v10, %v3778_v21 }
 0x311   : > { %vm4099_vm1 = vcmp.ge.s32.totalorder %v4035_v34, 18  ;;  %vm3908_vm8 = vcmp.lt.s32.totalorder %v3844_v41, 0  ;;  %v3591_v8 = vmul.f32 0.055555556, %v3527_v27  ;;  %v3525_v58 = vcvt.s32.f32 %v9701_v7  ;;  %v5324_v27 = vpop.f32.mrf.mxu1 }
 0x312   : > { %vm4291_vm14 = vcmp.lt.s32.totalorder %v9414_v31, 648  ;;  %vm4355_vm10 = vcmp.lt.s32.totalorder %v9568_v32, 288  ;;  %v3272_v9 = vsel %vm3144_vm2, %v3208_v60, %v3080_v29  ;;  %v5451_v12 = vtrunc.f32 %v2891_v50 }
 0x313   : > { %v2889_v48 = vfloor.f32 %v2825_v43  ;;  %v9710_v22 = vadd.s32 %v6918_v1, %v2635_v18  ;;  %v5217_v24 = vadd.s32 4294967278, %v4035_v34  ;;  %vm4097_vm15 = vcmp.ge.s32.totalorder %v4033_v0, 18 }
 0x314   : > { %v5215_v59 = vadd.s32 4294967278, %v4033_v0  ;;  %vm4289_vm7 = vcmp.lt.s32.totalorder %v9426_v15, 648  ;;  %vm4353_vm0 = vcmp.lt.s32.totalorder %v9580_v13, 288  ;;  %v3206_v57 = vadd.s32 324, %v3078_v17 }
 0x315   : > { %v4036_v19 = vsel %vm3908_vm8, %v3972_v62, %v3844_v41  ;;  %v3970_v33 = vadd.s32 18, %v3842_v3  ;;  %vm3142_vm11 = vcmp.lt.s32.totalorder %v3078_v17, 0  ;;  %v5447_v47 = vtrunc.f32 %v2889_v48 }
 0x316   : > { %vm3906_vm13 = vcmp.lt.s32.totalorder %v3842_v3, 0  ;;  %v3655_v16 = vfloor.f32 %v3591_v8  ;;  %v3589_v53 = vmul.f32 0.055555556, %v3525_v58  ;;  %v5158_v28 = vadd.s32 4294966972, %v3272_v9  ;;  %v2475_v8 = vpop.f32.mrf.mxu1 }
 0x317   : > { %v4797_v14 = vadd.f32 %v4796_v11, %v4734_v55  ;;  %vm3336_vm12 = vcmp.ge.s32.totalorder %v3272_v9, 324  ;;  %v5452_v40 = vcvt.f32.s32 %v5451_v12  ;;  %v2764_v23 = vcvt.s32.f32 %v9710_v22 }
 0x318   : > { %v4867_v5 = vmul.f32 %v4734_v55, %v4734_v55  ;;  %v4227_v56 = vsel %vm4099_vm1, %v5217_v24, %v4035_v34  ;;  %vm4292_vm6 = vcmp.lt.s32.totalorder %v9483_v52, 648  ;;  %v3270_v54 = vsel %vm3142_vm11, %v3206_v57, %v3078_v17  ;;  %vm9731_vm1 = vmand %vm4291_vm14, %vm4355_vm10 }
 0x319   : > { %v5448_v29 = vcvt.f32.s32 %v5447_v47  ;;  %v4225_v37 = vsel %vm4097_vm15, %v5215_v59, %v4033_v0  ;;  %vm4100_vm9 = vcmp.ge.s32.totalorder %v4036_v19, 18  ;;  %v5218_v61 = vadd.s32 4294967278, %v4036_v19  ;;  %vm4417_vm15 = vmand %vm4289_vm7, %vm4353_vm0  ;;  %v5325_v47 = vpop.f32.mrf.mxu1 }
 0x31a   : > { %v4034_v51 = vsel %vm3906_vm13, %v3970_v33, %v3842_v3  ;;  %vm4290_vm3 = vcmp.lt.s32.totalorder %v9512_v35, 648  ;;  %v5571_v11 = vtrunc.f32 %v3655_v16  ;;  %v3653_v42 = vfloor.f32 %v3589_v53 }
 0x31b   : > { %v9720_v41 = vsel %vm3336_vm12, %v5158_v28, %v3272_v9  ;;  %v2633_v21 = vadd.s32 360, %v6856_v26  ;;  %v4798_v25 = vadd.f32 %v4797_v14, %v9661_v20  ;;  %v5156_v34 = vadd.s32 4294966972, %v3270_v54 }
 0x31c   : > { %v3019_v60 = vmul.u32 324, %v5452_v40  ;;  %v2828_v50 = vmul.f32 0.0030864198, %v2764_v23  ;;  %v4930_v17 = vadd.f32 %v9691_v39, %v4867_v5  ;;  %vm4483_vm5 = vcmp.lt.s32.totalorder %v4227_v56, 16 }
 0x31d   : > { %vm3334_vm4 = vcmp.ge.s32.totalorder %v3270_v54, 324  ;;  %v3017_v43 = vmul.u32 324, %v5448_v29  ;;  %vm4481_vm2 = vcmp.lt.s32.totalorder %v4225_v37, 16  ;;  %v4228_v18 = vsel %vm4100_vm9, %v5218_v61, %v4036_v19  ;;  %vm9753_vm10 = vmand %vm9731_vm1, %vm4483_vm5 }
 0x31e   : > { %v5216_v55 = vadd.s32 4294967278, %v4034_v51  ;;  %v3528_v0 = vcvt.s32.f32 %v9720_v41  ;;  %vm4098_vm8 = vcmp.ge.s32.totalorder %v4034_v51, 18  ;;  %v5572_v62 = vcvt.f32.s32 %v5571_v11  ;;  %vm9761_vm0 = vmand %vm4417_vm15, %vm4481_vm2  ;;  %v2478_v11 = vpop.f32.mrf.mxu1 }
 0x31f   : > { %v5567_v39 = vtrunc.f32 %v3653_v42  ;;  %v9736_v3 = vadd.s32 %v6918_v1, %v2633_v21  ;;  %v9742_v58 = vsel %vm3334_vm4, %v5156_v34, %v3270_v54  ;;  %v3083_v31 = vsub.s32 %v9652_v30, %v3019_v60 }
 0x320   : > { %v2892_v32 = vfloor.f32 %v2828_v50  ;;  %v2638_v9 = vadd.s32 400, %v6856_v26  ;;  %v4931_v12 = vadd.f32 %v4930_v17, %v9673_v2  ;;  %vm4356_vm14 = vcmp.lt.s32.totalorder %v9591_v46, 288 }
 0x321   : > { %v3081_v48 = vsub.s32 %v9669_v63, %v3017_v43  ;;  %v2762_v24 = vcvt.s32.f32 %v9736_v3  ;;  %v4799_v13 = vadd.f32 %v4798_v25, %v9676_v38  ;;  %v4226_v59 = vsel %vm4098_vm8, %v5216_v55, %v4034_v51  ;;  %vm4420_vm13 = vmand %vm4292_vm6, %vm4356_vm14 }
 0x322   : > { %vm4354_vm7 = vcmp.lt.s32.totalorder %v9603_v10, 288  ;;  %v3592_v2 = vmul.f32 0.055555556, %v3528_v0  ;;  %vm4484_vm11 = vcmp.lt.s32.totalorder %v4228_v18, 16  ;;  %v3783_v57 = vmul.u32 18, %v5572_v62 }
 0x323   : > { %v5568_v19 = vcvt.f32.s32 %v5567_v39  ;;  %v3526_v33 = vcvt.s32.f32 %v9742_v58  ;;  %v3211_v38 = vadd.s32 324, %v3083_v31  ;;  %v5453_v16 = vtrunc.f32 %v2892_v32  ;;  %vm9773_vm12 = vmand %vm4290_vm3, %vm4354_vm7 }
 0x324   : > { %v2826_v53 = vmul.f32 0.0030864198, %v2762_v24  ;;  %v9769_v10 = vadd.s32 %v6918_v1, %v2638_v9  ;;  %vm4482_vm9 = vcmp.lt.s32.totalorder %v4226_v59, 16  ;;  %vm3147_vm5 = vcmp.lt.s32.totalorder %v3083_v31, 0  ;;  %vm9781_vm4 = vmand %vm4420_vm13, %vm4484_vm11 }
 0x325   : > { %v3209_v14 = vadd.s32 324, %v3081_v48  ;;  %v2636_v40 = vadd.s32 384, %v6856_v26  ;;  %v4737_v52 = vsel %vm9761_vm0, %v2475_v8, 0.0  ;;  %v3656_v23 = vfloor.f32 %v3592_v2  ;;  %vm4546_vm3 = vmand %vm9773_vm12, %vm4482_vm9 }
 0x326   : > { %vm3145_vm6 = vcmp.lt.s32.totalorder %v3081_v48, 0  ;;  %v2890_v5 = vfloor.f32 %v2826_v53  ;;  %v3847_v35 = vsub.s32 %v9686_v45, %v3783_v57  ;;  %v3781_v54 = vmul.u32 18, %v5568_v19 }
 0x327   : > { %v3590_v29 = vmul.f32 0.055555556, %v3526_v33  ;;  %v2767_v37 = vcvt.s32.f32 %v9769_v10  ;;  %v9789_v61 = vsel %vm9753_vm10, %v5324_v27, 0.0  ;;  %v4932_v51 = vadd.f32 %v4931_v12, %v9695_v44 }
 0x328   : > { %v3275_v42 = vsel %vm3147_vm5, %v3211_v38, %v3083_v31  ;;  %v5454_v21 = vcvt.f32.s32 %v5453_v16  ;;  %v3273_v25 = vsel %vm3145_vm6, %v3209_v14, %v3081_v48  ;;  %v5449_v34 = vtrunc.f32 %v2890_v5 }
 0x329   : > { %v2831_v60 = vmul.f32 0.0030864198, %v2767_v37  ;;  %v9797_v50 = vadd.s32 %v6918_v1, %v2636_v40  ;;  %v4800_v17 = vadd.f32 %v4799_v13, %v4737_v52  ;;  %v4870_v43 = vmul.f32 %v4737_v52, %v4737_v52 }
 0x32a   : > { %v9801_v27 = vsel %vm9781_vm4, %v5325_v47, 0.0  ;;  %v5573_v44 = vtrunc.f32 %v3656_v23  ;;  %v4738_v18 = vsel %vm4546_vm3, %v2478_v11, 0.0  ;;  %v3975_v55 = vadd.s32 18, %v3847_v35 }
 0x32b   : > { %v3845_v0 = vsub.s32 %v9701_v7, %v3781_v54  ;;  %v3654_v20 = vfloor.f32 %v3590_v29  ;;  %vm3339_vm2 = vcmp.ge.s32.totalorder %v3275_v42, 324  ;;  %v5161_v62 = vadd.s32 4294966972, %v3275_v42 }
 0x32c   : > { %v5159_v39 = vadd.s32 4294966972, %v3273_v25  ;;  %v5450_v8 = vcvt.f32.s32 %v5449_v34  ;;  %vm3337_vm1 = vcmp.ge.s32.totalorder %v3273_v25, 324  ;;  %v3020_v31 = vmul.u32 324, %v5454_v21 }
 0x32d   : > { %v2895_v32 = vfloor.f32 %v2831_v60  ;;  %v2765_v9 = vcvt.s32.f32 %v9797_v50  ;;  %v9807_v12 = vmul.f32 %v9789_v61, %v9789_v61  ;;  %v4933_v48 = vadd.f32 %v4932_v51, %v4870_v43 }
 0x32e   : > { %vm3911_vm8 = vcmp.lt.s32.totalorder %v3847_v35, 0  ;;  %v5574_v24 = vcvt.f32.s32 %v5573_v44  ;;  %v9811_v15 = vmul.f32 %v9801_v27, %v9801_v27  ;;  %v4801_v13 = vadd.f32 %v4800_v17, %v4738_v18 }
 0x32f   : > { %v4871_v59 = vmul.f32 %v4738_v18, %v4738_v18  ;;  %v5569_v2 = vtrunc.f32 %v3654_v20  ;;  %v9814_v46 = vsel %vm3339_vm2, %v5161_v62, %v3275_v42  ;;  %v9816_v57 = vsel %vm3337_vm1, %v5159_v39, %v3273_v25 }
 0x330   : > { %v3018_v19 = vmul.u32 324, %v5450_v8  ;;  %v5459_v33 = vtrunc.f32 %v2895_v32  ;;  %v4039_v47 = vsel %vm3911_vm8, %v3975_v55, %v3847_v35  ;;  %vm3909_vm15 = vcmp.lt.s32.totalorder %v3845_v0, 0 }
 0x331   : > { %v3084_v38 = vsub.s32 %v9710_v22, %v3020_v31  ;;  %v2829_v16 = vmul.f32 0.0030864198, %v2765_v9  ;;  %v3973_v53 = vadd.s32 18, %v3845_v0  ;;  %v3784_v28 = vmul.u32 18, %v5574_v24 }
 0x332   : > { %v3082_v14 = vsub.s32 %v9736_v3, %v3018_v19  ;;  %v2639_v40 = vadd.s32 408, %v6856_v26  ;;  %v5570_v52 = vcvt.f32.s32 %v5569_v2  ;;  %v3531_v23 = vcvt.s32.f32 %v9814_v46 }
 0x333   : > { %v3529_v5 = vcvt.s32.f32 %v9816_v57  ;;  %v2893_v56 = vfloor.f32 %v2829_v16  ;;  %v5221_v54 = vadd.s32 4294967278, %v4039_v47  ;;  %v5460_v29 = vcvt.f32.s32 %v5459_v33 }
 0x334   : > { %vm3146_vm14 = vcmp.lt.s32.totalorder %v3082_v14, 0  ;;  %v2637_v35 = vadd.s32 392, %v6856_v26  ;;  %vm4103_vm10 = vcmp.ge.s32.totalorder %v4039_v47, 18  ;;  %vm4295_vm7 = vcmp.lt.s32.totalorder %v9550_v49, 648 }
 0x335   : > { %vm4359_vm0 = vcmp.lt.s32.totalorder %v9686_v45, 288  ;;  %v3212_v37 = vadd.s32 324, %v3084_v38  ;;  %v3210_v51 = vadd.s32 324, %v3082_v14  ;;  %v5455_v11 = vtrunc.f32 %v2893_v56 }
 0x336   : > { %v4037_v42 = vsel %vm3909_vm15, %v3973_v53, %v3845_v0  ;;  %v3848_v21 = vsub.s32 %v9720_v41, %v3784_v28  ;;  %vm3148_vm11 = vcmp.lt.s32.totalorder %v3084_v38, 0  ;;  %v9829_v25 = vadd.s32 %v6918_v1, %v2639_v40  ;;  %vm9851_vm1 = vmand %vm4295_vm7, %vm4359_vm0 }
 0x337   : > { %v3782_v34 = vmul.u32 18, %v5570_v52  ;;  %v3595_v60 = vmul.f32 0.055555556, %v3531_v23  ;;  %v3593_v17 = vmul.f32 0.055555556, %v3529_v5  ;;  %v3274_v43 = vsel %vm3146_vm14, %v3210_v51, %v3082_v14 }
 0x338   : > { %v4934_v44 = vadd.f32 %v4933_v48, %v4871_v59  ;;  %v4231_v18 = vsel %vm4103_vm10, %v5221_v54, %v4039_v47  ;;  %v3023_v55 = vmul.u32 324, %v5460_v29  ;;  %v9833_v20 = vadd.s32 %v6918_v1, %v2637_v35 }
 0x339   : > { %vm4101_vm13 = vcmp.ge.s32.totalorder %v4037_v42, 18  ;;  %vm4293_vm12 = vcmp.lt.s32.totalorder %v9575_v4, 648  ;;  %vm4357_vm9 = vcmp.lt.s32.totalorder %v9701_v7, 288  ;;  %v3276_v0 = vsel %vm3148_vm11, %v3212_v37, %v3084_v38 }
 0x33a   : > { %v5456_v62 = vcvt.f32.s32 %v5455_v11  ;;  %v2768_v39 = vcvt.s32.f32 %v9829_v25  ;;  %v5219_v8 = vadd.s32 4294967278, %v4037_v42  ;;  %vm3912_vm5 = vcmp.lt.s32.totalorder %v3848_v21, 0  ;;  %v5328_v11 = vpop.f32.mrf.mxu1  ;;  %vm9874_vm11 = vmand %vm4293_vm12, %vm4357_vm9 }
 0x33b   : > { %v3976_v31 = vadd.s32 18, %v3848_v21  ;;  %v5160_v32 = vadd.s32 4294966972, %v3274_v43  ;;  %v3846_v9 = vsub.s32 %v9742_v58, %v3782_v34  ;;  %v3659_v48 = vfloor.f32 %v3595_v60 }
 0x33c   : > { %v3657_v24 = vfloor.f32 %v3593_v17  ;;  %vm3338_vm6 = vcmp.ge.s32.totalorder %v3274_v43, 324  ;;  %v5162_v59 = vadd.s32 4294966972, %v3276_v0  ;;  %v3087_v2 = vsub.s32 %v9769_v10, %v3023_v55 }
 0x33d   : > { %v2832_v19 = vmul.f32 0.0030864198, %v2768_v39  ;;  %v2766_v33 = vcvt.s32.f32 %v9833_v20  ;;  %v4802_v47 = vadd.f32 %v4801_v13, %v9789_v61  ;;  %v4935_v38 = vadd.f32 %v4934_v44, %v9807_v12 }
 0x33e   : > { %vm3340_vm4 = vcmp.ge.s32.totalorder %v3276_v0, 324  ;;  %v3021_v16 = vmul.u32 324, %v5456_v62  ;;  %vm4487_vm3 = vcmp.lt.s32.totalorder %v4231_v18, 16  ;;  %v4229_v53 = vsel %vm4101_vm13, %v5219_v8, %v4037_v42  ;;  %v2491_v62 = vpop.f32.mrf.mxu1 }
 0x33f   : > { %v4040_v28 = vsel %vm3912_vm5, %v3976_v31, %v3848_v21  ;;  %v9845_v14 = vsel %vm3338_vm6, %v5160_v32, %v3274_v43  ;;  %vm3910_vm2 = vcmp.lt.s32.totalorder %v3846_v9, 0  ;;  %v3974_v40 = vadd.s32 18, %v3846_v9  ;;  %vm4551_vm10 = vmand %vm9851_vm1, %vm4487_vm3 }
 0x340   : > { %v2896_v52 = vfloor.f32 %v2832_v19  ;;  %v2830_v23 = vmul.f32 0.0030864198, %v2766_v33  ;;  %v5579_v12 = vtrunc.f32 %v3659_v48  ;;  %v5575_v13 = vtrunc.f32 %v3657_v24 }
 0x341   : > { %v9855_v5 = vsel %vm3340_vm4, %v5162_v59, %v3276_v0  ;;  %v3215_v56 = vadd.s32 324, %v3087_v2  ;;  %v3530_v54 = vcvt.s32.f32 %v9845_v14  ;;  %vm3151_vm8 = vcmp.lt.s32.totalorder %v3087_v2, 0 }
 0x342   : > { %v3085_v29 = vsub.s32 %v9797_v50, %v3021_v16  ;;  %v2642_v35 = vadd.s32 432, %v6856_v26  ;;  %v9861_v45 = vadd.f32 %v4802_v47, %v9801_v27  ;;  %v5222_v49 = vadd.s32 4294967278, %v4040_v28 }
 0x343   : > { %vm4296_vm15 = vcmp.lt.s32.totalorder %v9585_v6, 648  ;;  %vm4360_vm14 = vcmp.lt.s32.totalorder %v9720_v41, 288  ;;  %v5461_v37 = vtrunc.f32 %v2896_v52  ;;  %v2894_v51 = vfloor.f32 %v2830_v23 }
 0x344   : > { %vm4485_vm7 = vcmp.lt.s32.totalorder %v4229_v53, 16  ;;  %vm4104_vm0 = vcmp.ge.s32.totalorder %v4040_v28, 18  ;;  %v4038_v42 = vsel %vm3910_vm2, %v3974_v40, %v3846_v9  ;;  %v3532_v21 = vcvt.s32.f32 %v9855_v5  ;;  %vm9904_vm2 = vmand %vm4296_vm15, %vm4360_vm14 }
 0x345   : > { %vm4294_vm13 = vcmp.lt.s32.totalorder %v9597_v36, 648  ;;  %v5580_v34 = vcvt.f32.s32 %v5579_v12  ;;  %v5576_v60 = vcvt.f32.s32 %v5575_v13  ;;  %v3279_v17 = vsel %vm3151_vm8, %v3215_v56, %v3087_v2  ;;  %vm4549_vm5 = vmand %vm9874_vm11, %vm4485_vm7 }
 0x346   : > { %v5462_v43 = vcvt.f32.s32 %v5461_v37  ;;  %v3594_v44 = vmul.f32 0.055555556, %v3530_v54  ;;  %v3213_v18 = vadd.s32 324, %v3085_v29  ;;  %v5457_v55 = vtrunc.f32 %v2894_v51 }
 0x347   : > { %v9881_v0 = vadd.s32 %v6918_v1, %v2642_v35  ;;  %v9883_v7 = vsel %vm4551_vm10, %v5328_v11, 0.0  ;;  %v4232_v4 = vsel %vm4104_vm0, %v5222_v49, %v4040_v28  ;;  %vm4102_vm12 = vcmp.ge.s32.totalorder %v4038_v42, 18  ;;  %v5329_v35 = vpop.f32.mrf.mxu1 }
 0x348   : > { %vm3149_vm9 = vcmp.lt.s32.totalorder %v3085_v29, 0  ;;  %v5220_v39 = vadd.s32 4294967278, %v4038_v42  ;;  %v3596_v8 = vmul.f32 0.055555556, %v3532_v21  ;;  %v3024_v31 = vmul.u32 324, %v5462_v43 }
 0x349   : > { %v5458_v32 = vcvt.f32.s32 %v5457_v55  ;;  %v3787_v9 = vmul.u32 18, %v5580_v34  ;;  %v3785_v48 = vmul.u32 18, %v5576_v60  ;;  %v5165_v24 = vadd.s32 4294966972, %v3279_v17  ;;  %v2494_v43 = vpop.f32.mrf.mxu1 }
 0x34a   : > { %v2771_v59 = vcvt.s32.f32 %v9881_v0  ;;  %v3658_v2 = vfloor.f32 %v3594_v44  ;;  %vm3343_vm6 = vcmp.ge.s32.totalorder %v3279_v17, 324  ;;  %v3277_v19 = vsel %vm3149_vm9, %v3213_v18, %v3085_v29 }
 0x34b   : > { %v3022_v33 = vmul.u32 324, %v5458_v32  ;;  %v9891_v47 = vmul.f32 %v9883_v7, %v9883_v7  ;;  %v4741_v16 = vsel %vm4549_vm5, %v2491_v62, 0.0  ;;  %v4936_v53 = vadd.f32 %v4935_v38, %v9811_v15 }
 0x34c   : > { %vm4358_vm4 = vcmp.lt.s32.totalorder %v9742_v58, 288  ;;  %vm4488_vm3 = vcmp.lt.s32.totalorder %v4232_v4, 16  ;;  %v3660_v28 = vfloor.f32 %v3596_v8  ;;  %v3088_v40 = vsub.s32 %v9829_v25, %v3024_v31 }
 0x34d   : > { %v3086_v52 = vsub.s32 %v9833_v20, %v3022_v33  ;;  %v4230_v23 = vsel %vm4102_vm12, %v5220_v39, %v4038_v42  ;;  %v9898_v61 = vsel %vm3343_vm6, %v5165_v24, %v3279_v17  ;;  %v5163_v12 = vadd.s32 4294966972, %v3277_v19  ;;  %vm9915_vm15 = vmand %vm4294_vm13, %vm4358_vm4 }
 0x34e   : > { %v2835_v13 = vmul.f32 0.0030864198, %v2771_v59  ;;  %v3851_v38 = vsub.s32 %v9814_v46, %v3787_v9  ;;  %v3849_v56 = vsub.s32 %v9816_v57, %v3785_v48  ;;  %v5577_v54 = vtrunc.f32 %v3658_v2  ;;  %vm4552_vm10 = vmand %vm9904_vm2, %vm4488_vm3 }
 0x34f   : > { %vm3341_vm1 = vcmp.ge.s32.totalorder %v3277_v19, 324  ;;  %v4874_v29 = vmul.f32 %v4741_v16, %v4741_v16  ;;  %vm3150_vm8 = vcmp.lt.s32.totalorder %v3086_v52, 0  ;;  %v3214_v49 = vadd.s32 324, %v3086_v52 }
 0x350   : > { %v2640_v37 = vadd.s32 416, %v6856_v26  ;;  %vm4486_vm14 = vcmp.lt.s32.totalorder %v4230_v23, 16  ;;  %v5581_v41 = vtrunc.f32 %v3660_v28  ;;  %v3535_v51 = vcvt.s32.f32 %v9898_v61 }
 0x351   : > { %v3216_v11 = vadd.s32 324, %v3088_v40  ;;  %v9923_v42 = vsel %vm3341_vm1, %v5163_v12, %v3277_v19  ;;  %vm3152_vm7 = vcmp.lt.s32.totalorder %v3088_v40, 0  ;;  %v3278_v21 = vsel %vm3150_vm8, %v3214_v49, %v3086_v52  ;;  %vm4550_vm0 = vmand %vm9915_vm15, %vm4486_vm14 }
 0x352   : > { %v2899_v58 = vfloor.f32 %v2835_v13  ;;  %v4804_v36 = vadd.f32 %v9861_v45, %v4741_v16  ;;  %v3979_v27 = vadd.s32 18, %v3851_v38  ;;  %v3977_v34 = vadd.s32 18, %v3849_v56 }
 0x353   : > { %v5578_v60 = vcvt.f32.s32 %v5577_v54  ;;  %v4937_v17 = vadd.f32 %v4936_v53, %v4874_v29  ;;  %vm3915_vm11 = vcmp.lt.s32.totalorder %v3851_v38, 0  ;;  %vm3913_vm13 = vcmp.lt.s32.totalorder %v3849_v56, 0 }
 0x354   : > { %v9930_v44 = vadd.s32 %v6918_v1, %v2640_v37  ;;  %v9932_v18 = vsel %vm4552_vm10, %v5329_v35, 0.0  ;;  %v3533_v55 = vcvt.s32.f32 %v9923_v42  ;;  %v3280_v4 = vsel %vm3152_vm7, %v3216_v11, %v3088_v40 }
 0x355   : > { %vm3342_vm12 = vcmp.ge.s32.totalorder %v3278_v21, 324  ;;  %v5582_v45 = vcvt.f32.s32 %v5581_v41  ;;  %v3599_v62 = vmul.f32 0.055555556, %v3535_v51  ;;  %v5164_v39 = vadd.s32 4294966972, %v3278_v21 }
 0x356   : > { %v5467_v8 = vtrunc.f32 %v2899_v58  ;;  %v4742_v31 = vsel %vm4550_vm0, %v2494_v43, 0.0  ;;  %v4043_v32 = vsel %vm3915_vm11, %v3979_v27, %v3851_v38  ;;  %v4041_v9 = vsel %vm3913_vm13, %v3977_v34, %v3849_v56 }
 0x357   : > { %v3786_v48 = vmul.u32 18, %v5578_v60  ;;  %v5166_v24 = vadd.s32 4294966972, %v3280_v4  ;;  %v9935_v59 = vsel %vm3342_vm12, %v5164_v39, %v3278_v21  ;;  %v2769_v19 = vcvt.s32.f32 %v9930_v44 }
 0x358   : > { %v5468_v2 = vcvt.f32.s32 %v5467_v8  ;;  %v3597_v33 = vmul.f32 0.055555556, %v3533_v55  ;;  %vm3344_vm9 = vcmp.ge.s32.totalorder %v3280_v4, 324  ;;  %v3534_v16 = vcvt.s32.f32 %v9935_v59 }
 0x359   : > { %v2643_v53 = vadd.s32 440, %v6856_v26  ;;  %v9942_v28 = vmul.f32 %v9932_v18, %v9932_v18  ;;  %v4805_v40 = vadd.f32 %v4804_v36, %v4742_v31  ;;  %vm4297_vm5 = vcmp.lt.s32.totalorder %v9669_v63, 648 }
 0x35a   : > { %v3788_v52 = vmul.u32 18, %v5582_v45  ;;  %v3663_v23 = vfloor.f32 %v3599_v62  ;;  %v4875_v12 = vmul.f32 %v4742_v31, %v4742_v31  ;;  %vm4107_vm6 = vcmp.ge.s32.totalorder %v4043_v32, 18 }
 0x35b   : > { %v5225_v13 = vadd.s32 4294967278, %v4043_v32  ;;  %v3850_v15 = vsub.s32 %v9845_v14, %v3786_v48  ;;  %vm4105_vm4 = vcmp.ge.s32.totalorder %v4041_v9, 18  ;;  %v9946_v38 = vsel %vm3344_vm9, %v5166_v24, %v3280_v4 }
 0x35c   : > { %v3027_v56 = vmul.u32 324, %v5468_v2  ;;  %v2833_v54 = vmul.f32 0.0030864198, %v2769_v19  ;;  %v3661_v29 = vfloor.f32 %v3597_v33  ;;  %v3598_v35 = vmul.f32 0.055555556, %v3534_v16  ;;  %v5332_v19 = vpop.f32.mrf.mxu1 }
 0x35d   : > { %v9949_v49 = vadd.s32 %v6918_v1, %v2643_v53  ;;  %v2641_v37 = vadd.s32 424, %v6856_v26  ;;  %vm4299_vm3 = vcmp.lt.s32.totalorder %v9652_v30, 648  ;;  %vm4363_vm2 = vcmp.lt.s32.totalorder %v9814_v46, 288 }
 0x35e   : > { %v5223_v6 = vadd.s32 4294967278, %v4041_v9  ;;  %v3852_v41 = vsub.s32 %v9855_v5, %v3788_v52  ;;  %v5587_v51 = vtrunc.f32 %v3663_v23  ;;  %v2897_v11 = vfloor.f32 %v2833_v54  ;;  %v2507_v63 = vpop.f32.mrf.mxu1  ;;  %vm4427_vm9 = vmand %vm4299_vm3, %vm4363_vm2 }
 0x35f   : > { %v3978_v21 = vadd.s32 18, %v3850_v15  ;;  %v3536_v58 = vcvt.s32.f32 %v9946_v38  ;;  %v3091_v36 = vsub.s32 %v9881_v0, %v3027_v56  ;;  %v2772_v27 = vcvt.s32.f32 %v9949_v49 }
 0x360   : > { %v4806_v34 = vadd.f32 %v4805_v40, %v9883_v7  ;;  %vm4361_vm1 = vcmp.lt.s32.totalorder %v9816_v57, 288  ;;  %vm3914_vm8 = vcmp.lt.s32.totalorder %v3850_v15, 0  ;;  %v9961_v60 = vadd.s32 %v6918_v1, %v2641_v37 }
 0x361   : > { %v4938_v43 = vadd.f32 %v4937_v17, %v4875_v12  ;;  %v5583_v55 = vtrunc.f32 %v3661_v29  ;;  %v3662_v4 = vfloor.f32 %v3598_v35  ;;  %v5463_v45 = vtrunc.f32 %v2897_v11  ;;  %vm9971_vm10 = vmand %vm4297_vm5, %vm4361_vm1 }
 0x362   : > { %v4235_v62 = vsel %vm4107_vm6, %v5225_v13, %v4043_v32  ;;  %v4233_v39 = vsel %vm4105_vm4, %v5223_v6, %v4041_v9  ;;  %v3980_v8 = vadd.s32 18, %v3852_v41  ;;  %v2836_v31 = vmul.f32 0.0030864198, %v2772_v27  ;;  %v9988_v27 = vpop.f32.mrf.mxu1 }
 0x363   : > { %v4042_v48 = vsel %vm3914_vm8, %v3978_v21, %v3850_v15  ;;  %vm4298_vm15 = vcmp.lt.s32.totalorder %v9736_v3, 648  ;;  %v5588_v7 = vcvt.f32.s32 %v5587_v51  ;;  %v3600_v24 = vmul.f32 0.055555556, %v3536_v58 }
 0x364   : > { %v3219_v2 = vadd.s32 324, %v3091_v36  ;;  %vm3155_vm14 = vcmp.lt.s32.totalorder %v3091_v36, 0  ;;  %v5464_v33 = vcvt.f32.s32 %v5463_v45  ;;  %v2900_v16 = vfloor.f32 %v2836_v31 }
 0x365   : > { %v2770_v17 = vcvt.s32.f32 %v9961_v60  ;;  %vm4489_vm7 = vcmp.lt.s32.totalorder %v4233_v39, 16  ;;  %vm3916_vm0 = vcmp.lt.s32.totalorder %v3852_v41, 0  ;;  %v5584_v9 = vcvt.f32.s32 %v5583_v55 }
 0x366   : > { %v5585_v53 = vtrunc.f32 %v3662_v4  ;;  %v4939_v40 = vadd.f32 %v4938_v43, %v9891_v47  ;;  %v4807_v52 = vadd.f32 %v4806_v34, %v9932_v18  ;;  %v5224_v23 = vadd.s32 4294967278, %v4042_v48  ;;  %vm4553_vm12 = vmand %vm9971_vm10, %vm4489_vm7 }
 0x367   : > { %v3025_v12 = vmul.u32 324, %v5464_v33  ;;  %vm4106_vm11 = vcmp.ge.s32.totalorder %v4042_v48, 18  ;;  %v3791_v13 = vmul.u32 18, %v5588_v7  ;;  %v3283_v15 = vsel %vm3155_vm14, %v3219_v2, %v3091_v36  ;;  %v2510_v2 = vpop.f32.mrf.mxu1 }
 0x368   : > { %v2834_v57 = vmul.f32 0.0030864198, %v2770_v17  ;;  %vm4491_vm13 = vcmp.lt.s32.totalorder %v4235_v62, 16  ;;  %v4044_v56 = vsel %vm3916_vm0, %v3980_v8, %v3852_v41  ;;  %v3664_v54 = vfloor.f32 %v3600_v24 }
 0x369   : > { %v5469_v29 = vtrunc.f32 %v2900_v16  ;;  %v3789_v47 = vmul.u32 18, %v5584_v9  ;;  %v5586_v18 = vcvt.f32.s32 %v5585_v53  ;;  %v3089_v35 = vsub.s32 %v9930_v44, %v3025_v12  ;;  %vm4555_vm1 = vmand %vm4427_vm9, %vm4491_vm13 }
 0x36a   : > { %v2898_v37 = vfloor.f32 %v2834_v57  ;;  %v4234_v6 = vsel %vm4106_vm11, %v5224_v23, %v4042_v48  ;;  %vm4362_vm5 = vcmp.lt.s32.totalorder %v9845_v14, 288  ;;  %v5169_v51 = vadd.s32 4294966972, %v3283_v15 }
 0x36b   : > { %v2646_v11 = vadd.s32 464, %v6856_v26  ;;  %v4745_v21 = vsel %vm4553_vm12, %v2507_v63, 0.0  ;;  %vm4108_vm6 = vcmp.ge.s32.totalorder %v4044_v56, 18  ;;  %v3855_v41 = vsub.s32 %v9898_v61, %v3791_v13  ;;  %vm9995_vm2 = vmand %vm4298_vm15, %vm4362_vm5 }
 0x36c   : > { %vm3347_vm4 = vcmp.ge.s32.totalorder %v3283_v15, 324  ;;  %v5226_v30 = vadd.s32 4294967278, %v4044_v56  ;;  %v5589_v46 = vtrunc.f32 %v3664_v54  ;;  %v5470_v58 = vcvt.f32.s32 %v5469_v29 }
 0x36d   : > { %v5465_v36 = vtrunc.f32 %v2898_v37  ;;  %vm4490_vm3 = vcmp.lt.s32.totalorder %v4234_v6, 16  ;;  %v3853_v34 = vsub.s32 %v9923_v42, %v3789_v47  ;;  %v3790_v43 = vmul.u32 18, %v5586_v18 }
 0x36e   : > { %v3217_v55 = vadd.s32 324, %v3089_v35  ;;  %v9999_v45 = vsel %vm3347_vm4, %v5169_v51, %v3283_v15  ;;  %vm3153_vm8 = vcmp.lt.s32.totalorder %v3089_v35, 0  ;;  %v10002_v39 = vadd.s32 %v6918_v1, %v2646_v11  ;;  %vm4554_vm7 = vmand %vm9995_vm2, %vm4490_vm3 }
 0x36f   : > { %v5466_v62 = vcvt.f32.s32 %v5465_v36  ;;  %v10004_v8 = vsel %vm4555_vm1, %v5332_v19, 0.0  ;;  %v4878_v31 = vmul.f32 %v4745_v21, %v4745_v21  ;;  %v4940_v48 = vadd.f32 %v4939_v40, %v9942_v28 }
 0x370   : > { %v3983_v7 = vadd.s32 18, %v3855_v41  ;;  %v10008_v14 = vsel %vm4108_vm6, %v5226_v30, %v4044_v56  ;;  %vm3919_vm15 = vcmp.lt.s32.totalorder %v3855_v41, 0  ;;  %v5590_v3 = vcvt.f32.s32 %v5589_v46 }
 0x371   : > { %v3028_v24 = vmul.u32 324, %v5470_v58  ;;  %vm4300_vm14 = vcmp.lt.s32.totalorder %v9710_v22, 648  ;;  %vm4364_vm10 = vcmp.lt.s32.totalorder %v9855_v5, 288  ;;  %v3981_v19 = vadd.s32 18, %v3853_v34 }
 0x372   : > { %v3539_v33 = vcvt.s32.f32 %v9999_v45  ;;  %v3281_v28 = vsel %vm3153_vm8, %v3217_v55, %v3089_v35  ;;  %v3026_v16 = vmul.u32 324, %v5466_v62  ;;  %v10019_v17 = vmul.f32 %v10004_v8, %v10004_v8  ;;  %v10039_v55 = vpop.f32.mrf.mxu1 }
 0x373   : > { %vm3917_vm0 = vcmp.lt.s32.totalorder %v3853_v34, 0  ;;  %v3854_v32 = vsub.s32 %v9935_v59, %v3790_v43  ;;  %v2775_v9 = vcvt.s32.f32 %v10002_v39  ;;  %v4808_v53 = vadd.f32 %v4807_v52, %v4745_v21 }
 0x374   : > { %v4941_v40 = vadd.f32 %v4940_v48, %v4878_v31  ;;  %v4047_v23 = vsel %vm3919_vm15, %v3983_v7, %v3855_v41  ;;  %v3090_v12 = vsub.s32 %v9961_v60, %v3026_v16  ;;  %vm4492_vm11 = vcmp.lt.s32.totalorder %v10008_v14, 16  ;;  %v2523_v22 = vpop.f32.mrf.mxu1 }
 0x375   : > { %v4746_v13 = vsel %vm4554_vm7, %v2510_v2, 0.0  ;;  %v3792_v15 = vmul.u32 18, %v5590_v3  ;;  %v5167_v57 = vadd.s32 4294966972, %v3281_v28  ;;  %v3092_v63 = vsub.s32 %v9949_v49, %v3028_v24  ;;  %vm4428_vm7 = vmand %vm4300_vm14, %vm4364_vm10 }
 0x376   : > { %v4045_v56 = vsel %vm3917_vm0, %v3981_v19, %v3853_v34  ;;  %vm4301_vm13 = vcmp.lt.s32.totalorder %v9797_v50, 648  ;;  %vm4365_vm12 = vcmp.lt.s32.totalorder %v9923_v42, 288  ;;  %v3603_v54 = vmul.f32 0.055555556, %v3539_v33 }
 0x377   : > { %vm3345_vm9 = vcmp.ge.s32.totalorder %v3281_v28, 324  ;;  %v2644_v52 = vadd.s32 448, %v6856_v26  ;;  %vm4111_vm5 = vcmp.ge.s32.totalorder %v4047_v23, 18  ;;  %v3982_v29 = vadd.s32 18, %v3854_v32  ;;  %vm10061_vm10 = vmand %vm4301_vm13, %vm4365_vm12 }
 0x378   : > { %v3218_v47 = vadd.s32 324, %v3090_v12  ;;  %v2839_v18 = vmul.f32 0.0030864198, %v2775_v9  ;;  %v4879_v35 = vmul.f32 %v4746_v13, %v4746_v13  ;;  %v5229_v37 = vadd.s32 4294967278, %v4047_v23 }
 0x379   : > { %vm4303_vm6 = vcmp.lt.s32.totalorder %v9769_v10, 648  ;;  %vm4367_vm4 = vcmp.lt.s32.totalorder %v9898_v61, 288  ;;  %vm3918_vm1 = vcmp.lt.s32.totalorder %v3854_v32, 0  ;;  %vm3154_vm3 = vcmp.lt.s32.totalorder %v3090_v12, 0 }
 0x37a   : > { %v5227_v6 = vadd.s32 4294967278, %v4045_v56  ;;  %v3856_v51 = vsub.s32 %v9946_v38, %v3792_v15  ;;  %v10033_v11 = vsel %vm3345_vm9, %v5167_v57, %v3281_v28  ;;  %v3220_v21 = vadd.s32 324, %v3092_v63  ;;  %vm10082_vm13 = vmand %vm4303_vm6, %vm4367_vm4 }
 0x37b   : > { %vm4109_vm2 = vcmp.ge.s32.totalorder %v4045_v56, 18  ;;  %vm4302_vm8 = vcmp.lt.s32.totalorder %v9833_v20, 648  ;;  %v3667_v41 = vfloor.f32 %v3603_v54  ;;  %vm3156_vm15 = vcmp.lt.s32.totalorder %v3092_v63, 0 }
 0x37c   : > { %v10037_v30 = vadd.s32 %v6918_v1, %v2644_v52  ;;  %v4809_v46 = vadd.f32 %v4808_v53, %v4746_v13  ;;  %v4046_v58 = vsel %vm3918_vm1, %v3982_v29, %v3854_v32  ;;  %v3282_v36 = vsel %vm3154_vm3, %v3218_v47, %v3090_v12  ;;  %vm10052_vm1 = vmand %vm4428_vm7, %vm4492_vm11  ;;  %v10092_v52 = vpop.f32.mrf.mxu1 }
 0x37d   : > { %v2903_v34 = vfloor.f32 %v2839_v18  ;;  %v4942_v43 = vadd.f32 %v4941_v40, %v4879_v35  ;;  %v4239_v4 = vsel %vm4111_vm5, %v5229_v37, %v4047_v23  ;;  %v3537_v62 = vcvt.s32.f32 %v10033_v11 }
 0x37e   : > { %v2773_v31 = vcvt.s32.f32 %v10037_v30  ;;  %v4237_v48 = vsel %vm4109_vm2, %v5227_v6, %v4045_v56  ;;  %vm3920_vm0 = vcmp.lt.s32.totalorder %v3856_v51, 0  ;;  %v3984_v7 = vadd.s32 18, %v3856_v51 }
 0x37f   : > { %v3284_v3 = vsel %vm3156_vm15, %v3220_v21, %v3092_v63  ;;  %v5228_v24 = vadd.s32 4294967278, %v4046_v58  ;;  %v5595_v2 = vtrunc.f32 %v3667_v41  ;;  %v5168_v19 = vadd.s32 4294966972, %v3282_v36 }
 0x380   : > { %v2837_v33 = vmul.f32 0.0030864198, %v2773_v31  ;;  %vm4110_vm9 = vcmp.ge.s32.totalorder %v4046_v58, 18  ;;  %vm3346_vm5 = vcmp.ge.s32.totalorder %v3282_v36, 324  ;;  %v5475_v28 = vtrunc.f32 %v2903_v34 }
 0x381   : > { %v2647_v16 = vadd.s32 472, %v6856_v26  ;;  %vm4366_vm14 = vcmp.lt.s32.totalorder %v9935_v59, 288  ;;  %v3601_v32 = vmul.f32 0.055555556, %v3537_v62  ;;  %v5170_v9 = vadd.s32 4294966972, %v3284_v3 }
 0x382   : > { %v2901_v53 = vfloor.f32 %v2837_v33  ;;  %vm4493_vm3 = vcmp.lt.s32.totalorder %v4237_v48, 16  ;;  %v4048_v14 = vsel %vm3920_vm0, %v3984_v7, %v3856_v51  ;;  %vm4304_vm11 = vcmp.lt.s32.totalorder %v9829_v25, 648  ;;  %vm10101_vm6 = vmand %vm4302_vm8, %vm4366_vm14 }
 0x383   : > { %vm3348_vm2 = vcmp.ge.s32.totalorder %v3284_v3, 324  ;;  %v10068_v23 = vadd.s32 %v6918_v1, %v2647_v16  ;;  %v4238_v12 = vsel %vm4110_vm9, %v5228_v24, %v4046_v58  ;;  %v5596_v13 = vcvt.f32.s32 %v5595_v2  ;;  %vm10088_vm15 = vmand %vm10061_vm10, %vm4493_vm3  ;;  %v2526_v58 = vpop.f32.mrf.mxu1 }
 0x384   : > { %v10072_v42 = vsel %vm3346_vm5, %v5168_v19, %v3282_v36  ;;  %v5471_v50 = vtrunc.f32 %v2901_v53  ;;  %v4748_v15 = vsel %vm10052_vm1, %v9988_v27, 0.0  ;;  %v4810_v57 = vadd.f32 %v4809_v46, %v10004_v8 }
 0x385   : > { %vm4495_vm12 = vcmp.lt.s32.totalorder %v4239_v4, 16  ;;  %v5476_v56 = vcvt.f32.s32 %v5475_v28  ;;  %v3665_v27 = vfloor.f32 %v3601_v32  ;;  %v10094_v8 = vsel %vm3348_vm2, %v5170_v9, %v3284_v3 }
 0x386   : > { %v5472_v61 = vcvt.f32.s32 %v5471_v50  ;;  %v2776_v10 = vcvt.s32.f32 %v10068_v23  ;;  %v5230_v29 = vadd.s32 4294967278, %v4048_v14  ;;  %vm4494_vm4 = vcmp.lt.s32.totalorder %v4238_v12, 16  ;;  %vm4559_vm0 = vmand %vm10082_vm13, %vm4495_vm12 }
 0x387   : > { %v3538_v18 = vcvt.s32.f32 %v10072_v42  ;;  %v2645_v35 = vadd.s32 456, %v6856_v26  ;;  %v4943_v37 = vadd.f32 %v4942_v43, %v10019_v17  ;;  %vm4112_vm7 = vcmp.ge.s32.totalorder %v4048_v14, 18  ;;  %vm4558_vm9 = vmand %vm10101_vm6, %vm4494_vm4 }
 0x388   : > { %v3795_v6 = vmul.u32 18, %v5596_v13  ;;  %v3029_v51 = vmul.u32 324, %v5472_v61  ;;  %v4881_v21 = vmul.f32 %v4748_v15, %v4748_v15  ;;  %v4749_v20 = vsel %vm10088_vm15, %v2523_v22, 0.0 }
 0x389   : > { %v3540_v59 = vcvt.s32.f32 %v10094_v8  ;;  %v3031_v41 = vmul.u32 324, %v5476_v56  ;;  %v4811_v46 = vadd.f32 %v4810_v57, %v4748_v15  ;;  %vm4368_vm8 = vcmp.lt.s32.totalorder %v9946_v38, 288 }
 0x38a   : > { %v5591_v17 = vtrunc.f32 %v3665_v27  ;;  %v2840_v36 = vmul.f32 0.0030864198, %v2776_v10  ;;  %v4240_v34 = vsel %vm4112_vm7, %v5230_v29, %v4048_v14  ;;  %v3602_v43 = vmul.f32 0.055555556, %v3538_v18  ;;  %vm4432_vm1 = vmand %vm4304_vm11, %vm4368_vm8 }
 0x38b   : > { %v3093_v4 = vsub.s32 %v10037_v30, %v3029_v51  ;;  %v10120_v62 = vadd.s32 %v6918_v1, %v2645_v35  ;;  %v10123_v31 = vsel %vm4559_vm0, %v10039_v55, 0.0  ;;  %v4812_v48 = vadd.f32 %v4811_v46, %v4749_v20 }
 0x38c   : > { %v4944_v7 = vadd.f32 %v4943_v37, %v4881_v21  ;;  %v3859_v3 = vsub.s32 %v9999_v45, %v3795_v6  ;;  %v4750_v24 = vsel %vm4558_vm9, %v2526_v58, 0.0  ;;  %v3604_v2 = vmul.f32 0.055555556, %v3540_v59 }
 0x38d   : > { %v3095_v19 = vsub.s32 %v10002_v39, %v3031_v41  ;;  %vm3157_vm5 = vcmp.lt.s32.totalorder %v3093_v4, 0  ;;  %vm4496_vm14 = vcmp.lt.s32.totalorder %v4240_v34, 16  ;;  %v5592_v33 = vcvt.f32.s32 %v5591_v17 }
 0x38e   : > { %v3221_v28 = vadd.s32 324, %v3093_v4  ;;  %v2904_v16 = vfloor.f32 %v2840_v36  ;;  %v4882_v55 = vmul.f32 %v4749_v20, %v4749_v20  ;;  %v3666_v5 = vfloor.f32 %v3602_v43  ;;  %vm4560_vm3 = vmand %vm4432_vm1, %vm4496_vm14 }
 0x38f   : > { %v2774_v22 = vcvt.s32.f32 %v10120_v62  ;;  %v2650_v32 = vadd.s32 496, %v6856_v26  ;;  %v4813_v9 = vadd.f32 %v4812_v48, %v4750_v24  ;;  %vm3923_vm10 = vcmp.lt.s32.totalorder %v3859_v3, 0 }
 0x390   : > { %v3285_v53 = vsel %vm3157_vm5, %v3221_v28, %v3093_v4  ;;  %v5477_v40 = vtrunc.f32 %v2904_v16  ;;  %v3987_v14 = vadd.s32 18, %v3859_v3  ;;  %v3668_v38 = vfloor.f32 %v3604_v2 }
 0x391   : > { %v3223_v12 = vadd.s32 324, %v3095_v19  ;;  %v2838_v25 = vmul.f32 0.0030864198, %v2774_v22  ;;  %v3793_v13 = vmul.u32 18, %v5592_v33  ;;  %vm3159_vm11 = vcmp.lt.s32.totalorder %v3095_v19, 0 }
 0x392   : > { %v5171_v50 = vadd.s32 4294966972, %v3285_v53  ;;  %v5478_v15 = vcvt.f32.s32 %v5477_v40  ;;  %v5593_v57 = vtrunc.f32 %v3666_v5  ;;  %vm3349_vm2 = vcmp.ge.s32.totalorder %v3285_v53, 324 }
 0x393   : > { %v2902_v63 = vfloor.f32 %v2838_v25  ;;  %v10134_v56 = vadd.s32 %v6918_v1, %v2650_v32  ;;  %v4945_v54 = vadd.f32 %v4944_v7, %v4882_v55  ;;  %v4752_v27 = vsel %vm4560_vm3, %v10092_v52, 0.0 }
 0x394   : > { %v4883_v61 = vmul.f32 %v4750_v24, %v4750_v24  ;;  %v2648_v10 = vadd.s32 480, %v6856_v26  ;;  %v4814_v29 = vadd.f32 %v4813_v9, %v10123_v31  ;;  %v3287_v47 = vsel %vm3159_vm11, %v3223_v12, %v3095_v19 }
 0x395   : > { %v3032_v18 = vmul.u32 324, %v5478_v15  ;;  %v5473_v35 = vtrunc.f32 %v2902_v63  ;;  %v4051_v37 = vsel %vm3923_vm10, %v3987_v14, %v3859_v3  ;;  %v5597_v6 = vtrunc.f32 %v3668_v38 }
 0x396   : > { %v10140_v51 = vsel %vm3349_vm2, %v5171_v50, %v3285_v53  ;;  %v2779_v21 = vcvt.s32.f32 %v10134_v56  ;;  %v3857_v20 = vsub.s32 %v10033_v11, %v3793_v13  ;;  %v5594_v59 = vcvt.f32.s32 %v5593_v57 }
 0x397   : > { %v3096_v52 = vsub.s32 %v10068_v23, %v3032_v18  ;;  %v5474_v41 = vcvt.f32.s32 %v5473_v35  ;;  %v4946_v46 = vadd.f32 %v4945_v54, %v4883_v61  ;;  %v5173_v58 = vadd.s32 4294966972, %v3287_v47 }
 0x398   : > { %v2843_v17 = vmul.f32 0.0030864198, %v2779_v21  ;;  %v10146_v36 = vadd.s32 %v6918_v1, %v2648_v10  ;;  %vm4115_vm13 = vcmp.ge.s32.totalorder %v4051_v37, 18  ;;  %vm3351_vm12 = vcmp.ge.s32.totalorder %v3287_v47, 324 }
 0x399   : > { %v3541_v34 = vcvt.s32.f32 %v10140_v51  ;;  %v3224_v43 = vadd.s32 324, %v3096_v52  ;;  %v5233_v4 = vadd.s32 4294967278, %v4051_v37  ;;  %v5598_v48 = vcvt.f32.s32 %v5597_v6 }
 0x39a   : > { %vm3160_vm15 = vcmp.lt.s32.totalorder %v3096_v52, 0  ;;  %v3030_v7 = vmul.u32 324, %v5474_v41  ;;  %v3985_v3 = vadd.s32 18, %v3857_v20  ;;  %v3794_v24 = vmul.u32 18, %v5594_v59 }
 0x39b   : > { %v2907_v2 = vfloor.f32 %v2843_v17  ;;  %v2777_v19 = vcvt.s32.f32 %v10146_v36  ;;  %v4884_v33 = vmul.f32 %v10123_v31, %v10123_v31  ;;  %v10152_v28 = vmul.f32 %v4752_v27, %v4752_v27 }
 0x39c   : > { %vm3921_vm6 = vcmp.lt.s32.totalorder %v3857_v20, 0  ;;  %v10154_v16 = vsel %vm3351_vm12, %v5173_v58, %v3287_v47  ;;  %v3605_v55 = vmul.f32 0.055555556, %v3541_v34  ;;  %v3288_v5 = vsel %vm3160_vm15, %v3224_v43, %v3096_v52 }
 0x39d   : > { %v3094_v22 = vsub.s32 %v10120_v62, %v3030_v7  ;;  %v5483_v32 = vtrunc.f32 %v2907_v2  ;;  %v10157_v9 = vadd.f32 %v4946_v46, %v4884_v33  ;;  %v10160_v53 = vsel %vm4115_vm13, %v5233_v4, %v4051_v37 }
 0x39e   : > { %v10162_v40 = vadd.f32 %v4814_v29, %v4752_v27  ;;  %v2841_v14 = vmul.f32 0.0030864198, %v2777_v19  ;;  %vm4307_vm4 = vcmp.lt.s32.totalorder %v9881_v0, 648  ;;  %vm4371_vm7 = vcmp.lt.s32.totalorder %v9999_v45, 288 }
 0x39f   : > { %v4049_v31 = vsel %vm3921_vm6, %v3985_v3, %v3857_v20  ;;  %v3796_v38 = vmul.u32 18, %v5598_v48  ;;  %v3858_v12 = vsub.s32 %v10072_v42, %v3794_v24  ;;  %vm3158_vm0 = vcmp.lt.s32.totalorder %v3094_v22, 0  ;;  %vm4435_vm13 = vmand %vm4307_vm4, %vm4371_vm7 }
 0x3a0   : > { %v3543_v25 = vcvt.s32.f32 %v10154_v16  ;;  %v5174_v13 = vadd.s32 4294966972, %v3288_v5  ;;  %v3222_v50 = vadd.s32 324, %v3094_v22  ;;  %v5484_v15 = vcvt.f32.s32 %v5483_v32 }
 0x3a1   : > { %vm4305_vm8 = vcmp.lt.s32.totalorder %v9930_v44, 648  ;;  %vm4369_vm9 = vcmp.lt.s32.totalorder %v10033_v11, 288  ;;  %v3669_v57 = vfloor.f32 %v3605_v55  ;;  %vm3352_vm5 = vcmp.ge.s32.totalorder %v3288_v5, 324  ;;  %v5340_v55 = vpop.f32.mrf.mxu1 }
 0x3a2   : > { %v2905_v63 = vfloor.f32 %v2841_v14  ;;  %v2651_v54 = vadd.s32 504, %v6856_v26  ;;  %vm4499_vm1 = vcmp.lt.s32.totalorder %v10160_v53, 16  ;;  %vm4113_vm14 = vcmp.ge.s32.totalorder %v4049_v31, 18 }
 0x3a3   : > { %v5231_v27 = vadd.s32 4294967278, %v4049_v31  ;;  %v3286_v61 = vsel %vm3158_vm0, %v3222_v50, %v3094_v22  ;;  %v3860_v10 = vsub.s32 %v10094_v8, %v3796_v38  ;;  %v3986_v29 = vadd.s32 18, %v3858_v12  ;;  %vm10198_vm0 = vmand %vm4305_vm8, %vm4369_vm9  ;;  %v2539_v11 = vpop.f32.mrf.mxu1 }
 0x3a4   : > { %vm3350_vm10 = vcmp.ge.s32.totalorder %v3286_v61, 324  ;;  %v5172_v47 = vadd.s32 4294966972, %v3286_v61  ;;  %v10173_v18 = vsel %vm3352_vm5, %v5174_v13, %v3288_v5  ;;  %v3035_v35 = vmul.u32 324, %v5484_v15  ;;  %vm4563_vm4 = vmand %vm4435_vm13, %vm4499_vm1 }
 0x3a5   : > { %v5479_v37 = vtrunc.f32 %v2905_v63  ;;  %v10176_v6 = vadd.s32 %v6918_v1, %v2651_v54  ;;  %vm3922_vm3 = vcmp.lt.s32.totalorder %v3858_v12, 0  ;;  %v3607_v21 = vmul.f32 0.055555556, %v3543_v25 }
 0x3a6   : > { %v5599_v20 = vtrunc.f32 %v3669_v57  ;;  %v10178_v59 = vsel %vm3350_vm10, %v5172_v47, %v3286_v61  ;;  %v3099_v41 = vsub.s32 %v10134_v56, %v3035_v35  ;;  %v2649_v58 = vadd.s32 488, %v6856_v26 }
 0x3a7   : > { %v3542_v52 = vcvt.s32.f32 %v10178_v59  ;;  %v5480_v46 = vcvt.f32.s32 %v5479_v37  ;;  %v4241_v17 = vsel %vm4113_vm14, %v5231_v27, %v4049_v31  ;;  %v3988_v34 = vadd.s32 18, %v3860_v10 }
 0x3a8   : > { %v3544_v43 = vcvt.s32.f32 %v10173_v18  ;;  %v2780_v4 = vcvt.s32.f32 %v10176_v6  ;;  %v4050_v48 = vsel %vm3922_vm3, %v3986_v29, %v3858_v12  ;;  %vm4306_vm11 = vcmp.lt.s32.totalorder %v9961_v60, 648 }
 0x3a9   : > { %v3606_v7 = vmul.f32 0.055555556, %v3542_v52  ;;  %vm3163_vm2 = vcmp.lt.s32.totalorder %v3099_v41, 0  ;;  %v3227_v3 = vadd.s32 324, %v3099_v41  ;;  %v3671_v24 = vfloor.f32 %v3607_v21 }
 0x3aa   : > { %v5600_v2 = vcvt.f32.s32 %v5599_v20  ;;  %v3033_v19 = vmul.u32 324, %v5480_v46  ;;  %v2844_v33 = vmul.f32 0.0030864198, %v2780_v4  ;;  %vm4497_vm12 = vcmp.lt.s32.totalorder %v4241_v17, 16  ;;  %v10216_v20 = vpop.f32.mrf.mxu1 }
 0x3ab   : > { %v3670_v26 = vfloor.f32 %v3606_v7  ;;  %v3291_v5 = vsel %vm3163_vm2, %v3227_v3, %v3099_v41  ;;  %v10192_v22 = vadd.s32 %v6918_v1, %v2649_v58  ;;  %vm4114_vm15 = vcmp.ge.s32.totalorder %v4050_v48, 18  ;;  %vm4561_vm9 = vmand %vm10198_vm0, %vm4497_vm12 }
 0x3ac   : > { %v5232_v32 = vadd.s32 4294967278, %v4050_v48  ;;  %v3608_v14 = vmul.f32 0.055555556, %v3544_v43  ;;  %vm3355_vm6 = vcmp.ge.s32.totalorder %v3291_v5, 324  ;;  %v5177_v45 = vadd.s32 4294966972, %v3291_v5 }
 0x3ad   : > { %v5601_v0 = vtrunc.f32 %v3670_v26  ;;  %v3097_v38 = vsub.s32 %v10146_v36, %v3033_v19  ;;  %v2908_v12 = vfloor.f32 %v2844_v33  ;;  %vm3924_vm7 = vcmp.lt.s32.totalorder %v3860_v10, 0  ;;  %v2542_v19 = vpop.f32.mrf.mxu1 }
 0x3ae   : > { %vm4370_vm5 = vcmp.lt.s32.totalorder %v10072_v42, 288  ;;  %v5603_v1 = vtrunc.f32 %v3671_v24  ;;  %v3797_v25 = vmul.u32 18, %v5600_v2  ;;  %v10206_v13 = vsel %vm3355_vm6, %v5177_v45, %v3291_v5 }
 0x3af   : > { %vm3161_vm8 = vcmp.lt.s32.totalorder %v3097_v38, 0  ;;  %v3225_v44 = vadd.s32 324, %v3097_v38  ;;  %v2778_v50 = vcvt.s32.f32 %v10192_v22  ;;  %v4242_v15 = vsel %vm4114_vm15, %v5232_v32, %v4050_v48  ;;  %vm10223_vm10 = vmand %vm4306_vm11, %vm4370_vm5  ;;  %v10251_v46 = vpop.f32.mrf.mxu1 }
 0x3b0   : > { %v5602_v53 = vcvt.f32.s32 %v5601_v0  ;;  %v3547_v57 = vcvt.s32.f32 %v10206_v13  ;;  %v5485_v63 = vtrunc.f32 %v2908_v12  ;;  %v10214_v54 = vsel %vm4563_vm4, %v5340_v55, 0.0 }
 0x3b1   : > { %v4052_v27 = vsel %vm3924_vm7, %v3988_v34, %v3860_v10  ;;  %v3672_v61 = vfloor.f32 %v3608_v14  ;;  %v3289_v29 = vsel %vm3161_vm8, %v3225_v44, %v3097_v38  ;;  %v5604_v47 = vcvt.f32.s32 %v5603_v1 }
 0x3b2   : > { %vm3353_vm1 = vcmp.ge.s32.totalorder %v3289_v29, 324  ;;  %v5175_v35 = vadd.s32 4294966972, %v3289_v29  ;;  %v5486_v37 = vcvt.f32.s32 %v5485_v63  ;;  %v4753_v21 = vsel %vm4561_vm9, %v2539_v11, 0.0 }
 0x3b3   : > { %vm4498_vm14 = vcmp.lt.s32.totalorder %v4242_v15, 16  ;;  %v3861_v52 = vsub.s32 %v10140_v51, %v3797_v25  ;;  %v2842_v41 = vmul.f32 0.0030864198, %v2778_v50  ;;  %v3798_v10 = vmul.u32 18, %v5602_v53 }
 0x3b4   : > { %v3611_v58 = vmul.f32 0.055555556, %v3547_v57  ;;  %v10227_v17 = vsel %vm3353_vm1, %v5175_v35, %v3289_v29  ;;  %v3036_v34 = vmul.u32 324, %v5486_v37  ;;  %v10231_v43 = vmul.f32 %v10214_v54, %v10214_v54  ;;  %vm4562_vm13 = vmand %vm10223_vm10, %vm4498_vm14 }
 0x3b5   : > { %v4948_v4 = vadd.f32 %v10157_v9, %v10152_v28  ;;  %v5605_v48 = vtrunc.f32 %v3672_v61  ;;  %v3545_v42 = vcvt.s32.f32 %v10227_v17  ;;  %v5234_v60 = vadd.s32 4294967278, %v4052_v27 }
 0x3b6   : > { %v3799_v7 = vmul.u32 18, %v5604_v47  ;;  %v3100_v3 = vsub.s32 %v10176_v6, %v3036_v34  ;;  %v2906_v24 = vfloor.f32 %v2842_v41  ;;  %v4816_v2 = vadd.f32 %v10162_v40, %v4753_v21 }
 0x3b7   : > { %vm4116_vm3 = vcmp.ge.s32.totalorder %v4052_v27, 18  ;;  %vm4308_vm11 = vcmp.lt.s32.totalorder %v9949_v49, 648  ;;  %vm4372_vm2 = vcmp.lt.s32.totalorder %v10094_v8, 288  ;;  %v3989_v28 = vadd.s32 18, %v3861_v52 }
 0x3b8   : > { %v3609_v9 = vmul.f32 0.055555556, %v3545_v42  ;;  %vm3925_vm12 = vcmp.lt.s32.totalorder %v3861_v52, 0  ;;  %v3862_v33 = vsub.s32 %v10178_v59, %v3798_v10  ;;  %v3675_v55 = vfloor.f32 %v3611_v58  ;;  %vm4436_vm14 = vmand %vm4308_vm11, %vm4372_vm2 }
 0x3b9   : > { %vm3164_vm15 = vcmp.lt.s32.totalorder %v3100_v3, 0  ;;  %v5606_v26 = vcvt.f32.s32 %v5605_v48  ;;  %v3228_v40 = vadd.s32 324, %v3100_v3  ;;  %v5481_v32 = vtrunc.f32 %v2906_v24 }
 0x3ba   : > { %v3673_v5 = vfloor.f32 %v3609_v9  ;;  %v4886_v14 = vmul.f32 %v4753_v21, %v4753_v21  ;;  %v4244_v31 = vsel %vm4116_vm3, %v5234_v60, %v4052_v27  ;;  %v4754_v0 = vsel %vm4562_vm13, %v2542_v19, 0.0 }
 0x3bb   : > { %v3863_v45 = vsub.s32 %v10154_v16, %v3799_v7  ;;  %v4053_v38 = vsel %vm3925_vm12, %v3989_v28, %v3861_v52  ;;  %v3292_v1 = vsel %vm3164_vm15, %v3228_v40, %v3100_v3  ;;  %v5482_v25 = vcvt.f32.s32 %v5481_v32  ;;  %v2555_v28 = vpop.f32.mrf.mxu1 }
 0x3bc   : > { %v5607_v12 = vtrunc.f32 %v3673_v5  ;;  %vm4309_vm6 = vcmp.lt.s32.totalorder %v10037_v30, 648  ;;  %v3990_v11 = vadd.s32 18, %v3862_v33  ;;  %v5611_v44 = vtrunc.f32 %v3675_v55 }
 0x3bd   : > { %vm3356_vm0 = vcmp.ge.s32.totalorder %v3292_v1, 324  ;;  %v5178_v50 = vadd.s32 4294966972, %v3292_v1  ;;  %v3800_v15 = vmul.u32 18, %v5606_v26  ;;  %vm3926_vm4 = vcmp.lt.s32.totalorder %v3862_v33, 0  ;;  %v10283_v30 = vpop.f32.mrf.mxu1 }
 0x3be   : > { %v5608_v53 = vcvt.f32.s32 %v5607_v12  ;;  %v3034_v57 = vmul.u32 324, %v5482_v25  ;;  %v4949_v63 = vadd.f32 %v4948_v4, %v4886_v14  ;;  %v4887_v61 = vmul.f32 %v4754_v0, %v4754_v0 }
 0x3bf   : > { %vm3927_vm7 = vcmp.lt.s32.totalorder %v3863_v45, 0  ;;  %v3991_v27 = vadd.s32 18, %v3863_v45  ;;  %v5235_v29 = vadd.s32 4294967278, %v4053_v38  ;;  %v10247_v35 = vsel %vm3356_vm0, %v5178_v50, %v3292_v1 }
 0x3c0   : > { %v3801_v47 = vmul.u32 18, %v5608_v53  ;;  %v3098_v37 = vsub.s32 %v10192_v22, %v3034_v57  ;;  %vm4117_vm5 = vcmp.ge.s32.totalorder %v4053_v38, 18  ;;  %v4054_v21 = vsel %vm3926_vm4, %v3990_v11, %v3862_v33  ;;  %v2558_v57 = vpop.f32.mrf.mxu1 }
 0x3c1   : > { %v5612_v52 = vcvt.f32.s32 %v5611_v44  ;;  %v3548_v41 = vcvt.s32.f32 %v10247_v35  ;;  %vm4500_vm8 = vcmp.lt.s32.totalorder %v4244_v31, 16  ;;  %vm4373_vm9 = vcmp.lt.s32.totalorder %v10140_v51, 288 }
 0x3c2   : > { %v3864_v10 = vsub.s32 %v10173_v18, %v3800_v15  ;;  %vm4310_vm1 = vcmp.lt.s32.totalorder %v10120_v62, 648  ;;  %v4055_v58 = vsel %vm3927_vm7, %v3991_v27, %v3863_v45  ;;  %v3865_v34 = vsub.s32 %v10227_v17, %v3801_v47  ;;  %vm10263_vm13 = vmand %vm4436_vm14, %vm4500_vm8 }
 0x3c3   : > { %v3612_v4 = vmul.f32 0.055555556, %v3548_v41  ;;  %vm3162_vm10 = vcmp.lt.s32.totalorder %v3098_v37, 0  ;;  %v4817_v48 = vadd.f32 %v4816_v2, %v4754_v0  ;;  %v4245_v42 = vsel %vm4117_vm5, %v5235_v29, %v4053_v38  ;;  %vm10273_vm0 = vmand %vm4309_vm6, %vm4373_vm9 }
 0x3c4   : > { %v5236_v60 = vadd.s32 4294967278, %v4054_v21  ;;  %v3226_v7 = vadd.s32 324, %v3098_v37  ;;  %v4950_v3 = vadd.f32 %v4949_v63, %v4887_v61  ;;  %vm4118_vm3 = vcmp.ge.s32.totalorder %v4054_v21, 18 }
 0x3c5   : > { %v3803_v24 = vmul.u32 18, %v5612_v52  ;;  %v3676_v19 = vfloor.f32 %v3612_v4  ;;  %v5237_v49 = vadd.s32 4294967278, %v4055_v58  ;;  %vm4311_vm11 = vcmp.lt.s32.totalorder %v10002_v39, 648  ;;  %v5348_v52 = vpop.f32.mrf.mxu1 }
 0x3c6   : > { %v3992_v9 = vadd.s32 18, %v3864_v10  ;;  %vm4374_vm2 = vcmp.lt.s32.totalorder %v10178_v59, 288  ;;  %v3290_v2 = vsel %vm3162_vm10, %v3226_v7, %v3098_v37  ;;  %vm4501_vm12 = vcmp.lt.s32.totalorder %v4245_v42, 16 }
 0x3c7   : > { %vm3928_vm15 = vcmp.lt.s32.totalorder %v3864_v10, 0  ;;  %v3993_v33 = vadd.s32 18, %v3865_v34  ;;  %v5613_v55 = vtrunc.f32 %v3676_v19  ;;  %v4246_v5 = vsel %vm4118_vm3, %v5236_v60, %v4054_v21  ;;  %vm10290_vm9 = vmand %vm4310_vm1, %vm4374_vm2  ;;  %v2571_v7 = vpop.f32.mrf.mxu1 }
 0x3c8   : > { %vm3929_vm4 = vcmp.lt.s32.totalorder %v3865_v34, 0  ;;  %vm3354_vm7 = vcmp.ge.s32.totalorder %v3290_v2, 324  ;;  %v5176_v40 = vadd.s32 4294966972, %v3290_v2  ;;  %v4756_v32 = vsel %vm10263_vm13, %v10216_v20, 0.0  ;;  %vm4565_vm14 = vmand %vm10273_vm0, %vm4501_vm12 }
 0x3c9   : > { %vm4119_vm5 = vcmp.ge.s32.totalorder %v4055_v58, 18  ;;  %v3867_v14 = vsub.s32 %v10206_v13, %v3803_v24  ;;  %v5614_v31 = vcvt.f32.s32 %v5613_v55  ;;  %vm4375_vm8 = vcmp.lt.s32.totalorder %v10154_v16, 288 }
 0x3ca   : > { %v4056_v51 = vsel %vm3928_vm15, %v3992_v9, %v3864_v10  ;;  %vm4312_vm6 = vcmp.lt.s32.totalorder %v10068_v23, 648  ;;  %v10294_v20 = vsel %vm3354_vm7, %v5176_v40, %v3290_v2  ;;  %vm4502_vm10 = vcmp.lt.s32.totalorder %v4246_v5, 16  ;;  %vm4439_vm7 = vmand %vm4311_vm11, %vm4375_vm8  ;;  %v5349_v2 = vpop.f32.mrf.mxu1 }
 0x3cb   : > { %v4057_v45 = vsel %vm3929_vm4, %v3993_v33, %v3865_v34  ;;  %v3804_v38 = vmul.u32 18, %v5614_v31  ;;  %v3546_v12 = vcvt.s32.f32 %v10294_v20  ;;  %v4889_v1 = vmul.f32 %v4756_v32, %v4756_v32  ;;  %vm4566_vm3 = vmand %vm10290_vm9, %vm4502_vm10 }
 0x3cc   : > { %v4818_v59 = vadd.f32 %v4817_v48, %v10214_v54  ;;  %v4951_v62 = vadd.f32 %v4950_v3, %v10231_v43  ;;  %v4247_v25 = vsel %vm4119_vm5, %v5237_v49, %v4055_v58  ;;  %v5238_v11 = vadd.s32 4294967278, %v4056_v51 }
 0x3cd   : > { %v3995_v44 = vadd.s32 18, %v3867_v14  ;;  %v3868_v50 = vsub.s32 %v10247_v35, %v3804_v38  ;;  %v3610_v15 = vmul.f32 0.055555556, %v3546_v12  ;;  %v4757_v53 = vsel %vm4565_vm14, %v2555_v28, 0.0 }
 0x3ce   : > { %vm4120_vm1 = vcmp.ge.s32.totalorder %v4056_v51, 18  ;;  %vm3931_vm13 = vcmp.lt.s32.totalorder %v3867_v14, 0  ;;  %v5239_v63 = vadd.s32 4294967278, %v4057_v45  ;;  %vm4121_vm2 = vcmp.ge.s32.totalorder %v4057_v45, 18 }
 0x3cf   : > { %vm3932_vm12 = vcmp.lt.s32.totalorder %v3868_v50, 0  ;;  %v3996_v54 = vadd.s32 18, %v3868_v50  ;;  %v3674_v43 = vfloor.f32 %v3610_v15  ;;  %vm4503_vm15 = vcmp.lt.s32.totalorder %v4247_v25, 16 }
 0x3d0   : > { %v4819_v61 = vadd.f32 %v4818_v59, %v4756_v32  ;;  %vm4376_vm0 = vcmp.lt.s32.totalorder %v10173_v18, 288  ;;  %vm4313_vm4 = vcmp.lt.s32.totalorder %v10146_v36, 648  ;;  %v4248_v27 = vsel %vm4120_vm1, %v5238_v11, %v4056_v51  ;;  %vm4567_vm11 = vmand %vm4439_vm7, %vm4503_vm15  ;;  %v2574_v32 = vpop.f32.mrf.mxu1 }
 0x3d1   : > { %v4758_v29 = vsel %vm4566_vm3, %v2558_v57, 0.0  ;;  %v4059_v47 = vsel %vm3931_vm13, %v3995_v44, %v3867_v14  ;;  %v5609_v37 = vtrunc.f32 %v3674_v43  ;;  %v4890_v21 = vmul.f32 %v4757_v53, %v4757_v53  ;;  %vm10317_vm9 = vmand %vm4312_vm6, %vm4376_vm0 }
 0x3d2   : > { %v4249_v41 = vsel %vm4121_vm2, %v5239_v63, %v4057_v45  ;;  %vm4377_vm5 = vcmp.lt.s32.totalorder %v10227_v17, 288  ;;  %v4060_v10 = vsel %vm3932_vm12, %v3996_v54, %v3868_v50  ;;  %v4952_v58 = vadd.f32 %v4951_v62, %v4889_v1 }
 0x3d3   : > { %v5610_v39 = vcvt.f32.s32 %v5609_v37  ;;  %v4820_v16 = vadd.f32 %v4819_v61, %v4757_v53  ;;  %vm4504_vm8 = vcmp.lt.s32.totalorder %v4248_v27, 16  ;;  %v4891_v34 = vmul.f32 %v4758_v29, %v4758_v29  ;;  %vm10324_vm10 = vmand %vm4313_vm4, %vm4377_vm5 }
 0x3d4   : > { %v5241_v4 = vadd.s32 4294967278, %v4059_v47  ;;  %vm4123_vm14 = vcmp.ge.s32.totalorder %v4059_v47, 18  ;;  %vm4505_vm1 = vcmp.lt.s32.totalorder %v4249_v41, 16  ;;  %v5242_v23 = vadd.s32 4294967278, %v4060_v10  ;;  %vm10331_vm3 = vmand %vm10317_vm9, %vm4504_vm8 }
 0x3d5   : > { %v3802_v48 = vmul.u32 18, %v5610_v39  ;;  %v4953_v42 = vadd.f32 %v4952_v58, %v4890_v21  ;;  %v4821_v60 = vadd.f32 %v4820_v16, %v4758_v29  ;;  %vm4124_vm6 = vcmp.ge.s32.totalorder %v4060_v10, 18  ;;  %vm4569_vm12 = vmand %vm10324_vm10, %vm4505_vm1 }
 0x3d6   : > { %v4759_v3 = vsel %vm4567_vm11, %v10251_v46, 0.0  ;;  %vm4315_vm13 = vcmp.lt.s32.totalorder %v10134_v56, 648  ;;  %v4251_v8 = vsel %vm4123_vm14, %v5241_v4, %v4059_v47  ;;  %vm4379_vm2 = vcmp.lt.s32.totalorder %v10206_v13, 288 }
 0x3d7   : > { %v3866_v36 = vsub.s32 %v10294_v20, %v3802_v48  ;;  %v4954_v19 = vadd.f32 %v4953_v42, %v4891_v34  ;;  %vm4316_vm15 = vcmp.lt.s32.totalorder %v10176_v6, 648  ;;  %v4252_v46 = vsel %vm4124_vm6, %v5242_v23, %v4060_v10  ;;  %vm4443_vm9 = vmand %vm4315_vm13, %vm4379_vm2 }
 0x3d8   : > { %vm4380_vm0 = vcmp.lt.s32.totalorder %v10247_v35, 288  ;;  %v4892_v28 = vmul.f32 %v4759_v3, %v4759_v3  ;;  %v4822_v9 = vadd.f32 %v4821_v60, %v4759_v3  ;;  %vm4314_vm7 = vcmp.lt.s32.totalorder %v10192_v22, 648 }
 0x3d9   : > { %vm3930_vm4 = vcmp.lt.s32.totalorder %v3866_v36, 0  ;;  %v3994_v49 = vadd.s32 18, %v3866_v36  ;;  %vm4378_vm5 = vcmp.lt.s32.totalorder %v10294_v20, 288  ;;  %v4760_v13 = vsel %vm10331_vm3, %v10283_v30, 0.0  ;;  %vm4444_vm8 = vmand %vm4316_vm15, %vm4380_vm0 }
 0x3da   : > { %vm4507_vm11 = vcmp.lt.s32.totalorder %v4251_v8, 16  ;;  %v4761_v33 = vsel %vm4569_vm12, %v2571_v7, 0.0  ;;  %v4955_v35 = vadd.f32 %v4954_v19, %v4892_v28  ;;  %vm4508_vm14 = vcmp.lt.s32.totalorder %v4252_v46, 16  ;;  %vm4442_vm1 = vmand %vm4314_vm7, %vm4378_vm5 }
 0x3db   : > { %v4058_v55 = vsel %vm3930_vm4, %v3994_v49, %v3866_v36  ;;  %v4893_v22 = vmul.f32 %v4760_v13, %v4760_v13  ;;  %vm4571_vm6 = vmand %vm4443_vm9, %vm4507_vm11  ;;  %v4823_v5 = vadd.f32 %v4822_v9, %v4760_v13  ;;  %v4894_v40 = vmul.f32 %v4761_v33, %v4761_v33 }
 0x3dc   : > { %vm4122_vm10 = vcmp.ge.s32.totalorder %v4058_v55, 18  ;;  %v5240_v26 = vadd.s32 4294967278, %v4058_v55  ;;  %vm4572_vm3 = vmand %vm4444_vm8, %vm4508_vm14  ;;  %v4763_v30 = vsel %vm4571_vm6, %v5348_v52, 0.0  ;;  %vm4967_vm12 = vcmask 1040384  }
 0x3dd   : > { %v4824_v56 = vadd.f32 %v4823_v5, %v4761_v33  ;;  %v4956_v31 = vadd.f32 %v4955_v35, %v4893_v22  ;;  %v4764_v45 = vsel %vm4572_vm3, %v5349_v2, 0.0  ;;  %v4896_v38 = vmul.f32 %v4763_v30, %v4763_v30 }
 0x3de   : > { %v4250_v14 = vsel %vm4122_vm10, %v5240_v26, %v4058_v55  ;;  %v4897_v59 = vmul.f32 %v4764_v45, %v4764_v45 }
 0x3df   : > { %vm4506_vm2 = vcmp.lt.s32.totalorder %v4250_v14, 16  ;;  %v4957_v0 = vadd.f32 %v4956_v31, %v4894_v40 }
 0x3e0   : > { %vm4570_vm13 = vmand %vm4442_vm1, %vm4506_vm2 }
 0x3e1   : > { %v4762_v51 = vsel %vm4570_vm13, %v2574_v32, 0.0 }
 0x3e2   : > { %v4825_v6 = vadd.f32 %v4824_v56, %v4762_v51  ;;  %v4895_v20 = vmul.f32 %v4762_v51, %v4762_v51 }
 0x3e4   : > { %v4826_v12 = vadd.f32 %v4825_v6, %v4763_v30  ;;  %v4958_v1 = vadd.f32 %v4957_v0, %v4895_v20 }
 0x3e6   : > { %v4827_v62 = vadd.f32 %v4826_v12, %v4764_v45  ;;  %v4959_v25 = vadd.f32 %v4958_v1, %v4896_v38 }
 0x3e8   : > { %v4828_v11 = vrot.slane %v4827_v62, 4  ;;  %v4960_v44 = vadd.f32 %v4959_v25, %v4897_v59 }
 0x3ea   : > { %v4829_v50 = vadd.f32 %v4828_v11, %v4827_v62  ;;  %v4961_v15 = vrot.slane %v4960_v44, 4 }
 0x3ec   : > { %v4830_v53 = vrot.slane %v4829_v50, 2  ;;  %v4962_v57 = vadd.f32 %v4961_v15, %v4960_v44 }
 0x3ee   : > { %v4831_v63 = vadd.f32 %v4830_v53, %v4829_v50  ;;  %v4963_v54 = vrot.slane %v4962_v57, 2 }
 0x3f0   : > { %v4832_v43 = vrot.slane %v4831_v63, 1  ;;  %v4964_v61 = vadd.f32 %v4963_v54, %v4962_v57 }
 0x3f2   : > { %v4965_v27 = vrot.slane %v4964_v61, 1  ;;  %v4833_v29 = vadd.f32 %v4832_v43, %v4831_v63 }
 0x3f4   : > { %v4966_v47 = vadd.f32 %v4965_v27, %v4964_v61 }
 0x3f6   : > { %v4968_v37 = vsel %vm4967_vm12, %v4833_v29, %v4966_v47 }
 0x3f7   : > { %4969 = vst [vmem:[%s190_s16] sm:$0x3] %v4968_v37 }
 0x3f8 PF: > { %s13_s12 = sadd.s32 1, %s5709_s12  }
 0x3f9   : > { %p10_p5 = scmp.ge.s32.totalorder %s13_s12, 4  }
 0x3fb   :  { %12 = sbr.rel (!%p10_p5) target bundleno = 1 (0x1), region = 65 }

</bundles_post_ra>
